<compile_context>
chip_gen: v6e
topology: v6e:2x2x1
jax: 0.10.0
libtpu: 0.0.40
codegen_flags: <defaults>
</compile_context>

<pallas_src>
import numpy as np
import jax
import jax.numpy as jnp
from jax.experimental import pallas as pl
from jax.experimental.pallas import tpu as pltpu


def _round_up(x, m):
    return ((x + m - 1) // m) * m


def _largest_tile(n, unit, cap):
    """Largest multiple of `unit` that divides n and is <= cap (assumes n % unit == 0)."""
    best = unit
    c = unit
    while c <= min(n, cap):
        if n % c == 0:
            best = c
        c += unit
    return best


def shift_tokens_right(input_ids, pad_token_id):
    """BART-style shift: last non-pad token moves to position 0, rest shifted right."""
    idx_eos = jnp.sum(input_ids != pad_token_id, axis=1) - 1            # (B,)
    eos = jnp.take_along_axis(input_ids, idx_eos[:, None], axis=1)      # (B, 1)
    return jnp.concatenate([eos, input_ids[:, :-1]], axis=1)


# ----------------------------- kernel 1: recurrence -----------------------------

def _recurrence_kernel(emb_ref, feat_ref, wrec_ref, bp_ref, wih_ref, blstm_ref,
                       h_out_ref, hh_sc, c_sc):
    Tt, bB, Ep = emb_ref.shape

    # (Re)initialize carries at the first T-block of every batch block.
    @pl.when(pl.program_id(1) == 0)
    def _():
        hh_sc[:, 0:Ep] = feat_ref[...]
        hh_sc[:, Ep:] = jnp.zeros((bB, Ep), jnp.float32)
        c_sc[...] = jnp.zeros_like(c_sc)

    # Input-gate projection for the whole T-block in one MXU matmul, with
    # (b_ih + b_hh + bp @ Whh^T) folded in — hoisted off the serial path.
    ygate = (jnp.dot(emb_ref[...].reshape(Tt * bB, Ep), wih_ref[...],
                     preferred_element_type=jnp.float32)
             + blstm_ref[...])                                   # (Tt*bB, 4*Ep)

    # Hoist the projection-bias broadcast out of the per-step body.
    bp_full = jnp.broadcast_to(bp_ref[...], (bB, Ep))

    # Tt is the small static T-block size -> static unrolled loop, static indices only.
    for tt in range(Tt):
        # ONE fused MXU push per step: hh @ [Wp_cat | Wp_cat @ Whh^T] -> (bB, 5*Ep).
        fused = jnp.dot(hh_sc[...], wrec_ref[...],
                        preferred_element_type=jnp.float32)
        h0_new = fused[:, 0:Ep] + bp_full
        gates = ygate[tt * bB:(tt + 1) * bB, :] + fused[:, Ep:]

        # Gate chunk order is (i, f, o, g): one sigmoid over 3*Ep, one tanh over Ep.
        sig = jax.nn.sigmoid(gates[:, 0:3 * Ep])
        g_g = jnp.tanh(gates[:, 3 * Ep:])
        c_new = sig[:, Ep:2 * Ep] * c_sc[...] + sig[:, 0:Ep] * g_g
        h_new = sig[:, 2 * Ep:3 * Ep] * jnp.tanh(c_new)

        c_sc[...] = c_new
        hh_sc[:, 0:Ep] = h_new
        hh_sc[:, Ep:] = h0_new
        # Batch-major, lane-dense output (masked sublane store).
        h_out_ref[:, tt, :] = h_new


# ----------------------------- kernel 2: lm-head matmul -----------------------------

def _logits_kernel(h_ref, w_ref, o_ref):
    # bf16 x bf16 MXU matmul with f32 accumulation.
    o_ref[...] = jnp.dot(h_ref[...].astype(w_ref.dtype), w_ref[...],
                         preferred_element_type=jnp.float32)


# ----------------------------- one-time weight preparation -----------------------------

def prepare_decoder_weights(params):
    """Pad / transpose / fuse all weights once per model (not per forward call)."""
    emb_w = params["embedding"].astype(jnp.float32)      # (V, E), row pad_id is zero
    wp = params["proj_w"].astype(jnp.float32)            # (E, 2E) nn.Linear (out, in)
    bp = params["proj_b"].astype(jnp.float32)            # (E,)
    wih = params["lstm_w_ih"].astype(jnp.float32)        # (4E, E)
    whh = params["lstm_w_hh"].astype(jnp.float32)        # (4E, E)
    bih = params["lstm_b_ih"].astype(jnp.float32)        # (4E,)
    bhh = params["lstm_b_hh"].astype(jnp.float32)        # (4E,)

    V, E = emb_w.shape
    Ep = _round_up(E, 128)
    Vp = _round_up(V, 128)
    f32 = jnp.float32
    hp = jax.lax.Precision.HIGHEST

    # PyTorch LSTMCell chunk order is (i, f, g, o); reorder to (i, f, o, g) so the
    # three sigmoid gates form one contiguous 3*Ep slab in the kernel.
    src_order = (0, 1, 3, 2)

    def pad_gate_mat(w):                                  # (4E, E) -> (Ep, 4*Ep), transposed
        out = jnp.zeros((Ep, 4 * Ep), f32)
        for k, s in enumerate(src_order):
            out = out.at[:E, k * Ep:k * Ep + E].set(w[s * E:(s + 1) * E, :].T)
        return out

    def pad_gate_vec(b):                                  # (4E,) -> (1, 4*Ep)
        out = jnp.zeros((1, 4 * Ep), f32)
        for k, s in enumerate(src_order):
            out = out.at[0, k * Ep:k * Ep + E].set(b[s * E:(s + 1) * E])
        return out

    wih_p = pad_gate_mat(wih)
    whh_p = pad_gate_mat(whh)

    # cell_input_projection weight in [h_ | h0] layout, zero padded.
    wp_cat = jnp.zeros((2 * Ep, Ep), f32)
    wp_cat = wp_cat.at[:E, :E].set(wp[:, :E].T)
    wp_cat = wp_cat.at[Ep:Ep + E, :E].set(wp[:, E:].T)
    bp_p = jnp.zeros((1, Ep), f32).at[0, :E].set(bp)

    # Pre-multiply projection into the recurrent weight -> ONE MXU push per step.
    w_fused = jnp.dot(wp_cat, whh_p, precision=hp)            # (2Ep, 4Ep)
    w_rec = jnp.concatenate([wp_cat, w_fused], axis=1)        # (2Ep, Ep + 4Ep)
    blstm_p = pad_gate_vec(bih + bhh) + jnp.dot(bp_p, whh_p, precision=hp)

    # lm-head weight: padded, transposed, bf16 (accumulation stays f32 on the MXU).
    wemb_bf16 = jnp.zeros((Ep, Vp), jnp.bfloat16)
    wemb_bf16 = wemb_bf16.at[:E, :V].set(emb_w.T.astype(jnp.bfloat16))

    return {"emb_w": emb_w, "w_rec": w_rec, "bp": bp_p, "wih": wih_p,
            "blstm": blstm_p, "wemb": wemb_bf16,
            "E": E, "V": V, "Ep": Ep, "Vp": Vp}


# ----------------------------- forward wrapper -----------------------------

def lstm_decoder_forward(prep, input_feature, tgt_token_id, pad_id=0):
    f32 = jnp.float32
    E, V, Ep, Vp = prep["E"], prep["V"], prep["Ep"], prep["Vp"]
    B, T = tgt_token_id.shape

    Bp = _round_up(B, 8)                    # sublane-aligned batch
    Tp = _round_up(T, 8)                    # pad time so T-blocks are always size 8
    Tt = 8                                  # T-block (per-grid-step) length
    nT = Tp // Tt
    # Split the batch in two blocks when possible so v7x's 2 TensorCores each take half.
    bB = Bp // 2 if (Bp // 2) % 8 == 0 else Bp
    nB = Bp // bB

    # Glue (data-dependent gather) stays in XLA.
    # TODO(synk): token shift + embedding gather could become an in-kernel DMA gather.
    tgt_ipt = shift_tokens_right(tgt_token_id, pad_id)                  # (B, T)
    tgt_emb = prep["emb_w"][tgt_ipt.T]                                  # (T, B, E)
    emb_tbe = jnp.zeros((Tp, Bp, Ep), f32).at[:T, :B, :E].set(tgt_emb)
    feat_p = jnp.zeros((Bp, Ep), f32).at[:B, :E].set(input_feature.astype(f32))

    # Explicit scoped-VMEM budget for the recurrence kernel (generous headroom).
    vmem_bytes = 4 * (
        2 * Tt * bB * Ep          # emb block, double buffered
        + 2 * bB * Tt * Ep        # h_out block, double buffered
        + 2 * bB * Ep             # feat block
        + 2 * 2 * Ep * 5 * Ep     # fused recurrent weight
        + 2 * Ep * 4 * Ep         # input-gate weight
        + 2 * 5 * Ep              # biases
        + bB * 3 * Ep             # hh + c carries
        + 2 * Tt * bB * 4 * Ep    # ygate temporaries
    )
    vmem_bytes = int(min(2 * vmem_bytes + (8 << 20), 100 << 20))

    # --- kernel 1: streamed recurrence (batch-parallel x time-arbitrary grid) ---
    h_bte = pl.pallas_call(
        _recurrence_kernel,
        out_shape=jax.ShapeDtypeStruct((Bp, Tp, Ep), f32),
        grid_spec=pltpu.PrefetchScalarGridSpec(
            num_scalar_prefetch=0,
            grid=(nB, nT),
            in_specs=[
                pl.BlockSpec((Tt, bB, Ep), lambda bi, ti: (ti, bi, 0)),     # emb
                pl.BlockSpec((bB, Ep), lambda bi, ti: (bi, 0)),             # feat
                pl.BlockSpec((2 * Ep, 5 * Ep), lambda bi, ti: (0, 0)),      # W_rec
                pl.BlockSpec((1, Ep), lambda bi, ti: (0, 0)),               # bp
                pl.BlockSpec((Ep, 4 * Ep), lambda bi, ti: (0, 0)),          # W_ih^T
                pl.BlockSpec((1, 4 * Ep), lambda bi, ti: (0, 0)),           # fused bias
            ],
            out_specs=pl.BlockSpec((bB, Tt, Ep), lambda bi, ti: (bi, ti, 0)),
            scratch_shapes=[
                pltpu.VMEM((bB, 2 * Ep), f32),    # [h_ | h0] carry (persists over grid)
                pltpu.VMEM((bB, Ep), f32),        # c carry
            ],
        ),
        compiler_params=pltpu.CompilerParams(
            dimension_semantics=("parallel", "arbitrary"),
            vmem_limit_bytes=vmem_bytes),
    )(emb_tbe, feat_p, prep["w_rec"], prep["bp"], prep["wih"], prep["blstm"])

    # --- kernel 2: lm-head matmul; batch-major hidden states feed straight in ---
    M = Bp * Tp
    h_2d = h_bte.reshape(M, Ep)                          # free reshape, no transpose
    tm = _largest_tile(M, 8, 256)
    tn = _largest_tile(Vp, 128, 512)

    logits2d = pl.pallas_call(
        _logits_kernel,
        out_shape=jax.ShapeDtypeStruct((M, Vp), jnp.float32),
        grid_spec=pltpu.PrefetchScalarGridSpec(
            num_scalar_prefetch=0,
            grid=(M // tm, Vp // tn),
            in_specs=[pl.BlockSpec((tm, Ep), lambda i, j: (i, 0)),
                      pl.BlockSpec((Ep, tn), lambda i, j: (0, j))],
            out_specs=pl.BlockSpec((tm, tn), lambda i, j: (i, j)),
        ),
        compiler_params=pltpu.CompilerParams(
            dimension_semantics=("parallel", "parallel")),
    )(h_2d, prep["wemb"])

    return logits2d.reshape(Bp, Tp, Vp)[:B, :T, :V]


# ----------------------------- pure-JAX reference -----------------------------

def lstm_decoder_reference(params, input_feature, tgt_token_id, pad_id=0):
    """Pure-JAX reference mirroring the PyTorch forward exactly (f32 throughout)."""
    emb_w = params["embedding"]
    wp, bp = params["proj_w"], params["proj_b"]
    wih, whh = params["lstm_w_ih"], params["lstm_w_hh"]
    bih, bhh = params["lstm_b_ih"], params["lstm_b_hh"]
    V, E = emb_w.shape
    B, T = tgt_token_id.shape
    hp = jax.lax.Precision.HIGHEST

    tgt_ipt = shift_tokens_right(tgt_token_id, pad_id)
    tgt_emb = emb_w[tgt_ipt]
    h_ = input_feature
    h0 = jnp.zeros_like(h_)
    c0 = jnp.zeros_like(h_)
    outs = []
    for t in range(T):
        h0 = jnp.dot(jnp.concatenate([h_, h0], -1), wp.T, precision=hp) + bp
        y = tgt_emb[:, t]
        gates = (jnp.dot(y, wih.T, precision=hp) + bih
                 + jnp.dot(h0, whh.T, precision=hp) + bhh)
        i_g = jax.nn.sigmoid(gates[:, :E])
        f_g = jax.nn.sigmoid(gates[:, E:2 * E])
        g_g = jnp.tanh(gates[:, 2 * E:3 * E])
        o_g = jax.nn.sigmoid(gates[:, 3 * E:])
        c0 = f_g * c0 + i_g * g_g
        h_ = o_g * jnp.tanh(c0)
        outs.append(h_)
    out = jnp.stack(outs, 1)
    return jnp.einsum("bte,ve->btv", out, emb_w, precision=hp)


if __name__ == "__main__":
    # Small shapes that still exercise both grid axes of the streamed recurrence:
    # B=10 -> Bp=16 -> 2 batch blocks; T=16 -> 2 T-blocks of 8.
    V, E, B, T = 50, 32, 10, 16
    pad_id = 0

    key = jax.random.PRNGKey(0)
    k = jax.random.split(key, 8)
    emb = jax.random.normal(k[0], (V, E), jnp.float32) * 0.1
    emb = emb.at[pad_id].set(0.0)   # nn.Embedding padding_idx row is zero
    params = {
        "embedding": emb,
        "proj_w": jax.random.normal(k[1], (E, 2 * E), jnp.float32) * 0.1,
        "proj_b": jax.random.normal(k[2], (E,), jnp.float32) * 0.1,
        "lstm_w_ih": jax.random.normal(k[3], (4 * E, E), jnp.float32) * 0.1,
        "lstm_w_hh": jax.random.normal(k[4], (4 * E, E), jnp.float32) * 0.1,
        "lstm_b_ih": jax.random.normal(k[5], (4 * E,), jnp.float32) * 0.1,
        "lstm_b_hh": jax.random.normal(k[6], (4 * E,), jnp.float32) * 0.1,
    }
    input_feature = jax.random.normal(k[7], (B, E), jnp.float32)
    tgt_token_id = jax.random.randint(jax.random.PRNGKey(42), (B, T), 1, V, dtype=jnp.int32)
    tgt_token_id = tgt_token_id.at[0, -3:].set(pad_id)   # trailing padding exercises shift

    prep = prepare_decoder_weights(params)               # once per model
    logits = lstm_decoder_forward(prep, input_feature, tgt_token_id, pad_id)
    logits = jax.block_until_ready(logits)
    assert logits.shape == (B, T, V)

    ref = lstm_decoder_reference(params, input_feature, tgt_token_id, pad_id)
    # bf16 lm-head weights (f32 accumulation) need a slightly relaxed tolerance.
    np.testing.assert_allclose(np.asarray(logits), np.asarray(ref), rtol=1e-2, atol=1e-2)

    print("KERNEL_OK")
</pallas_src>

<mosaic_0001>
module attributes {stable_mosaic.version = 11 : i64} {
  func.func @_recurrence_kernel(%arg0: i32, %arg1: i32, %arg2: memref<8x8x128xf32, #tpu.memory_space<vmem>>, %arg3: memref<8x128xf32, #tpu.memory_space<vmem>>, %arg4: memref<256x640xf32, #tpu.memory_space<vmem>>, %arg5: memref<1x128xf32, #tpu.memory_space<vmem>>, %arg6: memref<128x512xf32, #tpu.memory_space<vmem>>, %arg7: memref<1x512xf32, #tpu.memory_space<vmem>>, %arg8: memref<8x8x128xf32, #tpu.memory_space<vmem>>, %arg9: memref<8x256xf32, #tpu.memory_space<vmem>>, %arg10: memref<8x128xf32, #tpu.memory_space<vmem>>) attributes {dimension_semantics = [#tpu.dimension_semantics<parallel>, #tpu.dimension_semantics<arbitrary>], iteration_bounds = array<i64: 2, 2>, scalar_prefetch = 0 : i64, scratch_operands = 2 : i64, tpu.core_type = #tpu.core_type<tc>, window_params = [{transform_indices = @transform_0, window_bounds = array<i64: 8, 8, 128>}, {transform_indices = @transform_1, window_bounds = array<i64: 8, 128>}, {pipeline_mode = #tpu.pipeline_mode<synchronous>, transform_indices = @transform_2, window_bounds = array<i64: 256, 640>}, {pipeline_mode = #tpu.pipeline_mode<synchronous>, transform_indices = @transform_3, window_bounds = array<i64: 1, 128>}, {pipeline_mode = #tpu.pipeline_mode<synchronous>, transform_indices = @transform_4, window_bounds = array<i64: 128, 512>}, {pipeline_mode = #tpu.pipeline_mode<synchronous>, transform_indices = @transform_5, window_bounds = array<i64: 1, 512>}, {transform_indices = @transform_6, window_bounds = array<i64: 8, 8, 128>}]} {
    %c0_i32 = arith.constant 0 : i32
    %0 = arith.cmpi eq, %arg1, %c0_i32 : i32
    %1 = arith.extui %0 : i1 to i32
    %c0_i32_0 = arith.constant 0 : i32
    %2 = arith.cmpi ne, %1, %c0_i32_0 : i32
    scf.if %2 {
      %c0_137 = arith.constant 0 : index
      %c0_138 = arith.constant 0 : index
      %261 = vector.load %arg3[%c0_137, %c0_138] : memref<8x128xf32, #tpu.memory_space<vmem>>, vector<8x128xf32>
      %c0_139 = arith.constant 0 : index
      %c0_140 = arith.constant 0 : index
      %262 = vector.load %arg9[%c0_139, %c0_140] : memref<8x256xf32, #tpu.memory_space<vmem>>, vector<8x128xf32>
      tpu.vector_store %arg9[%c0_139, %c0_140], %261 {strides = array<i32>} : memref<8x256xf32, #tpu.memory_space<vmem>>, vector<8x128xf32>,
      %cst_141 = arith.constant 0.000000e+00 : f32
      %263 = vector.broadcast %cst_141 : f32 to vector<8x128xf32>
      %c0_142 = arith.constant 0 : index
      %c128_143 = arith.constant 128 : index
      %264 = vector.load %arg9[%c0_142, %c128_143] : memref<8x256xf32, #tpu.memory_space<vmem>>, vector<8x128xf32>
      tpu.vector_store %arg9[%c0_142, %c128_143], %263 {strides = array<i32>} : memref<8x256xf32, #tpu.memory_space<vmem>>, vector<8x128xf32>,
      %cst_144 = arith.constant 0.000000e+00 : f32
      %265 = vector.broadcast %cst_144 : f32 to vector<8x128xf32>
      %c0_145 = arith.constant 0 : index
      %c0_146 = arith.constant 0 : index
      %266 = vector.load %arg10[%c0_145, %c0_146] : memref<8x128xf32, #tpu.memory_space<vmem>>, vector<8x128xf32>
      tpu.vector_store %arg10[%c0_145, %c0_146], %265 {strides = array<i32>} : memref<8x128xf32, #tpu.memory_space<vmem>>, vector<8x128xf32>,
    } else {
    }
    %c0 = arith.constant 0 : index
    %c0_1 = arith.constant 0 : index
    %c0_2 = arith.constant 0 : index
    %3 = vector.load %arg2[%c0, %c0_1, %c0_2] : memref<8x8x128xf32, #tpu.memory_space<vmem>>, vector<8x8x128xf32>
    %4 = vector.shape_cast %3 : vector<8x8x128xf32> to vector<64x128xf32>
    %c0_3 = arith.constant 0 : index
    %c0_4 = arith.constant 0 : index
    %5 = vector.load %arg6[%c0_3, %c0_4] : memref<128x512xf32, #tpu.memory_space<vmem>>, vector<128x512xf32>
    %cst = arith.constant dense<0.000000e+00> : vector<64x512xf32>
    %6 = tpu.matmul %4, %5, %cst {dimension_numbers = #tpu.dot_dimension_numbers<[1], [0], [0], [1], [0, 0, 1, 1], [], []>} : vector<64x128xf32>, vector<128x512xf32>, vector<64x512xf32> -> vector<64x512xf32>
    %c0_5 = arith.constant 0 : index
    %c0_6 = arith.constant 0 : index
    %7 = vector.load %arg7[%c0_5, %c0_6] : memref<1x512xf32, #tpu.memory_space<vmem>>, vector<1x512xf32>
    %8 = vector.broadcast %7 : vector<1x512xf32> to vector<64x512xf32>
    %9 = arith.addf %6, %8 : vector<64x512xf32>
    %c0_7 = arith.constant 0 : index
    %c0_8 = arith.constant 0 : index
    %10 = vector.load %arg5[%c0_7, %c0_8] : memref<1x128xf32, #tpu.memory_space<vmem>>, vector<1x128xf32>
    %11 = vector.shape_cast %10 : vector<1x128xf32> to vector<1x128xf32>
    %12 = vector.broadcast %11 : vector<1x128xf32> to vector<8x128xf32>
    %c0_9 = arith.constant 0 : index
    %c0_10 = arith.constant 0 : index
    %13 = vector.load %arg9[%c0_9, %c0_10] : memref<8x256xf32, #tpu.memory_space<vmem>>, vector<8x256xf32>
    %c0_11 = arith.constant 0 : index
    %c0_12 = arith.constant 0 : index
    %14 = vector.load %arg4[%c0_11, %c0_12] : memref<256x640xf32, #tpu.memory_space<vmem>>, vector<256x640xf32>
    %cst_13 = arith.constant dense<0.000000e+00> : vector<8x640xf32>
    %15 = tpu.matmul %13, %14, %cst_13 {dimension_numbers = #tpu.dot_dimension_numbers<[1], [0], [0], [1], [0, 0, 1, 1], [], []>} : vector<8x256xf32>, vector<256x640xf32>, vector<8x640xf32> -> vector<8x640xf32>
    %16 = vector.extract_strided_slice %15 {offsets = [0, 0], sizes = [8, 128], strides = [1, 1]} : vector<8x640xf32> to vector<8x128xf32>
    %17 = arith.addf %16, %12 : vector<8x128xf32>
    %18 = vector.extract_strided_slice %9 {offsets = [0, 0], sizes = [8, 512], strides = [1, 1]} : vector<64x512xf32> to vector<8x512xf32>
    %19 = vector.extract_strided_slice %15 {offsets = [0, 128], sizes = [8, 512], strides = [1, 1]} : vector<8x640xf32> to vector<8x512xf32>
    %20 = arith.addf %18, %19 : vector<8x512xf32>
    %21 = vector.extract_strided_slice %20 {offsets = [0, 0], sizes = [8, 384], strides = [1, 1]} : vector<8x512xf32> to vector<8x384xf32>
    %22 = arith.negf %21 : vector<8x384xf32>
    %23 = math.exp %22 : vector<8x384xf32>
    %cst_14 = arith.constant 1.000000e+00 : f32
    %24 = vector.broadcast %cst_14 : f32 to vector<8x384xf32>
    %25 = arith.addf %24, %23 : vector<8x384xf32>
    %26 = arith.divf %24, %25 : vector<8x384xf32>
    %27 = vector.extract_strided_slice %20 {offsets = [0, 384], sizes = [8, 128], strides = [1, 1]} : vector<8x512xf32> to vector<8x128xf32>
    %28 = math.tanh %27 : vector<8x128xf32>
    %29 = vector.extract_strided_slice %26 {offsets = [0, 128], sizes = [8, 128], strides = [1, 1]} : vector<8x384xf32> to vector<8x128xf32>
    %c0_15 = arith.constant 0 : index
    %c0_16 = arith.constant 0 : index
    %30 = vector.load %arg10[%c0_15, %c0_16] : memref<8x128xf32, #tpu.memory_space<vmem>>, vector<8x128xf32>
    %31 = arith.mulf %29, %30 : vector<8x128xf32>
    %32 = vector.extract_strided_slice %26 {offsets = [0, 0], sizes = [8, 128], strides = [1, 1]} : vector<8x384xf32> to vector<8x128xf32>
    %33 = arith.mulf %32, %28 : vector<8x128xf32>
    %34 = arith.addf %31, %33 : vector<8x128xf32>
    %35 = vector.extract_strided_slice %26 {offsets = [0, 256], sizes = [8, 128], strides = [1, 1]} : vector<8x384xf32> to vector<8x128xf32>
    %36 = math.tanh %34 : vector<8x128xf32>
    %37 = arith.mulf %35, %36 : vector<8x128xf32>
    %c0_17 = arith.constant 0 : index
    %c0_18 = arith.constant 0 : index
    %38 = vector.load %arg10[%c0_17, %c0_18] : memref<8x128xf32, #tpu.memory_space<vmem>>, vector<8x128xf32>
    tpu.vector_store %arg10[%c0_17, %c0_18], %34 {strides = array<i32>} : memref<8x128xf32, #tpu.memory_space<vmem>>, vector<8x128xf32>,
    %c0_19 = arith.constant 0 : index
    %c0_20 = arith.constant 0 : index
    %39 = vector.load %arg9[%c0_19, %c0_20] : memref<8x256xf32, #tpu.memory_space<vmem>>, vector<8x128xf32>
    tpu.vector_store %arg9[%c0_19, %c0_20], %37 {strides = array<i32>} : memref<8x256xf32, #tpu.memory_space<vmem>>, vector<8x128xf32>,
    %c0_21 = arith.constant 0 : index
    %c128 = arith.constant 128 : index
    %40 = vector.load %arg9[%c0_21, %c128] : memref<8x256xf32, #tpu.memory_space<vmem>>, vector<8x128xf32>
    tpu.vector_store %arg9[%c0_21, %c128], %17 {strides = array<i32>} : memref<8x256xf32, #tpu.memory_space<vmem>>, vector<8x128xf32>,
    %c0_22 = arith.constant 0 : index
    %c0_23 = arith.constant 0 : index
    %c0_24 = arith.constant 0 : index
    %41 = vector.load %arg8[%c0_22, %c0_23, %c0_24] : memref<8x8x128xf32, #tpu.memory_space<vmem>>, vector<8x1x128xf32>
    %42 = vector.shape_cast %41 : vector<8x1x128xf32> to vector<8x128xf32>
    %43 = vector.shape_cast %37 : vector<8x128xf32> to vector<8x1x128xf32>
    tpu.vector_store %arg8[%c0_22, %c0_23, %c0_24], %43 {strides = array<i32>} : memref<8x8x128xf32, #tpu.memory_space<vmem>>, vector<8x1x128xf32>,
    %c0_25 = arith.constant 0 : index
    %c0_26 = arith.constant 0 : index
    %44 = vector.load %arg9[%c0_25, %c0_26] : memref<8x256xf32, #tpu.memory_space<vmem>>, vector<8x256xf32>
    %c0_27 = arith.constant 0 : index
    %c0_28 = arith.constant 0 : index
    %45 = vector.load %arg4[%c0_27, %c0_28] : memref<256x640xf32, #tpu.memory_space<vmem>>, vector<256x640xf32>
    %cst_29 = arith.constant dense<0.000000e+00> : vector<8x640xf32>
    %46 = tpu.matmul %44, %45, %cst_29 {dimension_numbers = #tpu.dot_dimension_numbers<[1], [0], [0], [1], [0, 0, 1, 1], [], []>} : vector<8x256xf32>, vector<256x640xf32>, vector<8x640xf32> -> vector<8x640xf32>
    %47 = vector.extract_strided_slice %46 {offsets = [0, 0], sizes = [8, 128], strides = [1, 1]} : vector<8x640xf32> to vector<8x128xf32>
    %48 = arith.addf %47, %12 : vector<8x128xf32>
    %49 = vector.extract_strided_slice %9 {offsets = [8, 0], sizes = [8, 512], strides = [1, 1]} : vector<64x512xf32> to vector<8x512xf32>
    %50 = vector.extract_strided_slice %46 {offsets = [0, 128], sizes = [8, 512], strides = [1, 1]} : vector<8x640xf32> to vector<8x512xf32>
    %51 = arith.addf %49, %50 : vector<8x512xf32>
    %52 = vector.extract_strided_slice %51 {offsets = [0, 0], sizes = [8, 384], strides = [1, 1]} : vector<8x512xf32> to vector<8x384xf32>
    %53 = arith.negf %52 : vector<8x384xf32>
    %54 = math.exp %53 : vector<8x384xf32>
    %cst_30 = arith.constant 1.000000e+00 : f32
    %55 = vector.broadcast %cst_30 : f32 to vector<8x384xf32>
    %56 = arith.addf %55, %54 : vector<8x384xf32>
    %57 = arith.divf %55, %56 : vector<8x384xf32>
    %58 = vector.extract_strided_slice %51 {offsets = [0, 384], sizes = [8, 128], strides = [1, 1]} : vector<8x512xf32> to vector<8x128xf32>
    %59 = math.tanh %58 : vector<8x128xf32>
    %60 = vector.extract_strided_slice %57 {offsets = [0, 128], sizes = [8, 128], strides = [1, 1]} : vector<8x384xf32> to vector<8x128xf32>
    %c0_31 = arith.constant 0 : index
    %c0_32 = arith.constant 0 : index
    %61 = vector.load %arg10[%c0_31, %c0_32] : memref<8x128xf32, #tpu.memory_space<vmem>>, vector<8x128xf32>
    %62 = arith.mulf %60, %61 : vector<8x128xf32>
    %63 = vector.extract_strided_slice %57 {offsets = [0, 0], sizes = [8, 128], strides = [1, 1]} : vector<8x384xf32> to vector<8x128xf32>
    %64 = arith.mulf %63, %59 : vector<8x128xf32>
    %65 = arith.addf %62, %64 : vector<8x128xf32>
    %66 = vector.extract_strided_slice %57 {offsets = [0, 256], sizes = [8, 128], strides = [1, 1]} : vector<8x384xf32> to vector<8x128xf32>
    %67 = math.tanh %65 : vector<8x128xf32>
    %68 = arith.mulf %66, %67 : vector<8x128xf32>
    %c0_33 = arith.constant 0 : index
    %c0_34 = arith.constant 0 : index
    %69 = vector.load %arg10[%c0_33, %c0_34] : memref<8x128xf32, #tpu.memory_space<vmem>>, vector<8x128xf32>
    tpu.vector_store %arg10[%c0_33, %c0_34], %65 {strides = array<i32>} : memref<8x128xf32, #tpu.memory_space<vmem>>, vector<8x128xf32>,
    %c0_35 = arith.constant 0 : index
    %c0_36 = arith.constant 0 : index
    %70 = vector.load %arg9[%c0_35, %c0_36] : memref<8x256xf32, #tpu.memory_space<vmem>>, vector<8x128xf32>
    tpu.vector_store %arg9[%c0_35, %c0_36], %68 {strides = array<i32>} : memref<8x256xf32, #tpu.memory_space<vmem>>, vector<8x128xf32>,
    %c0_37 = arith.constant 0 : index
    %c128_38 = arith.constant 128 : index
    %71 = vector.load %arg9[%c0_37, %c128_38] : memref<8x256xf32, #tpu.memory_space<vmem>>, vector<8x128xf32>
    tpu.vector_store %arg9[%c0_37, %c128_38], %48 {strides = array<i32>} : memref<8x256xf32, #tpu.memory_space<vmem>>, vector<8x128xf32>,
    %c0_39 = arith.constant 0 : index
    %c1 = arith.constant 1 : index
    %c0_40 = arith.constant 0 : index
    %72 = vector.load %arg8[%c0_39, %c1, %c0_40] : memref<8x8x128xf32, #tpu.memory_space<vmem>>, vector<8x1x128xf32>
    %73 = vector.shape_cast %72 : vector<8x1x128xf32> to vector<8x128xf32>
    %74 = vector.shape_cast %68 : vector<8x128xf32> to vector<8x1x128xf32>
    tpu.vector_store %arg8[%c0_39, %c1, %c0_40], %74 {strides = array<i32>} : memref<8x8x128xf32, #tpu.memory_space<vmem>>, vector<8x1x128xf32>,
    %c0_41 = arith.constant 0 : index
    %c0_42 = arith.constant 0 : index
    %75 = vector.load %arg9[%c0_41, %c0_42] : memref<8x256xf32, #tpu.memory_space<vmem>>, vector<8x256xf32>
    %c0_43 = arith.constant 0 : index
    %c0_44 = arith.constant 0 : index
    %76 = vector.load %arg4[%c0_43, %c0_44] : memref<256x640xf32, #tpu.memory_space<vmem>>, vector<256x640xf32>
    %cst_45 = arith.constant dense<0.000000e+00> : vector<8x640xf32>
    %77 = tpu.matmul %75, %76, %cst_45 {dimension_numbers = #tpu.dot_dimension_numbers<[1], [0], [0], [1], [0, 0, 1, 1], [], []>} : vector<8x256xf32>, vector<256x640xf32>, vector<8x640xf32> -> vector<8x640xf32>
    %78 = vector.extract_strided_slice %77 {offsets = [0, 0], sizes = [8, 128], strides = [1, 1]} : vector<8x640xf32> to vector<8x128xf32>
    %79 = arith.addf %78, %12 : vector<8x128xf32>
    %80 = vector.extract_strided_slice %9 {offsets = [16, 0], sizes = [8, 512], strides = [1, 1]} : vector<64x512xf32> to vector<8x512xf32>
    %81 = vector.extract_strided_slice %77 {offsets = [0, 128], sizes = [8, 512], strides = [1, 1]} : vector<8x640xf32> to vector<8x512xf32>
    %82 = arith.addf %80, %81 : vector<8x512xf32>
    %83 = vector.extract_strided_slice %82 {offsets = [0, 0], sizes = [8, 384], strides = [1, 1]} : vector<8x512xf32> to vector<8x384xf32>
    %84 = arith.negf %83 : vector<8x384xf32>
    %85 = math.exp %84 : vector<8x384xf32>
    %cst_46 = arith.constant 1.000000e+00 : f32
    %86 = vector.broadcast %cst_46 : f32 to vector<8x384xf32>
    %87 = arith.addf %86, %85 : vector<8x384xf32>
    %88 = arith.divf %86, %87 : vector<8x384xf32>
    %89 = vector.extract_strided_slice %82 {offsets = [0, 384], sizes = [8, 128], strides = [1, 1]} : vector<8x512xf32> to vector<8x128xf32>
    %90 = math.tanh %89 : vector<8x128xf32>
    %91 = vector.extract_strided_slice %88 {offsets = [0, 128], sizes = [8, 128], strides = [1, 1]} : vector<8x384xf32> to vector<8x128xf32>
    %c0_47 = arith.constant 0 : index
    %c0_48 = arith.constant 0 : index
    %92 = vector.load %arg10[%c0_47, %c0_48] : memref<8x128xf32, #tpu.memory_space<vmem>>, vector<8x128xf32>
    %93 = arith.mulf %91, %92 : vector<8x128xf32>
    %94 = vector.extract_strided_slice %88 {offsets = [0, 0], sizes = [8, 128], strides = [1, 1]} : vector<8x384xf32> to vector<8x128xf32>
    %95 = arith.mulf %94, %90 : vector<8x128xf32>
    %96 = arith.addf %93, %95 : vector<8x128xf32>
    %97 = vector.extract_strided_slice %88 {offsets = [0, 256], sizes = [8, 128], strides = [1, 1]} : vector<8x384xf32> to vector<8x128xf32>
    %98 = math.tanh %96 : vector<8x128xf32>
    %99 = arith.mulf %97, %98 : vector<8x128xf32>
    %c0_49 = arith.constant 0 : index
    %c0_50 = arith.constant 0 : index
    %100 = vector.load %arg10[%c0_49, %c0_50] : memref<8x128xf32, #tpu.memory_space<vmem>>, vector<8x128xf32>
    tpu.vector_store %arg10[%c0_49, %c0_50], %96 {strides = array<i32>} : memref<8x128xf32, #tpu.memory_space<vmem>>, vector<8x128xf32>,
    %c0_51 = arith.constant 0 : index
    %c0_52 = arith.constant 0 : index
    %101 = vector.load %arg9[%c0_51, %c0_52] : memref<8x256xf32, #tpu.memory_space<vmem>>, vector<8x128xf32>
    tpu.vector_store %arg9[%c0_51, %c0_52], %99 {strides = array<i32>} : memref<8x256xf32, #tpu.memory_space<vmem>>, vector<8x128xf32>,
    %c0_53 = arith.constant 0 : index
    %c128_54 = arith.constant 128 : index
    %102 = vector.load %arg9[%c0_53, %c128_54] : memref<8x256xf32, #tpu.memory_space<vmem>>, vector<8x128xf32>
    tpu.vector_store %arg9[%c0_53, %c128_54], %79 {strides = array<i32>} : memref<8x256xf32, #tpu.memory_space<vmem>>, vector<8x128xf32>,
    %c0_55 = arith.constant 0 : index
    %c2 = arith.constant 2 : index
    %c0_56 = arith.constant 0 : index
    %103 = vector.load %arg8[%c0_55, %c2, %c0_56] : memref<8x8x128xf32, #tpu.memory_space<vmem>>, vector<8x1x128xf32>
    %104 = vector.shape_cast %103 : vector<8x1x128xf32> to vector<8x128xf32>
    %105 = vector.shape_cast %99 : vector<8x128xf32> to vector<8x1x128xf32>
    tpu.vector_store %arg8[%c0_55, %c2, %c0_56], %105 {strides = array<i32>} : memref<8x8x128xf32, #tpu.memory_space<vmem>>, vector<8x1x128xf32>,
    %c0_57 = arith.constant 0 : index
    %c0_58 = arith.constant 0 : index
    %106 = vector.load %arg9[%c0_57, %c0_58] : memref<8x256xf32, #tpu.memory_space<vmem>>, vector<8x256xf32>
    %c0_59 = arith.constant 0 : index
    %c0_60 = arith.constant 0 : index
    %107 = vector.load %arg4[%c0_59, %c0_60] : memref<256x640xf32, #tpu.memory_space<vmem>>, vector<256x640xf32>
    %cst_61 = arith.constant dense<0.000000e+00> : vector<8x640xf32>
    %108 = tpu.matmul %106, %107, %cst_61 {dimension_numbers = #tpu.dot_dimension_numbers<[1], [0], [0], [1], [0, 0, 1, 1], [], []>} : vector<8x256xf32>, vector<256x640xf32>, vector<8x640xf32> -> vector<8x640xf32>
    %109 = vector.extract_strided_slice %108 {offsets = [0, 0], sizes = [8, 128], strides = [1, 1]} : vector<8x640xf32> to vector<8x128xf32>
    %110 = arith.addf %109, %12 : vector<8x128xf32>
    %111 = vector.extract_strided_slice %9 {offsets = [24, 0], sizes = [8, 512], strides = [1, 1]} : vector<64x512xf32> to vector<8x512xf32>
    %112 = vector.extract_strided_slice %108 {offsets = [0, 128], sizes = [8, 512], strides = [1, 1]} : vector<8x640xf32> to vector<8x512xf32>
    %113 = arith.addf %111, %112 : vector<8x512xf32>
    %114 = vector.extract_strided_slice %113 {offsets = [0, 0], sizes = [8, 384], strides = [1, 1]} : vector<8x512xf32> to vector<8x384xf32>
    %115 = arith.negf %114 : vector<8x384xf32>
    %116 = math.exp %115 : vector<8x384xf32>
    %cst_62 = arith.constant 1.000000e+00 : f32
    %117 = vector.broadcast %cst_62 : f32 to vector<8x384xf32>
    %118 = arith.addf %117, %116 : vector<8x384xf32>
    %119 = arith.divf %117, %118 : vector<8x384xf32>
    %120 = vector.extract_strided_slice %113 {offsets = [0, 384], sizes = [8, 128], strides = [1, 1]} : vector<8x512xf32> to vector<8x128xf32>
    %121 = math.tanh %120 : vector<8x128xf32>
    %122 = vector.extract_strided_slice %119 {offsets = [0, 128], sizes = [8, 128], strides = [1, 1]} : vector<8x384xf32> to vector<8x128xf32>
    %c0_63 = arith.constant 0 : index
    %c0_64 = arith.constant 0 : index
    %123 = vector.load %arg10[%c0_63, %c0_64] : memref<8x128xf32, #tpu.memory_space<vmem>>, vector<8x128xf32>
    %124 = arith.mulf %122, %123 : vector<8x128xf32>
    %125 = vector.extract_strided_slice %119 {offsets = [0, 0], sizes = [8, 128], strides = [1, 1]} : vector<8x384xf32> to vector<8x128xf32>
    %126 = arith.mulf %125, %121 : vector<8x128xf32>
    %127 = arith.addf %124, %126 : vector<8x128xf32>
    %128 = vector.extract_strided_slice %119 {offsets = [0, 256], sizes = [8, 128], strides = [1, 1]} : vector<8x384xf32> to vector<8x128xf32>
    %129 = math.tanh %127 : vector<8x128xf32>
    %130 = arith.mulf %128, %129 : vector<8x128xf32>
    %c0_65 = arith.constant 0 : index
    %c0_66 = arith.constant 0 : index
    %131 = vector.load %arg10[%c0_65, %c0_66] : memref<8x128xf32, #tpu.memory_space<vmem>>, vector<8x128xf32>
    tpu.vector_store %arg10[%c0_65, %c0_66], %127 {strides = array<i32>} : memref<8x128xf32, #tpu.memory_space<vmem>>, vector<8x128xf32>,
    %c0_67 = arith.constant 0 : index
    %c0_68 = arith.constant 0 : index
    %132 = vector.load %arg9[%c0_67, %c0_68] : memref<8x256xf32, #tpu.memory_space<vmem>>, vector<8x128xf32>
    tpu.vector_store %arg9[%c0_67, %c0_68], %130 {strides = array<i32>} : memref<8x256xf32, #tpu.memory_space<vmem>>, vector<8x128xf32>,
    %c0_69 = arith.constant 0 : index
    %c128_70 = arith.constant 128 : index
    %133 = vector.load %arg9[%c0_69, %c128_70] : memref<8x256xf32, #tpu.memory_space<vmem>>, vector<8x128xf32>
    tpu.vector_store %arg9[%c0_69, %c128_70], %110 {strides = array<i32>} : memref<8x256xf32, #tpu.memory_space<vmem>>, vector<8x128xf32>,
    %c0_71 = arith.constant 0 : index
    %c3 = arith.constant 3 : index
    %c0_72 = arith.constant 0 : index
    %134 = vector.load %arg8[%c0_71, %c3, %c0_72] : memref<8x8x128xf32, #tpu.memory_space<vmem>>, vector<8x1x128xf32>
    %135 = vector.shape_cast %134 : vector<8x1x128xf32> to vector<8x128xf32>
    %136 = vector.shape_cast %130 : vector<8x128xf32> to vector<8x1x128xf32>
    tpu.vector_store %arg8[%c0_71, %c3, %c0_72], %136 {strides = array<i32>} : memref<8x8x128xf32, #tpu.memory_space<vmem>>, vector<8x1x128xf32>,
    %c0_73 = arith.constant 0 : index
    %c0_74 = arith.constant 0 : index
    %137 = vector.load %arg9[%c0_73, %c0_74] : memref<8x256xf32, #tpu.memory_space<vmem>>, vector<8x256xf32>
    %c0_75 = arith.constant 0 : index
    %c0_76 = arith.constant 0 : index
    %138 = vector.load %arg4[%c0_75, %c0_76] : memref<256x640xf32, #tpu.memory_space<vmem>>, vector<256x640xf32>
    %cst_77 = arith.constant dense<0.000000e+00> : vector<8x640xf32>
    %139 = tpu.matmul %137, %138, %cst_77 {dimension_numbers = #tpu.dot_dimension_numbers<[1], [0], [0], [1], [0, 0, 1, 1], [], []>} : vector<8x256xf32>, vector<256x640xf32>, vector<8x640xf32> -> vector<8x640xf32>
    %140 = vector.extract_strided_slice %139 {offsets = [0, 0], sizes = [8, 128], strides = [1, 1]} : vector<8x640xf32> to vector<8x128xf32>
    %141 = arith.addf %140, %12 : vector<8x128xf32>
    %142 = vector.extract_strided_slice %9 {offsets = [32, 0], sizes = [8, 512], strides = [1, 1]} : vector<64x512xf32> to vector<8x512xf32>
    %143 = vector.extract_strided_slice %139 {offsets = [0, 128], sizes = [8, 512], strides = [1, 1]} : vector<8x640xf32> to vector<8x512xf32>
    %144 = arith.addf %142, %143 : vector<8x512xf32>
    %145 = vector.extract_strided_slice %144 {offsets = [0, 0], sizes = [8, 384], strides = [1, 1]} : vector<8x512xf32> to vector<8x384xf32>
    %146 = arith.negf %145 : vector<8x384xf32>
    %147 = math.exp %146 : vector<8x384xf32>
    %cst_78 = arith.constant 1.000000e+00 : f32
    %148 = vector.broadcast %cst_78 : f32 to vector<8x384xf32>
    %149 = arith.addf %148, %147 : vector<8x384xf32>
    %150 = arith.divf %148, %149 : vector<8x384xf32>
    %151 = vector.extract_strided_slice %144 {offsets = [0, 384], sizes = [8, 128], strides = [1, 1]} : vector<8x512xf32> to vector<8x128xf32>
    %152 = math.tanh %151 : vector<8x128xf32>
    %153 = vector.extract_strided_slice %150 {offsets = [0, 128], sizes = [8, 128], strides = [1, 1]} : vector<8x384xf32> to vector<8x128xf32>
    %c0_79 = arith.constant 0 : index
    %c0_80 = arith.constant 0 : index
    %154 = vector.load %arg10[%c0_79, %c0_80] : memref<8x128xf32, #tpu.memory_space<vmem>>, vector<8x128xf32>
    %155 = arith.mulf %153, %154 : vector<8x128xf32>
    %156 = vector.extract_strided_slice %150 {offsets = [0, 0], sizes = [8, 128], strides = [1, 1]} : vector<8x384xf32> to vector<8x128xf32>
    %157 = arith.mulf %156, %152 : vector<8x128xf32>
    %158 = arith.addf %155, %157 : vector<8x128xf32>
    %159 = vector.extract_strided_slice %150 {offsets = [0, 256], sizes = [8, 128], strides = [1, 1]} : vector<8x384xf32> to vector<8x128xf32>
    %160 = math.tanh %158 : vector<8x128xf32>
    %161 = arith.mulf %159, %160 : vector<8x128xf32>
    %c0_81 = arith.constant 0 : index
    %c0_82 = arith.constant 0 : index
    %162 = vector.load %arg10[%c0_81, %c0_82] : memref<8x128xf32, #tpu.memory_space<vmem>>, vector<8x128xf32>
    tpu.vector_store %arg10[%c0_81, %c0_82], %158 {strides = array<i32>} : memref<8x128xf32, #tpu.memory_space<vmem>>, vector<8x128xf32>,
    %c0_83 = arith.constant 0 : index
    %c0_84 = arith.constant 0 : index
    %163 = vector.load %arg9[%c0_83, %c0_84] : memref<8x256xf32, #tpu.memory_space<vmem>>, vector<8x128xf32>
    tpu.vector_store %arg9[%c0_83, %c0_84], %161 {strides = array<i32>} : memref<8x256xf32, #tpu.memory_space<vmem>>, vector<8x128xf32>,
    %c0_85 = arith.constant 0 : index
    %c128_86 = arith.constant 128 : index
    %164 = vector.load %arg9[%c0_85, %c128_86] : memref<8x256xf32, #tpu.memory_space<vmem>>, vector<8x128xf32>
    tpu.vector_store %arg9[%c0_85, %c128_86], %141 {strides = array<i32>} : memref<8x256xf32, #tpu.memory_space<vmem>>, vector<8x128xf32>,
    %c0_87 = arith.constant 0 : index
    %c4 = arith.constant 4 : index
    %c0_88 = arith.constant 0 : index
    %165 = vector.load %arg8[%c0_87, %c4, %c0_88] : memref<8x8x128xf32, #tpu.memory_space<vmem>>, vector<8x1x128xf32>
    %166 = vector.shape_cast %165 : vector<8x1x128xf32> to vector<8x128xf32>
    %167 = vector.shape_cast %161 : vector<8x128xf32> to vector<8x1x128xf32>
    tpu.vector_store %arg8[%c0_87, %c4, %c0_88], %167 {strides = array<i32>} : memref<8x8x128xf32, #tpu.memory_space<vmem>>, vector<8x1x128xf32>,
    %c0_89 = arith.constant 0 : index
    %c0_90 = arith.constant 0 : index
    %168 = vector.load %arg9[%c0_89, %c0_90] : memref<8x256xf32, #tpu.memory_space<vmem>>, vector<8x256xf32>
    %c0_91 = arith.constant 0 : index
    %c0_92 = arith.constant 0 : index
    %169 = vector.load %arg4[%c0_91, %c0_92] : memref<256x640xf32, #tpu.memory_space<vmem>>, vector<256x640xf32>
    %cst_93 = arith.constant dense<0.000000e+00> : vector<8x640xf32>
    %170 = tpu.matmul %168, %169, %cst_93 {dimension_numbers = #tpu.dot_dimension_numbers<[1], [0], [0], [1], [0, 0, 1, 1], [], []>} : vector<8x256xf32>, vector<256x640xf32>, vector<8x640xf32> -> vector<8x640xf32>
    %171 = vector.extract_strided_slice %170 {offsets = [0, 0], sizes = [8, 128], strides = [1, 1]} : vector<8x640xf32> to vector<8x128xf32>
    %172 = arith.addf %171, %12 : vector<8x128xf32>
    %173 = vector.extract_strided_slice %9 {offsets = [40, 0], sizes = [8, 512], strides = [1, 1]} : vector<64x512xf32> to vector<8x512xf32>
    %174 = vector.extract_strided_slice %170 {offsets = [0, 128], sizes = [8, 512], strides = [1, 1]} : vector<8x640xf32> to vector<8x512xf32>
    %175 = arith.addf %173, %174 : vector<8x512xf32>
    %176 = vector.extract_strided_slice %175 {offsets = [0, 0], sizes = [8, 384], strides = [1, 1]} : vector<8x512xf32> to vector<8x384xf32>
    %177 = arith.negf %176 : vector<8x384xf32>
    %178 = math.exp %177 : vector<8x384xf32>
    %cst_94 = arith.constant 1.000000e+00 : f32
    %179 = vector.broadcast %cst_94 : f32 to vector<8x384xf32>
    %180 = arith.addf %179, %178 : vector<8x384xf32>
    %181 = arith.divf %179, %180 : vector<8x384xf32>
    %182 = vector.extract_strided_slice %175 {offsets = [0, 384], sizes = [8, 128], strides = [1, 1]} : vector<8x512xf32> to vector<8x128xf32>
    %183 = math.tanh %182 : vector<8x128xf32>
    %184 = vector.extract_strided_slice %181 {offsets = [0, 128], sizes = [8, 128], strides = [1, 1]} : vector<8x384xf32> to vector<8x128xf32>
    %c0_95 = arith.constant 0 : index
    %c0_96 = arith.constant 0 : index
    %185 = vector.load %arg10[%c0_95, %c0_96] : memref<8x128xf32, #tpu.memory_space<vmem>>, vector<8x128xf32>
    %186 = arith.mulf %184, %185 : vector<8x128xf32>
    %187 = vector.extract_strided_slice %181 {offsets = [0, 0], sizes = [8, 128], strides = [1, 1]} : vector<8x384xf32> to vector<8x128xf32>
    %188 = arith.mulf %187, %183 : vector<8x128xf32>
    %189 = arith.addf %186, %188 : vector<8x128xf32>
    %190 = vector.extract_strided_slice %181 {offsets = [0, 256], sizes = [8, 128], strides = [1, 1]} : vector<8x384xf32> to vector<8x128xf32>
    %191 = math.tanh %189 : vector<8x128xf32>
    %192 = arith.mulf %190, %191 : vector<8x128xf32>
    %c0_97 = arith.constant 0 : index
    %c0_98 = arith.constant 0 : index
    %193 = vector.load %arg10[%c0_97, %c0_98] : memref<8x128xf32, #tpu.memory_space<vmem>>, vector<8x128xf32>
    tpu.vector_store %arg10[%c0_97, %c0_98], %189 {strides = array<i32>} : memref<8x128xf32, #tpu.memory_space<vmem>>, vector<8x128xf32>,
    %c0_99 = arith.constant 0 : index
    %c0_100 = arith.constant 0 : index
    %194 = vector.load %arg9[%c0_99, %c0_100] : memref<8x256xf32, #tpu.memory_space<vmem>>, vector<8x128xf32>
    tpu.vector_store %arg9[%c0_99, %c0_100], %192 {strides = array<i32>} : memref<8x256xf32, #tpu.memory_space<vmem>>, vector<8x128xf32>,
    %c0_101 = arith.constant 0 : index
    %c128_102 = arith.constant 128 : index
    %195 = vector.load %arg9[%c0_101, %c128_102] : memref<8x256xf32, #tpu.memory_space<vmem>>, vector<8x128xf32>
    tpu.vector_store %arg9[%c0_101, %c128_102], %172 {strides = array<i32>} : memref<8x256xf32, #tpu.memory_space<vmem>>, vector<8x128xf32>,
    %c0_103 = arith.constant 0 : index
    %c5 = arith.constant 5 : index
    %c0_104 = arith.constant 0 : index
    %196 = vector.load %arg8[%c0_103, %c5, %c0_104] : memref<8x8x128xf32, #tpu.memory_space<vmem>>, vector<8x1x128xf32>
    %197 = vector.shape_cast %196 : vector<8x1x128xf32> to vector<8x128xf32>
    %198 = vector.shape_cast %192 : vector<8x128xf32> to vector<8x1x128xf32>
    tpu.vector_store %arg8[%c0_103, %c5, %c0_104], %198 {strides = array<i32>} : memref<8x8x128xf32, #tpu.memory_space<vmem>>, vector<8x1x128xf32>,
    %c0_105 = arith.constant 0 : index
    %c0_106 = arith.constant 0 : index
    %199 = vector.load %arg9[%c0_105, %c0_106] : memref<8x256xf32, #tpu.memory_space<vmem>>, vector<8x256xf32>
    %c0_107 = arith.constant 0 : index
    %c0_108 = arith.constant 0 : index
    %200 = vector.load %arg4[%c0_107, %c0_108] : memref<256x640xf32, #tpu.memory_space<vmem>>, vector<256x640xf32>
    %cst_109 = arith.constant dense<0.000000e+00> : vector<8x640xf32>
    %201 = tpu.matmul %199, %200, %cst_109 {dimension_numbers = #tpu.dot_dimension_numbers<[1], [0], [0], [1], [0, 0, 1, 1], [], []>} : vector<8x256xf32>, vector<256x640xf32>, vector<8x640xf32> -> vector<8x640xf32>
    %202 = vector.extract_strided_slice %201 {offsets = [0, 0], sizes = [8, 128], strides = [1, 1]} : vector<8x640xf32> to vector<8x128xf32>
    %203 = arith.addf %202, %12 : vector<8x128xf32>
    %204 = vector.extract_strided_slice %9 {offsets = [48, 0], sizes = [8, 512], strides = [1, 1]} : vector<64x512xf32> to vector<8x512xf32>
    %205 = vector.extract_strided_slice %201 {offsets = [0, 128], sizes = [8, 512], strides = [1, 1]} : vector<8x640xf32> to vector<8x512xf32>
    %206 = arith.addf %204, %205 : vector<8x512xf32>
    %207 = vector.extract_strided_slice %206 {offsets = [0, 0], sizes = [8, 384], strides = [1, 1]} : vector<8x512xf32> to vector<8x384xf32>
    %208 = arith.negf %207 : vector<8x384xf32>
    %209 = math.exp %208 : vector<8x384xf32>
    %cst_110 = arith.constant 1.000000e+00 : f32
    %210 = vector.broadcast %cst_110 : f32 to vector<8x384xf32>
    %211 = arith.addf %210, %209 : vector<8x384xf32>
    %212 = arith.divf %210, %211 : vector<8x384xf32>
    %213 = vector.extract_strided_slice %206 {offsets = [0, 384], sizes = [8, 128], strides = [1, 1]} : vector<8x512xf32> to vector<8x128xf32>
    %214 = math.tanh %213 : vector<8x128xf32>
    %215 = vector.extract_strided_slice %212 {offsets = [0, 128], sizes = [8, 128], strides = [1, 1]} : vector<8x384xf32> to vector<8x128xf32>
    %c0_111 = arith.constant 0 : index
    %c0_112 = arith.constant 0 : index
    %216 = vector.load %arg10[%c0_111, %c0_112] : memref<8x128xf32, #tpu.memory_space<vmem>>, vector<8x128xf32>
    %217 = arith.mulf %215, %216 : vector<8x128xf32>
    %218 = vector.extract_strided_slice %212 {offsets = [0, 0], sizes = [8, 128], strides = [1, 1]} : vector<8x384xf32> to vector<8x128xf32>
    %219 = arith.mulf %218, %214 : vector<8x128xf32>
    %220 = arith.addf %217, %219 : vector<8x128xf32>
    %221 = vector.extract_strided_slice %212 {offsets = [0, 256], sizes = [8, 128], strides = [1, 1]} : vector<8x384xf32> to vector<8x128xf32>
    %222 = math.tanh %220 : vector<8x128xf32>
    %223 = arith.mulf %221, %222 : vector<8x128xf32>
    %c0_113 = arith.constant 0 : index
    %c0_114 = arith.constant 0 : index
    %224 = vector.load %arg10[%c0_113, %c0_114] : memref<8x128xf32, #tpu.memory_space<vmem>>, vector<8x128xf32>
    tpu.vector_store %arg10[%c0_113, %c0_114], %220 {strides = array<i32>} : memref<8x128xf32, #tpu.memory_space<vmem>>, vector<8x128xf32>,
    %c0_115 = arith.constant 0 : index
    %c0_116 = arith.constant 0 : index
    %225 = vector.load %arg9[%c0_115, %c0_116] : memref<8x256xf32, #tpu.memory_space<vmem>>, vector<8x128xf32>
    tpu.vector_store %arg9[%c0_115, %c0_116], %223 {strides = array<i32>} : memref<8x256xf32, #tpu.memory_space<vmem>>, vector<8x128xf32>,
    %c0_117 = arith.constant 0 : index
    %c128_118 = arith.constant 128 : index
    %226 = vector.load %arg9[%c0_117, %c128_118] : memref<8x256xf32, #tpu.memory_space<vmem>>, vector<8x128xf32>
    tpu.vector_store %arg9[%c0_117, %c128_118], %203 {strides = array<i32>} : memref<8x256xf32, #tpu.memory_space<vmem>>, vector<8x128xf32>,
    %c0_119 = arith.constant 0 : index
    %c6 = arith.constant 6 : index
    %c0_120 = arith.constant 0 : index
    %227 = vector.load %arg8[%c0_119, %c6, %c0_120] : memref<8x8x128xf32, #tpu.memory_space<vmem>>, vector<8x1x128xf32>
    %228 = vector.shape_cast %227 : vector<8x1x128xf32> to vector<8x128xf32>
    %229 = vector.shape_cast %223 : vector<8x128xf32> to vector<8x1x128xf32>
    tpu.vector_store %arg8[%c0_119, %c6, %c0_120], %229 {strides = array<i32>} : memref<8x8x128xf32, #tpu.memory_space<vmem>>, vector<8x1x128xf32>,
    %c0_121 = arith.constant 0 : index
    %c0_122 = arith.constant 0 : index
    %230 = vector.load %arg9[%c0_121, %c0_122] : memref<8x256xf32, #tpu.memory_space<vmem>>, vector<8x256xf32>
    %c0_123 = arith.constant 0 : index
    %c0_124 = arith.constant 0 : index
    %231 = vector.load %arg4[%c0_123, %c0_124] : memref<256x640xf32, #tpu.memory_space<vmem>>, vector<256x640xf32>
    %cst_125 = arith.constant dense<0.000000e+00> : vector<8x640xf32>
    %232 = tpu.matmul %230, %231, %cst_125 {dimension_numbers = #tpu.dot_dimension_numbers<[1], [0], [0], [1], [0, 0, 1, 1], [], []>} : vector<8x256xf32>, vector<256x640xf32>, vector<8x640xf32> -> vector<8x640xf32>
    %233 = vector.extract_strided_slice %232 {offsets = [0, 0], sizes = [8, 128], strides = [1, 1]} : vector<8x640xf32> to vector<8x128xf32>
    %234 = arith.addf %233, %12 : vector<8x128xf32>
    %235 = vector.extract_strided_slice %9 {offsets = [56, 0], sizes = [8, 512], strides = [1, 1]} : vector<64x512xf32> to vector<8x512xf32>
    %236 = vector.extract_strided_slice %232 {offsets = [0, 128], sizes = [8, 512], strides = [1, 1]} : vector<8x640xf32> to vector<8x512xf32>
    %237 = arith.addf %235, %236 : vector<8x512xf32>
    %238 = vector.extract_strided_slice %237 {offsets = [0, 0], sizes = [8, 384], strides = [1, 1]} : vector<8x512xf32> to vector<8x384xf32>
    %239 = arith.negf %238 : vector<8x384xf32>
    %240 = math.exp %239 : vector<8x384xf32>
    %cst_126 = arith.constant 1.000000e+00 : f32
    %241 = vector.broadcast %cst_126 : f32 to vector<8x384xf32>
    %242 = arith.addf %241, %240 : vector<8x384xf32>
    %243 = arith.divf %241, %242 : vector<8x384xf32>
    %244 = vector.extract_strided_slice %237 {offsets = [0, 384], sizes = [8, 128], strides = [1, 1]} : vector<8x512xf32> to vector<8x128xf32>
    %245 = math.tanh %244 : vector<8x128xf32>
    %246 = vector.extract_strided_slice %243 {offsets = [0, 128], sizes = [8, 128], strides = [1, 1]} : vector<8x384xf32> to vector<8x128xf32>
    %c0_127 = arith.constant 0 : index
    %c0_128 = arith.constant 0 : index
    %247 = vector.load %arg10[%c0_127, %c0_128] : memref<8x128xf32, #tpu.memory_space<vmem>>, vector<8x128xf32>
    %248 = arith.mulf %246, %247 : vector<8x128xf32>
    %249 = vector.extract_strided_slice %243 {offsets = [0, 0], sizes = [8, 128], strides = [1, 1]} : vector<8x384xf32> to vector<8x128xf32>
    %250 = arith.mulf %249, %245 : vector<8x128xf32>
    %251 = arith.addf %248, %250 : vector<8x128xf32>
    %252 = vector.extract_strided_slice %243 {offsets = [0, 256], sizes = [8, 128], strides = [1, 1]} : vector<8x384xf32> to vector<8x128xf32>
    %253 = math.tanh %251 : vector<8x128xf32>
    %254 = arith.mulf %252, %253 : vector<8x128xf32>
    %c0_129 = arith.constant 0 : index
    %c0_130 = arith.constant 0 : index
    %255 = vector.load %arg10[%c0_129, %c0_130] : memref<8x128xf32, #tpu.memory_space<vmem>>, vector<8x128xf32>
    tpu.vector_store %arg10[%c0_129, %c0_130], %251 {strides = array<i32>} : memref<8x128xf32, #tpu.memory_space<vmem>>, vector<8x128xf32>,
    %c0_131 = arith.constant 0 : index
    %c0_132 = arith.constant 0 : index
    %256 = vector.load %arg9[%c0_131, %c0_132] : memref<8x256xf32, #tpu.memory_space<vmem>>, vector<8x128xf32>
    tpu.vector_store %arg9[%c0_131, %c0_132], %254 {strides = array<i32>} : memref<8x256xf32, #tpu.memory_space<vmem>>, vector<8x128xf32>,
    %c0_133 = arith.constant 0 : index
    %c128_134 = arith.constant 128 : index
    %257 = vector.load %arg9[%c0_133, %c128_134] : memref<8x256xf32, #tpu.memory_space<vmem>>, vector<8x128xf32>
    tpu.vector_store %arg9[%c0_133, %c128_134], %234 {strides = array<i32>} : memref<8x256xf32, #tpu.memory_space<vmem>>, vector<8x128xf32>,
    %c0_135 = arith.constant 0 : index
    %c7 = arith.constant 7 : index
    %c0_136 = arith.constant 0 : index
    %258 = vector.load %arg8[%c0_135, %c7, %c0_136] : memref<8x8x128xf32, #tpu.memory_space<vmem>>, vector<8x1x128xf32>
    %259 = vector.shape_cast %258 : vector<8x1x128xf32> to vector<8x128xf32>
    %260 = vector.shape_cast %254 : vector<8x128xf32> to vector<8x1x128xf32>
    tpu.vector_store %arg8[%c0_135, %c7, %c0_136], %260 {strides = array<i32>} : memref<8x8x128xf32, #tpu.memory_space<vmem>>, vector<8x1x128xf32>,
    return
  }
  func.func @transform_0(%arg0: i32, %arg1: i32) -> (i32, i32, i32) {
    %c0_i32 = arith.constant 0 : i32
    %c0_i32_0 = arith.constant 0 : i32
    return %arg1, %arg0, %c0_i32 : i32, i32, i32
  }
  func.func @transform_1(%arg0: i32, %arg1: i32) -> (i32, i32) {
    %c0_i32 = arith.constant 0 : i32
    %c0_i32_0 = arith.constant 0 : i32
    return %arg0, %c0_i32 : i32, i32
  }
  func.func @transform_2(%arg0: i32, %arg1: i32) -> (i32, i32) {
    %c0_i32 = arith.constant 0 : i32
    %c0_i32_0 = arith.constant 0 : i32
    %c0_i32_1 = arith.constant 0 : i32
    return %c0_i32, %c0_i32_0 : i32, i32
  }
  func.func @transform_3(%arg0: i32, %arg1: i32) -> (i32, i32) {
    %c0_i32 = arith.constant 0 : i32
    %c0_i32_0 = arith.constant 0 : i32
    %c0_i32_1 = arith.constant 0 : i32
    return %c0_i32, %c0_i32_0 : i32, i32
  }
  func.func @transform_4(%arg0: i32, %arg1: i32) -> (i32, i32) {
    %c0_i32 = arith.constant 0 : i32
    %c0_i32_0 = arith.constant 0 : i32
    %c0_i32_1 = arith.constant 0 : i32
    return %c0_i32, %c0_i32_0 : i32, i32
  }
  func.func @transform_5(%arg0: i32, %arg1: i32) -> (i32, i32) {
    %c0_i32 = arith.constant 0 : i32
    %c0_i32_0 = arith.constant 0 : i32
    %c0_i32_1 = arith.constant 0 : i32
    return %c0_i32, %c0_i32_0 : i32, i32
  }
  func.func @transform_6(%arg0: i32, %arg1: i32) -> (i32, i32, i32) {
    %c0_i32 = arith.constant 0 : i32
    %c0_i32_0 = arith.constant 0 : i32
    return %arg0, %arg1, %c0_i32 : i32, i32, i32
  }
}

</mosaic_0001>

<bundles_post_ra>
// kernel: tpu_custom_call.1
= control target key start
LH: loop header
LB: loop body
LE: loop exit
PB: predicated region body
PF: predicated region fallthrough
CT: control target
= control target key end

     0   :  { %s8755_s0 = inlined_call_operand.hbm [shape: f32[16,16,128], index: 0, kind: input, shape index: {}]   ;;  %s8756_s1 = inlined_call_operand.hbm [shape: f32[16,128], index: 1, kind: input, shape index: {}]   ;;  %s8757_s2 = inlined_call_operand.hbm [shape: f32[256,640], index: 2, kind: input, shape index: {}]   ;;  %s8758_s3 = inlined_call_operand.vmem [shape: f32[1,128], index: 3, kind: input, shape index: {}]   ;;  %s8759_s4 = inlined_call_operand.hbm [shape: f32[128,512], index: 4, kind: input, shape index: {}]   ;;  %s8760_s5 = inlined_call_operand.vmem [shape: f32[1,512], index: 5, kind: input, shape index: {}]   ;;  %s8761_s6 = inlined_call_operand.hbm [shape: f32[16,16,128], index: 6, kind: output, shape index: {}]  }
   0x1   :  { %9122 = sst [smem:[#allocation140_spill]] %s8757_s2 }
   0x2   :  { %9123 = sst [smem:[#allocation141_spill]] %s8758_s3 }
   0x3   :  { %9124 = sst [smem:[#allocation142_spill]] %s8759_s4 }
   0x4   :  { %9125 = sst [smem:[#allocation143_spill]] %s8760_s5 }
   0x5   :  { %9126 = sst [smem:[#allocation144_spill]] %s8761_s6 }
   0x6   :  { %11 = vsyncpa [#allocation5], 0 }
   0x7   :  { %13 = vsyncpa [#allocation5 + $0x1], 0 }
   0x8   :  { %14 = vsyncpa [#allocation8], 0 }
   0x9   :  { %16 = vsyncpa [#allocation8 + $0x1], 0 }
   0xa   :  { %17 = vsyncpa [#allocation11], 0 }
   0xb   :  { %18 = vsyncpa [#allocation6], 0 }
   0xc   :  { %20 = vsyncpa [#allocation6 + $0x1], 0  ;;  %s5552_s21 = smov 0   ;;  %s5554_s22 = smov 0  }
   0xd   :  { %s5556_s23 = smov 0   ;;  %s5558_s24 = smov 0  }
   0xe   :  { %s5560_s25 = smov 0   ;;  %s5562_s26 = smov 0  }
   0xf   :  { %s5564_s27 = smov 0   ;;  %s5566_s28 = smov 0  }
  0x10   :  { %s5568_s29 = smov 0   ;;  %s5570_s30 = smov 0  }
  0x11   :  { %s5572_s7 = smov 0  }
  0x12 LB: > { %9127 = sst [smem:[#allocation18_spill]] %s5469_s24  ;;  %s5608_s8 = sadd.s32 4294967295, %s5497_s7   ;;  %s5497_s7 = sphi %s5572_s7, %s26_s7   ;;  %s5493_s30 = sphi %s5570_s30, %s9911_s30   ;;  %s5489_s29 = sphi %s5568_s29, %s9910_s29   ;;  %s5485_s28 = sphi %s5566_s28, %s9909_s28   ;;  %s5481_s27 = sphi %s5564_s27, %s9908_s27   ;;  %s5477_s26 = sphi %s5562_s26, %s9907_s26   ;;  %s5473_s25 = sphi %s5560_s25, %s9906_s25   ;;  %s5469_s24 = sphi %s5558_s24, %s9905_s24   ;;  %s5465_s23 = sphi %s5556_s23, %s9904_s23   ;;  %s5461_s22 = sphi %s5554_s22, %s9903_s22   ;;  %s5457_s21 = sphi %s5552_s21, %s9902_s21  }
  0x13   : > { %9128 = sst [smem:[#allocation19_spill]] %s5485_s28  ;;  %s4622_s9 = sadd.s32 4294967294, %s5497_s7  }
  0x14   : > { %p60_p0 = scmp.ne.s32.totalorder %s5473_s25, %s5469_s24  ;;  %p8762_p1 = scmp.eq.s32.totalorder %s5608_s8, 0 }
  0x15   : > { %p202_p3 = scmp.eq.s32.totalorder %s4622_s9, 3  ;;  %p4623_p5 = scmp.ge.s32.totalorder %s5497_s7, 1 }
  0x16   : > { %p5617_p4 = por %p8762_p1, %p60_p0  ;;  %p209_p7 = scmp.lt.s32.totalorder %s5497_s7, 5 }
  0x17   : > { %p5622_p6 = por %p202_p3, %p60_p0  ;;  %s5499_s13 = smov [#allocation9]  }
  0x18   : > { %p5627_p8 = pnand %p4623_p5, %p209_p7  ;;  %s221_s14 = sshll.u32 %s5499_s13, 4  ;;  %s222_s14 = int_to_ptr.vmem [resolvable:$true] %s221_s14 }
  0x19   : > { %s9130_s11 = scalar_select %p5622_p6, 1, 0 }
  0x1a   : > { %p4999_p9 = pneg %p5627_p8  ;;  %s5500_s16 = smov [#allocation10]  }
  0x1b   : > { %9131 = sst [smem:[#allocation20_spill]] %s9130_s11  ;;  %s237_s17 = sshll.u32 %s5500_s16, 4  ;;  %s238_s17 = int_to_ptr.vmem [resolvable:$true] %s237_s17 }
  0x1c   : > { %p5635_p10 = pnand %p4999_p9, %p8762_p1  ;;  %s5268_s18 = scalar_lea.vmem %s222_s14, 20480 }
  0x1d   : > { %p5269_p12 = scmp.ne.s32.totalorder %s222_s14, %s5268_s18  ;;  %p5276_p3 = scmp.lt.s32.totalorder %s222_s14, %s222_s14 }
  0x1e   : > { %p5259_p11 = pneg %p5635_p10  ;;  %p5277_p5 = scmp.lt.s32.totalorder %s5268_s18, %s5268_s18 }
  0x20   : > { %p5271_p13 = pnand %p5269_p12, %p5259_p11  ;;  %p5278_p7 = por %p5277_p5, %p5276_p3 }
  0x22   : > { %p5272_p0 = pneg %p5271_p13 }
  0x24   : > { %p5279_p9 = pnand %p5278_p7, %p5272_p0 }
  0x26   : > { %5282 = shalt.err (!%p5279_p9)
}
  0x27   : > { %s5501_s19 = smov 640   ;;  %s5502_s20 = smov 40  }
  0x28   : > { %s9134_s2 = sld [smem:[#allocation140_spill]]  ;;  %s5294_s16 = scalar_lea.vmem %s238_s17, 8192 }
  0x29   : > { %p5295_p1 = scmp.ne.s32.totalorder %s238_s17, %s5294_s16  ;;  %p5302_p2 = scmp.lt.s32.totalorder %s238_s17, %s238_s17 }
  0x2a   : > { %p5303_p6 = scmp.lt.s32.totalorder %s5294_s16, %s5294_s16 }
  0x2b   : > { %p5297_p12 = pnand %p5295_p1, %p5259_p11 }
  0x2c   : > { %p5304_p3 = por %p5303_p6, %p5302_p2 }
  0x2d   : > { %p5298_p13 = pneg %p5297_p12 }
  0x2e   : > { %5002 = dma.hbm_to_vmem [thread:$0]  (!%p5635_p10), %s9134_s2, 20480, %s222_s14, [#allocation8], %s5501_s19, %s5501_s19, %s5502_s20  }
  0x2f   : > { %p5305_p0 = pnand %p5304_p3, %p5298_p13 }
  0x31   : > { %5308 = shalt.err (!%p5305_p0)
}
  0x32   : > { %s5503_s18 = smov 512   ;;  %s5504_s14 = smov 32  }
  0x33   : > { %s9135_s4 = sld [smem:[#allocation142_spill]]  ;;  %s35_s9 = sadd.s32 1, %s5489_s29 }
  0x34   : > { %s38_s13 = sadd.s32 1, %s5493_s30  ;;  %p36_p1 = scmp.ge.s32.totalorder %s35_s9, 2 }
  0x35   : > { %s47_s16 = sadd.s32 1, %s5477_s26  ;;  %p54_p2 = scmp.ne.s32.totalorder %s5477_s26, %s5473_s25 }
  0x36   : > { %p8771_p6 = scmp.eq.s32.totalorder %s5497_s7, 0  ;;  %s9913_s9 = smov (%p36_p1, %s35_s9), 0 }
  0x37   : > { %9136 = sst [smem:[#allocation21_spill]] %s9913_s9  ;;  %s9915_s13 = smov (!%p36_p1, %s38_s13), %s5493_s30 }
  0x38   : > { %s42_s2 = ssub.s32 %s5489_s29, %s9913_s9  ;;  %p5670_p11 = por %p8771_p6, %p54_p2 }
  0x39   : > { %5005 = dma.hbm_to_vmem [thread:$0]  (!%p5635_p10), %s9135_s4, 8192, %s238_s17, [#allocation11], %s5503_s18, %s5503_s18, %s5504_s14  }
  0x3a   : > { %p40_p10 = scmp.ge.s32.totalorder %s9915_s13, 2  ;;  %p9138_p5 = scmp.eq.s32.totalorder %s5608_s8, 3 }
  0x3b   : > { %p5019_p9 = scmp.lt.s32.totalorder %s5497_s7, 4  ;;  %s254_s18 = sand.u32 1, %s5477_s26  }
  0x3c   : > { %p5676_p7 = por %p9138_p5, %p54_p2  ;;  %s9917_s13 = smov (%p40_p10, %s9915_s13), 0 }
  0x3d   : > { %9141 = sst [smem:[#allocation23_spill]] %s9917_s13  ;;  %s4627_s14 = sshll.u32 %s254_s18, 6 }
  0x3e   : > { %s9139_s17 = scalar_select %p5676_p7, 1, 0 }
  0x3f   : > { %s5686_s19 = ssub.s32 %s5493_s30, %s9917_s13  ;;  %s4703_s4 = sshll.u32 %s5489_s29, 4 }
  0x40   : > { %9140 = sst [smem:[#allocation22_spill]] %s9139_s17  ;;  %s44_s20 = sor.u32 %s5686_s19, %s42_s2 }
  0x41   : > { %p45_p12 = scmp.eq.s32.totalorder %s44_s20, 0  ;;  %s264_s9 = sadd.s32 %s5493_s30, %s4703_s4 }
  0x42   : > { %s4630_s11 = sshll.u32 %s264_s9, 7  ;;  %s258_s24 = scalar_lea.vmem [#allocation4], %s4627_s14 }
  0x43   : > { %s267_s6 = sshll.u32 %s258_s24, 4  ;;  %s266_s3 = scalar_lea.hbm %s8755_s0, %s4630_s11  ;;  %s268_s6 = int_to_ptr.vmem [resolvable:$true] %s267_s6 }
  0x44   : > { %s5692_s28 = scalar_select %p45_p12, %s5477_s26, %s47_s16  }
  0x45   : > { %p5701_p13 = pnand %p5019_p9, %p5670_p11  ;;  %s255_s2 = scalar_lea.sflag [#allocation5], %s254_s18 }
  0x46   : > { %s5322_s4 = scalar_lea.vmem %s268_s6, 1024  ;;  %s5505_s24 = smov [#allocation4]  }
  0x47   : > { %p5311_p3 = pneg %p5701_p13  ;;  %p5323_p0 = scmp.ne.s32.totalorder %s268_s6, %s5322_s4 }
  0x48   : > { %s5327_s9 = sshll.u32 %s5505_s24, 4  ;;  %s5328_s9 = int_to_ptr.vmem [resolvable:$false] %s5327_s9 }
  0x49   : > { %p5325_p1 = pnand %p5323_p0, %p5311_p3  ;;  %s5329_s5 = scalar_lea.vmem %s5328_s9, 2048 }
  0x4a   : > { %p5330_p10 = scmp.lt.s32.totalorder %s268_s6, %s5328_s9  ;;  %p5331_p5 = scmp.lt.s32.totalorder %s5329_s5, %s5322_s4 }
  0x4b   : > { %p5326_p2 = pneg %p5325_p1 }
  0x4c   : > { %p5332_p12 = por %p5331_p5, %p5330_p10 }
  0x4e   : > { %p5333_p6 = pnand %p5332_p12, %p5326_p2 }
  0x50   : > { %5336 = shalt.err (!%p5333_p6)
}
  0x51   : > { %s5506_s11 = smov 256   ;;  %s5507_s16 = smov 128  }
  0x52   : > { %s5508_s15 = smov 8   ;;  %p71_p6 = scmp.eq.s32.totalorder %s5686_s19, 0 }
  0x53   : > { %5009 = dma.hbm_to_vmem [thread:$0]  (!%p5701_p13), %s266_s3, 1024, %s268_s6, %s255_s2, %s5506_s11, %s5507_s16, %s5508_s15  }
  0x54   : > { %s73_s17 = sadd.s32 1, %s5465_s23  ;;  %p80_p11 = scmp.ne.s32.totalorder %s5465_s23, %s5461_s22 }
  0x55   : > { %s5714_s18 = scalar_select %p71_p6, %s5465_s23, %s73_s17  }
  0x56   : > { %p9143_p3 = scmp.eq.s32.totalorder %s5497_s7, 0  ;;  %p86_p1 = scmp.ne.s32.totalorder %s5461_s22, %s5457_s21 }
  0x57   : > { %s277_s14 = sand.u32 1, %s5497_s7   ;;  %s279_s20 = sand.u32 1, %s5465_s23  }
  0x58   : > { %p82_p0 = por %p80_p11, %p9143_p3  ;;  %p9144_p2 = scmp.eq.s32.totalorder %s5608_s8, 0 }
  0x59   : > { %s4631_s24 = sshll.u32 %s279_s20, 3  ;;  %s4632_s9 = sshll.u32 %s5493_s30, 7 }
  0x5a   : > { %p5724_p10 = por %p86_p1, %p9144_p2  ;;  %s286_s3 = scalar_lea.hbm %s8756_s1, %s4632_s9 }
  0x5b   : > { %s281_s6 = scalar_lea.vmem [#allocation7], %s4631_s24  ;;  %p5734_p13 = pnand %p5019_p9, %p82_p0 }
  0x5c   : > { %s288_s19 = sshll.u32 %s281_s6, 4  ;;  %s278_s21 = scalar_lea.sflag [#allocation8], %s277_s14  ;;  %s289_s19 = int_to_ptr.vmem [resolvable:$true] %s288_s19 }
  0x5d   : > { %p5339_p5 = pneg %p5734_p13  ;;  %s5350_s11 = scalar_lea.vmem %s289_s19, 128 }
  0x5e   : > { %p5351_p12 = scmp.ne.s32.totalorder %s289_s19, %s5350_s11  ;;  %s5509_s16 = smov [#allocation7]  }
  0x5f   : > { %s5355_s15 = sshll.u32 %s5509_s16, 4  ;;  %s5356_s15 = int_to_ptr.vmem [resolvable:$false] %s5355_s15 }
  0x60   : > { %p5353_p6 = pnand %p5351_p12, %p5339_p5  ;;  %s5357_s17 = scalar_lea.vmem %s5356_s15, 256 }
  0x61   : > { %p5358_p3 = scmp.lt.s32.totalorder %s289_s19, %s5356_s15  ;;  %p5359_p1 = scmp.lt.s32.totalorder %s5357_s17, %s5350_s11 }
  0x62   : > { %p5354_p11 = pneg %p5353_p6 }
  0x63   : > { %p5360_p2 = por %p5359_p1, %p5358_p3 }
  0x65   : > { %p5361_p9 = pnand %p5360_p2, %p5354_p11 }
  0x67   : > { %5364 = shalt.err (!%p5361_p9)
}
  0x68   : > { %5012 = dma.hbm_to_vmem [thread:$0]  (!%p5734_p13), %s286_s3, 128, %s289_s19, %s278_s21  }
  0x69   : > { %297 = sbr.rel (%p5627_p8) target bundleno = 2402 (0x962), region = 44 }
  0x6e   : > { %s5745_s14 = sand.u32 1, %s5473_s25  }
  0x6f   : > { %s4634_s20 = sshll.u32 %s5745_s14, 6  ;;  %s300_s24 = scalar_lea.sflag [#allocation5], %s5745_s14 }
  0x70   : > { %s5749_s9 = scalar_lea.vmem [#allocation4], %s4634_s20 }
  0x71   : > { %5436 = dma.done.wait (%p5617_p4), %s300_s24, 1024  }
  0x72   : > { %5438 = vsyncadd (%p5617_p4), %s300_s24, 4294966272  ;;  %s308_s12 = sand.u32 1, %s5608_s8   ;;  %s310_s13 = sand.u32 1, %s5461_s22  }
  0x73   : > { %s4635_s5 = sshll.u32 %s310_s13, 3  ;;  %s309_s3 = scalar_lea.sflag [#allocation8], %s308_s12 }
  0x74   : > { %s312_s6 = scalar_lea.vmem [#allocation7], %s4635_s5 }
  0x75   : > { %5440 = dma.done.wait (%p5724_p10), %s309_s3, 128  }
  0x76   : > { %5442 = vsyncadd (%p5724_p10), %s309_s3, 4294967168  ;;  %p9147_p8 = scmp.eq.s32.totalorder %s5608_s8, 0 }
  0x78   : > { %5444 = dma.done.wait (%p9147_p8), [#allocation8], 20480   ;;  %p9148_p0 = pmov %p9147_p8 }
  0x7a   : > { %5446 = vsyncadd (%p9148_p0), [#allocation8], 4294946816  ;;  %p9149_p4 = pmov %p9148_p0 }
  0x7b   : > { %p9150_p13 = pmov %p9148_p0 }
  0x7c   : > { %5448 = dma.done.wait (%p9149_p4), [#allocation11], 8192  }
  0x7d   : > { %5450 = vsyncadd (%p9150_p13), [#allocation11], 4294959104  ;;  %s5769_s10 = scalar_lea.vmem [#allocation12], %s4634_s20  ;;  %p4639_p5 = scmp.ne.s32.totalorder %s5481_s27, 0 }
  0x7f   : > { %359 = sbr.rel (%p4639_p5) target bundleno = 135 (0x87), region = 64 }
  0x84   : > { %v360_v0 = vld [vmem:[%s312_s6] sm:$0xff]  ;;  %v5510_v1 = vmov 0.0  }
  0x85   : > { %361 = vst [vmem:[#allocation2] sm:$0xff] %v360_v0  ;;  %362 = vst [vmem:[#allocation2 + $0x8] sm:$0xff] %v5510_v1 }
  0x86   : > { %363 = vst [vmem:[#allocation3] sm:$0xff] %v5510_v1 }
  0x87 PF: > { %v433_v2 = vld [vmem:[#allocation10 + $0x1e8] sm:$0xff]  ;;  %v435_v3 = vld [vmem:[#allocation10 + $0x1f8] sm:$0xff]  ;;  %v432_v4 = vld [vmem:[#allocation10 + $0x1e0] sm:$0xff]  ;;  %s9320_s19 = sld [smem:[#allocation141_spill]]  ;;  %s4491_s6 = sshll.u32 %s5769_s10, 4  ;;  %s8690_s6 = int_to_ptr.vmem [resolvable:$true] %s4491_s6 }
  0x88   : > { %458 = vmatprep.subr.mxu0 %v433_v2  ;;  %571 = vmatprep.subr.mxu1 %v435_v3  ;;  %v434_v5 = vld [vmem:[#allocation10 + $0x1f0] sm:$0xff]  ;;  %v429_v6 = vld [vmem:[#allocation10 + $0x1c8] sm:$0xff]  ;;  %v431_v7 = vld [vmem:[#allocation10 + $0x1d8] sm:$0xff]  ;;  %s9322_s11 = sld [smem:[#allocation143_spill]]  ;;  %s5365_s16 = scalar_lea.vmem %s8690_s6, 1024 }
  0x89   : > { %459 = vmatpush1.msra.mxu0 %v432_v4  ;;  %572 = vmatpush1.msra.mxu1 %v434_v5  ;;  %v428_v8 = vld [vmem:[#allocation10 + $0x1c0] sm:$0xff]  ;;  %v430_v9 = vld [vmem:[#allocation10 + $0x1d0] sm:$0xff]  ;;  %v425_v10 = vld [vmem:[#allocation10 + $0x1a8] sm:$0xff]  ;;  %v8772_v4 = vmov 0.0   ;;  %s9894_s12 = sld [smem:[#allocation19_spill]]  ;;  %p5366_p10 = scmp.ne.s32.totalorder %s8690_s6, %s5365_s16 }
  0x8a   : > { %460 = vmatprep.subr.mxu0 %v429_v6  ;;  %573 = vmatprep.subr.mxu1 %v431_v7  ;;  %v427_v11 = vld [vmem:[#allocation10 + $0x1b8] sm:$0xff]  ;;  %v424_v12 = vld [vmem:[#allocation10 + $0x1a0] sm:$0xff]  ;;  %v426_v13 = vld [vmem:[#allocation10 + $0x1b0] sm:$0xff]  ;;  %s9896_s2 = sld [smem:[#allocation144_spill]]  ;;  %s5513_s15 = smov [#allocation12]  }
  0x8b   : > { %461 = vmatpush1.msra.mxu0 %v428_v8  ;;  %574 = vmatpush1.msra.mxu1 %v430_v9  ;;  %v421_v14 = vld [vmem:[#allocation10 + $0x188] sm:$0xff]  ;;  %v423_v15 = vld [vmem:[#allocation10 + $0x198] sm:$0xff]  ;;  %v420_v16 = vld [vmem:[#allocation10 + $0x180] sm:$0xff]  ;;  %p5367_p12 = pnand %p5366_p10, %p5676_p7  ;;  %s5369_s17 = sshll.u32 %s5513_s15, 4  ;;  %s5370_s17 = int_to_ptr.vmem [resolvable:$false] %s5369_s17 }
  0x8c   : > { %462 = vmatprep.subr.mxu0 %v425_v10  ;;  %575 = vmatprep.subr.mxu1 %v427_v11  ;;  %v422_v17 = vld [vmem:[#allocation10 + $0x190] sm:$0xff]  ;;  %v417_v18 = vld [vmem:[#allocation10 + $0x168] sm:$0xff]  ;;  %v419_v19 = vld [vmem:[#allocation10 + $0x178] sm:$0xff]  ;;  %s5371_s20 = scalar_lea.vmem %s5370_s17, 2048  ;;  %p5372_p11 = scmp.lt.s32.totalorder %s8690_s6, %s5370_s17 }
  0x8d   : > { %463 = vmatpush1.msra.mxu0 %v424_v12  ;;  %576 = vmatpush1.msra.mxu1 %v426_v13  ;;  %v416_v20 = vld [vmem:[#allocation10 + $0x160] sm:$0xff]  ;;  %v418_v21 = vld [vmem:[#allocation10 + $0x170] sm:$0xff]  ;;  %v413_v22 = vld [vmem:[#allocation10 + $0x148] sm:$0xff]  ;;  %p5368_p6 = pneg %p5367_p12  ;;  %p5373_p3 = scmp.lt.s32.totalorder %s5371_s20, %s5365_s16 }
  0x8e   : > { %464 = vmatprep.subr.mxu0 %v421_v14  ;;  %577 = vmatprep.subr.mxu1 %v423_v15  ;;  %v415_v23 = vld [vmem:[#allocation10 + $0x158] sm:$0xff]  ;;  %v412_v24 = vld [vmem:[#allocation10 + $0x140] sm:$0xff]  ;;  %v414_v25 = vld [vmem:[#allocation10 + $0x150] sm:$0xff] }
  0x8f   : > { %465 = vmatpush1.msra.mxu0 %v420_v16  ;;  %578 = vmatpush1.msra.mxu1 %v422_v17  ;;  %v409_v26 = vld [vmem:[#allocation10 + $0x128] sm:$0xff]  ;;  %v411_v27 = vld [vmem:[#allocation10 + $0x138] sm:$0xff]  ;;  %v408_v28 = vld [vmem:[#allocation10 + $0x120] sm:$0xff]  ;;  %s4704_s13 = sshll.u32 %s9894_s12, 4  ;;  %p5374_p1 = por %p5373_p3, %p5372_p11 }
  0x90   : > { %466 = vmatprep.subr.mxu0 %v417_v18  ;;  %579 = vmatprep.subr.mxu1 %v419_v19  ;;  %v410_v29 = vld [vmem:[#allocation10 + $0x130] sm:$0xff]  ;;  %v405_v30 = vld [vmem:[#allocation10 + $0x108] sm:$0xff]  ;;  %v407_v31 = vld [vmem:[#allocation10 + $0x118] sm:$0xff]  ;;  %s4488_s5 = sadd.s32 %s5481_s27, %s4704_s13 }
  0x91   : > { %467 = vmatpush1.msra.mxu0 %v416_v20  ;;  %580 = vmatpush1.msra.mxu1 %v418_v21  ;;  %v404_v32 = vld [vmem:[#allocation10 + $0x100] sm:$0xff]  ;;  %v406_v33 = vld [vmem:[#allocation10 + $0x110] sm:$0xff]  ;;  %v401_v34 = vld [vmem:[#allocation10 + $0xe8] sm:$0xff]  ;;  %s4700_s3 = sshll.u32 %s4488_s5, 7  ;;  %p5375_p2 = pnand %p5374_p1, %p5368_p6 }
  0x92   : > { %468 = vmatprep.subr.mxu0 %v413_v22  ;;  %581 = vmatprep.subr.mxu1 %v415_v23  ;;  %v403_v35 = vld [vmem:[#allocation10 + $0xf8] sm:$0xff]  ;;  %v400_v36 = vld [vmem:[#allocation10 + $0xe0] sm:$0xff]  ;;  %v402_v37 = vld [vmem:[#allocation10 + $0xf0] sm:$0xff]  ;;  %s8688_s21 = scalar_lea.hbm %s9896_s2, %s4700_s3 }
  0x93   : > { %469 = vmatpush1.msra.mxu0 %v412_v24  ;;  %582 = vmatpush1.msra.mxu1 %v414_v25  ;;  %v397_v38 = vld [vmem:[#allocation10 + $0xc8] sm:$0xff]  ;;  %v399_v39 = vld [vmem:[#allocation10 + $0xd8] sm:$0xff]  ;;  %v396_v40 = vld [vmem:[#allocation10 + $0xc0] sm:$0xff] }
  0x94   : > { %470 = vmatprep.subr.mxu0 %v409_v26  ;;  %583 = vmatprep.subr.mxu1 %v411_v27  ;;  %v398_v41 = vld [vmem:[#allocation10 + $0xd0] sm:$0xff]  ;;  %v393_v42 = vld [vmem:[#allocation10 + $0xa8] sm:$0xff]  ;;  %v395_v43 = vld [vmem:[#allocation10 + $0xb8] sm:$0xff] }
  0x95   : > { %471 = vmatpush1.msra.mxu0 %v408_v28  ;;  %584 = vmatpush1.msra.mxu1 %v410_v29  ;;  %v392_v44 = vld [vmem:[#allocation10 + $0xa0] sm:$0xff]  ;;  %v394_v45 = vld [vmem:[#allocation10 + $0xb0] sm:$0xff]  ;;  %v389_v46 = vld [vmem:[#allocation10 + $0x88] sm:$0xff] }
  0x96   : > { %472 = vmatprep.subr.mxu0 %v405_v30  ;;  %585 = vmatprep.subr.mxu1 %v407_v31  ;;  %v391_v47 = vld [vmem:[#allocation10 + $0x98] sm:$0xff]  ;;  %v388_v48 = vld [vmem:[#allocation10 + $0x80] sm:$0xff]  ;;  %v390_v49 = vld [vmem:[#allocation10 + $0x90] sm:$0xff] }
  0x97   : > { %473 = vmatpush1.msra.mxu0 %v404_v32  ;;  %586 = vmatpush1.msra.mxu1 %v406_v33  ;;  %v385_v50 = vld [vmem:[#allocation10 + $0x68] sm:$0xff]  ;;  %v387_v51 = vld [vmem:[#allocation10 + $0x78] sm:$0xff]  ;;  %v384_v52 = vld [vmem:[#allocation10 + $0x60] sm:$0xff] }
  0x98   : > { %474 = vmatprep.subr.mxu0 %v401_v34  ;;  %587 = vmatprep.subr.mxu1 %v403_v35  ;;  %v386_v53 = vld [vmem:[#allocation10 + $0x70] sm:$0xff]  ;;  %v381_v54 = vld [vmem:[#allocation10 + $0x48] sm:$0xff]  ;;  %v383_v55 = vld [vmem:[#allocation10 + $0x58] sm:$0xff] }
  0x99   : > { %475 = vmatpush1.msra.mxu0 %v400_v36  ;;  %588 = vmatpush1.msra.mxu1 %v402_v37  ;;  %v380_v56 = vld [vmem:[#allocation10 + $0x40] sm:$0xff]  ;;  %v382_v57 = vld [vmem:[#allocation10 + $0x50] sm:$0xff]  ;;  %v377_v58 = vld [vmem:[#allocation10 + $0x28] sm:$0xff] }
  0x9a   : > { %476 = vmatprep.subr.mxu0 %v397_v38  ;;  %589 = vmatprep.subr.mxu1 %v399_v39  ;;  %v379_v59 = vld [vmem:[#allocation10 + $0x38] sm:$0xff]  ;;  %v376_v60 = vld [vmem:[#allocation10 + $0x20] sm:$0xff]  ;;  %v378_v61 = vld [vmem:[#allocation10 + $0x30] sm:$0xff] }
  0x9b   : > { %477 = vmatpush1.msra.mxu0 %v396_v40  ;;  %590 = vmatpush1.msra.mxu1 %v398_v41  ;;  %v373_v62 = vld [vmem:[#allocation10 + $0x8] sm:$0xff]  ;;  %v375_v63 = vld [vmem:[#allocation10 + $0x18] sm:$0xff]  ;;  %v372_v0 = vld [vmem:[#allocation10] sm:$0xff] }
  0x9c   : > { %478 = vmatprep.subr.mxu0 %v393_v42  ;;  %591 = vmatprep.subr.mxu1 %v395_v43  ;;  %v374_v1 = vld [vmem:[#allocation10 + $0x10] sm:$0xff]  ;;  %v5773_v3 = vld [vmem:[#allocation9 + $0x260] sm:$0xff]  ;;  %v5778_v6 = vld [vmem:[#allocation9 + $0x258] sm:$0xff] }
  0x9d   : > { %479 = vmatpush1.msra.mxu0 %v392_v44  ;;  %592 = vmatpush1.msra.mxu1 %v394_v45  ;;  %v364_v2 = vld [vmem:[%s5749_s9] sm:$0xff]  ;;  %v5780_v7 = vld [vmem:[#allocation9 + $0x268] sm:$0xff]  ;;  %v5784_v8 = vld [vmem:[#allocation9 + $0x238] sm:$0xff] }
  0x9e   : > { %480 = vmatprep.subr.mxu0 %v389_v46  ;;  %593 = vmatprep.subr.mxu1 %v391_v47  ;;  %v5776_v5 = vld [vmem:[#allocation9 + $0x270] sm:$0xff]  ;;  %v5786_v9 = vld [vmem:[#allocation9 + $0x248] sm:$0xff]  ;;  %v5791_v11 = vld [vmem:[#allocation9 + $0x240] sm:$0xff] }
  0x9f   : > { %481 = vmatpush1.msra.mxu0 %v388_v48  ;;  %594 = vmatpush1.msra.mxu1 %v390_v49  ;;  %v5789_v10 = vld [vmem:[#allocation9 + $0x230] sm:$0xff]  ;;  %v5797_v13 = vld [vmem:[#allocation9 + $0x220] sm:$0xff]  ;;  %v5801_v14 = vld [vmem:[#allocation9 + $0x208] sm:$0xff] }
  0xa0   : > { %482 = vmatprep.subr.mxu0 %v385_v50  ;;  %595 = vmatprep.subr.mxu1 %v387_v51  ;;  %v5795_v12 = vld [vmem:[#allocation9 + $0x210] sm:$0xff]  ;;  %v5803_v15 = vld [vmem:[#allocation9 + $0x218] sm:$0xff]  ;;  %v5807_v16 = vld [vmem:[#allocation9 + $0x1e8] sm:$0xff] }
  0xa1   : > { %483 = vmatpush1.msra.mxu0 %v384_v52  ;;  %596 = vmatpush1.msra.mxu1 %v386_v53  ;;  %v5809_v17 = vld [vmem:[#allocation9 + $0x1f8] sm:$0xff]  ;;  %v5813_v18 = vld [vmem:[#allocation9 + $0x1e0] sm:$0xff]  ;;  %v5815_v19 = vld [vmem:[#allocation9 + $0x1f0] sm:$0xff] }
  0xa2   : > { %484 = vmatprep.subr.mxu0 %v381_v54  ;;  %597 = vmatprep.subr.mxu1 %v383_v55  ;;  %v5819_v20 = vld [vmem:[#allocation9 + $0x1c0] sm:$0xff]  ;;  %v5821_v21 = vld [vmem:[#allocation9 + $0x1d0] sm:$0xff]  ;;  %v5825_v22 = vld [vmem:[#allocation9 + $0x1b8] sm:$0xff] }
  0xa3   : > { %485 = vmatpush1.msra.mxu0 %v380_v56  ;;  %598 = vmatpush1.msra.mxu1 %v382_v57  ;;  %v5827_v23 = vld [vmem:[#allocation9 + $0x1c8] sm:$0xff]  ;;  %v5831_v24 = vld [vmem:[#allocation9 + $0x198] sm:$0xff]  ;;  %v5837_v26 = vld [vmem:[#allocation9 + $0x190] sm:$0xff] }
  0xa4   : > { %486 = vmatprep.subr.mxu0 %v377_v58  ;;  %599 = vmatprep.subr.mxu1 %v379_v59  ;;  %v5833_v25 = vld [vmem:[#allocation9 + $0x1a8] sm:$0xff]  ;;  %v5839_v27 = vld [vmem:[#allocation9 + $0x1a0] sm:$0xff]  ;;  %v5843_v28 = vld [vmem:[#allocation9 + $0x170] sm:$0xff] }
  0xa5   : > { %487 = vmatpush1.msra.mxu0 %v376_v60  ;;  %600 = vmatpush1.msra.mxu1 %v378_v61  ;;  %v5845_v29 = vld [vmem:[#allocation9 + $0x180] sm:$0xff]  ;;  %v5849_v30 = vld [vmem:[#allocation9 + $0x168] sm:$0xff]  ;;  %v5851_v31 = vld [vmem:[#allocation9 + $0x178] sm:$0xff] }
  0xa6   : > { %488 = vmatprep.subr.mxu0 %v373_v62  ;;  %601 = vmatprep.subr.mxu1 %v375_v63  ;;  %9151 = vst [vmem:[#allocation24_spill] sm:$0xff] %v5845_v29  ;;  %9152 = vst [vmem:[#allocation25_spill] sm:$0xff] %v5851_v31  ;;  %v5855_v32 = vld [vmem:[#allocation9 + $0x148] sm:$0xff]  ;;  %v5857_v33 = vld [vmem:[#allocation9 + $0x158] sm:$0xff] }
  0xa7   : > { %489 = vmatpush1.msra.mxu0 %v372_v0  ;;  %522 = vmatprep.mubr.f32.mxu0 %v8772_v4  ;;  %9153 = vst [vmem:[#allocation26_spill] sm:$0xff] %v5857_v33  ;;  %v5861_v34 = vld [vmem:[#allocation9 + $0x140] sm:$0xff]  ;;  %v5863_v35 = vld [vmem:[#allocation9 + $0x150] sm:$0xff]  ;;  %v5873_v38 = vld [vmem:[#allocation9 + $0x118] sm:$0xff] }
  0xa8   : > { %602 = vmatpush1.msra.mxu1 %v374_v1  ;;  %523 = vmatmul.mubr.f32.vlgmr.msra.gmra.mxu0 %v364_v2  ;;  %9154 = vst [vmem:[#allocation27_spill] sm:$0xff] %v5863_v35  ;;  %v5867_v36 = vld [vmem:[#allocation9 + $0x120] sm:$0xff]  ;;  %v5869_v37 = vld [vmem:[#allocation9 + $0x130] sm:$0xff]  ;;  %v5875_v39 = vld [vmem:[#allocation9 + $0x128] sm:$0xff] }
  0xa9   : > { %635 = vmatprep.mubr.f32.mxu1 %v8772_v4  ;;  %853 = vmatprep.subr.mxu0 %v5773_v3  ;;  %9155 = vst [vmem:[#allocation28_spill] sm:$0xff] %v5869_v37  ;;  %9156 = vst [vmem:[#allocation29_spill] sm:$0xff] %v5875_v39  ;;  %v5879_v40 = vld [vmem:[#allocation9 + $0xf8] sm:$0xff]  ;;  %v5881_v41 = vld [vmem:[#allocation9 + $0x108] sm:$0xff] }
  0xaa   : > { %924 = vmatprep.subr.mxu1 %v5776_v5  ;;  %636 = vmatmul.mubr.f32.vlgmr.msra.gmra.mxu1 %v364_v2  ;;  %9157 = vst [vmem:[#allocation30_spill] sm:$0xff] %v5881_v41  ;;  %v5885_v42 = vld [vmem:[#allocation9 + $0xf0] sm:$0xff]  ;;  %v5887_v43 = vld [vmem:[#allocation9 + $0x100] sm:$0xff]  ;;  %v5897_v46 = vld [vmem:[#allocation9 + $0xc8] sm:$0xff] }
  0xab   : > { %854 = vmatpush1.msra.mxu0 %v5778_v6  ;;  %925 = vmatpush1.msra.mxu1 %v5780_v7  ;;  %9158 = vst [vmem:[#allocation31_spill] sm:$0xff] %v5887_v43  ;;  %v5891_v44 = vld [vmem:[#allocation9 + $0xd0] sm:$0xff]  ;;  %v5893_v45 = vld [vmem:[#allocation9 + $0xe0] sm:$0xff]  ;;  %v5899_v47 = vld [vmem:[#allocation9 + $0xd8] sm:$0xff] }
  0xac   : > { %855 = vmatprep.subr.mxu0 %v5784_v8  ;;  %926 = vmatprep.subr.mxu1 %v5786_v9  ;;  %9159 = vst [vmem:[#allocation32_spill] sm:$0xff] %v5893_v45  ;;  %9160 = vst [vmem:[#allocation33_spill] sm:$0xff] %v5899_v47  ;;  %v5903_v48 = vld [vmem:[#allocation9 + $0xa8] sm:$0xff]  ;;  %v5905_v49 = vld [vmem:[#allocation9 + $0xb8] sm:$0xff] }
  0xad   : > { %856 = vmatpush1.msra.mxu0 %v5789_v10  ;;  %927 = vmatpush1.msra.mxu1 %v5791_v11  ;;  %9161 = vst [vmem:[#allocation34_spill] sm:$0xff] %v5905_v49  ;;  %v5909_v50 = vld [vmem:[#allocation9 + $0xa0] sm:$0xff]  ;;  %v5911_v51 = vld [vmem:[#allocation9 + $0xb0] sm:$0xff]  ;;  %v5921_v54 = vld [vmem:[#allocation9 + $0x78] sm:$0xff] }
  0xae   : > { %857 = vmatprep.subr.mxu0 %v5795_v12  ;;  %928 = vmatprep.subr.mxu1 %v5797_v13  ;;  %9162 = vst [vmem:[#allocation35_spill] sm:$0xff] %v5911_v51  ;;  %v5915_v52 = vld [vmem:[#allocation9 + $0x80] sm:$0xff]  ;;  %v5917_v53 = vld [vmem:[#allocation9 + $0x90] sm:$0xff]  ;;  %v5923_v55 = vld [vmem:[#allocation9 + $0x88] sm:$0xff] }
  0xaf   : > { %858 = vmatpush1.msra.mxu0 %v5801_v14  ;;  %929 = vmatpush1.msra.mxu1 %v5803_v15  ;;  %9163 = vst [vmem:[#allocation36_spill] sm:$0xff] %v5917_v53  ;;  %9164 = vst [vmem:[#allocation37_spill] sm:$0xff] %v5923_v55  ;;  %v5927_v56 = vld [vmem:[#allocation9 + $0x58] sm:$0xff]  ;;  %v5929_v57 = vld [vmem:[#allocation9 + $0x68] sm:$0xff] }
  0xb0   : > { %859 = vmatprep.subr.mxu0 %v5807_v16  ;;  %930 = vmatprep.subr.mxu1 %v5809_v17  ;;  %9165 = vst [vmem:[#allocation38_spill] sm:$0xff] %v5929_v57  ;;  %v5933_v58 = vld [vmem:[#allocation9 + $0x50] sm:$0xff]  ;;  %v5935_v59 = vld [vmem:[#allocation9 + $0x60] sm:$0xff]  ;;  %v5945_v62 = vld [vmem:[#allocation9 + $0x28] sm:$0xff] }
  0xb1   : > { %860 = vmatpush1.msra.mxu0 %v5813_v18  ;;  %931 = vmatpush1.msra.mxu1 %v5815_v19  ;;  %9166 = vst [vmem:[#allocation39_spill] sm:$0xff] %v5935_v59  ;;  %v5939_v60 = vld [vmem:[#allocation9 + $0x30] sm:$0xff]  ;;  %v5941_v61 = vld [vmem:[#allocation9 + $0x40] sm:$0xff]  ;;  %v5947_v63 = vld [vmem:[#allocation9 + $0x38] sm:$0xff] }
  0xb2   : > { %861 = vmatprep.subr.mxu0 %v5819_v20  ;;  %932 = vmatprep.subr.mxu1 %v5821_v21  ;;  %9167 = vst [vmem:[#allocation40_spill] sm:$0xff] %v5941_v61  ;;  %9168 = vst [vmem:[#allocation41_spill] sm:$0xff] %v5947_v63  ;;  %v5951_v0 = vld [vmem:[#allocation9 + $0x8] sm:$0xff]  ;;  %v5953_v1 = vld [vmem:[#allocation9 + $0x18] sm:$0xff] }
  0xb3   : > { %862 = vmatpush1.msra.mxu0 %v5825_v22  ;;  %933 = vmatpush1.msra.mxu1 %v5827_v23  ;;  %9169 = vst [vmem:[#allocation42_spill] sm:$0xff] %v5953_v1  ;;  %v5957_v2 = vld [vmem:[#allocation9] sm:$0xff]  ;;  %v5959_v4 = vld [vmem:[#allocation9 + $0x10] sm:$0xff] }
  0xb4   : > { %863 = vmatprep.subr.mxu0 %v5831_v24  ;;  %934 = vmatprep.subr.mxu1 %v5833_v25  ;;  %9170 = vst [vmem:[#allocation43_spill] sm:$0xff] %v5959_v4 }
  0xb5   : > { %864 = vmatpush1.msra.mxu0 %v5837_v26  ;;  %935 = vmatpush1.msra.mxu1 %v5839_v27 }
  0xb6   : > { %865 = vmatprep.subr.mxu0 %v5843_v28  ;;  %936 = vmatprep.subr.mxu1 %v5845_v29  ;;  %v6044_v29 = vld [vmem:[#allocation9 + $0x3f0] sm:$0xff] }
  0xb7   : > { %866 = vmatpush1.msra.mxu0 %v5849_v30  ;;  %937 = vmatpush1.msra.mxu1 %v5851_v31  ;;  %v6038_v31 = vld [vmem:[#allocation9 + $0x410] sm:$0xff]  ;;  %9187 = vst [vmem:[#allocation59_spill] sm:$0xff] %v6044_v29 }
  0xb8   : > { %867 = vmatprep.subr.mxu0 %v5855_v32  ;;  %938 = vmatprep.subr.mxu1 %v5857_v33  ;;  %v367_v33 = vld [vmem:[%s5749_s9 + $0x18] sm:$0xff]  ;;  %9185 = vst [vmem:[#allocation57_spill] sm:$0xff] %v6038_v31 }
  0xb9   : > { %868 = vmatpush1.msra.mxu0 %v5861_v34  ;;  %939 = vmatpush1.msra.mxu1 %v5863_v35  ;;  %v6030_v35 = vld [vmem:[#allocation9 + $0x418] sm:$0xff] }
  0xba   : > { %869 = vmatprep.subr.mxu0 %v5867_v36  ;;  %940 = vmatprep.subr.mxu1 %v5869_v37  ;;  %v6017_v37 = vld [vmem:[#allocation9 + $0x440] sm:$0xff]  ;;  %9183 = vst [vmem:[#allocation55_spill] sm:$0xff] %v6030_v35 }
  0xbb   : > { %870 = vmatpush1.msra.mxu0 %v5873_v38  ;;  %941 = vmatpush1.msra.mxu1 %v5875_v39  ;;  %v6011_v39 = vld [vmem:[#allocation9 + $0x460] sm:$0xff] }
  0xbc   : > { %871 = vmatprep.subr.mxu0 %v5879_v40  ;;  %942 = vmatprep.subr.mxu1 %v5881_v41  ;;  %v366_v41 = vld [vmem:[%s5749_s9 + $0x10] sm:$0xff] }
  0xbd   : > { %872 = vmatpush1.msra.mxu0 %v5885_v42  ;;  %943 = vmatpush1.msra.mxu1 %v5887_v43  ;;  %v6003_v43 = vld [vmem:[#allocation9 + $0x468] sm:$0xff] }
  0xbe   : > { %873 = vmatprep.subr.mxu0 %v5891_v44  ;;  %944 = vmatprep.subr.mxu1 %v5893_v45  ;;  %v5999_v45 = vld [vmem:[#allocation9 + $0x498] sm:$0xff] }
  0xbf   : > { %874 = vmatpush1.msra.mxu0 %v5897_v46  ;;  %945 = vmatpush1.msra.mxu1 %v5899_v47  ;;  %v5990_v47 = vld [vmem:[#allocation9 + $0x490] sm:$0xff]  ;;  %9177 = vst [vmem:[#allocation49_spill] sm:$0xff] %v5999_v45 }
  0xc0   : > { %875 = vmatprep.subr.mxu0 %v5903_v48  ;;  %946 = vmatprep.subr.mxu1 %v5905_v49  ;;  %v9174_v49 = vmov 0.0  }
  0xc1   : > { %876 = vmatpush1.msra.mxu0 %v5909_v50  ;;  %947 = vmatpush1.msra.mxu1 %v5911_v51  ;;  %v365_v51 = vld [vmem:[%s5749_s9 + $0x8] sm:$0xff] }
  0xc2   : > { %877 = vmatprep.subr.mxu0 %v5915_v52  ;;  %948 = vmatprep.subr.mxu1 %v5917_v53  ;;  %v5975_v53 = vld [vmem:[#allocation9 + $0x4b8] sm:$0xff] }
  0xc3   : > { %878 = vmatpush1.msra.mxu0 %v5921_v54  ;;  %949 = vmatpush1.msra.mxu1 %v5923_v55  ;;  %v5969_v55 = vld [vmem:[#allocation9 + $0x4d8] sm:$0xff] }
  0xc4   : > { %879 = vmatprep.subr.mxu0 %v5927_v56  ;;  %950 = vmatprep.subr.mxu1 %v5929_v57  ;;  %v5963_v57 = vld [vmem:[#allocation9 + $0x4e0] sm:$0xff] }
  0xc5   : > { %880 = vmatpush1.msra.mxu0 %v5933_v58  ;;  %951 = vmatpush1.msra.mxu1 %v5935_v59  ;;  %v5965_v59 = vld [vmem:[#allocation9 + $0x4f0] sm:$0xff] }
  0xc6   : > { %881 = vmatprep.subr.mxu0 %v5939_v60  ;;  %952 = vmatprep.subr.mxu1 %v5941_v61  ;;  %9171 = vst [vmem:[#allocation44_spill] sm:$0xff] %v5965_v59  ;;  %v5971_v61 = vld [vmem:[#allocation9 + $0x4e8] sm:$0xff] }
  0xc7   : > { %882 = vmatpush1.msra.mxu0 %v5945_v62  ;;  %953 = vmatpush1.msra.mxu1 %v5947_v63  ;;  %9172 = vst [vmem:[#allocation45_spill] sm:$0xff] %v5971_v61  ;;  %v5979_v63 = vld [vmem:[#allocation9 + $0x4c8] sm:$0xff] }
  0xc8   : > { %883 = vmatprep.subr.mxu0 %v5951_v0  ;;  %954 = vmatprep.subr.mxu1 %v5953_v1  ;;  %9173 = vst [vmem:[#allocation46_spill] sm:$0xff] %v5979_v63  ;;  %v5984_v1 = vld [vmem:[#allocation9 + $0x4b0] sm:$0xff] }
  0xc9   : > { %884 = vmatpush1.msra.mxu0 %v5957_v2  ;;  %955 = vmatpush1.msra.mxu1 %v5959_v4  ;;  %v5988_v4 = vld [vmem:[#allocation9 + $0x4c0] sm:$0xff] }
  0xca   : > { %885 = vmatprep.subr.mxu0 %v5963_v57  ;;  %956 = vmatprep.subr.mxu1 %v5965_v59  ;;  %9175 = vst [vmem:[#allocation47_spill] sm:$0xff] %v5988_v4  ;;  %v5993_v59 = vld [vmem:[#allocation9 + $0x4a0] sm:$0xff] }
  0xcb   : > { %886 = vmatpush2.msra.mxu0 %v5969_v55  ;;  %957 = vmatpush2.msra.mxu1 %v5971_v61  ;;  %9176 = vst [vmem:[#allocation48_spill] sm:$0xff] %v5993_v59  ;;  %v5997_v61 = vld [vmem:[#allocation9 + $0x488] sm:$0xff] }
  0xcc   : > { %528 = vmatprep.mubr.f32.mxu0 %v9174_v49  ;;  %887 = vmatprep.subr.mxu0 %v5975_v53 }
  0xcd   : > { %958 = vmatprep.subr.mxu1 %v5979_v63  ;;  %529 = vmatmul.mubr.f32.gmra.mxu0 %v365_v51  ;;  %v6006_v63 = vld [vmem:[#allocation9 + $0x478] sm:$0xff] }
  0xce   : > { %641 = vmatprep.mubr.f32.mxu1 %v9174_v49  ;;  %888 = vmatpush2.msra.mxu0 %v5984_v1  ;;  %9178 = vst [vmem:[#allocation50_spill] sm:$0xff] %v6006_v63 }
  0xcf   : > { %959 = vmatpush2.msra.mxu1 %v5988_v4  ;;  %889 = vmatprep.subr.mxu0 %v5990_v47  ;;  %v6015_v4 = vld [vmem:[#allocation9 + $0x470] sm:$0xff] }
  0xd0   : > { %642 = vmatmul.mubr.f32.gmra.mxu1 %v365_v51  ;;  %960 = vmatprep.subr.mxu1 %v5993_v59  ;;  %9179 = vst [vmem:[#allocation51_spill] sm:$0xff] %v6015_v4  ;;  %v6020_v51 = vld [vmem:[#allocation9 + $0x450] sm:$0xff]  ;;  %v6026_v59 = vld [vmem:[#allocation9 + $0x448] sm:$0xff] }
  0xd1   : > { %890 = vmatpush2.msra.mxu0 %v5997_v61  ;;  %961 = vmatpush2.msra.mxu1 %v5999_v45  ;;  %9180 = vst [vmem:[#allocation52_spill] sm:$0xff] %v6020_v51  ;;  %v6024_v45 = vld [vmem:[#allocation9 + $0x438] sm:$0xff]  ;;  %9182 = vst [vmem:[#allocation54_spill] sm:$0xff] %v6026_v59 }
  0xd2   : > { %534 = vmatprep.mubr.f32.mxu0 %v9174_v49  ;;  %891 = vmatprep.subr.mxu0 %v6003_v43  ;;  %9181 = vst [vmem:[#allocation53_spill] sm:$0xff] %v6024_v45 }
  0xd3   : > { %962 = vmatprep.subr.mxu1 %v6006_v63  ;;  %535 = vmatmul.mubr.f32.gmra.mxu0 %v366_v41  ;;  %v6033_v63 = vld [vmem:[#allocation9 + $0x428] sm:$0xff] }
  0xd4   : > { %647 = vmatprep.mubr.f32.mxu1 %v9174_v49  ;;  %892 = vmatpush2.msra.mxu0 %v6011_v39  ;;  %9184 = vst [vmem:[#allocation56_spill] sm:$0xff] %v6033_v63 }
  0xd5   : > { %963 = vmatpush2.msra.mxu1 %v6015_v4  ;;  %893 = vmatprep.subr.mxu0 %v6017_v37  ;;  %v6042_v4 = vld [vmem:[#allocation9 + $0x420] sm:$0xff] }
  0xd6   : > { %648 = vmatmul.mubr.f32.gmra.mxu1 %v366_v41  ;;  %964 = vmatprep.subr.mxu1 %v6020_v51  ;;  %9186 = vst [vmem:[#allocation58_spill] sm:$0xff] %v6042_v4  ;;  %v6047_v41 = vld [vmem:[#allocation9 + $0x400] sm:$0xff]  ;;  %v6053_v51 = vld [vmem:[#allocation9 + $0x3f8] sm:$0xff] }
  0xd7   : > { %894 = vmatpush2.msra.mxu0 %v6024_v45  ;;  %965 = vmatpush2.msra.mxu1 %v6026_v59  ;;  %9188 = vst [vmem:[#allocation60_spill] sm:$0xff] %v6047_v41  ;;  %v6051_v59 = vld [vmem:[#allocation9 + $0x3e8] sm:$0xff]  ;;  %9190 = vst [vmem:[#allocation62_spill] sm:$0xff] %v6053_v51  ;;  %v368_v45 = vld [vmem:[%s5749_s9 + $0x20] sm:$0xff] }
  0xd8   : > { %540 = vmatprep.mubr.f32.mxu0 %v9174_v49  ;;  %895 = vmatprep.subr.mxu0 %v6030_v35  ;;  %9189 = vst [vmem:[#allocation61_spill] sm:$0xff] %v6051_v59  ;;  %v6057_v35 = vld [vmem:[#allocation9 + $0x3c8] sm:$0xff] }
  0xd9   : > { %966 = vmatprep.subr.mxu1 %v6033_v63  ;;  %541 = vmatmul.mubr.f32.gmra.mxu0 %v367_v33  ;;  %9191 = vst [vmem:[#allocation63_spill] sm:$0xff] %v6057_v35  ;;  %v6060_v63 = vld [vmem:[#allocation9 + $0x3d8] sm:$0xff] }
  0xda   : > { %653 = vmatprep.mubr.f32.mxu1 %v9174_v49  ;;  %896 = vmatpush2.msra.mxu0 %v6038_v31  ;;  %9192 = vst [vmem:[#allocation64_spill] sm:$0xff] %v6060_v63  ;;  %v6065_v31 = vld [vmem:[#allocation9 + $0x3c0] sm:$0xff] }
  0xdb   : > { %967 = vmatpush2.msra.mxu1 %v6042_v4  ;;  %897 = vmatprep.subr.mxu0 %v6044_v29  ;;  %9193 = vst [vmem:[#allocation65_spill] sm:$0xff] %v6065_v31  ;;  %v6069_v4 = vld [vmem:[#allocation9 + $0x3d0] sm:$0xff]  ;;  %v6071_v29 = vld [vmem:[#allocation9 + $0x3a0] sm:$0xff] }
  0xdc   : > { %654 = vmatmul.mubr.f32.gmra.mxu1 %v367_v33  ;;  %968 = vmatprep.subr.mxu1 %v6047_v41  ;;  %9194 = vst [vmem:[#allocation66_spill] sm:$0xff] %v6069_v4  ;;  %9195 = vst [vmem:[#allocation67_spill] sm:$0xff] %v6071_v29  ;;  %v6074_v33 = vld [vmem:[#allocation9 + $0x3b0] sm:$0xff]  ;;  %v6080_v41 = vld [vmem:[#allocation9 + $0x3a8] sm:$0xff] }
  0xdd   : > { %898 = vmatpush2.msra.mxu0 %v6051_v59  ;;  %969 = vmatpush2.msra.mxu1 %v6053_v51  ;;  %9196 = vst [vmem:[#allocation68_spill] sm:$0xff] %v6074_v33  ;;  %v6078_v51 = vld [vmem:[#allocation9 + $0x398] sm:$0xff]  ;;  %9198 = vst [vmem:[#allocation70_spill] sm:$0xff] %v6080_v41 }
  0xde   : > { %546 = vmatprep.mubr.f32.mxu0 %v9174_v49  ;;  %899 = vmatprep.subr.mxu0 %v6057_v35  ;;  %9197 = vst [vmem:[#allocation69_spill] sm:$0xff] %v6078_v51  ;;  %v6084_v35 = vld [vmem:[#allocation9 + $0x378] sm:$0xff] }
  0xdf   : > { %970 = vmatprep.subr.mxu1 %v6060_v63  ;;  %547 = vmatmul.mubr.f32.gmra.mxu0 %v368_v45  ;;  %9199 = vst [vmem:[#allocation71_spill] sm:$0xff] %v6084_v35  ;;  %v6087_v63 = vld [vmem:[#allocation9 + $0x388] sm:$0xff]  ;;  %v369_v59 = vld [vmem:[%s5749_s9 + $0x28] sm:$0xff] }
  0xe0   : > { %659 = vmatprep.mubr.f32.mxu1 %v9174_v49  ;;  %900 = vmatpush2.msra.mxu0 %v6065_v31  ;;  %9200 = vst [vmem:[#allocation72_spill] sm:$0xff] %v6087_v63  ;;  %v6092_v31 = vld [vmem:[#allocation9 + $0x370] sm:$0xff] }
  0xe1   : > { %971 = vmatpush2.msra.mxu1 %v6069_v4  ;;  %901 = vmatprep.subr.mxu0 %v6071_v29  ;;  %9201 = vst [vmem:[#allocation73_spill] sm:$0xff] %v6092_v31  ;;  %v6096_v4 = vld [vmem:[#allocation9 + $0x380] sm:$0xff]  ;;  %v6098_v29 = vld [vmem:[#allocation9 + $0x350] sm:$0xff] }
  0xe2   : > { %660 = vmatmul.mubr.f32.gmra.mxu1 %v368_v45  ;;  %972 = vmatprep.subr.mxu1 %v6074_v33  ;;  %9202 = vst [vmem:[#allocation74_spill] sm:$0xff] %v6096_v4  ;;  %9203 = vst [vmem:[#allocation75_spill] sm:$0xff] %v6098_v29  ;;  %v6101_v45 = vld [vmem:[#allocation9 + $0x360] sm:$0xff]  ;;  %v6107_v33 = vld [vmem:[#allocation9 + $0x358] sm:$0xff] }
  0xe3   : > { %902 = vmatpush2.msra.mxu0 %v6078_v51  ;;  %973 = vmatpush2.msra.mxu1 %v6080_v41  ;;  %9204 = vst [vmem:[#allocation76_spill] sm:$0xff] %v6101_v45  ;;  %v6105_v41 = vld [vmem:[#allocation9 + $0x348] sm:$0xff]  ;;  %9206 = vst [vmem:[#allocation78_spill] sm:$0xff] %v6107_v33  ;;  %v370_v51 = vld [vmem:[%s5749_s9 + $0x30] sm:$0xff] }
  0xe4   : > { %552 = vmatprep.mubr.f32.mxu0 %v9174_v49  ;;  %903 = vmatprep.subr.mxu0 %v6084_v35  ;;  %9205 = vst [vmem:[#allocation77_spill] sm:$0xff] %v6105_v41  ;;  %v6111_v35 = vld [vmem:[#allocation9 + $0x328] sm:$0xff] }
  0xe5   : > { %974 = vmatprep.subr.mxu1 %v6087_v63  ;;  %553 = vmatmul.mubr.f32.gmra.mxu0 %v369_v59  ;;  %9207 = vst [vmem:[#allocation79_spill] sm:$0xff] %v6111_v35  ;;  %v6114_v63 = vld [vmem:[#allocation9 + $0x338] sm:$0xff] }
  0xe6   : > { %665 = vmatprep.mubr.f32.mxu1 %v9174_v49  ;;  %904 = vmatpush2.msra.mxu0 %v6092_v31  ;;  %9208 = vst [vmem:[#allocation80_spill] sm:$0xff] %v6114_v63  ;;  %v6119_v31 = vld [vmem:[#allocation9 + $0x320] sm:$0xff] }
  0xe7   : > { %975 = vmatpush2.msra.mxu1 %v6096_v4  ;;  %905 = vmatprep.subr.mxu0 %v6098_v29  ;;  %9209 = vst [vmem:[#allocation81_spill] sm:$0xff] %v6119_v31  ;;  %v6123_v4 = vld [vmem:[#allocation9 + $0x330] sm:$0xff]  ;;  %v6125_v29 = vld [vmem:[#allocation9 + $0x300] sm:$0xff] }
  0xe8   : > { %666 = vmatmul.mubr.f32.gmra.mxu1 %v369_v59  ;;  %976 = vmatprep.subr.mxu1 %v6101_v45  ;;  %9210 = vst [vmem:[#allocation82_spill] sm:$0xff] %v6123_v4  ;;  %9211 = vst [vmem:[#allocation83_spill] sm:$0xff] %v6125_v29  ;;  %v6128_v59 = vld [vmem:[#allocation9 + $0x310] sm:$0xff]  ;;  %v6134_v45 = vld [vmem:[#allocation9 + $0x308] sm:$0xff] }
  0xe9   : > { %906 = vmatpush2.msra.mxu0 %v6105_v41  ;;  %977 = vmatpush2.msra.mxu1 %v6107_v33  ;;  %9212 = vst [vmem:[#allocation84_spill] sm:$0xff] %v6128_v59  ;;  %v6132_v33 = vld [vmem:[#allocation9 + $0x2f8] sm:$0xff]  ;;  %9214 = vst [vmem:[#allocation86_spill] sm:$0xff] %v6134_v45  ;;  %v371_v41 = vld [vmem:[%s5749_s9 + $0x38] sm:$0xff] }
  0xea   : > { %558 = vmatprep.mubr.f32.mxu0 %v9174_v49  ;;  %907 = vmatprep.subr.mxu0 %v6111_v35  ;;  %9213 = vst [vmem:[#allocation85_spill] sm:$0xff] %v6132_v33  ;;  %v6138_v35 = vld [vmem:[#allocation9 + $0x2d8] sm:$0xff] }
  0xeb   : > { %978 = vmatprep.subr.mxu1 %v6114_v63  ;;  %559 = vmatmul.mubr.f32.gmra.mxu0 %v370_v51  ;;  %9215 = vst [vmem:[#allocation87_spill] sm:$0xff] %v6138_v35  ;;  %v6141_v63 = vld [vmem:[#allocation9 + $0x2e8] sm:$0xff] }
  0xec   : > { %671 = vmatprep.mubr.f32.mxu1 %v9174_v49  ;;  %908 = vmatpush2.msra.mxu0 %v6119_v31  ;;  %9216 = vst [vmem:[#allocation88_spill] sm:$0xff] %v6141_v63  ;;  %v6146_v31 = vld [vmem:[#allocation9 + $0x2d0] sm:$0xff] }
  0xed   : > { %979 = vmatpush2.msra.mxu1 %v6123_v4  ;;  %909 = vmatprep.subr.mxu0 %v6125_v29  ;;  %9217 = vst [vmem:[#allocation89_spill] sm:$0xff] %v6146_v31  ;;  %v6150_v4 = vld [vmem:[#allocation9 + $0x2e0] sm:$0xff]  ;;  %v6152_v29 = vld [vmem:[#allocation9 + $0x2b0] sm:$0xff] }
  0xee   : > { %672 = vmatmul.mubr.f32.gmra.mxu1 %v370_v51  ;;  %980 = vmatprep.subr.mxu1 %v6128_v59  ;;  %9218 = vst [vmem:[#allocation90_spill] sm:$0xff] %v6150_v4  ;;  %v6155_v51 = vld [vmem:[#allocation9 + $0x2c0] sm:$0xff]  ;;  %v6161_v59 = vld [vmem:[#allocation9 + $0x2b8] sm:$0xff] }
  0xef   : > { %910 = vmatpush2.msra.mxu0 %v6132_v33  ;;  %981 = vmatpush2.msra.mxu1 %v6134_v45  ;;  %9219 = vst [vmem:[#allocation91_spill] sm:$0xff] %v6155_v51  ;;  %v6159_v45 = vld [vmem:[#allocation9 + $0x2a8] sm:$0xff]  ;;  %9220 = vst [vmem:[#allocation92_spill] sm:$0xff] %v6161_v59  ;;  %v6167_v33 = vld [vmem:[#allocation9 + $0x298] sm:$0xff] }
  0xf0   : > { %564 = vmatprep.mubr.f32.mxu0 %v9174_v49  ;;  %911 = vmatprep.subr.mxu0 %v6138_v35  ;;  %v6165_v35 = vld [vmem:[#allocation9 + $0x288] sm:$0xff]  ;;  %9222 = vst [vmem:[#allocation94_spill] sm:$0xff] %v6167_v33 }
  0xf1   : > { %982 = vmatprep.subr.mxu1 %v6141_v63  ;;  %565 = vmatmul.mubr.f32.gmra.mxu0 %v371_v41  ;;  %9221 = vst [vmem:[#allocation93_spill] sm:$0xff] %v6165_v35  ;;  %v6170_v63 = vld [vmem:[#allocation9 + $0x280] sm:$0xff] }
  0xf2   : > { %677 = vmatprep.mubr.f32.mxu1 %v9174_v49  ;;  %912 = vmatpush2.msra.mxu0 %v6146_v31  ;;  %9223 = vst [vmem:[#allocation95_spill] sm:$0xff] %v6170_v63  ;;  %v692_v49 = vld [vmem:[#allocation2 + $0x8] sm:$0xff]  ;;  %v6174_v31 = vld [vmem:[#allocation9 + $0x290] sm:$0xff] }
  0xf3   : > { %983 = vmatpush2.msra.mxu1 %v6150_v4  ;;  %913 = vmatprep.subr.mxu0 %v6152_v29  ;;  %9224 = vst [vmem:[#allocation96_spill] sm:$0xff] %v6174_v31  ;;  %v6178_v4 = vld [vmem:[#allocation2] sm:$0xff] }
  0xf4   : > { %678 = vmatmul.mubr.f32.gmra.mxu1 %v371_v41  ;;  %984 = vmatprep.subr.mxu1 %v6155_v51  ;;  %v6181_v41 = vld [vmem:[#allocation9 + $0x4f8] sm:$0xff] }
  0xf5   : > { %914 = vmatpush2.msra.mxu0 %v6159_v45  ;;  %985 = vmatpush2.msra.mxu1 %v6161_v59  ;;  %v6184_v51 = vld [vmem:[#allocation9 + $0x278] sm:$0xff]  ;;  %v6188_v59 = vld [vmem:[#allocation9 + $0x4d0] sm:$0xff] }
  0xf6   : > { %915 = vmatprep.subr.mxu0 %v6165_v35  ;;  %986 = vmatprep.subr.mxu1 %v6167_v33  ;;  %v6191_v33 = vld [vmem:[#allocation9 + $0x250] sm:$0xff]  ;;  %v6202_v35 = vld [vmem:[#allocation9 + $0x480] sm:$0xff] }
  0xf7   : > { %916 = vmatpush2.msra.mxu0 %v6170_v63  ;;  %917 = vmatprep.mubr.f32.mxu0 %v692_v49  ;;  %v6194_v63 = vld [vmem:[#allocation9 + $0x4a8] sm:$0xff] }
  0xf8   : > { %987 = vmatpush2.msra.mxu1 %v6174_v31  ;;  %988 = vmatprep.mubr.f32.mxu1 %v692_v49  ;;  %v6198_v31 = vld [vmem:[#allocation9 + $0x228] sm:$0xff] }
  0xf9   : > { %918 = vmatmul.mubr.f32.vlgmr.msra.gmra.mxu0 %v6178_v4  ;;  %989 = vmatmul.mubr.f32.vlgmr.msra.gmra.mxu1 %v6178_v4 }
  0xfa   : > { %4705 = vmatprep.subr.mxu0 %v6181_v41  ;;  %1059 = vmatprep.mubr.f32.mxu0 %v692_v49  ;;  %v6206_v49 = vld [vmem:[#allocation9 + $0x200] sm:$0xff] }
  0xfb   : > { %4706 = vmatpush3.msra.mxu0 %v6184_v51  ;;  %1326 = vmatprep.subr.mxu1 %v5773_v3  ;;  %v6210_v3 = vld [vmem:[#allocation9 + $0x458] sm:$0xff] }
  0xfc   : > { %4707 = vmatprep.subr.mxu0 %v6188_v59  ;;  %1327 = vmatpush1.msra.mxu1 %v5778_v6  ;;  %v6214_v6 = vld [vmem:[#allocation9 + $0x1d8] sm:$0xff] }
  0xfd   : > { %4708 = vmatpush3.msra.mxu0 %v6191_v33  ;;  %1328 = vmatprep.subr.mxu1 %v5784_v8  ;;  %v6218_v8 = vld [vmem:[#allocation9 + $0x430] sm:$0xff] }
  0xfe   : > { %4709 = vmatprep.subr.mxu0 %v6194_v63  ;;  %1329 = vmatpush1.msra.mxu1 %v5789_v10  ;;  %v6222_v10 = vld [vmem:[#allocation9 + $0x1b0] sm:$0xff] }
  0xff   : > { %4710 = vmatpush3.msra.mxu0 %v6198_v31  ;;  %1330 = vmatprep.subr.mxu1 %v5795_v12  ;;  %v6226_v12 = vld [vmem:[#allocation9 + $0x408] sm:$0xff] }
 0x100   : > { %4711 = vmatprep.subr.mxu0 %v6202_v35  ;;  %1331 = vmatpush1.msra.mxu1 %v5801_v14  ;;  %v6230_v14 = vld [vmem:[#allocation9 + $0x188] sm:$0xff] }
 0x101   : > { %4712 = vmatpush3.msra.mxu0 %v6206_v49  ;;  %1332 = vmatprep.subr.mxu1 %v5807_v16  ;;  %v6234_v16 = vld [vmem:[#allocation9 + $0x3e0] sm:$0xff] }
 0x102   : > { %4713 = vmatprep.subr.mxu0 %v6210_v3  ;;  %1333 = vmatpush1.msra.mxu1 %v5813_v18  ;;  %v6238_v18 = vld [vmem:[#allocation9 + $0x160] sm:$0xff] }
 0x103   : > { %4714 = vmatpush3.msra.mxu0 %v6214_v6  ;;  %1334 = vmatprep.subr.mxu1 %v5819_v20  ;;  %v6242_v20 = vld [vmem:[#allocation9 + $0x3b8] sm:$0xff] }
 0x104   : > { %4715 = vmatprep.subr.mxu0 %v6218_v8  ;;  %1335 = vmatpush1.msra.mxu1 %v5825_v22  ;;  %v6246_v22 = vld [vmem:[#allocation9 + $0x138] sm:$0xff] }
 0x105   : > { %4716 = vmatpush3.msra.mxu0 %v6222_v10  ;;  %1336 = vmatprep.subr.mxu1 %v5831_v24  ;;  %v6250_v24 = vld [vmem:[#allocation9 + $0x390] sm:$0xff] }
 0x106   : > { %4717 = vmatprep.subr.mxu0 %v6226_v12  ;;  %1337 = vmatpush1.msra.mxu1 %v5837_v26  ;;  %v6254_v26 = vld [vmem:[#allocation9 + $0x110] sm:$0xff] }
 0x107   : > { %4718 = vmatpush3.msra.mxu0 %v6230_v14  ;;  %1338 = vmatprep.subr.mxu1 %v5843_v28  ;;  %v6258_v28 = vld [vmem:[#allocation9 + $0x368] sm:$0xff] }
 0x108   : > { %4719 = vmatprep.subr.mxu0 %v6234_v16  ;;  %1339 = vmatpush1.msra.mxu1 %v5849_v30  ;;  %v6262_v30 = vld [vmem:[#allocation9 + $0xe8] sm:$0xff] }
 0x109   : > { %4720 = vmatpush3.msra.mxu0 %v6238_v18  ;;  %1340 = vmatprep.subr.mxu1 %v5855_v32  ;;  %v6266_v32 = vld [vmem:[#allocation9 + $0x340] sm:$0xff] }
 0x10a   : > { %4721 = vmatprep.subr.mxu0 %v6242_v20  ;;  %1341 = vmatpush1.msra.mxu1 %v5861_v34  ;;  %v6270_v34 = vld [vmem:[#allocation9 + $0xc0] sm:$0xff] }
 0x10b   : > { %4722 = vmatpush3.msra.mxu0 %v6246_v22  ;;  %1342 = vmatprep.subr.mxu1 %v5867_v36  ;;  %v6274_v36 = vld [vmem:[#allocation9 + $0x318] sm:$0xff] }
 0x10c   : > { %4723 = vmatprep.subr.mxu0 %v6250_v24  ;;  %1343 = vmatpush1.msra.mxu1 %v5873_v38  ;;  %v6278_v38 = vld [vmem:[#allocation9 + $0x98] sm:$0xff] }
 0x10d   : > { %4724 = vmatpush3.msra.mxu0 %v6254_v26  ;;  %1344 = vmatprep.subr.mxu1 %v5879_v40  ;;  %v6282_v40 = vld [vmem:[#allocation9 + $0x2f0] sm:$0xff] }
 0x10e   : > { %4725 = vmatprep.subr.mxu0 %v6258_v28  ;;  %1345 = vmatpush1.msra.mxu1 %v5885_v42  ;;  %v6286_v42 = vld [vmem:[#allocation9 + $0x70] sm:$0xff] }
 0x10f   : > { %4726 = vmatpush3.msra.mxu0 %v6262_v30  ;;  %1346 = vmatprep.subr.mxu1 %v5891_v44  ;;  %v6290_v44 = vld [vmem:[#allocation9 + $0x2c8] sm:$0xff] }
 0x110   : > { %4727 = vmatprep.subr.mxu0 %v6266_v32  ;;  %1347 = vmatpush1.msra.mxu1 %v5897_v46  ;;  %v6294_v46 = vld [vmem:[#allocation9 + $0x48] sm:$0xff] }
 0x111   : > { %4728 = vmatpush3.msra.mxu0 %v6270_v34  ;;  %1348 = vmatprep.subr.mxu1 %v5903_v48  ;;  %v6298_v48 = vld [vmem:[#allocation9 + $0x2a0] sm:$0xff] }
 0x112   : > { %4729 = vmatprep.subr.mxu0 %v6274_v36  ;;  %1349 = vmatpush1.msra.mxu1 %v5909_v50  ;;  %v6302_v50 = vld [vmem:[#allocation9 + $0x20] sm:$0xff] }
 0x113   : > { %4730 = vmatpush3.msra.mxu0 %v6278_v38  ;;  %1350 = vmatprep.subr.mxu1 %v5915_v52  ;;  %v9242_v52 = vld [vmem:[#allocation32_spill] sm:$0xff] }
 0x114   : > { %4731 = vmatprep.subr.mxu0 %v6282_v40  ;;  %1351 = vmatpush1.msra.mxu1 %v5921_v54  ;;  %v9244_v54 = vld [vmem:[#allocation33_spill] sm:$0xff] }
 0x115   : > { %4732 = vmatpush3.msra.mxu0 %v6286_v42  ;;  %1352 = vmatprep.subr.mxu1 %v5927_v56  ;;  %v9246_v56 = vld [vmem:[#allocation34_spill] sm:$0xff] }
 0x116   : > { %4733 = vmatprep.subr.mxu0 %v6290_v44  ;;  %1353 = vmatpush1.msra.mxu1 %v5933_v58  ;;  %v9248_v58 = vld [vmem:[#allocation35_spill] sm:$0xff] }
 0x117   : > { %4734 = vmatpush3.msra.mxu0 %v6294_v46  ;;  %1354 = vmatprep.subr.mxu1 %v5939_v60  ;;  %v9249_v60 = vld [vmem:[#allocation77_spill] sm:$0xff] }
 0x118   : > { %4735 = vmatprep.subr.mxu0 %v6298_v48  ;;  %1355 = vmatpush1.msra.mxu1 %v5945_v62  ;;  %v9251_v62 = vld [vmem:[#allocation79_spill] sm:$0xff] }
 0x119   : > { %4736 = vmatpush3.msra.mxu0 %v6302_v50  ;;  %1356 = vmatprep.subr.mxu1 %v5951_v0  ;;  %v9252_v0 = vld [vmem:[#allocation37_spill] sm:$0xff] }
 0x11a   : > { %1060 = vmatmul.mubr.f32.vlgmr.msra.gmra.mxu0 %v6178_v4  ;;  %1397 = vmatprep.subr.mxu0 %v5776_v5  ;;  %v9225_v4 = vld [vmem:[#allocation53_spill] sm:$0xff]  ;;  %v9226_v5 = vld [vmem:[#allocation24_spill] sm:$0xff] }
 0x11b   : > { %1398 = vmatpush1.msra.mxu0 %v5780_v7  ;;  %1357 = vmatpush1.msra.mxu1 %v5957_v2  ;;  %v9227_v7 = vld [vmem:[#allocation55_spill] sm:$0xff]  ;;  %v9254_v2 = vld [vmem:[#allocation38_spill] sm:$0xff] }
 0x11c   : > { %1399 = vmatprep.subr.mxu0 %v5786_v9  ;;  %1358 = vmatprep.subr.mxu1 %v5963_v57  ;;  %v9228_v9 = vld [vmem:[#allocation25_spill] sm:$0xff]  ;;  %v9247_v57 = vld [vmem:[#allocation75_spill] sm:$0xff] }
 0x11d   : > { %1400 = vmatpush1.msra.mxu0 %v5791_v11  ;;  %1359 = vmatpush2.msra.mxu1 %v5969_v55  ;;  %v9229_v11 = vld [vmem:[#allocation57_spill] sm:$0xff] }
 0x11e   : > { %1401 = vmatprep.subr.mxu0 %v5797_v13  ;;  %1360 = vmatprep.subr.mxu1 %v5975_v53  ;;  %v9230_v13 = vld [vmem:[#allocation26_spill] sm:$0xff]  ;;  %v9243_v53 = vld [vmem:[#allocation71_spill] sm:$0xff]  ;;  %v9245_v55 = vld [vmem:[#allocation73_spill] sm:$0xff] }
 0x11f   : > { %1402 = vmatpush1.msra.mxu0 %v5803_v15  ;;  %1361 = vmatpush2.msra.mxu1 %v5984_v1  ;;  %v9231_v15 = vld [vmem:[#allocation59_spill] sm:$0xff]  ;;  %v9253_v1 = vld [vmem:[#allocation81_spill] sm:$0xff] }
 0x120   : > { %1403 = vmatprep.subr.mxu0 %v5809_v17  ;;  %1362 = vmatprep.subr.mxu1 %v5990_v47  ;;  %v9232_v17 = vld [vmem:[#allocation27_spill] sm:$0xff]  ;;  %v9241_v47 = vld [vmem:[#allocation69_spill] sm:$0xff] }
 0x121   : > { %1404 = vmatpush1.msra.mxu0 %v5815_v19  ;;  %1363 = vmatpush2.msra.mxu1 %v5997_v61  ;;  %v9233_v19 = vld [vmem:[#allocation61_spill] sm:$0xff]  ;;  %v9250_v61 = vld [vmem:[#allocation36_spill] sm:$0xff] }
 0x122   : > { %1405 = vmatprep.subr.mxu0 %v5821_v21  ;;  %1364 = vmatprep.subr.mxu1 %v6003_v43  ;;  %v9234_v21 = vld [vmem:[#allocation28_spill] sm:$0xff]  ;;  %v9240_v43 = vld [vmem:[#allocation31_spill] sm:$0xff] }
 0x123   : > { %1406 = vmatpush1.msra.mxu0 %v5827_v23  ;;  %1365 = vmatpush2.msra.mxu1 %v6011_v39  ;;  %v9235_v23 = vld [vmem:[#allocation63_spill] sm:$0xff] }
 0x124   : > { %1407 = vmatprep.subr.mxu0 %v5833_v25  ;;  %1366 = vmatprep.subr.mxu1 %v6017_v37  ;;  %v9236_v25 = vld [vmem:[#allocation29_spill] sm:$0xff]  ;;  %v9238_v37 = vld [vmem:[#allocation30_spill] sm:$0xff]  ;;  %v9239_v39 = vld [vmem:[#allocation67_spill] sm:$0xff] }
 0x125   : > { %1408 = vmatpush1.msra.mxu0 %v5839_v27  ;;  %1367 = vmatpush2.msra.mxu1 %v9225_v4  ;;  %v9237_v27 = vld [vmem:[#allocation65_spill] sm:$0xff]  ;;  %v9255_v4 = vld [vmem:[#allocation83_spill] sm:$0xff] }
 0x126   : > { %1409 = vmatprep.subr.mxu0 %v9226_v5  ;;  %1368 = vmatprep.subr.mxu1 %v9227_v7  ;;  %v9256_v5 = vld [vmem:[#allocation39_spill] sm:$0xff]  ;;  %v9257_v7 = vld [vmem:[#allocation85_spill] sm:$0xff] }
 0x127   : > { %1410 = vmatpush1.msra.mxu0 %v9228_v9  ;;  %1369 = vmatpush2.msra.mxu1 %v9229_v11  ;;  %v9258_v9 = vld [vmem:[#allocation40_spill] sm:$0xff]  ;;  %v9259_v11 = vld [vmem:[#allocation87_spill] sm:$0xff] }
 0x128   : > { %1411 = vmatprep.subr.mxu0 %v9230_v13  ;;  %1370 = vmatprep.subr.mxu1 %v9231_v15  ;;  %v9260_v13 = vld [vmem:[#allocation41_spill] sm:$0xff] }
 0x129   : > { %1412 = vmatpush1.msra.mxu0 %v9232_v17  ;;  %1371 = vmatpush2.msra.mxu1 %v9233_v19  ;;  %v9261_v15 = vld [vmem:[#allocation89_spill] sm:$0xff]  ;;  %v9262_v17 = vld [vmem:[#allocation42_spill] sm:$0xff]  ;;  %v9263_v19 = vld [vmem:[#allocation43_spill] sm:$0xff] }
 0x12a   : > { %1413 = vmatprep.subr.mxu0 %v9234_v21  ;;  %1372 = vmatprep.subr.mxu1 %v9235_v23  ;;  %v9264_v21 = vld [vmem:[#allocation44_spill] sm:$0xff]  ;;  %v9265_v23 = vld [vmem:[#allocation93_spill] sm:$0xff] }
 0x12b   : > { %1414 = vmatpush1.msra.mxu0 %v9236_v25  ;;  %1373 = vmatpush2.msra.mxu1 %v9237_v27  ;;  %v9266_v25 = vld [vmem:[#allocation45_spill] sm:$0xff]  ;;  %v9267_v27 = vld [vmem:[#allocation95_spill] sm:$0xff] }
 0x12c   : > { %1415 = vmatprep.subr.mxu0 %v9238_v37  ;;  %1374 = vmatprep.subr.mxu1 %v9239_v39  ;;  %v9268_v37 = vld [vmem:[#allocation46_spill] sm:$0xff]  ;;  %v9269_v39 = vld [vmem:[#allocation47_spill] sm:$0xff] }
 0x12d   : > { %1416 = vmatpush1.msra.mxu0 %v9240_v43  ;;  %1375 = vmatpush2.msra.mxu1 %v9241_v47  ;;  %v9270_v43 = vld [vmem:[#allocation48_spill] sm:$0xff]  ;;  %v9272_v47 = vld [vmem:[#allocation50_spill] sm:$0xff] }
 0x12e   : > { %1417 = vmatprep.subr.mxu0 %v9242_v52  ;;  %1376 = vmatprep.subr.mxu1 %v9243_v53  ;;  %v9274_v52 = vld [vmem:[#allocation52_spill] sm:$0xff]  ;;  %v9275_v53 = vld [vmem:[#allocation54_spill] sm:$0xff] }
 0x12f   : > { %1418 = vmatpush1.msra.mxu0 %v9244_v54  ;;  %1377 = vmatpush2.msra.mxu1 %v9245_v55  ;;  %v9276_v54 = vld [vmem:[#allocation56_spill] sm:$0xff]  ;;  %v9277_v55 = vld [vmem:[#allocation58_spill] sm:$0xff] }
 0x130   : > { %1419 = vmatprep.subr.mxu0 %v9246_v56  ;;  %1378 = vmatprep.subr.mxu1 %v9247_v57  ;;  %v9278_v56 = vld [vmem:[#allocation60_spill] sm:$0xff] }
 0x131   : > { %1420 = vmatpush1.msra.mxu0 %v9248_v58  ;;  %1379 = vmatpush2.msra.mxu1 %v9249_v60  ;;  %v9280_v57 = vld [vmem:[#allocation64_spill] sm:$0xff]  ;;  %v9281_v58 = vld [vmem:[#allocation66_spill] sm:$0xff] }
 0x132   : > { %1421 = vmatprep.subr.mxu0 %v9250_v61  ;;  %1380 = vmatprep.subr.mxu1 %v9251_v62  ;;  %v9282_v60 = vld [vmem:[#allocation68_spill] sm:$0xff]  ;;  %v9283_v61 = vld [vmem:[#allocation70_spill] sm:$0xff] }
 0x133   : > { %1422 = vmatpush1.msra.mxu0 %v9252_v0  ;;  %1381 = vmatpush2.msra.mxu1 %v9253_v1  ;;  %v9284_v62 = vld [vmem:[#allocation72_spill] sm:$0xff]  ;;  %v9285_v0 = vld [vmem:[#allocation74_spill] sm:$0xff] }
 0x134   : > { %1423 = vmatprep.subr.mxu0 %v9254_v2  ;;  %1382 = vmatprep.subr.mxu1 %v9255_v4  ;;  %v9286_v1 = vld [vmem:[#allocation76_spill] sm:$0xff]  ;;  %v9287_v2 = vld [vmem:[#allocation78_spill] sm:$0xff] }
 0x135   : > { %1424 = vmatpush1.msra.mxu0 %v9256_v5  ;;  %1383 = vmatpush2.msra.mxu1 %v9257_v7  ;;  %v9288_v4 = vld [vmem:[#allocation80_spill] sm:$0xff]  ;;  %v9289_v5 = vld [vmem:[#allocation82_spill] sm:$0xff] }
 0x136   : > { %1425 = vmatprep.subr.mxu0 %v9258_v9  ;;  %1384 = vmatprep.subr.mxu1 %v9259_v11  ;;  %v9290_v7 = vld [vmem:[#allocation84_spill] sm:$0xff]  ;;  %v9291_v9 = vld [vmem:[#allocation86_spill] sm:$0xff] }
 0x137   : > { %1426 = vmatpush1.msra.mxu0 %v9260_v13  ;;  %1385 = vmatpush2.msra.mxu1 %v9261_v15  ;;  %v9292_v11 = vld [vmem:[#allocation88_spill] sm:$0xff]  ;;  %v9293_v13 = vld [vmem:[#allocation90_spill] sm:$0xff]  ;;  %v9294_v15 = vld [vmem:[#allocation91_spill] sm:$0xff] }
 0x138   : > { %1427 = vmatprep.subr.mxu0 %v9262_v17  ;;  %1386 = vmatprep.subr.mxu1 %v6152_v29  ;;  %v9271_v29 = vld [vmem:[#allocation49_spill] sm:$0xff]  ;;  %v9295_v17 = vld [vmem:[#allocation92_spill] sm:$0xff] }
 0x139   : > { %1428 = vmatpush1.msra.mxu0 %v9263_v19  ;;  %1387 = vmatpush2.msra.mxu1 %v6159_v45  ;;  %v9273_v45 = vld [vmem:[#allocation51_spill] sm:$0xff]  ;;  %v9296_v19 = vld [vmem:[#allocation94_spill] sm:$0xff] }
 0x13a   : > { %1429 = vmatprep.subr.mxu0 %v9264_v21  ;;  %1388 = vmatprep.subr.mxu1 %v9265_v23  ;;  %v9297_v21 = vld [vmem:[#allocation96_spill] sm:$0xff] }
 0x13b   : > { %1430 = vmatpush2.msra.mxu0 %v9266_v25  ;;  %1389 = vmatpush2.msra.mxu1 %v9267_v27 }
 0x13c   : > { %1431 = vmatprep.subr.mxu0 %v9268_v37  ;;  %4740 = vmatprep.subr.mxu1 %v6181_v41  ;;  %v9279_v41 = vld [vmem:[#allocation62_spill] sm:$0xff] }
 0x13d   : > { %1432 = vmatpush2.msra.mxu0 %v9269_v39 }
 0x13e   : > { %1433 = vmatprep.subr.mxu0 %v9270_v43 }
 0x13f   : > { %1434 = vmatpush2.msra.mxu0 %v9271_v29 }
 0x140   : > { %1435 = vmatprep.subr.mxu0 %v9272_v47 }
 0x141   : > { %1436 = vmatpush2.msra.mxu0 %v9273_v45 }
 0x142   : > { %1437 = vmatprep.subr.mxu0 %v9274_v52 }
 0x143   : > { %1438 = vmatpush2.msra.mxu0 %v9275_v53 }
 0x144   : > { %1439 = vmatprep.subr.mxu0 %v9276_v54 }
 0x145   : > { %1440 = vmatpush2.msra.mxu0 %v9277_v55 }
 0x146   : > { %1441 = vmatprep.subr.mxu0 %v9278_v56 }
 0x147   : > { %1442 = vmatpush2.msra.mxu0 %v9279_v41 }
 0x148   : > { %1443 = vmatprep.subr.mxu0 %v9280_v57 }
 0x149   : > { %1444 = vmatpush2.msra.mxu0 %v9281_v58 }
 0x14a   : > { %1445 = vmatprep.subr.mxu0 %v9282_v60 }
 0x14b   : > { %1446 = vmatpush2.msra.mxu0 %v9283_v61 }
 0x14c   : > { %1447 = vmatprep.subr.mxu0 %v9284_v62 }
 0x14d   : > { %1448 = vmatpush2.msra.mxu0 %v9285_v0 }
 0x14e   : > { %1449 = vmatprep.subr.mxu0 %v9286_v1 }
 0x14f   : > { %1450 = vmatpush2.msra.mxu0 %v9287_v2 }
 0x150   : > { %1451 = vmatprep.subr.mxu0 %v9288_v4 }
 0x151   : > { %1452 = vmatpush2.msra.mxu0 %v9289_v5 }
 0x152   : > { %1453 = vmatprep.subr.mxu0 %v9290_v7 }
 0x153   : > { %1454 = vmatpush2.msra.mxu0 %v9291_v9 }
 0x154   : > { %1455 = vmatprep.subr.mxu0 %v9292_v11  ;;  %v438_v11 = vlaneseq }
 0x155   : > { %1456 = vmatpush2.msra.mxu0 %v9293_v13 }
 0x156   : > { %1457 = vmatprep.subr.mxu0 %v9294_v15 }
 0x157   : > { %1458 = vmatpush2.msra.mxu0 %v9295_v17  ;;  %v439_v17 = vshrl.u32 %v438_v11, 7 }
 0x158   : > { %1459 = vmatprep.subr.mxu0 %v9296_v19 }
 0x159   : > { %1460 = vmatpush2.msra.mxu0 %v9297_v21  ;;  %v6467_v21 = vld [vmem:[%s9320_s19] ss:$0 sm:$0xff] }
 0x168   : > { %v524_v23 = vpop.f32.mrf.mxu0 }
 0x16a   : > { %v637_v25 = vpop.f32.mrf.mxu1  ;;  %v526_v27 = vpop.f32.mrf.mxu0 }
 0x16c   : > { %v6412_v39 = vpop.f32.mrf.mxu1 }
 0x18d   : > { %v6410_v37 = vpop.f32.mrf.mxu0 }
 0x18f   : > { %v6414_v43 = vpop.f32.mrf.mxu0 }
 0x190   : > { %v6416_v29 = vpop.f32.mrf.mxu1 }
 0x192   : > { %v6418_v47 = vpop.f32.mrf.mxu1 }
 0x193   : > { %v6420_v45 = vpop.f32.mrf.mxu0 }
 0x194   : > { %9298 = vst [vmem:[#allocation53_spill] sm:$0xff] %v6420_v45  ;;  %v6693_v45 = vld [vmem:[#allocation9 + $0x58] sm:$0xff] }
 0x195   : > { %v6422_v52 = vpop.f32.mrf.mxu0 }
 0x196   : > { %9299 = vst [vmem:[#allocation24_spill] sm:$0xff] %v6422_v52  ;;  %v6424_v53 = vpop.f32.mrf.mxu1  ;;  %v6695_v52 = vld [vmem:[#allocation9 + $0x88] sm:$0xff] }
 0x197   : > { %9300 = vst [vmem:[#allocation55_spill] sm:$0xff] %v6424_v53  ;;  %9345 = vst [vmem:[#allocation48_spill] sm:$0xff] %v6695_v52 }
 0x198   : > { %v6426_v54 = vpop.f32.mrf.mxu1 }
 0x199   : > { %9301 = vst [vmem:[#allocation25_spill] sm:$0xff] %v6426_v54  ;;  %v6428_v55 = vpop.f32.mrf.mxu0 }
 0x19a   : > { %9302 = vst [vmem:[#allocation57_spill] sm:$0xff] %v6428_v55 }
 0x19b   : > { %v6430_v56 = vpop.f32.mrf.mxu0 }
 0x19c   : > { %9303 = vst [vmem:[#allocation26_spill] sm:$0xff] %v6430_v56  ;;  %v6432_v41 = vpop.f32.mrf.mxu1 }
 0x19d   : > { %9304 = vst [vmem:[#allocation59_spill] sm:$0xff] %v6432_v41 }
 0x19e   : > { %v6434_v57 = vpop.f32.mrf.mxu1 }
 0x19f   : > { %9305 = vst [vmem:[#allocation27_spill] sm:$0xff] %v6434_v57  ;;  %v6436_v58 = vpop.f32.mrf.mxu0 }
 0x1a0   : > { %9306 = vst [vmem:[#allocation61_spill] sm:$0xff] %v6436_v58 }
 0x1a1   : > { %v6438_v60 = vpop.f32.mrf.mxu0 }
 0x1a2   : > { %9307 = vst [vmem:[#allocation28_spill] sm:$0xff] %v6438_v60  ;;  %v6440_v61 = vpop.f32.mrf.mxu1 }
 0x1a3   : > { %9308 = vst [vmem:[#allocation63_spill] sm:$0xff] %v6440_v61 }
 0x1a4   : > { %v6442_v62 = vpop.f32.mrf.mxu1 }
 0x1a5   : > { %9309 = vst [vmem:[#allocation29_spill] sm:$0xff] %v6442_v62  ;;  %v6444_v0 = vpop.f32.mrf.mxu0 }
 0x1a6   : > { %9310 = vst [vmem:[#allocation65_spill] sm:$0xff] %v6444_v0 }
 0x1a7   : > { %v6446_v1 = vpop.f32.mrf.mxu0 }
 0x1a8   : > { %9311 = vst [vmem:[#allocation30_spill] sm:$0xff] %v6446_v1  ;;  %v6448_v2 = vpop.f32.mrf.mxu1 }
 0x1a9   : > { %9312 = vst [vmem:[#allocation67_spill] sm:$0xff] %v6448_v2 }
 0x1aa   : > { %v6452_v5 = vpop.f32.mrf.mxu1 }
 0x1ab   : > { %v6450_v4 = vpop.f32.mrf.mxu0  ;;  %9314 = vst [vmem:[#allocation69_spill] sm:$0xff] %v6452_v5  ;;  %v444_v5 = vsub.s32 1, %v439_v17 }
 0x1ac   : > { %9313 = vst [vmem:[#allocation31_spill] sm:$0xff] %v6450_v4 }
 0x1ad   : > { %v6454_v7 = vpop.f32.mrf.mxu0 }
 0x1ae   : > { %9315 = vst [vmem:[#allocation32_spill] sm:$0xff] %v6454_v7  ;;  %v6456_v9 = vpop.f32.mrf.mxu1  ;;  %v440_v7 = vsub.s32 0, %v439_v17 }
 0x1af   : > { %9316 = vst [vmem:[#allocation71_spill] sm:$0xff] %v6456_v9  ;;  %v436_v9 = vld [vmem:[%s9322_s11] sm:$0xf]  ;;  %s4476_s11 = scalar_lea.sflag [#allocation6], %s5745_s14 }
 0x1b0   : > { %v6460_v15 = vpop.f32.mrf.mxu1  ;;  %v6477_v11 = vrot.slane %v436_v9, %v444_v5 }
 0x1b1   : > { %v6458_v13 = vpop.f32.mrf.mxu0  ;;  %9318 = vst [vmem:[#allocation73_spill] sm:$0xff] %v6460_v15 }
 0x1b2   : > { %9317 = vst [vmem:[#allocation33_spill] sm:$0xff] %v6458_v13  ;;  %9324 = vst [vmem:[#allocation77_spill] sm:$0xff] %v6477_v11 }
 0x1b3   : > { %v6462_v19 = vpop.f32.mrf.mxu0 }
 0x1b4   : > { %9319 = vst [vmem:[#allocation34_spill] sm:$0xff] %v6462_v19  ;;  %v6469_v4 = vpop.f32.mrf.mxu1  ;;  %v6479_v19 = vrot.slane %v436_v9, %v440_v7  ;;  %v452_v7 = vsub.s32 3, %v439_v17 }
 0x1b5   : > { %9321 = vst [vmem:[#allocation75_spill] sm:$0xff] %v6469_v4  ;;  %v527_v4 = vadd.f32 %v526_v27, %v6477_v11 }
 0x1b6   : > { %v6475_v15 = vpop.f32.mrf.mxu1  ;;  %v525_v62 = vadd.f32 %v524_v23, %v6479_v19  ;;  %v6486_v27 = vrot.slane %v436_v9, %v452_v7 }
 0x1b7   : > { %9323 = vst [vmem:[#allocation35_spill] sm:$0xff] %v6475_v15 }
 0x1b9   : > { %v919_v2 = vpop.f32.mrf.mxu0  ;;  %v990_v0 = vpop.f32.mrf.mxu1 }
 0x1ba   : > { %v1065_v13 = vadd.f32 %v6467_v21, %v919_v2  ;;  %v1067_v61 = vadd.f32 %v990_v0, %v527_v4  ;;  %v448_v2 = vsub.s32 2, %v439_v17 }
 0x1bb   : > { %v921_v1 = vpop.f32.mrf.mxu0  ;;  %v992_v41 = vpop.f32.mrf.mxu1 }
 0x1bc   : > { %1390 = vmatprep.mubr.f32.mxu1 %v1065_v13  ;;  %1461 = vmatprep.mubr.f32.mxu0 %v1065_v13  ;;  %v1066_v58 = vadd.f32 %v921_v1, %v525_v62  ;;  %v4642_v60 = vmul.f32 -1.442695, %v1067_v61  ;;  %v6483_v15 = vrot.slane %v436_v9, %v448_v2  ;;  %v1089_v1 = vld [vmem:[#allocation3] sm:$0xff] }
 0x1be   : > { %v4641_v57 = vmul.f32 -1.442695, %v1066_v58  ;;  %5126 = vpow2.f32 %v4642_v60  ;;  %v638_v5 = vadd.f32 %v637_v25, %v6483_v15  ;;  %v640_v58 = vadd.f32 %v6412_v39, %v6486_v27 }
 0x1bf   : > { %v5512_v39 = vmov 1966171168  }
 0x1c0   : > { %5128 = vpow2.f32 %v4641_v57  ;;  %v1068_v55 = vadd.f32 %v992_v41, %v638_v5 }
 0x1c2   : > { %v4643_v53 = vmul.f32 -1.442695, %v1068_v55 }
 0x1c4   : > { %5130 = vpow2.f32 %v4643_v53  ;;  %v1101_v53 = vunpack.c.l.s4 %v5512_v39  ;;  %v6635_v39 = vld [vmem:[#allocation9 + $0x150] sm:$0xff] }
 0x1c5   : > { %9335 = vst [vmem:[#allocation41_spill] sm:$0xff] %v6635_v39 }
 0x1cb   : > { %v5127_v56 = vpop.eup %5126 }
 0x1cc   : > { %v1080_v0 = vadd.f32 1.0, %v5127_v56 }
 0x1cd   : > { %v5129_v54 = vpop.eup %5128 }
 0x1ce   : > { %v1079_v62 = vadd.f32 1.0, %v5129_v54  ;;  %5132 = vrcp.f32 %v1080_v0  ;;  %v1102_v54 = vunpack.c.0.s8 %v1101_v53  ;;  %v6639_v53 = vld [vmem:[#allocation9 + $0x118] sm:$0xff] }
 0x1d0   : > { %5134 = vrcp.f32 %v1079_v62 }
 0x1d1   : > { %v5131_v25 = vpop.eup %5130 }
 0x1d2   : > { %v1081_v2 = vadd.f32 1.0, %v5131_v25 }
 0x1da   : > { %v4737_v23 = vpop.f32.mrf.mxu0 }
 0x1db   : > { %v5133_v41 = vpop.eup %5132 }
 0x1dc   : > { %v4738_v61 = vpop.f32.mrf.mxu0  ;;  %v1090_v55 = vmul.f32 %v5133_v41, %v1089_v1 }
 0x1dd   : > { %v4739_v57 = vadd.f32 %v4738_v61, %v4737_v23  ;;  %v5135_v4 = vpop.eup %5134  ;;  %v6493_v23 = vsub.s32 %v1102_v54, %v439_v17  ;;  %v6641_v54 = vld [vmem:[#allocation9 + $0x130] sm:$0xff] }
 0x1de   : > { %9336 = vst [vmem:[#allocation89_spill] sm:$0xff] %v6641_v54 }
 0x1df   : > { %v1069_v60 = vadd.f32 %v4739_v57, %v640_v58 }
 0x1e1   : > { %5136 = vtanh.f32 %v1069_v60 }
 0x1e2   : > { %5138 = vrcp.f32 %v1081_v2  ;;  %v6627_v2 = vld [vmem:[#allocation9 + $0x140] sm:$0xff] }
 0x1ee   : > { %v5137_v9 = vpop.eup %5136 }
 0x1ef   : > { %v1091_v5 = vmul.f32 %v5137_v9, %v5135_v4  ;;  %v5139_v7 = vpop.eup %5138  ;;  %v6623_v9 = vld [vmem:[#allocation9 + $0x178] sm:$0xff] }
 0x1f0   : > { %9333 = vst [vmem:[#allocation40_spill] sm:$0xff] %v6623_v9 }
 0x1f1   : > { %v6490_v56 = vadd.f32 %v1091_v5, %v1090_v55  ;;  %v6629_v55 = vld [vmem:[#allocation9 + $0x158] sm:$0xff]  ;;  %v6633_v5 = vld [vmem:[#allocation9 + $0x120] sm:$0xff] }
 0x1f2   : > { %9334 = vst [vmem:[#allocation87_spill] sm:$0xff] %v6629_v55 }
 0x1f3   : > { %5140 = vtanh.f32 %v6490_v56 }
 0x200   : > { %v5141_v0 = vpop.eup %5140 }
 0x201   : > { %v1094_v62 = vmul.f32 %v5141_v0, %v5139_v7  ;;  %v6645_v7 = vld [vmem:[#allocation9 + $0xf8] sm:$0xff]  ;;  %v6647_v0 = vld [vmem:[#allocation9 + $0x128] sm:$0xff] }
 0x202   : > { %9337 = vst [vmem:[#allocation42_spill] sm:$0xff] %v6647_v0 }
 0x203   : > { %v1099_v61 = vcombine.high %v1094_v62, %v1094_v62  ;;  %v1106_v58 = vrot.slane %v1094_v62, %v6493_v23  ;;  %1391 = vmatmul.mubr.f32.vlgmr.msra.gmra.mxu1 %v1094_v62  ;;  %1462 = vmatmul.mubr.f32.vlgmr.msra.gmra.mxu0 %v1094_v62 }
 0x204   : > { %4741 = vmatpush3.msra.mxu1 %v6184_v51  ;;  %1532 = vmatprep.mubr.f32.mxu1 %v1065_v13 }
 0x205   : > { %v1113_v57 = vrot.slane %v1099_v61, %v6493_v23  ;;  %v1114_v60 = vcombine.high %v1106_v58, %v1106_v58  ;;  %v1122_v25 = vrot.slane %v1106_v58, %v6493_v23  ;;  %4644 = vst.sshfl [vmem:[%s5769_s10] sm:$0x1 pattern:$0x73625140] %v1106_v58  ;;  %4742 = vmatprep.subr.mxu1 %v6188_v59  ;;  %v6653_v61 = vld [vmem:[#allocation9 + $0x108] sm:$0xff]  ;;  %v6657_v58 = vld [vmem:[#allocation9 + $0xd0] sm:$0xff] }
 0x206   : > { %4743 = vmatpush3.msra.mxu1 %v6191_v33  ;;  %9338 = vst [vmem:[#allocation43_spill] sm:$0xff] %v6653_v61 }
 0x207   : > { %v1115_v17 = vcombine.high %v1113_v57, %v1113_v57  ;;  %v1129_v41 = vrot.slane %v1113_v57, %v6493_v23  ;;  %v1136_v51 = vrot.slane %v1114_v60, %v6493_v23  ;;  %v1144_v13 = vcombine.high %v1122_v25, %v1122_v25  ;;  %4645 = vst.sshfl [vmem:[%s5769_s10 + $0x8] sm:$0x1 pattern:$0x73625140] %v1114_v60  ;;  %v6663_v60 = vld [vmem:[#allocation9 + $0xc8] sm:$0xff]  ;;  %v6665_v25 = vld [vmem:[#allocation9 + $0xe0] sm:$0xff] }
 0x208   : > { %4646 = vst.sshfl [vmem:[%s5769_s10 + $0x20] sm:$0x1 pattern:$0x73625140] %v1113_v57  ;;  %4744 = vmatprep.subr.mxu1 %v6194_v63  ;;  %v6545_v63 = vld [vmem:[#allocation9 + $0x270] sm:$0xff]  ;;  %v6659_v57 = vld [vmem:[#allocation9 + $0x100] sm:$0xff] }
 0x209   : > { %4745 = vmatpush3.msra.mxu1 %v6198_v31  ;;  %v1143_v1 = vrot.slane %v1115_v17, %v6493_v23  ;;  %v1145_v59 = vcombine.high %v1129_v41, %v1129_v41  ;;  %v1146_v4 = vcombine.high %v1136_v51, %v1136_v51  ;;  %1158 = vst [vmem:[%s5769_s10 + $0x10] sm:$0x1] %v1144_v13  ;;  %4647 = vst.sshfl [vmem:[%s5769_s10 + $0x28] sm:$0x1 pattern:$0x73625140] %v1115_v17 }
 0x20a   : > { %4746 = vmatprep.subr.mxu1 %v6202_v35  ;;  %v6540_v31 = vld [vmem:[#allocation9 + $0x260] sm:$0xff]  ;;  %v6543_v35 = vld [vmem:[#allocation9 + $0x258] sm:$0xff]  ;;  %9339 = vst [vmem:[#allocation44_spill] sm:$0xff] %v6659_v57  ;;  %9340 = vst [vmem:[#allocation93_spill] sm:$0xff] %v6665_v25 }
 0x20b   : > { %4747 = vmatpush3.msra.mxu1 %v6206_v49  ;;  %v1147_v33 = vcombine.high %v1143_v1, %v1143_v1  ;;  %1159 = vst [vmem:[%s5769_s10 + $0x18] sm:$0x1] %v1146_v4  ;;  %1162 = vst [vmem:[%s5769_s10 + $0x30] sm:$0x1] %v1145_v59  ;;  %1799 = vmatprep.subr.mxu0 %v6540_v31  ;;  %v6549_v49 = vld [vmem:[#allocation9 + $0x238] sm:$0xff]  ;;  %v6669_v17 = vld [vmem:[#allocation9 + $0xa8] sm:$0xff] }
 0x20c   : > { %4748 = vmatprep.subr.mxu1 %v6210_v3  ;;  %1800 = vmatpush1.msra.mxu0 %v6543_v35  ;;  %v6551_v3 = vld [vmem:[#allocation9 + $0x268] sm:$0xff]  ;;  %v6671_v41 = vld [vmem:[#allocation9 + $0xd8] sm:$0xff]  ;;  %v6675_v51 = vld [vmem:[#allocation9 + $0xa0] sm:$0xff] }
 0x20d   : > { %4749 = vmatpush3.msra.mxu1 %v6214_v6  ;;  %1163 = vst [vmem:[%s5769_s10 + $0x38] sm:$0x1] %v1147_v33  ;;  %1801 = vmatprep.subr.mxu0 %v6549_v49  ;;  %v6555_v6 = vld [vmem:[#allocation9 + $0x230] sm:$0xff]  ;;  %9341 = vst [vmem:[#allocation45_spill] sm:$0xff] %v6671_v41  ;;  %v6677_v13 = vld [vmem:[#allocation9 + $0xb8] sm:$0xff] }
 0x20e   : > { %4750 = vmatprep.subr.mxu1 %v6218_v8  ;;  %v6557_v8 = vld [vmem:[#allocation9 + $0x248] sm:$0xff]  ;;  %1802 = vmatpush1.msra.mxu0 %v6555_v6  ;;  %9342 = vst [vmem:[#allocation95_spill] sm:$0xff] %v6677_v13  ;;  %v6681_v1 = vld [vmem:[#allocation9 + $0x80] sm:$0xff]  ;;  %v6683_v59 = vld [vmem:[#allocation9 + $0xb0] sm:$0xff] }
 0x20f   : > { %4751 = vmatpush3.msra.mxu1 %v6222_v10  ;;  %v6561_v10 = vld [vmem:[#allocation9 + $0x210] sm:$0xff]  ;;  %9343 = vst [vmem:[#allocation46_spill] sm:$0xff] %v6683_v59  ;;  %v6687_v4 = vld [vmem:[#allocation9 + $0x78] sm:$0xff] }
 0x210   : > { %4752 = vmatprep.subr.mxu1 %v6226_v12  ;;  %v6563_v12 = vld [vmem:[#allocation9 + $0x240] sm:$0xff]  ;;  %1803 = vmatprep.subr.mxu0 %v6561_v10  ;;  %v6689_v33 = vld [vmem:[#allocation9 + $0x90] sm:$0xff] }
 0x211   : > { %4753 = vmatpush3.msra.mxu1 %v6230_v14  ;;  %v6567_v14 = vld [vmem:[#allocation9 + $0x208] sm:$0xff]  ;;  %9344 = vst [vmem:[#allocation47_spill] sm:$0xff] %v6689_v33 }
 0x212   : > { %4754 = vmatprep.subr.mxu1 %v6234_v16  ;;  %v6569_v16 = vld [vmem:[#allocation9 + $0x220] sm:$0xff]  ;;  %1804 = vmatpush1.msra.mxu0 %v6567_v14 }
 0x213   : > { %4755 = vmatpush3.msra.mxu1 %v6238_v18  ;;  %v6573_v18 = vld [vmem:[#allocation9 + $0x1e8] sm:$0xff] }
 0x214   : > { %4756 = vmatprep.subr.mxu1 %v6242_v20  ;;  %v6575_v20 = vld [vmem:[#allocation9 + $0x218] sm:$0xff]  ;;  %1805 = vmatprep.subr.mxu0 %v6573_v18 }
 0x215   : > { %4757 = vmatpush3.msra.mxu1 %v6246_v22  ;;  %9325 = vst [vmem:[#allocation36_spill] sm:$0xff] %v6575_v20  ;;  %v6579_v22 = vld [vmem:[#allocation9 + $0x1e0] sm:$0xff] }
 0x216   : > { %4758 = vmatprep.subr.mxu1 %v6250_v24  ;;  %v6581_v24 = vld [vmem:[#allocation9 + $0x1f8] sm:$0xff]  ;;  %1806 = vmatpush1.msra.mxu0 %v6579_v22 }
 0x217   : > { %4759 = vmatpush3.msra.mxu1 %v6254_v26  ;;  %9326 = vst [vmem:[#allocation79_spill] sm:$0xff] %v6581_v24  ;;  %v6585_v26 = vld [vmem:[#allocation9 + $0x1c0] sm:$0xff] }
 0x218   : > { %4760 = vmatprep.subr.mxu1 %v6258_v28  ;;  %v6587_v28 = vld [vmem:[#allocation9 + $0x1f0] sm:$0xff]  ;;  %1807 = vmatprep.subr.mxu0 %v6585_v26 }
 0x219   : > { %4761 = vmatpush3.msra.mxu1 %v6262_v30  ;;  %9327 = vst [vmem:[#allocation37_spill] sm:$0xff] %v6587_v28  ;;  %v6591_v30 = vld [vmem:[#allocation9 + $0x1b8] sm:$0xff] }
 0x21a   : > { %4762 = vmatprep.subr.mxu1 %v6266_v32  ;;  %v6593_v32 = vld [vmem:[#allocation9 + $0x1d0] sm:$0xff]  ;;  %1808 = vmatpush1.msra.mxu0 %v6591_v30 }
 0x21b   : > { %4763 = vmatpush3.msra.mxu1 %v6270_v34  ;;  %9328 = vst [vmem:[#allocation81_spill] sm:$0xff] %v6593_v32  ;;  %v6597_v34 = vld [vmem:[#allocation9 + $0x198] sm:$0xff] }
 0x21c   : > { %4764 = vmatprep.subr.mxu1 %v6274_v36  ;;  %v6599_v36 = vld [vmem:[#allocation9 + $0x1c8] sm:$0xff]  ;;  %1809 = vmatprep.subr.mxu0 %v6597_v34 }
 0x21d   : > { %4765 = vmatpush3.msra.mxu1 %v6278_v38  ;;  %9329 = vst [vmem:[#allocation38_spill] sm:$0xff] %v6599_v36  ;;  %v6603_v38 = vld [vmem:[#allocation9 + $0x190] sm:$0xff] }
 0x21e   : > { %4766 = vmatprep.subr.mxu1 %v6282_v40  ;;  %v6605_v40 = vld [vmem:[#allocation9 + $0x1a8] sm:$0xff]  ;;  %1810 = vmatpush1.msra.mxu0 %v6603_v38 }
 0x21f   : > { %4767 = vmatpush3.msra.mxu1 %v6286_v42  ;;  %9330 = vst [vmem:[#allocation83_spill] sm:$0xff] %v6605_v40  ;;  %v6609_v42 = vld [vmem:[#allocation9 + $0x170] sm:$0xff] }
 0x220   : > { %4768 = vmatprep.subr.mxu1 %v6290_v44  ;;  %v6611_v44 = vld [vmem:[#allocation9 + $0x1a0] sm:$0xff]  ;;  %1811 = vmatprep.subr.mxu0 %v6609_v42 }
 0x221   : > { %4769 = vmatpush3.msra.mxu1 %v6294_v46  ;;  %9331 = vst [vmem:[#allocation39_spill] sm:$0xff] %v6611_v44  ;;  %v6615_v46 = vld [vmem:[#allocation9 + $0x168] sm:$0xff] }
 0x222   : > { %4770 = vmatprep.subr.mxu1 %v6298_v48  ;;  %v6617_v48 = vld [vmem:[#allocation9 + $0x180] sm:$0xff]  ;;  %1812 = vmatpush1.msra.mxu0 %v6615_v46 }
 0x223   : > { %4771 = vmatpush3.msra.mxu1 %v6302_v50  ;;  %9332 = vst [vmem:[#allocation85_spill] sm:$0xff] %v6617_v48  ;;  %v6621_v50 = vld [vmem:[#allocation9 + $0x148] sm:$0xff] }
 0x224   : > { %1533 = vmatmul.mubr.f32.vlgmr.msra.gmra.mxu1 %v1094_v62  ;;  %1870 = vmatprep.subr.mxu1 %v6545_v63  ;;  %v6651_v62 = vld [vmem:[#allocation9 + $0xf0] sm:$0xff] }
 0x225   : > { %1871 = vmatpush1.msra.mxu1 %v6551_v3  ;;  %1813 = vmatprep.subr.mxu0 %v6621_v50 }
 0x226   : > { %1872 = vmatprep.subr.mxu1 %v6557_v8  ;;  %1814 = vmatpush1.msra.mxu0 %v6627_v2 }
 0x227   : > { %1873 = vmatpush1.msra.mxu1 %v6563_v12  ;;  %1815 = vmatprep.subr.mxu0 %v6633_v5 }
 0x228   : > { %1874 = vmatprep.subr.mxu1 %v6569_v16  ;;  %1816 = vmatpush1.msra.mxu0 %v6639_v53 }
 0x229   : > { %1875 = vmatpush1.msra.mxu1 %v6575_v20  ;;  %1817 = vmatprep.subr.mxu0 %v6645_v7 }
 0x22a   : > { %1876 = vmatprep.subr.mxu1 %v6581_v24  ;;  %1818 = vmatpush1.msra.mxu0 %v6651_v62 }
 0x22b   : > { %1877 = vmatpush1.msra.mxu1 %v6587_v28  ;;  %1819 = vmatprep.subr.mxu0 %v6657_v58 }
 0x22c   : > { %1878 = vmatprep.subr.mxu1 %v6593_v32  ;;  %1820 = vmatpush1.msra.mxu0 %v6663_v60  ;;  %v531_v32 = vadd.f32 %v6410_v37, %v6479_v19  ;;  %v646_v37 = vadd.f32 %v6418_v47, %v6486_v27 }
 0x22d   : > { %1879 = vmatpush1.msra.mxu1 %v6599_v36  ;;  %1821 = vmatprep.subr.mxu0 %v6669_v17  ;;  %v6773_v36 = vld [vmem:[#allocation9 + $0x478] sm:$0xff] }
 0x22e   : > { %1880 = vmatprep.subr.mxu1 %v6605_v40  ;;  %1822 = vmatpush1.msra.mxu0 %v6675_v51  ;;  %v6767_v40 = vld [vmem:[#allocation9 + $0x498] sm:$0xff]  ;;  %9365 = vst [vmem:[#allocation84_spill] sm:$0xff] %v6773_v36 }
 0x22f   : > { %1881 = vmatpush1.msra.mxu1 %v6611_v44  ;;  %1823 = vmatprep.subr.mxu0 %v6681_v1  ;;  %v6761_v44 = vld [vmem:[#allocation9 + $0x4a0] sm:$0xff]  ;;  %9363 = vst [vmem:[#allocation80_spill] sm:$0xff] %v6767_v40 }
 0x230   : > { %1882 = vmatprep.subr.mxu1 %v6617_v48  ;;  %1824 = vmatpush1.msra.mxu0 %v6687_v4  ;;  %v6755_v48 = vld [vmem:[#allocation9 + $0x4c0] sm:$0xff]  ;;  %9361 = vst [vmem:[#allocation76_spill] sm:$0xff] %v6761_v44 }
 0x231   : > { %1883 = vmatpush1.msra.mxu1 %v6623_v9  ;;  %1825 = vmatprep.subr.mxu0 %v6693_v45  ;;  %v6749_v9 = vld [vmem:[#allocation9 + $0x4c8] sm:$0xff]  ;;  %9359 = vst [vmem:[#allocation72_spill] sm:$0xff] %v6755_v48 }
 0x232   : > { %1884 = vmatprep.subr.mxu1 %v6629_v55  ;;  %v6743_v55 = vld [vmem:[#allocation9 + $0x4e8] sm:$0xff]  ;;  %9357 = vst [vmem:[#allocation68_spill] sm:$0xff] %v6749_v9 }
 0x233   : > { %1885 = vmatpush1.msra.mxu1 %v6635_v39  ;;  %v6737_v39 = vld [vmem:[#allocation9 + $0x4f0] sm:$0xff]  ;;  %9355 = vst [vmem:[#allocation64_spill] sm:$0xff] %v6743_v55 }
 0x234   : > { %1886 = vmatprep.subr.mxu1 %v6641_v54  ;;  %v6731_v54 = vld [vmem:[#allocation9 + $0x10] sm:$0xff]  ;;  %9353 = vst [vmem:[#allocation60_spill] sm:$0xff] %v6737_v39 }
 0x235   : > { %1887 = vmatpush1.msra.mxu1 %v6647_v0  ;;  %v6725_v0 = vld [vmem:[#allocation9 + $0x18] sm:$0xff]  ;;  %9351 = vst [vmem:[#allocation56_spill] sm:$0xff] %v6731_v54 }
 0x236   : > { %1888 = vmatprep.subr.mxu1 %v6653_v61  ;;  %v6719_v61 = vld [vmem:[#allocation9 + $0x38] sm:$0xff]  ;;  %9350 = vst [vmem:[#allocation54_spill] sm:$0xff] %v6725_v0 }
 0x237   : > { %1889 = vmatpush1.msra.mxu1 %v6659_v57  ;;  %v6713_v57 = vld [vmem:[#allocation9 + $0x40] sm:$0xff]  ;;  %9349 = vst [vmem:[#allocation52_spill] sm:$0xff] %v6719_v61 }
 0x238   : > { %1890 = vmatprep.subr.mxu1 %v6665_v25  ;;  %v6707_v25 = vld [vmem:[#allocation9 + $0x60] sm:$0xff]  ;;  %9348 = vst [vmem:[#allocation51_spill] sm:$0xff] %v6713_v57 }
 0x239   : > { %1891 = vmatpush1.msra.mxu1 %v6671_v41  ;;  %v6701_v41 = vld [vmem:[#allocation9 + $0x68] sm:$0xff]  ;;  %9347 = vst [vmem:[#allocation50_spill] sm:$0xff] %v6707_v25 }
 0x23a   : > { %1892 = vmatprep.subr.mxu1 %v6677_v13  ;;  %v6699_v13 = vld [vmem:[#allocation9 + $0x50] sm:$0xff]  ;;  %9346 = vst [vmem:[#allocation49_spill] sm:$0xff] %v6701_v41 }
 0x23b   : > { %1893 = vmatpush1.msra.mxu1 %v6683_v59  ;;  %1826 = vmatpush1.msra.mxu0 %v6699_v13  ;;  %v6705_v59 = vld [vmem:[#allocation9 + $0x30] sm:$0xff] }
 0x23c   : > { %1894 = vmatprep.subr.mxu1 %v6689_v33  ;;  %1827 = vmatprep.subr.mxu0 %v6705_v59  ;;  %v6711_v33 = vld [vmem:[#allocation9 + $0x28] sm:$0xff] }
 0x23d   : > { %1895 = vmatpush1.msra.mxu1 %v6695_v52  ;;  %1828 = vmatpush1.msra.mxu0 %v6711_v33  ;;  %v6717_v52 = vld [vmem:[#allocation9 + $0x8] sm:$0xff] }
 0x23e   : > { %1896 = vmatprep.subr.mxu1 %v6701_v41  ;;  %1829 = vmatprep.subr.mxu0 %v6717_v52  ;;  %v6723_v41 = vld [vmem:[#allocation9] sm:$0xff] }
 0x23f   : > { %1897 = vmatpush1.msra.mxu1 %v6707_v25  ;;  %1830 = vmatpush1.msra.mxu0 %v6723_v41  ;;  %v6729_v25 = vld [vmem:[#allocation9 + $0x4e0] sm:$0xff] }
 0x240   : > { %1898 = vmatprep.subr.mxu1 %v6713_v57  ;;  %1831 = vmatprep.subr.mxu0 %v6729_v25  ;;  %v6735_v57 = vld [vmem:[#allocation9 + $0x4d8] sm:$0xff] }
 0x241   : > { %1899 = vmatpush1.msra.mxu1 %v6719_v61  ;;  %9352 = vst [vmem:[#allocation58_spill] sm:$0xff] %v6735_v57  ;;  %1832 = vmatpush2.msra.mxu0 %v6735_v57  ;;  %v6741_v61 = vld [vmem:[#allocation9 + $0x4b8] sm:$0xff] }
 0x242   : > { %1900 = vmatprep.subr.mxu1 %v6725_v0  ;;  %9354 = vst [vmem:[#allocation62_spill] sm:$0xff] %v6741_v61  ;;  %1833 = vmatprep.subr.mxu0 %v6741_v61  ;;  %v6747_v0 = vld [vmem:[#allocation9 + $0x4b0] sm:$0xff] }
 0x243   : > { %1901 = vmatpush1.msra.mxu1 %v6731_v54  ;;  %9356 = vst [vmem:[#allocation66_spill] sm:$0xff] %v6747_v0  ;;  %1834 = vmatpush2.msra.mxu0 %v6747_v0  ;;  %v6753_v54 = vld [vmem:[#allocation9 + $0x490] sm:$0xff] }
 0x244   : > { %1902 = vmatprep.subr.mxu1 %v6737_v39  ;;  %9358 = vst [vmem:[#allocation70_spill] sm:$0xff] %v6753_v54  ;;  %1835 = vmatprep.subr.mxu0 %v6753_v54  ;;  %v6759_v39 = vld [vmem:[#allocation9 + $0x488] sm:$0xff] }
 0x245   : > { %1903 = vmatpush2.msra.mxu1 %v6743_v55  ;;  %9360 = vst [vmem:[#allocation74_spill] sm:$0xff] %v6759_v39  ;;  %1836 = vmatpush2.msra.mxu0 %v6759_v39  ;;  %v6765_v55 = vld [vmem:[#allocation9 + $0x468] sm:$0xff]  ;;  %v6779_v39 = vld [vmem:[#allocation9 + $0x470] sm:$0xff] }
 0x246   : > { %1904 = vmatprep.subr.mxu1 %v6749_v9  ;;  %9362 = vst [vmem:[#allocation78_spill] sm:$0xff] %v6765_v55  ;;  %1837 = vmatprep.subr.mxu0 %v6765_v55  ;;  %v6771_v9 = vld [vmem:[#allocation9 + $0x460] sm:$0xff]  ;;  %9367 = vst [vmem:[#allocation88_spill] sm:$0xff] %v6779_v39  ;;  %v6785_v55 = vld [vmem:[#allocation9 + $0x450] sm:$0xff] }
 0x247   : > { %1905 = vmatpush2.msra.mxu1 %v6755_v48  ;;  %9364 = vst [vmem:[#allocation82_spill] sm:$0xff] %v6771_v9  ;;  %1838 = vmatpush2.msra.mxu0 %v6771_v9  ;;  %v6777_v48 = vld [vmem:[#allocation9 + $0x440] sm:$0xff]  ;;  %9369 = vst [vmem:[#allocation91_spill] sm:$0xff] %v6785_v55  ;;  %v6791_v9 = vld [vmem:[#allocation9 + $0x448] sm:$0xff] }
 0x248   : > { %1906 = vmatprep.subr.mxu1 %v6761_v44  ;;  %9366 = vst [vmem:[#allocation86_spill] sm:$0xff] %v6777_v48  ;;  %1839 = vmatprep.subr.mxu0 %v6777_v48  ;;  %v6783_v44 = vld [vmem:[#allocation9 + $0x438] sm:$0xff]  ;;  %9371 = vst [vmem:[#allocation94_spill] sm:$0xff] %v6791_v9  ;;  %v6797_v48 = vld [vmem:[#allocation9 + $0x428] sm:$0xff] }
 0x249   : > { %1907 = vmatpush2.msra.mxu1 %v6767_v40  ;;  %9368 = vst [vmem:[#allocation90_spill] sm:$0xff] %v6783_v44  ;;  %1840 = vmatpush2.msra.mxu0 %v6783_v44  ;;  %v6789_v40 = vld [vmem:[#allocation9 + $0x418] sm:$0xff]  ;;  %9373 = vst [vmem:[#allocation97_spill] sm:$0xff] %v6797_v48  ;;  %v6803_v44 = vld [vmem:[#allocation9 + $0x420] sm:$0xff] }
 0x24a   : > { %1908 = vmatprep.subr.mxu1 %v6773_v36  ;;  %9370 = vst [vmem:[#allocation92_spill] sm:$0xff] %v6789_v40  ;;  %1841 = vmatprep.subr.mxu0 %v6789_v40  ;;  %v6795_v36 = vld [vmem:[#allocation9 + $0x410] sm:$0xff]  ;;  %9375 = vst [vmem:[#allocation99_spill] sm:$0xff] %v6803_v44  ;;  %v6809_v40 = vld [vmem:[#allocation9 + $0x400] sm:$0xff] }
 0x24b   : > { %1909 = vmatpush2.msra.mxu1 %v6779_v39  ;;  %9372 = vst [vmem:[#allocation96_spill] sm:$0xff] %v6795_v36  ;;  %1842 = vmatpush2.msra.mxu0 %v6795_v36  ;;  %v6801_v39 = vld [vmem:[#allocation9 + $0x3f0] sm:$0xff]  ;;  %9377 = vst [vmem:[#allocation101_spill] sm:$0xff] %v6809_v40  ;;  %v6815_v36 = vld [vmem:[#allocation9 + $0x3f8] sm:$0xff] }
 0x24c   : > { %1910 = vmatprep.subr.mxu1 %v6785_v55  ;;  %9374 = vst [vmem:[#allocation98_spill] sm:$0xff] %v6801_v39  ;;  %1843 = vmatprep.subr.mxu0 %v6801_v39  ;;  %v6807_v55 = vld [vmem:[#allocation9 + $0x3e8] sm:$0xff]  ;;  %9379 = vst [vmem:[#allocation103_spill] sm:$0xff] %v6815_v36  ;;  %v6821_v39 = vld [vmem:[#allocation9 + $0x3d8] sm:$0xff] }
 0x24d   : > { %1911 = vmatpush2.msra.mxu1 %v6791_v9  ;;  %9376 = vst [vmem:[#allocation100_spill] sm:$0xff] %v6807_v55  ;;  %1844 = vmatpush2.msra.mxu0 %v6807_v55  ;;  %v6813_v9 = vld [vmem:[#allocation9 + $0x3c8] sm:$0xff]  ;;  %9381 = vst [vmem:[#allocation105_spill] sm:$0xff] %v6821_v39  ;;  %v6827_v55 = vld [vmem:[#allocation9 + $0x3d0] sm:$0xff] }
 0x24e   : > { %1912 = vmatprep.subr.mxu1 %v6797_v48  ;;  %9378 = vst [vmem:[#allocation102_spill] sm:$0xff] %v6813_v9  ;;  %1845 = vmatprep.subr.mxu0 %v6813_v9  ;;  %v6819_v48 = vld [vmem:[#allocation9 + $0x3c0] sm:$0xff]  ;;  %9383 = vst [vmem:[#allocation107_spill] sm:$0xff] %v6827_v55  ;;  %v6833_v9 = vld [vmem:[#allocation9 + $0x3b0] sm:$0xff] }
 0x24f   : > { %1913 = vmatpush2.msra.mxu1 %v6803_v44  ;;  %9380 = vst [vmem:[#allocation104_spill] sm:$0xff] %v6819_v48  ;;  %1846 = vmatpush2.msra.mxu0 %v6819_v48  ;;  %v6825_v44 = vld [vmem:[#allocation9 + $0x3a0] sm:$0xff]  ;;  %9385 = vst [vmem:[#allocation109_spill] sm:$0xff] %v6833_v9  ;;  %v6839_v48 = vld [vmem:[#allocation9 + $0x3a8] sm:$0xff] }
 0x250   : > { %1914 = vmatprep.subr.mxu1 %v6809_v40  ;;  %9382 = vst [vmem:[#allocation106_spill] sm:$0xff] %v6825_v44  ;;  %1847 = vmatprep.subr.mxu0 %v6825_v44  ;;  %v6831_v40 = vld [vmem:[#allocation9 + $0x398] sm:$0xff]  ;;  %9387 = vst [vmem:[#allocation111_spill] sm:$0xff] %v6839_v48  ;;  %v6845_v44 = vld [vmem:[#allocation9 + $0x388] sm:$0xff] }
 0x251   : > { %1915 = vmatpush2.msra.mxu1 %v6815_v36  ;;  %9384 = vst [vmem:[#allocation108_spill] sm:$0xff] %v6831_v40  ;;  %1848 = vmatpush2.msra.mxu0 %v6831_v40  ;;  %v6837_v36 = vld [vmem:[#allocation9 + $0x378] sm:$0xff]  ;;  %9389 = vst [vmem:[#allocation113_spill] sm:$0xff] %v6845_v44  ;;  %v6851_v40 = vld [vmem:[#allocation9 + $0x380] sm:$0xff] }
 0x252   : > { %1916 = vmatprep.subr.mxu1 %v6821_v39  ;;  %9386 = vst [vmem:[#allocation110_spill] sm:$0xff] %v6837_v36  ;;  %1849 = vmatprep.subr.mxu0 %v6837_v36  ;;  %v6843_v39 = vld [vmem:[#allocation9 + $0x370] sm:$0xff]  ;;  %9391 = vst [vmem:[#allocation115_spill] sm:$0xff] %v6851_v40  ;;  %v6857_v36 = vld [vmem:[#allocation9 + $0x360] sm:$0xff] }
 0x253   : > { %1917 = vmatpush2.msra.mxu1 %v6827_v55  ;;  %9388 = vst [vmem:[#allocation112_spill] sm:$0xff] %v6843_v39  ;;  %1850 = vmatpush2.msra.mxu0 %v6843_v39  ;;  %v6849_v55 = vld [vmem:[#allocation9 + $0x350] sm:$0xff]  ;;  %9393 = vst [vmem:[#allocation117_spill] sm:$0xff] %v6857_v36  ;;  %v6863_v39 = vld [vmem:[#allocation9 + $0x358] sm:$0xff] }
 0x254   : > { %1918 = vmatprep.subr.mxu1 %v6833_v9  ;;  %9390 = vst [vmem:[#allocation114_spill] sm:$0xff] %v6849_v55  ;;  %1851 = vmatprep.subr.mxu0 %v6849_v55  ;;  %v6855_v9 = vld [vmem:[#allocation9 + $0x348] sm:$0xff]  ;;  %9395 = vst [vmem:[#allocation119_spill] sm:$0xff] %v6863_v39  ;;  %v6869_v55 = vld [vmem:[#allocation9 + $0x338] sm:$0xff] }
 0x255   : > { %1919 = vmatpush2.msra.mxu1 %v6839_v48  ;;  %9392 = vst [vmem:[#allocation116_spill] sm:$0xff] %v6855_v9  ;;  %1852 = vmatpush2.msra.mxu0 %v6855_v9  ;;  %v6861_v48 = vld [vmem:[#allocation9 + $0x328] sm:$0xff]  ;;  %9397 = vst [vmem:[#allocation121_spill] sm:$0xff] %v6869_v55  ;;  %v6875_v9 = vld [vmem:[#allocation9 + $0x330] sm:$0xff] }
 0x256   : > { %1920 = vmatprep.subr.mxu1 %v6845_v44  ;;  %9394 = vst [vmem:[#allocation118_spill] sm:$0xff] %v6861_v48  ;;  %1853 = vmatprep.subr.mxu0 %v6861_v48  ;;  %v6867_v44 = vld [vmem:[#allocation9 + $0x320] sm:$0xff]  ;;  %9399 = vst [vmem:[#allocation123_spill] sm:$0xff] %v6875_v9  ;;  %v6881_v48 = vld [vmem:[#allocation9 + $0x310] sm:$0xff] }
 0x257   : > { %1921 = vmatpush2.msra.mxu1 %v6851_v40  ;;  %9396 = vst [vmem:[#allocation120_spill] sm:$0xff] %v6867_v44  ;;  %1854 = vmatpush2.msra.mxu0 %v6867_v44  ;;  %v6873_v40 = vld [vmem:[#allocation9 + $0x300] sm:$0xff]  ;;  %9401 = vst [vmem:[#allocation125_spill] sm:$0xff] %v6881_v48  ;;  %v6887_v44 = vld [vmem:[#allocation9 + $0x308] sm:$0xff] }
 0x258   : > { %1922 = vmatprep.subr.mxu1 %v6857_v36  ;;  %9398 = vst [vmem:[#allocation122_spill] sm:$0xff] %v6873_v40  ;;  %1855 = vmatprep.subr.mxu0 %v6873_v40  ;;  %v6879_v36 = vld [vmem:[#allocation9 + $0x2f8] sm:$0xff]  ;;  %9403 = vst [vmem:[#allocation127_spill] sm:$0xff] %v6887_v44  ;;  %v6893_v40 = vld [vmem:[#allocation9 + $0x2e8] sm:$0xff] }
 0x259   : > { %1923 = vmatpush2.msra.mxu1 %v6863_v39  ;;  %9400 = vst [vmem:[#allocation124_spill] sm:$0xff] %v6879_v36  ;;  %1856 = vmatpush2.msra.mxu0 %v6879_v36  ;;  %v6885_v39 = vld [vmem:[#allocation9 + $0x2d8] sm:$0xff]  ;;  %9405 = vst [vmem:[#allocation129_spill] sm:$0xff] %v6893_v40  ;;  %v6899_v36 = vld [vmem:[#allocation9 + $0x2e0] sm:$0xff] }
 0x25a   : > { %1924 = vmatprep.subr.mxu1 %v6869_v55  ;;  %9402 = vst [vmem:[#allocation126_spill] sm:$0xff] %v6885_v39  ;;  %1857 = vmatprep.subr.mxu0 %v6885_v39  ;;  %v6891_v55 = vld [vmem:[#allocation9 + $0x2d0] sm:$0xff]  ;;  %9407 = vst [vmem:[#allocation131_spill] sm:$0xff] %v6899_v36  ;;  %v6905_v39 = vld [vmem:[#allocation9 + $0x2c0] sm:$0xff] }
 0x25b   : > { %1925 = vmatpush2.msra.mxu1 %v6875_v9  ;;  %9404 = vst [vmem:[#allocation128_spill] sm:$0xff] %v6891_v55  ;;  %1858 = vmatpush2.msra.mxu0 %v6891_v55  ;;  %v6897_v9 = vld [vmem:[#allocation9 + $0x2b0] sm:$0xff]  ;;  %9409 = vst [vmem:[#allocation133_spill] sm:$0xff] %v6905_v39  ;;  %v6911_v55 = vld [vmem:[#allocation9 + $0x2b8] sm:$0xff] }
 0x25c   : > { %1926 = vmatprep.subr.mxu1 %v6881_v48  ;;  %9406 = vst [vmem:[#allocation130_spill] sm:$0xff] %v6897_v9  ;;  %1859 = vmatprep.subr.mxu0 %v6897_v9  ;;  %v6903_v48 = vld [vmem:[#allocation9 + $0x2a8] sm:$0xff]  ;;  %9411 = vst [vmem:[#allocation135_spill] sm:$0xff] %v6911_v55  ;;  %v6917_v9 = vld [vmem:[#allocation9 + $0x298] sm:$0xff] }
 0x25d   : > { %1927 = vmatpush2.msra.mxu1 %v6887_v44  ;;  %9408 = vst [vmem:[#allocation132_spill] sm:$0xff] %v6903_v48  ;;  %1860 = vmatpush2.msra.mxu0 %v6903_v48  ;;  %v6909_v44 = vld [vmem:[#allocation9 + $0x288] sm:$0xff]  ;;  %9413 = vst [vmem:[#allocation137_spill] sm:$0xff] %v6917_v9  ;;  %v6923_v48 = vld [vmem:[#allocation9 + $0x4f8] sm:$0xff] }
 0x25e   : > { %1928 = vmatprep.subr.mxu1 %v6893_v40  ;;  %9410 = vst [vmem:[#allocation134_spill] sm:$0xff] %v6909_v44  ;;  %1861 = vmatprep.subr.mxu0 %v6909_v44  ;;  %v6915_v40 = vld [vmem:[#allocation9 + $0x280] sm:$0xff]  ;;  %9415 = vst [vmem:[#allocation139_spill] sm:$0xff] %v6923_v48 }
 0x25f   : > { %1929 = vmatpush2.msra.mxu1 %v6899_v36  ;;  %9412 = vst [vmem:[#allocation136_spill] sm:$0xff] %v6915_v40  ;;  %1862 = vmatpush2.msra.mxu0 %v6915_v40  ;;  %v6921_v36 = vld [vmem:[#allocation9 + $0x290] sm:$0xff]  ;;  %v533_v40 = vadd.f32 %v6414_v43, %v6477_v11 }
 0x260   : > { %1930 = vmatprep.subr.mxu1 %v6905_v39  ;;  %9414 = vst [vmem:[#allocation138_spill] sm:$0xff] %v6921_v36  ;;  %4775 = vmatprep.subr.mxu0 %v6923_v48 }
 0x261   : > { %1931 = vmatpush2.msra.mxu1 %v6911_v55 }
 0x262   : > { %1932 = vmatprep.subr.mxu1 %v6917_v9 }
 0x263   : > { %1933 = vmatpush2.msra.mxu1 %v6921_v36 }
 0x264   : > { %2272 = vmatprep.subr.mxu1 %v6540_v31 }
 0x2c3   : > { %v1392_v39 = vpop.f32.mrf.mxu1  ;;  %v1463_v44 = vpop.f32.mrf.mxu0 }
 0x2c4   : > { %v1538_v55 = vadd.f32 %v6467_v21, %v1392_v39  ;;  %v1540_v54 = vadd.f32 %v1463_v44, %v533_v40  ;;  %v644_v21 = vadd.f32 %v6416_v29, %v6483_v15 }
 0x2c5   : > { %v1394_v9 = vpop.f32.mrf.mxu1  ;;  %v1465_v31 = vpop.f32.mrf.mxu0 }
 0x2c6   : > { %1863 = vmatprep.mubr.f32.mxu0 %v1538_v55  ;;  %1934 = vmatprep.mubr.f32.mxu1 %v1538_v55  ;;  %v1539_v28 = vadd.f32 %v1394_v9, %v531_v32  ;;  %v4649_v36 = vmul.f32 -1.442695, %v1540_v54  ;;  %v1541_v39 = vadd.f32 %v1465_v31, %v644_v21  ;;  %v6953_v31 = vld [vmem:[#allocation9 + $0x250] sm:$0xff]  ;;  %v6956_v21 = vld [vmem:[#allocation9 + $0x4a8] sm:$0xff] }
 0x2c8   : > { %v4648_v0 = vmul.f32 -1.442695, %v1539_v28  ;;  %5142 = vpow2.f32 %v4649_v36  ;;  %v4650_v61 = vmul.f32 -1.442695, %v1541_v39 }
 0x2ca   : > { %5144 = vpow2.f32 %v4648_v0 }
 0x2cb   : > { %5146 = vpow2.f32 %v4650_v61  ;;  %v6945_v61 = vld [vmem:[#allocation9 + $0x4d0] sm:$0xff] }
 0x2d5   : > { %v5143_v48 = vpop.eup %5142 }
 0x2d6   : > { %v1553_v43 = vadd.f32 1.0, %v5143_v48 }
 0x2d7   : > { %v5145_v24 = vpop.eup %5144 }
 0x2d8   : > { %v1552_v11 = vadd.f32 1.0, %v5145_v24  ;;  %5148 = vrcp.f32 %v1553_v43  ;;  %v5147_v36 = vpop.eup %5146 }
 0x2d9   : > { %v1554_v9 = vadd.f32 1.0, %v5147_v36 }
 0x2da   : > { %5150 = vrcp.f32 %v1552_v11  ;;  %v6943_v11 = vld [vmem:[#allocation9 + $0x278] sm:$0xff] }
 0x2e4   : > { %v4772_v20 = vpop.f32.mrf.mxu1 }
 0x2e5   : > { %v5149_v40 = vpop.eup %5148 }
 0x2e6   : > { %v4773_v57 = vpop.f32.mrf.mxu1  ;;  %v1563_v54 = vmul.f32 %v5149_v40, %v6490_v56 }
 0x2e7   : > { %v4774_v32 = vadd.f32 %v4773_v57, %v4772_v20  ;;  %v5151_v29 = vpop.eup %5150 }
 0x2e9   : > { %v1542_v28 = vadd.f32 %v4774_v32, %v646_v37  ;;  %v6962_v32 = vld [vmem:[#allocation9 + $0x228] sm:$0xff] }
 0x2eb   : > { %5152 = vtanh.f32 %v1542_v28  ;;  %v6966_v28 = vld [vmem:[#allocation9 + $0x480] sm:$0xff] }
 0x2ec   : > { %5154 = vrcp.f32 %v1554_v9 }
 0x2f8   : > { %v5153_v44 = vpop.eup %5152 }
 0x2f9   : > { %v1564_v0 = vmul.f32 %v5153_v44, %v5151_v29  ;;  %v5155_v47 = vpop.eup %5154  ;;  %v6974_v44 = vld [vmem:[#allocation9 + $0x200] sm:$0xff] }
 0x2fb   : > { %v6938_v48 = vadd.f32 %v1564_v0, %v1563_v54  ;;  %v6984_v0 = vld [vmem:[#allocation9 + $0x1d8] sm:$0xff] }
 0x2fd   : > { %5156 = vtanh.f32 %v6938_v48 }
 0x30a   : > { %v5157_v20 = vpop.eup %5156 }
 0x30b   : > { %v6941_v24 = vmul.f32 %v5157_v20, %v5155_v47  ;;  %v6988_v47 = vld [vmem:[#allocation9 + $0x430] sm:$0xff] }
 0x30c   : > { %v6994_v20 = vld [vmem:[#allocation9 + $0x1b0] sm:$0xff] }
 0x30d   : > { %v1572_v57 = vcombine.high %v6941_v24, %v6941_v24  ;;  %v1579_v56 = vrot.slane %v6941_v24, %v6493_v23  ;;  %1864 = vmatmul.mubr.f32.vlgmr.msra.gmra.mxu0 %v6941_v24  ;;  %1935 = vmatmul.mubr.f32.vlgmr.msra.gmra.mxu1 %v6941_v24 }
 0x30e   : > { %4776 = vmatpush3.msra.mxu0 %v6943_v11  ;;  %2005 = vmatprep.mubr.f32.mxu0 %v1538_v55 }
 0x30f   : > { %v1586_v39 = vrot.slane %v1572_v57, %v6493_v23  ;;  %v1587_v43 = vcombine.high %v1579_v56, %v1579_v56  ;;  %v1595_v37 = vrot.slane %v1579_v56, %v6493_v23  ;;  %4651 = vst.sshfl [vmem:[%s5769_s10 + $0x1] sm:$0x1 pattern:$0x73625140] %v1579_v56  ;;  %4777 = vmatprep.subr.mxu0 %v6945_v61  ;;  %v6998_v57 = vld [vmem:[#allocation9 + $0x408] sm:$0xff]  ;;  %v9432_v56 = vld [vmem:[#allocation90_spill] sm:$0xff] }
 0x310   : > { %2273 = vmatpush1.msra.mxu1 %v6543_v35  ;;  %4778 = vmatpush3.msra.mxu0 %v6953_v31  ;;  %v6977_v35 = vld [vmem:[#allocation9 + $0x458] sm:$0xff] }
 0x311   : > { %2274 = vmatprep.subr.mxu1 %v6549_v49  ;;  %v1588_v55 = vcombine.high %v1586_v39, %v1586_v39  ;;  %v1602_v36 = vrot.slane %v1586_v39, %v6493_v23  ;;  %v1609_v40 = vrot.slane %v1587_v43, %v6493_v23  ;;  %v1617_v29 = vcombine.high %v1595_v37, %v1595_v37  ;;  %v9435_v37 = vld [vmem:[#allocation87_spill] sm:$0xff] }
 0x312   : > { %4652 = vst.sshfl [vmem:[%s5769_s10 + $0x9] sm:$0x1 pattern:$0x73625140] %v1587_v43  ;;  %4779 = vmatprep.subr.mxu0 %v6956_v21  ;;  %2275 = vmatpush1.msra.mxu1 %v6555_v6  ;;  %v9434_v43 = vld [vmem:[#allocation92_spill] sm:$0xff] }
 0x313   : > { %4653 = vst.sshfl [vmem:[%s5769_s10 + $0x21] sm:$0x1 pattern:$0x73625140] %v1586_v39  ;;  %4780 = vmatpush3.msra.mxu0 %v6962_v32  ;;  %v1616_v49 = vrot.slane %v1588_v55, %v6493_v23  ;;  %v1618_v9 = vcombine.high %v1602_v36, %v1602_v36  ;;  %v1619_v54 = vcombine.high %v1609_v40, %v1609_v40  ;;  %1631 = vst [vmem:[%s5769_s10 + $0x11] sm:$0x1] %v1617_v29 }
 0x314   : > { %4654 = vst.sshfl [vmem:[%s5769_s10 + $0x29] sm:$0x1 pattern:$0x73625140] %v1588_v55  ;;  %4781 = vmatprep.subr.mxu0 %v6966_v28  ;;  %2276 = vmatprep.subr.mxu1 %v6561_v10  ;;  %v7003_v10 = vld [vmem:[#allocation9 + $0x188] sm:$0xff]  ;;  %v9433_v39 = vld [vmem:[#allocation40_spill] sm:$0xff] }
 0x315   : > { %4782 = vmatpush3.msra.mxu0 %v6974_v44  ;;  %2277 = vmatpush1.msra.mxu1 %v6567_v14  ;;  %v1620_v6 = vcombine.high %v1616_v49, %v1616_v49  ;;  %1632 = vst [vmem:[%s5769_s10 + $0x19] sm:$0x1] %v1619_v54  ;;  %1635 = vst [vmem:[%s5769_s10 + $0x31] sm:$0x1] %v1618_v9  ;;  %v7007_v14 = vld [vmem:[#allocation9 + $0x3e0] sm:$0xff]  ;;  %v9437_v36 = vld [vmem:[#allocation41_spill] sm:$0xff] }
 0x316   : > { %4783 = vmatprep.subr.mxu0 %v6977_v35  ;;  %2278 = vmatprep.subr.mxu1 %v6573_v18  ;;  %v7011_v18 = vld [vmem:[#allocation9 + $0x160] sm:$0xff]  ;;  %v9438_v40 = vld [vmem:[#allocation98_spill] sm:$0xff]  ;;  %v9439_v29 = vld [vmem:[#allocation89_spill] sm:$0xff] }
 0x317   : > { %4784 = vmatpush3.msra.mxu0 %v6984_v0  ;;  %2279 = vmatpush1.msra.mxu1 %v6579_v22  ;;  %1636 = vst [vmem:[%s5769_s10 + $0x39] sm:$0x1] %v1620_v6  ;;  %v7015_v22 = vld [vmem:[#allocation9 + $0x3b8] sm:$0xff]  ;;  %v9436_v55 = vld [vmem:[#allocation96_spill] sm:$0xff]  ;;  %v9441_v9 = vld [vmem:[#allocation42_spill] sm:$0xff] }
 0x318   : > { %4785 = vmatprep.subr.mxu0 %v6988_v47  ;;  %2280 = vmatprep.subr.mxu1 %v6585_v26  ;;  %v7019_v26 = vld [vmem:[#allocation9 + $0x138] sm:$0xff]  ;;  %v9440_v49 = vld [vmem:[#allocation100_spill] sm:$0xff]  ;;  %v9442_v54 = vld [vmem:[#allocation102_spill] sm:$0xff] }
 0x319   : > { %4786 = vmatpush3.msra.mxu0 %v6994_v20  ;;  %2281 = vmatpush1.msra.mxu1 %v6591_v30  ;;  %v7023_v30 = vld [vmem:[#allocation9 + $0x390] sm:$0xff]  ;;  %v9443_v6 = vld [vmem:[#allocation43_spill] sm:$0xff] }
 0x31a   : > { %4787 = vmatprep.subr.mxu0 %v6998_v57  ;;  %2282 = vmatprep.subr.mxu1 %v6597_v34  ;;  %v7027_v34 = vld [vmem:[#allocation9 + $0x110] sm:$0xff] }
 0x31b   : > { %4788 = vmatpush3.msra.mxu0 %v7003_v10  ;;  %2283 = vmatpush1.msra.mxu1 %v6603_v38  ;;  %v7031_v38 = vld [vmem:[#allocation9 + $0x368] sm:$0xff] }
 0x31c   : > { %4789 = vmatprep.subr.mxu0 %v7007_v14  ;;  %2284 = vmatprep.subr.mxu1 %v6609_v42  ;;  %v7035_v42 = vld [vmem:[#allocation9 + $0xe8] sm:$0xff] }
 0x31d   : > { %4790 = vmatpush3.msra.mxu0 %v7011_v18  ;;  %2285 = vmatpush1.msra.mxu1 %v6615_v46  ;;  %v7039_v46 = vld [vmem:[#allocation9 + $0x340] sm:$0xff] }
 0x31e   : > { %4791 = vmatprep.subr.mxu0 %v7015_v22  ;;  %2286 = vmatprep.subr.mxu1 %v6621_v50  ;;  %v7043_v50 = vld [vmem:[#allocation9 + $0xc0] sm:$0xff] }
 0x31f   : > { %4792 = vmatpush3.msra.mxu0 %v7019_v26  ;;  %2287 = vmatpush1.msra.mxu1 %v6627_v2  ;;  %v7047_v2 = vld [vmem:[#allocation9 + $0x318] sm:$0xff] }
 0x320   : > { %4793 = vmatprep.subr.mxu0 %v7023_v30  ;;  %2288 = vmatprep.subr.mxu1 %v6633_v5  ;;  %v7051_v5 = vld [vmem:[#allocation9 + $0x98] sm:$0xff] }
 0x321   : > { %4794 = vmatpush3.msra.mxu0 %v7027_v34  ;;  %2289 = vmatpush1.msra.mxu1 %v6639_v53  ;;  %v7055_v53 = vld [vmem:[#allocation9 + $0x2f0] sm:$0xff] }
 0x322   : > { %4795 = vmatprep.subr.mxu0 %v7031_v38  ;;  %2290 = vmatprep.subr.mxu1 %v6645_v7  ;;  %v7059_v7 = vld [vmem:[#allocation9 + $0x70] sm:$0xff] }
 0x323   : > { %4796 = vmatpush3.msra.mxu0 %v7035_v42  ;;  %2291 = vmatpush1.msra.mxu1 %v6651_v62  ;;  %v7063_v62 = vld [vmem:[#allocation9 + $0x2c8] sm:$0xff] }
 0x324   : > { %4797 = vmatprep.subr.mxu0 %v7039_v46  ;;  %2292 = vmatprep.subr.mxu1 %v6657_v58  ;;  %v7067_v58 = vld [vmem:[#allocation9 + $0x48] sm:$0xff] }
 0x325   : > { %4798 = vmatpush3.msra.mxu0 %v7043_v50  ;;  %2293 = vmatpush1.msra.mxu1 %v6663_v60  ;;  %v7071_v60 = vld [vmem:[#allocation9 + $0x2a0] sm:$0xff] }
 0x326   : > { %4799 = vmatprep.subr.mxu0 %v7047_v2  ;;  %2294 = vmatprep.subr.mxu1 %v6669_v17  ;;  %v7075_v17 = vld [vmem:[#allocation9 + $0x20] sm:$0xff] }
 0x327   : > { %4800 = vmatpush3.msra.mxu0 %v7051_v5  ;;  %2295 = vmatpush1.msra.mxu1 %v6675_v51  ;;  %v9417_v51 = vld [vmem:[#allocation36_spill] sm:$0xff] }
 0x328   : > { %4801 = vmatprep.subr.mxu0 %v7055_v53  ;;  %2296 = vmatprep.subr.mxu1 %v6681_v1  ;;  %v9427_v1 = vld [vmem:[#allocation83_spill] sm:$0xff] }
 0x329   : > { %4802 = vmatpush3.msra.mxu0 %v7059_v7  ;;  %2297 = vmatpush1.msra.mxu1 %v6687_v4  ;;  %v9429_v4 = vld [vmem:[#allocation39_spill] sm:$0xff] }
 0x32a   : > { %4803 = vmatprep.subr.mxu0 %v7063_v62  ;;  %2298 = vmatprep.subr.mxu1 %v6693_v45  ;;  %v9416_v45 = vld [vmem:[#allocation58_spill] sm:$0xff] }
 0x32b   : > { %4804 = vmatpush3.msra.mxu0 %v7067_v58  ;;  %2299 = vmatpush1.msra.mxu1 %v6699_v13  ;;  %v9418_v13 = vld [vmem:[#allocation62_spill] sm:$0xff] }
 0x32c   : > { %4805 = vmatprep.subr.mxu0 %v7071_v60  ;;  %2300 = vmatprep.subr.mxu1 %v6705_v59  ;;  %v9428_v59 = vld [vmem:[#allocation82_spill] sm:$0xff] }
 0x32d   : > { %4806 = vmatpush3.msra.mxu0 %v7075_v17  ;;  %2301 = vmatpush1.msra.mxu1 %v6711_v33  ;;  %v9430_v33 = vld [vmem:[#allocation86_spill] sm:$0xff] }
 0x32e   : > { %2006 = vmatmul.mubr.f32.vlgmr.msra.gmra.mxu0 %v6941_v24  ;;  %2343 = vmatprep.subr.mxu0 %v6545_v63  ;;  %v9419_v63 = vld [vmem:[#allocation79_spill] sm:$0xff]  ;;  %v9431_v24 = vld [vmem:[#allocation85_spill] sm:$0xff] }
 0x32f   : > { %2344 = vmatpush1.msra.mxu0 %v6551_v3  ;;  %2302 = vmatprep.subr.mxu1 %v6717_v52  ;;  %v9420_v3 = vld [vmem:[#allocation66_spill] sm:$0xff]  ;;  %v9421_v52 = vld [vmem:[#allocation37_spill] sm:$0xff] }
 0x330   : > { %2345 = vmatprep.subr.mxu0 %v6557_v8  ;;  %2303 = vmatpush1.msra.mxu1 %v6723_v41  ;;  %v9422_v8 = vld [vmem:[#allocation70_spill] sm:$0xff]  ;;  %v9423_v41 = vld [vmem:[#allocation81_spill] sm:$0xff] }
 0x331   : > { %2346 = vmatpush1.msra.mxu0 %v6563_v12  ;;  %2304 = vmatprep.subr.mxu1 %v6729_v25  ;;  %v9424_v12 = vld [vmem:[#allocation74_spill] sm:$0xff] }
 0x332   : > { %2347 = vmatprep.subr.mxu0 %v6569_v16  ;;  %2305 = vmatpush2.msra.mxu1 %v9416_v45  ;;  %v9425_v25 = vld [vmem:[#allocation38_spill] sm:$0xff]  ;;  %v9444_v45 = vld [vmem:[#allocation104_spill] sm:$0xff] }
 0x333   : > { %2348 = vmatpush1.msra.mxu0 %v9417_v51  ;;  %2306 = vmatprep.subr.mxu1 %v9418_v13  ;;  %v9426_v16 = vld [vmem:[#allocation78_spill] sm:$0xff]  ;;  %v9445_v51 = vld [vmem:[#allocation44_spill] sm:$0xff] }
 0x334   : > { %2349 = vmatprep.subr.mxu0 %v9419_v63  ;;  %2307 = vmatpush2.msra.mxu1 %v9420_v3  ;;  %v9446_v13 = vld [vmem:[#allocation106_spill] sm:$0xff]  ;;  %v9447_v63 = vld [vmem:[#allocation93_spill] sm:$0xff]  ;;  %v9448_v3 = vld [vmem:[#allocation108_spill] sm:$0xff] }
 0x335   : > { %2350 = vmatpush1.msra.mxu0 %v9421_v52  ;;  %2308 = vmatprep.subr.mxu1 %v9422_v8  ;;  %v9449_v52 = vld [vmem:[#allocation45_spill] sm:$0xff]  ;;  %v9450_v8 = vld [vmem:[#allocation110_spill] sm:$0xff] }
 0x336   : > { %2351 = vmatprep.subr.mxu0 %v9423_v41  ;;  %2309 = vmatpush2.msra.mxu1 %v9424_v12  ;;  %v9451_v41 = vld [vmem:[#allocation95_spill] sm:$0xff]  ;;  %v9452_v12 = vld [vmem:[#allocation112_spill] sm:$0xff] }
 0x337   : > { %2352 = vmatpush1.msra.mxu0 %v9425_v25  ;;  %2310 = vmatprep.subr.mxu1 %v9426_v16  ;;  %v9453_v25 = vld [vmem:[#allocation46_spill] sm:$0xff] }
 0x338   : > { %2353 = vmatprep.subr.mxu0 %v9427_v1  ;;  %2311 = vmatpush2.msra.mxu1 %v9428_v59  ;;  %v9454_v16 = vld [vmem:[#allocation114_spill] sm:$0xff]  ;;  %v9455_v1 = vld [vmem:[#allocation47_spill] sm:$0xff]  ;;  %v9456_v59 = vld [vmem:[#allocation116_spill] sm:$0xff] }
 0x339   : > { %2354 = vmatpush1.msra.mxu0 %v9429_v4  ;;  %2312 = vmatprep.subr.mxu1 %v9430_v33  ;;  %v9457_v4 = vld [vmem:[#allocation48_spill] sm:$0xff]  ;;  %v9458_v33 = vld [vmem:[#allocation118_spill] sm:$0xff] }
 0x33a   : > { %2355 = vmatprep.subr.mxu0 %v9431_v24  ;;  %2313 = vmatpush2.msra.mxu1 %v9432_v56  ;;  %v9459_v24 = vld [vmem:[#allocation49_spill] sm:$0xff]  ;;  %v9460_v56 = vld [vmem:[#allocation120_spill] sm:$0xff] }
 0x33b   : > { %2356 = vmatpush1.msra.mxu0 %v9433_v39  ;;  %2314 = vmatprep.subr.mxu1 %v9434_v43  ;;  %v9461_v39 = vld [vmem:[#allocation50_spill] sm:$0xff] }
 0x33c   : > { %2357 = vmatprep.subr.mxu0 %v9435_v37  ;;  %2315 = vmatpush2.msra.mxu1 %v9436_v55  ;;  %v9462_v43 = vld [vmem:[#allocation122_spill] sm:$0xff]  ;;  %v9463_v37 = vld [vmem:[#allocation51_spill] sm:$0xff]  ;;  %v9464_v55 = vld [vmem:[#allocation124_spill] sm:$0xff] }
 0x33d   : > { %2358 = vmatpush1.msra.mxu0 %v9437_v36  ;;  %2316 = vmatprep.subr.mxu1 %v9438_v40  ;;  %v9465_v36 = vld [vmem:[#allocation52_spill] sm:$0xff]  ;;  %v9466_v40 = vld [vmem:[#allocation126_spill] sm:$0xff] }
 0x33e   : > { %2359 = vmatprep.subr.mxu0 %v9439_v29  ;;  %2317 = vmatpush2.msra.mxu1 %v9440_v49  ;;  %v9467_v29 = vld [vmem:[#allocation54_spill] sm:$0xff]  ;;  %v9468_v49 = vld [vmem:[#allocation128_spill] sm:$0xff] }
 0x33f   : > { %2360 = vmatpush1.msra.mxu0 %v9441_v9  ;;  %2318 = vmatprep.subr.mxu1 %v9442_v54  ;;  %v9469_v9 = vld [vmem:[#allocation56_spill] sm:$0xff]  ;;  %v9470_v54 = vld [vmem:[#allocation130_spill] sm:$0xff] }
 0x340   : > { %2361 = vmatprep.subr.mxu0 %v9443_v6  ;;  %2319 = vmatpush2.msra.mxu1 %v9444_v45  ;;  %v9471_v6 = vld [vmem:[#allocation60_spill] sm:$0xff] }
 0x341   : > { %2362 = vmatpush1.msra.mxu0 %v9445_v51  ;;  %2320 = vmatprep.subr.mxu1 %v9446_v13  ;;  %v9472_v45 = vld [vmem:[#allocation132_spill] sm:$0xff]  ;;  %v9474_v13 = vld [vmem:[#allocation134_spill] sm:$0xff] }
 0x342   : > { %2363 = vmatprep.subr.mxu0 %v9447_v63  ;;  %2321 = vmatpush2.msra.mxu1 %v9448_v3  ;;  %v9473_v51 = vld [vmem:[#allocation64_spill] sm:$0xff] }
 0x343   : > { %2364 = vmatpush1.msra.mxu0 %v9449_v52  ;;  %2322 = vmatprep.subr.mxu1 %v9450_v8  ;;  %v9475_v63 = vld [vmem:[#allocation68_spill] sm:$0xff]  ;;  %v9478_v8 = vld [vmem:[#allocation139_spill] sm:$0xff] }
 0x344   : > { %2365 = vmatprep.subr.mxu0 %v9451_v41  ;;  %2323 = vmatpush2.msra.mxu1 %v9452_v12  ;;  %v9476_v3 = vld [vmem:[#allocation136_spill] sm:$0xff] }
 0x345   : > { %2366 = vmatpush1.msra.mxu0 %v9453_v25  ;;  %2324 = vmatprep.subr.mxu1 %v9454_v16  ;;  %v9477_v52 = vld [vmem:[#allocation72_spill] sm:$0xff] }
 0x346   : > { %2367 = vmatprep.subr.mxu0 %v9455_v1  ;;  %2325 = vmatpush2.msra.mxu1 %v9456_v59  ;;  %v9479_v41 = vld [vmem:[#allocation76_spill] sm:$0xff]  ;;  %v9483_v1 = vld [vmem:[#allocation91_spill] sm:$0xff]  ;;  %v9484_v59 = vld [vmem:[#allocation94_spill] sm:$0xff] }
 0x347   : > { %2368 = vmatpush1.msra.mxu0 %v9457_v4  ;;  %2326 = vmatprep.subr.mxu1 %v9458_v33  ;;  %v9480_v12 = vld [vmem:[#allocation80_spill] sm:$0xff]  ;;  %v9485_v4 = vld [vmem:[#allocation97_spill] sm:$0xff]  ;;  %v9486_v33 = vld [vmem:[#allocation99_spill] sm:$0xff] }
 0x348   : > { %2369 = vmatprep.subr.mxu0 %v9459_v24  ;;  %2327 = vmatpush2.msra.mxu1 %v9460_v56  ;;  %v9481_v25 = vld [vmem:[#allocation84_spill] sm:$0xff]  ;;  %v9487_v24 = vld [vmem:[#allocation101_spill] sm:$0xff]  ;;  %v9488_v56 = vld [vmem:[#allocation103_spill] sm:$0xff] }
 0x349   : > { %2370 = vmatpush1.msra.mxu0 %v9461_v39  ;;  %2328 = vmatprep.subr.mxu1 %v9462_v43  ;;  %v9482_v16 = vld [vmem:[#allocation88_spill] sm:$0xff]  ;;  %v9489_v39 = vld [vmem:[#allocation105_spill] sm:$0xff]  ;;  %v9490_v43 = vld [vmem:[#allocation107_spill] sm:$0xff] }
 0x34a   : > { %2371 = vmatprep.subr.mxu0 %v9463_v37  ;;  %2329 = vmatpush2.msra.mxu1 %v9464_v55  ;;  %v9491_v37 = vld [vmem:[#allocation109_spill] sm:$0xff]  ;;  %v9492_v55 = vld [vmem:[#allocation111_spill] sm:$0xff] }
 0x34b   : > { %2372 = vmatpush1.msra.mxu0 %v9465_v36  ;;  %2330 = vmatprep.subr.mxu1 %v9466_v40  ;;  %v9493_v36 = vld [vmem:[#allocation113_spill] sm:$0xff]  ;;  %v9494_v40 = vld [vmem:[#allocation115_spill] sm:$0xff] }
 0x34c   : > { %2373 = vmatprep.subr.mxu0 %v9467_v29  ;;  %2331 = vmatpush2.msra.mxu1 %v9468_v49  ;;  %v9495_v29 = vld [vmem:[#allocation117_spill] sm:$0xff]  ;;  %v9496_v49 = vld [vmem:[#allocation119_spill] sm:$0xff] }
 0x34d   : > { %2374 = vmatpush1.msra.mxu0 %v9469_v9  ;;  %2332 = vmatprep.subr.mxu1 %v9470_v54  ;;  %v9497_v9 = vld [vmem:[#allocation121_spill] sm:$0xff]  ;;  %v9498_v54 = vld [vmem:[#allocation123_spill] sm:$0xff] }
 0x34e   : > { %2375 = vmatprep.subr.mxu0 %v9471_v6  ;;  %2333 = vmatpush2.msra.mxu1 %v9472_v45  ;;  %v9499_v6 = vld [vmem:[#allocation125_spill] sm:$0xff]  ;;  %v9500_v45 = vld [vmem:[#allocation127_spill] sm:$0xff] }
 0x34f   : > { %2376 = vmatpush2.msra.mxu0 %v9473_v51  ;;  %2334 = vmatprep.subr.mxu1 %v9474_v13  ;;  %v9501_v51 = vld [vmem:[#allocation129_spill] sm:$0xff]  ;;  %v9502_v13 = vld [vmem:[#allocation131_spill] sm:$0xff] }
 0x350   : > { %2377 = vmatprep.subr.mxu0 %v9475_v63  ;;  %2335 = vmatpush2.msra.mxu1 %v9476_v3  ;;  %v9503_v63 = vld [vmem:[#allocation133_spill] sm:$0xff]  ;;  %v9504_v3 = vld [vmem:[#allocation135_spill] sm:$0xff] }
 0x351   : > { %2378 = vmatpush2.msra.mxu0 %v9477_v52  ;;  %4810 = vmatprep.subr.mxu1 %v9478_v8  ;;  %v9505_v52 = vld [vmem:[#allocation137_spill] sm:$0xff]  ;;  %v9506_v8 = vld [vmem:[#allocation138_spill] sm:$0xff] }
 0x352   : > { %2379 = vmatprep.subr.mxu0 %v9479_v41 }
 0x353   : > { %2380 = vmatpush2.msra.mxu0 %v9480_v12  ;;  %v7187_v12 = vld [vmem:[%s9320_s19] ss:$0 sm:$0xff] }
 0x354   : > { %2381 = vmatprep.subr.mxu0 %v9481_v25 }
 0x355   : > { %2382 = vmatpush2.msra.mxu0 %v9482_v16 }
 0x356   : > { %2383 = vmatprep.subr.mxu0 %v9483_v1  ;;  %v9507_v1 = vld [vmem:[#allocation77_spill] sm:$0xff] }
 0x357   : > { %2384 = vmatpush2.msra.mxu0 %v9484_v59  ;;  %v9508_v59 = vld [vmem:[#allocation24_spill] sm:$0xff] }
 0x358   : > { %2385 = vmatprep.subr.mxu0 %v9485_v4  ;;  %v539_v4 = vadd.f32 %v9508_v59, %v9507_v1 }
 0x359   : > { %2386 = vmatpush2.msra.mxu0 %v9486_v33 }
 0x35a   : > { %2387 = vmatprep.subr.mxu0 %v9487_v24  ;;  %v9509_v24 = vld [vmem:[#allocation53_spill] sm:$0xff] }
 0x35b   : > { %2388 = vmatpush2.msra.mxu0 %v9488_v56  ;;  %v537_v56 = vadd.f32 %v9509_v24, %v6479_v19 }
 0x35c   : > { %2389 = vmatprep.subr.mxu0 %v9489_v39 }
 0x35d   : > { %2390 = vmatpush2.msra.mxu0 %v9490_v43 }
 0x35e   : > { %2391 = vmatprep.subr.mxu0 %v9491_v37 }
 0x35f   : > { %2392 = vmatpush2.msra.mxu0 %v9492_v55 }
 0x360   : > { %2393 = vmatprep.subr.mxu0 %v9493_v36 }
 0x361   : > { %2394 = vmatpush2.msra.mxu0 %v9494_v40  ;;  %v9510_v40 = vld [vmem:[#allocation55_spill] sm:$0xff] }
 0x362   : > { %2395 = vmatprep.subr.mxu0 %v9495_v29  ;;  %v650_v29 = vadd.f32 %v9510_v40, %v6483_v15 }
 0x363   : > { %2396 = vmatpush2.msra.mxu0 %v9496_v49 }
 0x364   : > { %2397 = vmatprep.subr.mxu0 %v9497_v9 }
 0x365   : > { %2398 = vmatpush2.msra.mxu0 %v9498_v54 }
 0x366   : > { %2399 = vmatprep.subr.mxu0 %v9499_v6 }
 0x367   : > { %2400 = vmatpush2.msra.mxu0 %v9500_v45 }
 0x368   : > { %2401 = vmatprep.subr.mxu0 %v9501_v51 }
 0x369   : > { %2402 = vmatpush2.msra.mxu0 %v9502_v13 }
 0x36a   : > { %2403 = vmatprep.subr.mxu0 %v9503_v63 }
 0x36b   : > { %2404 = vmatpush2.msra.mxu0 %v9504_v3  ;;  %v9511_v3 = vld [vmem:[#allocation25_spill] sm:$0xff] }
 0x36c   : > { %2405 = vmatprep.subr.mxu0 %v9505_v52  ;;  %v652_v52 = vadd.f32 %v9511_v3, %v6486_v27  ;;  %v7336_v3 = vld [vmem:[#allocation9 + $0x158] sm:$0xff] }
 0x36d   : > { %2406 = vmatpush2.msra.mxu0 %v9506_v8  ;;  %9521 = vst [vmem:[#allocation38_spill] sm:$0xff] %v7336_v3 }
 0x3cd   : > { %v1865_v41 = vpop.f32.mrf.mxu0  ;;  %v1936_v16 = vpop.f32.mrf.mxu1 }
 0x3ce   : > { %v2011_v25 = vadd.f32 %v7187_v12, %v1865_v41  ;;  %v2013_v39 = vadd.f32 %v1936_v16, %v539_v4 }
 0x3cf   : > { %v1867_v33 = vpop.f32.mrf.mxu0  ;;  %v1938_v36 = vpop.f32.mrf.mxu1 }
 0x3d0   : > { %2336 = vmatprep.mubr.f32.mxu1 %v2011_v25  ;;  %2407 = vmatprep.mubr.f32.mxu0 %v2011_v25  ;;  %v2012_v43 = vadd.f32 %v1867_v33, %v537_v56  ;;  %v4656_v37 = vmul.f32 -1.442695, %v2013_v39  ;;  %v2014_v49 = vadd.f32 %v1938_v36, %v650_v29 }
 0x3d2   : > { %v4655_v55 = vmul.f32 -1.442695, %v2012_v43  ;;  %5158 = vpow2.f32 %v4656_v37  ;;  %v4657_v6 = vmul.f32 -1.442695, %v2014_v49 }
 0x3d4   : > { %5160 = vpow2.f32 %v4655_v55 }
 0x3d5   : > { %5162 = vpow2.f32 %v4657_v6 }
 0x3df   : > { %v5159_v9 = vpop.eup %5158 }
 0x3e0   : > { %v2026_v51 = vadd.f32 1.0, %v5159_v9 }
 0x3e1   : > { %v5161_v54 = vpop.eup %5160 }
 0x3e2   : > { %v2025_v13 = vadd.f32 1.0, %v5161_v54  ;;  %5164 = vrcp.f32 %v2026_v51  ;;  %v5163_v16 = vpop.eup %5162 }
 0x3e3   : > { %v2027_v24 = vadd.f32 1.0, %v5163_v16  ;;  %v7348_v16 = vld [vmem:[#allocation9 + $0x130] sm:$0xff] }
 0x3e4   : > { %5166 = vrcp.f32 %v2025_v13  ;;  %v7330_v13 = vld [vmem:[#allocation9 + $0x178] sm:$0xff]  ;;  %9523 = vst [vmem:[#allocation83_spill] sm:$0xff] %v7348_v16 }
 0x3e5   : > { %9520 = vst [vmem:[#allocation74_spill] sm:$0xff] %v7330_v13 }
 0x3ee   : > { %v4807_v45 = vpop.f32.mrf.mxu0 }
 0x3ef   : > { %v5165_v59 = vpop.eup %5164 }
 0x3f0   : > { %v4808_v63 = vpop.f32.mrf.mxu0  ;;  %v2036_v56 = vmul.f32 %v5165_v59, %v6938_v48  ;;  %v7352_v59 = vld [vmem:[#allocation9 + $0xf8] sm:$0xff] }
 0x3f1   : > { %v4809_v8 = vadd.f32 %v4808_v63, %v4807_v45  ;;  %v5167_v4 = vpop.eup %5166  ;;  %v7334_v63 = vld [vmem:[#allocation9 + $0x140] sm:$0xff] }
 0x3f3   : > { %v2015_v41 = vadd.f32 %v4809_v8, %v652_v52  ;;  %v7340_v52 = vld [vmem:[#allocation9 + $0x120] sm:$0xff]  ;;  %v7342_v8 = vld [vmem:[#allocation9 + $0x150] sm:$0xff] }
 0x3f4   : > { %9522 = vst [vmem:[#allocation78_spill] sm:$0xff] %v7342_v8 }
 0x3f5   : > { %5168 = vtanh.f32 %v2015_v41  ;;  %v7346_v41 = vld [vmem:[#allocation9 + $0x118] sm:$0xff] }
 0x3f6   : > { %5170 = vrcp.f32 %v2027_v24  ;;  %v7360_v24 = vld [vmem:[#allocation9 + $0x108] sm:$0xff] }
 0x3f7   : > { %9525 = vst [vmem:[#allocation39_spill] sm:$0xff] %v7360_v24 }
 0x402   : > { %v5169_v33 = vpop.eup %5168 }
 0x403   : > { %v2037_v39 = vmul.f32 %v5169_v33, %v5167_v4  ;;  %v5171_v37 = vpop.eup %5170  ;;  %v7354_v4 = vld [vmem:[#allocation9 + $0x128] sm:$0xff]  ;;  %v7358_v33 = vld [vmem:[#allocation9 + $0xf0] sm:$0xff] }
 0x404   : > { %9524 = vst [vmem:[#allocation82_spill] sm:$0xff] %v7354_v4 }
 0x405   : > { %v7199_v43 = vadd.f32 %v2037_v39, %v2036_v56  ;;  %v7364_v56 = vld [vmem:[#allocation9 + $0xd0] sm:$0xff]  ;;  %v7366_v39 = vld [vmem:[#allocation9 + $0x100] sm:$0xff] }
 0x406   : > { %9526 = vst [vmem:[#allocation86_spill] sm:$0xff] %v7366_v39 }
 0x407   : > { %5172 = vtanh.f32 %v7199_v43 }
 0x414   : > { %v5173_v55 = vpop.eup %5172 }
 0x415   : > { %v2040_v36 = vmul.f32 %v5173_v55, %v5171_v37  ;;  %v7370_v37 = vld [vmem:[#allocation9 + $0xc8] sm:$0xff]  ;;  %v7372_v55 = vld [vmem:[#allocation9 + $0xe0] sm:$0xff] }
 0x416   : > { %9527 = vst [vmem:[#allocation85_spill] sm:$0xff] %v7372_v55 }
 0x417   : > { %v2045_v40 = vcombine.high %v2040_v36, %v2040_v36  ;;  %v2052_v29 = vrot.slane %v2040_v36, %v6493_v23  ;;  %2337 = vmatmul.mubr.f32.vlgmr.msra.gmra.mxu1 %v2040_v36  ;;  %2408 = vmatmul.mubr.f32.vlgmr.msra.gmra.mxu0 %v2040_v36 }
 0x418   : > { %4811 = vmatpush3.msra.mxu1 %v6943_v11  ;;  %2478 = vmatprep.mubr.f32.mxu1 %v2011_v25 }
 0x419   : > { %v2059_v48 = vrot.slane %v2045_v40, %v6493_v23  ;;  %v2060_v49 = vcombine.high %v2052_v29, %v2052_v29  ;;  %v2068_v9 = vrot.slane %v2052_v29, %v6493_v23  ;;  %4658 = vst.sshfl [vmem:[%s5769_s10 + $0x2] sm:$0x1 pattern:$0x73625140] %v2052_v29  ;;  %4812 = vmatprep.subr.mxu1 %v6945_v61  ;;  %v7378_v40 = vld [vmem:[#allocation9 + $0xd8] sm:$0xff]  ;;  %v7382_v29 = vld [vmem:[#allocation9 + $0xa0] sm:$0xff] }
 0x41a   : > { %4813 = vmatpush3.msra.mxu1 %v6953_v31  ;;  %9528 = vst [vmem:[#allocation90_spill] sm:$0xff] %v7378_v40 }
 0x41b   : > { %v2061_v54 = vcombine.high %v2059_v48, %v2059_v48  ;;  %v2075_v6 = vrot.slane %v2059_v48, %v6493_v23  ;;  %v2082_v11 = vrot.slane %v2060_v49, %v6493_v23  ;;  %v2090_v25 = vcombine.high %v2068_v9, %v2068_v9  ;;  %4659 = vst.sshfl [vmem:[%s5769_s10 + $0xa] sm:$0x1 pattern:$0x73625140] %v2060_v49  ;;  %v7388_v49 = vld [vmem:[#allocation9 + $0x80] sm:$0xff]  ;;  %v7390_v9 = vld [vmem:[#allocation9 + $0xb0] sm:$0xff] }
 0x41c   : > { %4660 = vst.sshfl [vmem:[%s5769_s10 + $0x22] sm:$0x1 pattern:$0x73625140] %v2059_v48  ;;  %4814 = vmatprep.subr.mxu1 %v6956_v21  ;;  %v7247_v21 = vld [vmem:[#allocation9 + $0x260] sm:$0xff]  ;;  %v7384_v48 = vld [vmem:[#allocation9 + $0xb8] sm:$0xff] }
 0x41d   : > { %4815 = vmatpush3.msra.mxu1 %v6962_v32  ;;  %v2089_v45 = vrot.slane %v2061_v54, %v6493_v23  ;;  %v2091_v61 = vcombine.high %v2075_v6, %v2075_v6  ;;  %v2092_v51 = vcombine.high %v2082_v11, %v2082_v11  ;;  %2104 = vst [vmem:[%s5769_s10 + $0x12] sm:$0x1] %v2090_v25  ;;  %4661 = vst.sshfl [vmem:[%s5769_s10 + $0x2a] sm:$0x1 pattern:$0x73625140] %v2061_v54 }
 0x41e   : > { %4816 = vmatprep.subr.mxu1 %v6966_v28  ;;  %2745 = vmatprep.subr.mxu0 %v7247_v21  ;;  %v7250_v32 = vld [vmem:[#allocation9 + $0x258] sm:$0xff]  ;;  %v7252_v28 = vld [vmem:[#allocation9 + $0x270] sm:$0xff]  ;;  %9529 = vst [vmem:[#allocation40_spill] sm:$0xff] %v7384_v48  ;;  %9530 = vst [vmem:[#allocation92_spill] sm:$0xff] %v7390_v9 }
 0x41f   : > { %4817 = vmatpush3.msra.mxu1 %v6974_v44  ;;  %v2093_v31 = vcombine.high %v2089_v45, %v2089_v45  ;;  %2105 = vst [vmem:[%s5769_s10 + $0x1a] sm:$0x1] %v2092_v51  ;;  %2108 = vst [vmem:[%s5769_s10 + $0x32] sm:$0x1] %v2091_v61  ;;  %2746 = vmatpush1.msra.mxu0 %v7250_v32  ;;  %v7256_v44 = vld [vmem:[#allocation9 + $0x238] sm:$0xff]  ;;  %v7396_v6 = vld [vmem:[#allocation9 + $0x90] sm:$0xff] }
 0x420   : > { %4818 = vmatprep.subr.mxu1 %v6977_v35  ;;  %v7258_v35 = vld [vmem:[#allocation9 + $0x268] sm:$0xff]  ;;  %2747 = vmatprep.subr.mxu0 %v7256_v44  ;;  %v7394_v54 = vld [vmem:[#allocation9 + $0x78] sm:$0xff]  ;;  %9531 = vst [vmem:[#allocation87_spill] sm:$0xff] %v7396_v6  ;;  %v7406_v45 = vld [vmem:[#allocation9 + $0x50] sm:$0xff] }
 0x421   : > { %4819 = vmatpush3.msra.mxu1 %v6984_v0  ;;  %2109 = vst [vmem:[%s5769_s10 + $0x3a] sm:$0x1] %v2093_v31  ;;  %v7262_v0 = vld [vmem:[#allocation9 + $0x230] sm:$0xff]  ;;  %v7400_v11 = vld [vmem:[#allocation9 + $0x58] sm:$0xff]  ;;  %v7402_v25 = vld [vmem:[#allocation9 + $0x88] sm:$0xff] }
 0x422   : > { %4820 = vmatprep.subr.mxu1 %v6988_v47  ;;  %v7264_v47 = vld [vmem:[#allocation9 + $0x248] sm:$0xff]  ;;  %2748 = vmatpush1.msra.mxu0 %v7262_v0  ;;  %9532 = vst [vmem:[#allocation96_spill] sm:$0xff] %v7402_v25  ;;  %v7412_v51 = vld [vmem:[#allocation9 + $0x30] sm:$0xff]  ;;  %v7414_v31 = vld [vmem:[#allocation9 + $0x60] sm:$0xff] }
 0x423   : > { %4821 = vmatpush3.msra.mxu1 %v6994_v20  ;;  %v7268_v20 = vld [vmem:[#allocation9 + $0x210] sm:$0xff]  ;;  %v7408_v61 = vld [vmem:[#allocation9 + $0x68] sm:$0xff]  ;;  %9534 = vst [vmem:[#allocation98_spill] sm:$0xff] %v7414_v31 }
 0x424   : > { %4822 = vmatprep.subr.mxu1 %v6998_v57  ;;  %v7270_v57 = vld [vmem:[#allocation9 + $0x240] sm:$0xff]  ;;  %2749 = vmatprep.subr.mxu0 %v7268_v20  ;;  %9533 = vst [vmem:[#allocation41_spill] sm:$0xff] %v7408_v61 }
 0x425   : > { %4823 = vmatpush3.msra.mxu1 %v7003_v10  ;;  %v7274_v10 = vld [vmem:[#allocation9 + $0x208] sm:$0xff] }
 0x426   : > { %4824 = vmatprep.subr.mxu1 %v7007_v14  ;;  %v7276_v14 = vld [vmem:[#allocation9 + $0x220] sm:$0xff]  ;;  %2750 = vmatpush1.msra.mxu0 %v7274_v10 }
 0x427   : > { %4825 = vmatpush3.msra.mxu1 %v7011_v18  ;;  %v7280_v18 = vld [vmem:[#allocation9 + $0x1e8] sm:$0xff] }
 0x428   : > { %4826 = vmatprep.subr.mxu1 %v7015_v22  ;;  %v7282_v22 = vld [vmem:[#allocation9 + $0x218] sm:$0xff]  ;;  %2751 = vmatprep.subr.mxu0 %v7280_v18 }
 0x429   : > { %4827 = vmatpush3.msra.mxu1 %v7019_v26  ;;  %9512 = vst [vmem:[#allocation58_spill] sm:$0xff] %v7282_v22  ;;  %v7286_v26 = vld [vmem:[#allocation9 + $0x1e0] sm:$0xff] }
 0x42a   : > { %4828 = vmatprep.subr.mxu1 %v7023_v30  ;;  %v7288_v30 = vld [vmem:[#allocation9 + $0x1f8] sm:$0xff]  ;;  %2752 = vmatpush1.msra.mxu0 %v7286_v26 }
 0x42b   : > { %4829 = vmatpush3.msra.mxu1 %v7027_v34  ;;  %9513 = vst [vmem:[#allocation36_spill] sm:$0xff] %v7288_v30  ;;  %v7292_v34 = vld [vmem:[#allocation9 + $0x1c0] sm:$0xff] }
 0x42c   : > { %4830 = vmatprep.subr.mxu1 %v7031_v38  ;;  %v7294_v38 = vld [vmem:[#allocation9 + $0x1f0] sm:$0xff]  ;;  %2753 = vmatprep.subr.mxu0 %v7292_v34 }
 0x42d   : > { %4831 = vmatpush3.msra.mxu1 %v7035_v42  ;;  %9514 = vst [vmem:[#allocation62_spill] sm:$0xff] %v7294_v38  ;;  %v7298_v42 = vld [vmem:[#allocation9 + $0x1b8] sm:$0xff] }
 0x42e   : > { %4832 = vmatprep.subr.mxu1 %v7039_v46  ;;  %v7300_v46 = vld [vmem:[#allocation9 + $0x1d0] sm:$0xff]  ;;  %2754 = vmatpush1.msra.mxu0 %v7298_v42 }
 0x42f   : > { %4833 = vmatpush3.msra.mxu1 %v7043_v50  ;;  %9515 = vst [vmem:[#allocation79_spill] sm:$0xff] %v7300_v46  ;;  %v7304_v50 = vld [vmem:[#allocation9 + $0x198] sm:$0xff] }
 0x430   : > { %4834 = vmatprep.subr.mxu1 %v7047_v2  ;;  %v7306_v2 = vld [vmem:[#allocation9 + $0x1c8] sm:$0xff]  ;;  %2755 = vmatprep.subr.mxu0 %v7304_v50 }
 0x431   : > { %4835 = vmatpush3.msra.mxu1 %v7051_v5  ;;  %9516 = vst [vmem:[#allocation66_spill] sm:$0xff] %v7306_v2  ;;  %v7310_v5 = vld [vmem:[#allocation9 + $0x190] sm:$0xff] }
 0x432   : > { %4836 = vmatprep.subr.mxu1 %v7055_v53  ;;  %v7312_v53 = vld [vmem:[#allocation9 + $0x1a8] sm:$0xff]  ;;  %2756 = vmatpush1.msra.mxu0 %v7310_v5 }
 0x433   : > { %4837 = vmatpush3.msra.mxu1 %v7059_v7  ;;  %9517 = vst [vmem:[#allocation37_spill] sm:$0xff] %v7312_v53  ;;  %v7316_v7 = vld [vmem:[#allocation9 + $0x170] sm:$0xff] }
 0x434   : > { %4838 = vmatprep.subr.mxu1 %v7063_v62  ;;  %v7318_v62 = vld [vmem:[#allocation9 + $0x1a0] sm:$0xff]  ;;  %2757 = vmatprep.subr.mxu0 %v7316_v7 }
 0x435   : > { %4839 = vmatpush3.msra.mxu1 %v7067_v58  ;;  %9518 = vst [vmem:[#allocation70_spill] sm:$0xff] %v7318_v62  ;;  %v7322_v58 = vld [vmem:[#allocation9 + $0x168] sm:$0xff] }
 0x436   : > { %4840 = vmatprep.subr.mxu1 %v7071_v60  ;;  %v7324_v60 = vld [vmem:[#allocation9 + $0x180] sm:$0xff]  ;;  %2758 = vmatpush1.msra.mxu0 %v7322_v58 }
 0x437   : > { %4841 = vmatpush3.msra.mxu1 %v7075_v17  ;;  %9519 = vst [vmem:[#allocation81_spill] sm:$0xff] %v7324_v60  ;;  %v7328_v17 = vld [vmem:[#allocation9 + $0x148] sm:$0xff] }
 0x438   : > { %2479 = vmatmul.mubr.f32.vlgmr.msra.gmra.mxu1 %v2040_v36  ;;  %2816 = vmatprep.subr.mxu1 %v7252_v28  ;;  %v7376_v36 = vld [vmem:[#allocation9 + $0xa8] sm:$0xff] }
 0x439   : > { %2817 = vmatpush1.msra.mxu1 %v7258_v35  ;;  %2759 = vmatprep.subr.mxu0 %v7328_v17 }
 0x43a   : > { %2818 = vmatprep.subr.mxu1 %v7264_v47  ;;  %2760 = vmatpush1.msra.mxu0 %v7334_v63 }
 0x43b   : > { %2819 = vmatpush1.msra.mxu1 %v7270_v57  ;;  %2761 = vmatprep.subr.mxu0 %v7340_v52 }
 0x43c   : > { %2820 = vmatprep.subr.mxu1 %v7276_v14  ;;  %2762 = vmatpush1.msra.mxu0 %v7346_v41 }
 0x43d   : > { %2821 = vmatpush1.msra.mxu1 %v7282_v22  ;;  %2763 = vmatprep.subr.mxu0 %v7352_v59 }
 0x43e   : > { %2822 = vmatprep.subr.mxu1 %v7288_v30  ;;  %2764 = vmatpush1.msra.mxu0 %v7358_v33 }
 0x43f   : > { %2823 = vmatpush1.msra.mxu1 %v7294_v38  ;;  %2765 = vmatprep.subr.mxu0 %v7364_v56 }
 0x440   : > { %2824 = vmatprep.subr.mxu1 %v7300_v46  ;;  %2766 = vmatpush1.msra.mxu0 %v7370_v37 }
 0x441   : > { %2825 = vmatpush1.msra.mxu1 %v7306_v2  ;;  %2767 = vmatprep.subr.mxu0 %v7376_v36 }
 0x442   : > { %2826 = vmatprep.subr.mxu1 %v7312_v53  ;;  %2768 = vmatpush1.msra.mxu0 %v7382_v29 }
 0x443   : > { %2827 = vmatpush1.msra.mxu1 %v7318_v62  ;;  %2769 = vmatprep.subr.mxu0 %v7388_v49  ;;  %v7492_v62 = vld [vmem:[#allocation9 + $0x450] sm:$0xff] }
 0x444   : > { %2828 = vmatprep.subr.mxu1 %v7324_v60  ;;  %2770 = vmatpush1.msra.mxu0 %v7394_v54  ;;  %v7486_v60 = vld [vmem:[#allocation9 + $0x470] sm:$0xff]  ;;  %9555 = vst [vmem:[#allocation49_spill] sm:$0xff] %v7492_v62 }
 0x445   : > { %2829 = vmatpush1.msra.mxu1 %v7330_v13  ;;  %2771 = vmatprep.subr.mxu0 %v7400_v11  ;;  %v7480_v13 = vld [vmem:[#allocation9 + $0x478] sm:$0xff]  ;;  %9553 = vst [vmem:[#allocation48_spill] sm:$0xff] %v7486_v60 }
 0x446   : > { %2830 = vmatprep.subr.mxu1 %v7336_v3  ;;  %2772 = vmatpush1.msra.mxu0 %v7406_v45  ;;  %v7474_v3 = vld [vmem:[#allocation9 + $0x498] sm:$0xff]  ;;  %9551 = vst [vmem:[#allocation47_spill] sm:$0xff] %v7480_v13 }
 0x447   : > { %2831 = vmatpush1.msra.mxu1 %v7342_v8  ;;  %2773 = vmatprep.subr.mxu0 %v7412_v51  ;;  %v7468_v8 = vld [vmem:[#allocation9 + $0x4a0] sm:$0xff]  ;;  %9549 = vst [vmem:[#allocation46_spill] sm:$0xff] %v7474_v3 }
 0x448   : > { %2832 = vmatprep.subr.mxu1 %v7348_v16  ;;  %v7462_v16 = vld [vmem:[#allocation9 + $0x4c0] sm:$0xff]  ;;  %9547 = vst [vmem:[#allocation95_spill] sm:$0xff] %v7468_v8 }
 0x449   : > { %2833 = vmatpush1.msra.mxu1 %v7354_v4  ;;  %v7456_v4 = vld [vmem:[#allocation9 + $0x4c8] sm:$0xff]  ;;  %9545 = vst [vmem:[#allocation45_spill] sm:$0xff] %v7462_v16 }
 0x44a   : > { %2834 = vmatprep.subr.mxu1 %v7360_v24  ;;  %v7450_v24 = vld [vmem:[#allocation9 + $0x4e8] sm:$0xff]  ;;  %9543 = vst [vmem:[#allocation93_spill] sm:$0xff] %v7456_v4 }
 0x44b   : > { %2835 = vmatpush1.msra.mxu1 %v7366_v39  ;;  %v7444_v39 = vld [vmem:[#allocation9 + $0x4f0] sm:$0xff]  ;;  %9541 = vst [vmem:[#allocation44_spill] sm:$0xff] %v7450_v24 }
 0x44c   : > { %2836 = vmatprep.subr.mxu1 %v7372_v55  ;;  %v7438_v55 = vld [vmem:[#allocation9 + $0x10] sm:$0xff]  ;;  %9539 = vst [vmem:[#allocation43_spill] sm:$0xff] %v7444_v39 }
 0x44d   : > { %2837 = vmatpush1.msra.mxu1 %v7378_v40  ;;  %v7432_v40 = vld [vmem:[#allocation9 + $0x18] sm:$0xff]  ;;  %9538 = vst [vmem:[#allocation102_spill] sm:$0xff] %v7438_v55 }
 0x44e   : > { %2838 = vmatprep.subr.mxu1 %v7384_v48  ;;  %v7426_v48 = vld [vmem:[#allocation9 + $0x38] sm:$0xff]  ;;  %9537 = vst [vmem:[#allocation42_spill] sm:$0xff] %v7432_v40 }
 0x44f   : > { %2839 = vmatpush1.msra.mxu1 %v7390_v9  ;;  %v7420_v9 = vld [vmem:[#allocation9 + $0x40] sm:$0xff]  ;;  %9536 = vst [vmem:[#allocation100_spill] sm:$0xff] %v7426_v48 }
 0x450   : > { %2840 = vmatprep.subr.mxu1 %v7396_v6  ;;  %v7418_v6 = vld [vmem:[#allocation9 + $0x28] sm:$0xff]  ;;  %9535 = vst [vmem:[#allocation89_spill] sm:$0xff] %v7420_v9 }
 0x451   : > { %2841 = vmatpush1.msra.mxu1 %v7402_v25  ;;  %2774 = vmatpush1.msra.mxu0 %v7418_v6  ;;  %v7424_v25 = vld [vmem:[#allocation9 + $0x8] sm:$0xff] }
 0x452   : > { %2842 = vmatprep.subr.mxu1 %v7408_v61  ;;  %2775 = vmatprep.subr.mxu0 %v7424_v25  ;;  %v7430_v61 = vld [vmem:[#allocation9] sm:$0xff] }
 0x453   : > { %2843 = vmatpush1.msra.mxu1 %v7414_v31  ;;  %2776 = vmatpush1.msra.mxu0 %v7430_v61  ;;  %v7436_v31 = vld [vmem:[#allocation9 + $0x4e0] sm:$0xff] }
 0x454   : > { %2844 = vmatprep.subr.mxu1 %v7420_v9  ;;  %2777 = vmatprep.subr.mxu0 %v7436_v31  ;;  %v7442_v9 = vld [vmem:[#allocation9 + $0x4d8] sm:$0xff] }
 0x455   : > { %2845 = vmatpush1.msra.mxu1 %v7426_v48  ;;  %2778 = vmatpush2.msra.mxu0 %v7442_v9  ;;  %v7448_v48 = vld [vmem:[#allocation9 + $0x4b8] sm:$0xff] }
 0x456   : > { %2846 = vmatprep.subr.mxu1 %v7432_v40  ;;  %9540 = vst [vmem:[#allocation104_spill] sm:$0xff] %v7448_v48  ;;  %2779 = vmatprep.subr.mxu0 %v7448_v48  ;;  %v7454_v40 = vld [vmem:[#allocation9 + $0x4b0] sm:$0xff] }
 0x457   : > { %2847 = vmatpush1.msra.mxu1 %v7438_v55  ;;  %9542 = vst [vmem:[#allocation106_spill] sm:$0xff] %v7454_v40  ;;  %2780 = vmatpush2.msra.mxu0 %v7454_v40  ;;  %v7460_v55 = vld [vmem:[#allocation9 + $0x490] sm:$0xff] }
 0x458   : > { %2848 = vmatprep.subr.mxu1 %v7444_v39  ;;  %9544 = vst [vmem:[#allocation108_spill] sm:$0xff] %v7460_v55  ;;  %2781 = vmatprep.subr.mxu0 %v7460_v55  ;;  %v7466_v39 = vld [vmem:[#allocation9 + $0x488] sm:$0xff] }
 0x459   : > { %2849 = vmatpush2.msra.mxu1 %v7450_v24  ;;  %9546 = vst [vmem:[#allocation110_spill] sm:$0xff] %v7466_v39  ;;  %2782 = vmatpush2.msra.mxu0 %v7466_v39  ;;  %v7472_v24 = vld [vmem:[#allocation9 + $0x468] sm:$0xff] }
 0x45a   : > { %2850 = vmatprep.subr.mxu1 %v7456_v4  ;;  %9548 = vst [vmem:[#allocation112_spill] sm:$0xff] %v7472_v24  ;;  %2783 = vmatprep.subr.mxu0 %v7472_v24  ;;  %v7478_v4 = vld [vmem:[#allocation9 + $0x460] sm:$0xff]  ;;  %v9603_v24 = vld [vmem:[#allocation57_spill] sm:$0xff] }
 0x45b   : > { %2851 = vmatpush2.msra.mxu1 %v7462_v16  ;;  %9550 = vst [vmem:[#allocation114_spill] sm:$0xff] %v7478_v4  ;;  %2784 = vmatpush2.msra.mxu0 %v7478_v4  ;;  %v7484_v16 = vld [vmem:[#allocation9 + $0x440] sm:$0xff]  ;;  %v7498_v4 = vld [vmem:[#allocation9 + $0x448] sm:$0xff]  ;;  %v543_v2 = vadd.f32 %v9603_v24, %v6479_v19  ;;  %v9605_v24 = vld [vmem:[#allocation27_spill] sm:$0xff] }
 0x45c   : > { %2852 = vmatprep.subr.mxu1 %v7468_v8  ;;  %9552 = vst [vmem:[#allocation116_spill] sm:$0xff] %v7484_v16  ;;  %2785 = vmatprep.subr.mxu0 %v7484_v16  ;;  %v7490_v8 = vld [vmem:[#allocation9 + $0x438] sm:$0xff]  ;;  %9557 = vst [vmem:[#allocation50_spill] sm:$0xff] %v7498_v4  ;;  %v7504_v16 = vld [vmem:[#allocation9 + $0x428] sm:$0xff] }
 0x45d   : > { %2853 = vmatpush2.msra.mxu1 %v7474_v3  ;;  %9554 = vst [vmem:[#allocation118_spill] sm:$0xff] %v7490_v8  ;;  %2786 = vmatpush2.msra.mxu0 %v7490_v8  ;;  %v7496_v3 = vld [vmem:[#allocation9 + $0x418] sm:$0xff]  ;;  %9559 = vst [vmem:[#allocation51_spill] sm:$0xff] %v7504_v16  ;;  %v7510_v8 = vld [vmem:[#allocation9 + $0x420] sm:$0xff] }
 0x45e   : > { %2854 = vmatprep.subr.mxu1 %v7480_v13  ;;  %9556 = vst [vmem:[#allocation120_spill] sm:$0xff] %v7496_v3  ;;  %2787 = vmatprep.subr.mxu0 %v7496_v3  ;;  %v7502_v13 = vld [vmem:[#allocation9 + $0x410] sm:$0xff]  ;;  %9561 = vst [vmem:[#allocation52_spill] sm:$0xff] %v7510_v8  ;;  %v7516_v3 = vld [vmem:[#allocation9 + $0x400] sm:$0xff] }
 0x45f   : > { %2855 = vmatpush2.msra.mxu1 %v7486_v60  ;;  %9558 = vst [vmem:[#allocation122_spill] sm:$0xff] %v7502_v13  ;;  %2788 = vmatpush2.msra.mxu0 %v7502_v13  ;;  %v7508_v60 = vld [vmem:[#allocation9 + $0x3f0] sm:$0xff]  ;;  %9563 = vst [vmem:[#allocation54_spill] sm:$0xff] %v7516_v3  ;;  %v7522_v13 = vld [vmem:[#allocation9 + $0x3f8] sm:$0xff] }
 0x460   : > { %2856 = vmatprep.subr.mxu1 %v7492_v62  ;;  %9560 = vst [vmem:[#allocation124_spill] sm:$0xff] %v7508_v60  ;;  %2789 = vmatprep.subr.mxu0 %v7508_v60  ;;  %v7514_v62 = vld [vmem:[#allocation9 + $0x3e8] sm:$0xff]  ;;  %9565 = vst [vmem:[#allocation56_spill] sm:$0xff] %v7522_v13  ;;  %v7528_v60 = vld [vmem:[#allocation9 + $0x3d8] sm:$0xff] }
 0x461   : > { %2857 = vmatpush2.msra.mxu1 %v7498_v4  ;;  %9562 = vst [vmem:[#allocation126_spill] sm:$0xff] %v7514_v62  ;;  %2790 = vmatpush2.msra.mxu0 %v7514_v62  ;;  %v7520_v4 = vld [vmem:[#allocation9 + $0x3c8] sm:$0xff]  ;;  %9567 = vst [vmem:[#allocation60_spill] sm:$0xff] %v7528_v60  ;;  %v7534_v62 = vld [vmem:[#allocation9 + $0x3d0] sm:$0xff] }
 0x462   : > { %2858 = vmatprep.subr.mxu1 %v7504_v16  ;;  %9564 = vst [vmem:[#allocation128_spill] sm:$0xff] %v7520_v4  ;;  %2791 = vmatprep.subr.mxu0 %v7520_v4  ;;  %v7526_v16 = vld [vmem:[#allocation9 + $0x3c0] sm:$0xff]  ;;  %9569 = vst [vmem:[#allocation64_spill] sm:$0xff] %v7534_v62  ;;  %v7540_v4 = vld [vmem:[#allocation9 + $0x3b0] sm:$0xff] }
 0x463   : > { %2859 = vmatpush2.msra.mxu1 %v7510_v8  ;;  %9566 = vst [vmem:[#allocation130_spill] sm:$0xff] %v7526_v16  ;;  %2792 = vmatpush2.msra.mxu0 %v7526_v16  ;;  %v7532_v8 = vld [vmem:[#allocation9 + $0x3a0] sm:$0xff]  ;;  %9571 = vst [vmem:[#allocation68_spill] sm:$0xff] %v7540_v4  ;;  %v7546_v16 = vld [vmem:[#allocation9 + $0x3a8] sm:$0xff] }
 0x464   : > { %2860 = vmatprep.subr.mxu1 %v7516_v3  ;;  %9568 = vst [vmem:[#allocation132_spill] sm:$0xff] %v7532_v8  ;;  %2793 = vmatprep.subr.mxu0 %v7532_v8  ;;  %v7538_v3 = vld [vmem:[#allocation9 + $0x398] sm:$0xff]  ;;  %9573 = vst [vmem:[#allocation72_spill] sm:$0xff] %v7546_v16  ;;  %v7552_v8 = vld [vmem:[#allocation9 + $0x388] sm:$0xff] }
 0x465   : > { %2861 = vmatpush2.msra.mxu1 %v7522_v13  ;;  %9570 = vst [vmem:[#allocation134_spill] sm:$0xff] %v7538_v3  ;;  %2794 = vmatpush2.msra.mxu0 %v7538_v3  ;;  %v7544_v13 = vld [vmem:[#allocation9 + $0x378] sm:$0xff]  ;;  %9575 = vst [vmem:[#allocation76_spill] sm:$0xff] %v7552_v8  ;;  %v7558_v3 = vld [vmem:[#allocation9 + $0x380] sm:$0xff] }
 0x466   : > { %2862 = vmatprep.subr.mxu1 %v7528_v60  ;;  %9572 = vst [vmem:[#allocation136_spill] sm:$0xff] %v7544_v13  ;;  %2795 = vmatprep.subr.mxu0 %v7544_v13  ;;  %v7550_v60 = vld [vmem:[#allocation9 + $0x370] sm:$0xff]  ;;  %9577 = vst [vmem:[#allocation84_spill] sm:$0xff] %v7558_v3  ;;  %v7564_v13 = vld [vmem:[#allocation9 + $0x360] sm:$0xff] }
 0x467   : > { %2863 = vmatpush2.msra.mxu1 %v7534_v62  ;;  %9574 = vst [vmem:[#allocation139_spill] sm:$0xff] %v7550_v60  ;;  %2796 = vmatpush2.msra.mxu0 %v7550_v60  ;;  %v7556_v62 = vld [vmem:[#allocation9 + $0x350] sm:$0xff]  ;;  %9579 = vst [vmem:[#allocation91_spill] sm:$0xff] %v7564_v13  ;;  %v7570_v60 = vld [vmem:[#allocation9 + $0x358] sm:$0xff] }
 0x468   : > { %2864 = vmatprep.subr.mxu1 %v7540_v4  ;;  %9576 = vst [vmem:[#allocation80_spill] sm:$0xff] %v7556_v62  ;;  %2797 = vmatprep.subr.mxu0 %v7556_v62  ;;  %v7562_v4 = vld [vmem:[#allocation9 + $0x348] sm:$0xff]  ;;  %9581 = vst [vmem:[#allocation97_spill] sm:$0xff] %v7570_v60  ;;  %v7576_v62 = vld [vmem:[#allocation9 + $0x338] sm:$0xff] }
 0x469   : > { %2865 = vmatpush2.msra.mxu1 %v7546_v16  ;;  %9578 = vst [vmem:[#allocation88_spill] sm:$0xff] %v7562_v4  ;;  %2798 = vmatpush2.msra.mxu0 %v7562_v4  ;;  %v7568_v16 = vld [vmem:[#allocation9 + $0x328] sm:$0xff]  ;;  %9583 = vst [vmem:[#allocation101_spill] sm:$0xff] %v7576_v62  ;;  %v7582_v4 = vld [vmem:[#allocation9 + $0x330] sm:$0xff] }
 0x46a   : > { %2866 = vmatprep.subr.mxu1 %v7552_v8  ;;  %9580 = vst [vmem:[#allocation94_spill] sm:$0xff] %v7568_v16  ;;  %2799 = vmatprep.subr.mxu0 %v7568_v16  ;;  %v7574_v8 = vld [vmem:[#allocation9 + $0x320] sm:$0xff]  ;;  %9585 = vst [vmem:[#allocation105_spill] sm:$0xff] %v7582_v4  ;;  %v7588_v16 = vld [vmem:[#allocation9 + $0x310] sm:$0xff] }
 0x46b   : > { %2867 = vmatpush2.msra.mxu1 %v7558_v3  ;;  %9582 = vst [vmem:[#allocation99_spill] sm:$0xff] %v7574_v8  ;;  %2800 = vmatpush2.msra.mxu0 %v7574_v8  ;;  %v7580_v3 = vld [vmem:[#allocation9 + $0x300] sm:$0xff]  ;;  %9587 = vst [vmem:[#allocation109_spill] sm:$0xff] %v7588_v16  ;;  %v7594_v8 = vld [vmem:[#allocation9 + $0x308] sm:$0xff] }
 0x46c   : > { %2868 = vmatprep.subr.mxu1 %v7564_v13  ;;  %9584 = vst [vmem:[#allocation103_spill] sm:$0xff] %v7580_v3  ;;  %2801 = vmatprep.subr.mxu0 %v7580_v3  ;;  %v7586_v13 = vld [vmem:[#allocation9 + $0x2f8] sm:$0xff]  ;;  %9589 = vst [vmem:[#allocation113_spill] sm:$0xff] %v7594_v8  ;;  %v7600_v3 = vld [vmem:[#allocation9 + $0x2e8] sm:$0xff] }
 0x46d   : > { %2869 = vmatpush2.msra.mxu1 %v7570_v60  ;;  %9586 = vst [vmem:[#allocation107_spill] sm:$0xff] %v7586_v13  ;;  %2802 = vmatpush2.msra.mxu0 %v7586_v13  ;;  %v7592_v60 = vld [vmem:[#allocation9 + $0x2d8] sm:$0xff]  ;;  %9591 = vst [vmem:[#allocation117_spill] sm:$0xff] %v7600_v3  ;;  %v7606_v13 = vld [vmem:[#allocation9 + $0x2e0] sm:$0xff] }
 0x46e   : > { %2870 = vmatprep.subr.mxu1 %v7576_v62  ;;  %9588 = vst [vmem:[#allocation111_spill] sm:$0xff] %v7592_v60  ;;  %2803 = vmatprep.subr.mxu0 %v7592_v60  ;;  %v7598_v62 = vld [vmem:[#allocation9 + $0x2d0] sm:$0xff]  ;;  %9593 = vst [vmem:[#allocation121_spill] sm:$0xff] %v7606_v13  ;;  %v7612_v60 = vld [vmem:[#allocation9 + $0x2c0] sm:$0xff] }
 0x46f   : > { %2871 = vmatpush2.msra.mxu1 %v7582_v4  ;;  %9590 = vst [vmem:[#allocation115_spill] sm:$0xff] %v7598_v62  ;;  %2804 = vmatpush2.msra.mxu0 %v7598_v62  ;;  %v7604_v4 = vld [vmem:[#allocation9 + $0x2b0] sm:$0xff]  ;;  %9595 = vst [vmem:[#allocation125_spill] sm:$0xff] %v7612_v60  ;;  %v7618_v62 = vld [vmem:[#allocation9 + $0x2b8] sm:$0xff] }
 0x470   : > { %2872 = vmatprep.subr.mxu1 %v7588_v16  ;;  %9592 = vst [vmem:[#allocation119_spill] sm:$0xff] %v7604_v4  ;;  %2805 = vmatprep.subr.mxu0 %v7604_v4  ;;  %v7610_v16 = vld [vmem:[#allocation9 + $0x2a8] sm:$0xff]  ;;  %9597 = vst [vmem:[#allocation129_spill] sm:$0xff] %v7618_v62  ;;  %v7624_v4 = vld [vmem:[#allocation9 + $0x298] sm:$0xff] }
 0x471   : > { %2873 = vmatpush2.msra.mxu1 %v7594_v8  ;;  %9594 = vst [vmem:[#allocation123_spill] sm:$0xff] %v7610_v16  ;;  %2806 = vmatpush2.msra.mxu0 %v7610_v16  ;;  %v7616_v8 = vld [vmem:[#allocation9 + $0x288] sm:$0xff]  ;;  %9599 = vst [vmem:[#allocation133_spill] sm:$0xff] %v7624_v4  ;;  %v7630_v16 = vld [vmem:[#allocation9 + $0x4f8] sm:$0xff] }
 0x472   : > { %2874 = vmatprep.subr.mxu1 %v7600_v3  ;;  %9596 = vst [vmem:[#allocation127_spill] sm:$0xff] %v7616_v8  ;;  %2807 = vmatprep.subr.mxu0 %v7616_v8  ;;  %v7622_v3 = vld [vmem:[#allocation9 + $0x280] sm:$0xff]  ;;  %9601 = vst [vmem:[#allocation137_spill] sm:$0xff] %v7630_v16 }
 0x473   : > { %2875 = vmatpush2.msra.mxu1 %v7606_v13  ;;  %9598 = vst [vmem:[#allocation131_spill] sm:$0xff] %v7622_v3  ;;  %2808 = vmatpush2.msra.mxu0 %v7622_v3  ;;  %v7628_v13 = vld [vmem:[#allocation9 + $0x290] sm:$0xff] }
 0x474   : > { %2876 = vmatprep.subr.mxu1 %v7612_v60  ;;  %9600 = vst [vmem:[#allocation135_spill] sm:$0xff] %v7628_v13  ;;  %4845 = vmatprep.subr.mxu0 %v7630_v16  ;;  %v9602_v3 = vld [vmem:[#allocation26_spill] sm:$0xff]  ;;  %v9604_v16 = vld [vmem:[#allocation59_spill] sm:$0xff] }
 0x475   : > { %2877 = vmatpush2.msra.mxu1 %v7618_v62  ;;  %v545_v53 = vadd.f32 %v9602_v3, %v9507_v1 }
 0x476   : > { %2878 = vmatprep.subr.mxu1 %v7624_v4 }
 0x477   : > { %2879 = vmatpush2.msra.mxu1 %v7628_v13 }
 0x478   : > { %3218 = vmatprep.subr.mxu1 %v7247_v21 }
 0x4d7   : > { %v2338_v60 = vpop.f32.mrf.mxu1  ;;  %v2409_v8 = vpop.f32.mrf.mxu0 }
 0x4d8   : > { %v2484_v62 = vadd.f32 %v7187_v12, %v2338_v60  ;;  %v2486_v39 = vadd.f32 %v2409_v8, %v545_v53  ;;  %v656_v12 = vadd.f32 %v9604_v16, %v6483_v15  ;;  %v658_v53 = vadd.f32 %v9605_v24, %v6486_v27 }
 0x4d9   : > { %v2340_v4 = vpop.f32.mrf.mxu1  ;;  %v2411_v21 = vpop.f32.mrf.mxu0 }
 0x4da   : > { %2809 = vmatprep.mubr.f32.mxu0 %v2484_v62  ;;  %2880 = vmatprep.mubr.f32.mxu1 %v2484_v62  ;;  %v2485_v46 = vadd.f32 %v2340_v4, %v543_v2  ;;  %v4663_v13 = vmul.f32 -1.442695, %v2486_v39  ;;  %v2487_v60 = vadd.f32 %v2411_v21, %v656_v12 }
 0x4dc   : > { %v4662_v55 = vmul.f32 -1.442695, %v2485_v46  ;;  %5174 = vpow2.f32 %v4663_v13  ;;  %v4664_v30 = vmul.f32 -1.442695, %v2487_v60  ;;  %v7660_v60 = vld [vmem:[#allocation9 + $0x250] sm:$0xff] }
 0x4de   : > { %5176 = vpow2.f32 %v4662_v55 }
 0x4df   : > { %5178 = vpow2.f32 %v4664_v30 }
 0x4e9   : > { %v5175_v38 = vpop.eup %5174 }
 0x4ea   : > { %v2499_v3 = vadd.f32 1.0, %v5175_v38 }
 0x4eb   : > { %v5177_v40 = vpop.eup %5176 }
 0x4ec   : > { %v2498_v1 = vadd.f32 1.0, %v5177_v40  ;;  %5180 = vrcp.f32 %v2499_v3  ;;  %v5179_v13 = vpop.eup %5178  ;;  %v7663_v3 = vld [vmem:[#allocation9 + $0x4a8] sm:$0xff] }
 0x4ed   : > { %v2500_v39 = vadd.f32 1.0, %v5179_v13  ;;  %v7673_v13 = vld [vmem:[#allocation9 + $0x480] sm:$0xff] }
 0x4ee   : > { %5182 = vrcp.f32 %v2498_v1  ;;  %v7650_v1 = vld [vmem:[#allocation9 + $0x278] sm:$0xff] }
 0x4f8   : > { %v4842_v48 = vpop.f32.mrf.mxu1 }
 0x4f9   : > { %v5181_v8 = vpop.eup %5180 }
 0x4fa   : > { %v4843_v22 = vpop.f32.mrf.mxu1  ;;  %v2509_v55 = vmul.f32 %v5181_v8, %v7199_v43 }
 0x4fb   : > { %v4844_v2 = vadd.f32 %v4843_v22, %v4842_v48  ;;  %v5183_v16 = vpop.eup %5182  ;;  %v7652_v48 = vld [vmem:[#allocation9 + $0x4d0] sm:$0xff] }
 0x4fd   : > { %v2488_v46 = vadd.f32 %v4844_v2, %v658_v53 }
 0x4ff   : > { %5184 = vtanh.f32 %v2488_v46  ;;  %v7669_v46 = vld [vmem:[#allocation9 + $0x228] sm:$0xff] }
 0x500   : > { %5186 = vrcp.f32 %v2500_v39  ;;  %v7681_v39 = vld [vmem:[#allocation9 + $0x200] sm:$0xff] }
 0x50c   : > { %v5185_v4 = vpop.eup %5184 }
 0x50d   : > { %v2510_v21 = vmul.f32 %v5185_v4, %v5183_v16  ;;  %v5187_v40 = vpop.eup %5186 }
 0x50f   : > { %v7645_v38 = vadd.f32 %v2510_v21, %v2509_v55 }
 0x511   : > { %5188 = vtanh.f32 %v7645_v38 }
 0x51e   : > { %v5189_v22 = vpop.eup %5188 }
 0x51f   : > { %v7648_v30 = vmul.f32 %v5189_v22, %v5187_v40  ;;  %v7691_v40 = vld [vmem:[#allocation9 + $0x1d8] sm:$0xff]  ;;  %v7695_v22 = vld [vmem:[#allocation9 + $0x430] sm:$0xff] }
 0x521   : > { %v2518_v12 = vcombine.high %v7648_v30, %v7648_v30  ;;  %v2525_v43 = vrot.slane %v7648_v30, %v6493_v23  ;;  %2810 = vmatmul.mubr.f32.vlgmr.msra.gmra.mxu0 %v7648_v30  ;;  %2881 = vmatmul.mubr.f32.vlgmr.msra.gmra.mxu1 %v7648_v30 }
 0x522   : > { %4846 = vmatpush3.msra.mxu0 %v7650_v1  ;;  %2951 = vmatprep.mubr.f32.mxu0 %v2484_v62 }
 0x523   : > { %v2532_v24 = vrot.slane %v2518_v12, %v6493_v23  ;;  %v2533_v53 = vcombine.high %v2525_v43, %v2525_v43  ;;  %v2541_v2 = vrot.slane %v2525_v43, %v6493_v23  ;;  %4665 = vst.sshfl [vmem:[%s5769_s10 + $0x3] sm:$0x1 pattern:$0x73625140] %v2525_v43  ;;  %4847 = vmatprep.subr.mxu0 %v7652_v48  ;;  %v7701_v12 = vld [vmem:[#allocation9 + $0x1b0] sm:$0xff]  ;;  %v7705_v43 = vld [vmem:[#allocation9 + $0x408] sm:$0xff] }
 0x524   : > { %3219 = vmatpush1.msra.mxu1 %v7250_v32  ;;  %4848 = vmatpush3.msra.mxu0 %v7660_v60  ;;  %v7684_v32 = vld [vmem:[#allocation9 + $0x458] sm:$0xff] }
 0x525   : > { %3220 = vmatprep.subr.mxu1 %v7256_v44  ;;  %v2534_v62 = vcombine.high %v2532_v24, %v2532_v24  ;;  %v2548_v8 = vrot.slane %v2532_v24, %v6493_v23  ;;  %v2555_v16 = vrot.slane %v2533_v53, %v6493_v23  ;;  %v2563_v4 = vcombine.high %v2541_v2, %v2541_v2  ;;  %v9625_v2 = vld [vmem:[#allocation122_spill] sm:$0xff] }
 0x526   : > { %4666 = vst.sshfl [vmem:[%s5769_s10 + $0xb] sm:$0x1 pattern:$0x73625140] %v2533_v53  ;;  %4849 = vmatprep.subr.mxu0 %v7663_v3  ;;  %3221 = vmatpush1.msra.mxu1 %v7262_v0  ;;  %v9624_v53 = vld [vmem:[#allocation38_spill] sm:$0xff] }
 0x527   : > { %4667 = vst.sshfl [vmem:[%s5769_s10 + $0x23] sm:$0x1 pattern:$0x73625140] %v2532_v24  ;;  %4850 = vmatpush3.msra.mxu0 %v7669_v46  ;;  %v2562_v44 = vrot.slane %v2534_v62, %v6493_v23  ;;  %v2564_v55 = vcombine.high %v2548_v8, %v2548_v8  ;;  %v2565_v21 = vcombine.high %v2555_v16, %v2555_v16  ;;  %2577 = vst [vmem:[%s5769_s10 + $0x13] sm:$0x1] %v2563_v4 }
 0x528   : > { %4668 = vst.sshfl [vmem:[%s5769_s10 + $0x2b] sm:$0x1 pattern:$0x73625140] %v2534_v62  ;;  %4851 = vmatprep.subr.mxu0 %v7673_v13  ;;  %3222 = vmatprep.subr.mxu1 %v7268_v20  ;;  %v7710_v20 = vld [vmem:[#allocation9 + $0x188] sm:$0xff]  ;;  %v9623_v24 = vld [vmem:[#allocation120_spill] sm:$0xff] }
 0x529   : > { %4852 = vmatpush3.msra.mxu0 %v7681_v39  ;;  %3223 = vmatpush1.msra.mxu1 %v7274_v10  ;;  %v2566_v0 = vcombine.high %v2562_v44, %v2562_v44  ;;  %2578 = vst [vmem:[%s5769_s10 + $0x1b] sm:$0x1] %v2565_v21  ;;  %2581 = vst [vmem:[%s5769_s10 + $0x33] sm:$0x1] %v2564_v55  ;;  %v7714_v10 = vld [vmem:[#allocation9 + $0x3e0] sm:$0xff]  ;;  %v9626_v62 = vld [vmem:[#allocation78_spill] sm:$0xff] }
 0x52a   : > { %4853 = vmatprep.subr.mxu0 %v7684_v32  ;;  %3224 = vmatprep.subr.mxu1 %v7280_v18  ;;  %v7718_v18 = vld [vmem:[#allocation9 + $0x160] sm:$0xff]  ;;  %v9628_v16 = vld [vmem:[#allocation83_spill] sm:$0xff]  ;;  %v9629_v4 = vld [vmem:[#allocation126_spill] sm:$0xff] }
 0x52b   : > { %4854 = vmatpush3.msra.mxu0 %v7691_v40  ;;  %3225 = vmatpush1.msra.mxu1 %v7286_v26  ;;  %2582 = vst [vmem:[%s5769_s10 + $0x3b] sm:$0x1] %v2566_v0  ;;  %v7722_v26 = vld [vmem:[#allocation9 + $0x3b8] sm:$0xff]  ;;  %v9627_v8 = vld [vmem:[#allocation124_spill] sm:$0xff]  ;;  %v9630_v44 = vld [vmem:[#allocation82_spill] sm:$0xff] }
 0x52c   : > { %4855 = vmatprep.subr.mxu0 %v7695_v22  ;;  %3226 = vmatprep.subr.mxu1 %v7292_v34  ;;  %v7726_v34 = vld [vmem:[#allocation9 + $0x138] sm:$0xff]  ;;  %v9631_v55 = vld [vmem:[#allocation128_spill] sm:$0xff]  ;;  %v9633_v0 = vld [vmem:[#allocation130_spill] sm:$0xff] }
 0x52d   : > { %4856 = vmatpush3.msra.mxu0 %v7701_v12  ;;  %3227 = vmatpush1.msra.mxu1 %v7298_v42  ;;  %v7730_v42 = vld [vmem:[#allocation9 + $0x390] sm:$0xff]  ;;  %v9632_v21 = vld [vmem:[#allocation39_spill] sm:$0xff] }
 0x52e   : > { %4857 = vmatprep.subr.mxu0 %v7705_v43  ;;  %3228 = vmatprep.subr.mxu1 %v7304_v50  ;;  %v7734_v50 = vld [vmem:[#allocation9 + $0x110] sm:$0xff] }
 0x52f   : > { %4858 = vmatpush3.msra.mxu0 %v7710_v20  ;;  %3229 = vmatpush1.msra.mxu1 %v7310_v5  ;;  %v7738_v5 = vld [vmem:[#allocation9 + $0x368] sm:$0xff] }
 0x530   : > { %4859 = vmatprep.subr.mxu0 %v7714_v10  ;;  %3230 = vmatprep.subr.mxu1 %v7316_v7  ;;  %v7742_v7 = vld [vmem:[#allocation9 + $0xe8] sm:$0xff] }
 0x531   : > { %4860 = vmatpush3.msra.mxu0 %v7718_v18  ;;  %3231 = vmatpush1.msra.mxu1 %v7322_v58  ;;  %v7746_v58 = vld [vmem:[#allocation9 + $0x340] sm:$0xff] }
 0x532   : > { %4861 = vmatprep.subr.mxu0 %v7722_v26  ;;  %3232 = vmatprep.subr.mxu1 %v7328_v17  ;;  %v7750_v17 = vld [vmem:[#allocation9 + $0xc0] sm:$0xff] }
 0x533   : > { %4862 = vmatpush3.msra.mxu0 %v7726_v34  ;;  %3233 = vmatpush1.msra.mxu1 %v7334_v63  ;;  %v7754_v63 = vld [vmem:[#allocation9 + $0x318] sm:$0xff] }
 0x534   : > { %4863 = vmatprep.subr.mxu0 %v7730_v42  ;;  %3234 = vmatprep.subr.mxu1 %v7340_v52  ;;  %v7758_v52 = vld [vmem:[#allocation9 + $0x98] sm:$0xff] }
 0x535   : > { %4864 = vmatpush3.msra.mxu0 %v7734_v50  ;;  %3235 = vmatpush1.msra.mxu1 %v7346_v41  ;;  %v7762_v41 = vld [vmem:[#allocation9 + $0x2f0] sm:$0xff] }
 0x536   : > { %4865 = vmatprep.subr.mxu0 %v7738_v5  ;;  %3236 = vmatprep.subr.mxu1 %v7352_v59  ;;  %v7766_v59 = vld [vmem:[#allocation9 + $0x70] sm:$0xff] }
 0x537   : > { %4866 = vmatpush3.msra.mxu0 %v7742_v7  ;;  %3237 = vmatpush1.msra.mxu1 %v7358_v33  ;;  %v7770_v33 = vld [vmem:[#allocation9 + $0x2c8] sm:$0xff] }
 0x538   : > { %4867 = vmatprep.subr.mxu0 %v7746_v58  ;;  %3238 = vmatprep.subr.mxu1 %v7364_v56  ;;  %v7774_v56 = vld [vmem:[#allocation9 + $0x48] sm:$0xff] }
 0x539   : > { %4868 = vmatpush3.msra.mxu0 %v7750_v17  ;;  %3239 = vmatpush1.msra.mxu1 %v7370_v37  ;;  %v7778_v37 = vld [vmem:[#allocation9 + $0x2a0] sm:$0xff] }
 0x53a   : > { %4869 = vmatprep.subr.mxu0 %v7754_v63  ;;  %3240 = vmatprep.subr.mxu1 %v7376_v36  ;;  %v7782_v36 = vld [vmem:[#allocation9 + $0x20] sm:$0xff] }
 0x53b   : > { %4870 = vmatpush3.msra.mxu0 %v7758_v52  ;;  %3241 = vmatpush1.msra.mxu1 %v7382_v29  ;;  %v9606_v29 = vld [vmem:[#allocation58_spill] sm:$0xff] }
 0x53c   : > { %4871 = vmatprep.subr.mxu0 %v7762_v41  ;;  %3242 = vmatprep.subr.mxu1 %v7388_v49  ;;  %v9607_v49 = vld [vmem:[#allocation104_spill] sm:$0xff] }
 0x53d   : > { %4872 = vmatpush3.msra.mxu0 %v7766_v59  ;;  %3243 = vmatpush1.msra.mxu1 %v7394_v54  ;;  %v9610_v54 = vld [vmem:[#allocation62_spill] sm:$0xff] }
 0x53e   : > { %4873 = vmatprep.subr.mxu0 %v7770_v33  ;;  %3244 = vmatprep.subr.mxu1 %v7400_v11  ;;  %v9614_v11 = vld [vmem:[#allocation66_spill] sm:$0xff] }
 0x53f   : > { %4874 = vmatpush3.msra.mxu0 %v7774_v56  ;;  %3245 = vmatpush1.msra.mxu1 %v7406_v45  ;;  %v9618_v45 = vld [vmem:[#allocation70_spill] sm:$0xff] }
 0x540   : > { %4875 = vmatprep.subr.mxu0 %v7778_v37  ;;  %3246 = vmatprep.subr.mxu1 %v7412_v51  ;;  %v9620_v51 = vld [vmem:[#allocation81_spill] sm:$0xff] }
 0x541   : > { %4876 = vmatpush3.msra.mxu0 %v7782_v36  ;;  %3247 = vmatpush1.msra.mxu1 %v7418_v6  ;;  %v9612_v6 = vld [vmem:[#allocation79_spill] sm:$0xff] }
 0x542   : > { %2952 = vmatmul.mubr.f32.vlgmr.msra.gmra.mxu0 %v7648_v30  ;;  %3289 = vmatprep.subr.mxu0 %v7252_v28  ;;  %v9608_v28 = vld [vmem:[#allocation36_spill] sm:$0xff]  ;;  %v9622_v30 = vld [vmem:[#allocation74_spill] sm:$0xff] }
 0x543   : > { %3290 = vmatpush1.msra.mxu0 %v7258_v35  ;;  %3248 = vmatprep.subr.mxu1 %v7424_v25  ;;  %v9609_v35 = vld [vmem:[#allocation106_spill] sm:$0xff] }
 0x544   : > { %3291 = vmatprep.subr.mxu0 %v7264_v47  ;;  %3249 = vmatpush1.msra.mxu1 %v7430_v61  ;;  %v9611_v47 = vld [vmem:[#allocation108_spill] sm:$0xff]  ;;  %v9617_v25 = vld [vmem:[#allocation114_spill] sm:$0xff] }
 0x545   : > { %3292 = vmatpush1.msra.mxu0 %v7270_v57  ;;  %3250 = vmatprep.subr.mxu1 %v7436_v31  ;;  %v9613_v57 = vld [vmem:[#allocation110_spill] sm:$0xff]  ;;  %v9619_v61 = vld [vmem:[#allocation116_spill] sm:$0xff] }
 0x546   : > { %3293 = vmatprep.subr.mxu0 %v7276_v14  ;;  %3251 = vmatpush2.msra.mxu1 %v7442_v9  ;;  %v9615_v14 = vld [vmem:[#allocation112_spill] sm:$0xff]  ;;  %v9616_v9 = vld [vmem:[#allocation37_spill] sm:$0xff]  ;;  %v9621_v31 = vld [vmem:[#allocation118_spill] sm:$0xff] }
 0x547   : > { %3294 = vmatpush1.msra.mxu0 %v9606_v29  ;;  %3252 = vmatprep.subr.mxu1 %v9607_v49  ;;  %v9634_v29 = vld [vmem:[#allocation86_spill] sm:$0xff]  ;;  %v9635_v49 = vld [vmem:[#allocation132_spill] sm:$0xff] }
 0x548   : > { %3295 = vmatprep.subr.mxu0 %v9608_v28  ;;  %3253 = vmatpush2.msra.mxu1 %v9609_v35  ;;  %v9636_v28 = vld [vmem:[#allocation85_spill] sm:$0xff]  ;;  %v9637_v35 = vld [vmem:[#allocation134_spill] sm:$0xff] }
 0x549   : > { %3296 = vmatpush1.msra.mxu0 %v9610_v54  ;;  %3254 = vmatprep.subr.mxu1 %v9611_v47  ;;  %v9638_v54 = vld [vmem:[#allocation90_spill] sm:$0xff]  ;;  %v9639_v47 = vld [vmem:[#allocation136_spill] sm:$0xff] }
 0x54a   : > { %3297 = vmatprep.subr.mxu0 %v9612_v6  ;;  %3255 = vmatpush2.msra.mxu1 %v9613_v57  ;;  %v9640_v6 = vld [vmem:[#allocation40_spill] sm:$0xff]  ;;  %v9641_v57 = vld [vmem:[#allocation139_spill] sm:$0xff] }
 0x54b   : > { %3298 = vmatpush1.msra.mxu0 %v9614_v11  ;;  %3256 = vmatprep.subr.mxu1 %v9615_v14  ;;  %v9642_v11 = vld [vmem:[#allocation92_spill] sm:$0xff] }
 0x54c   : > { %3299 = vmatprep.subr.mxu0 %v9616_v9  ;;  %3257 = vmatpush2.msra.mxu1 %v9617_v25  ;;  %v9643_v14 = vld [vmem:[#allocation80_spill] sm:$0xff]  ;;  %v9644_v9 = vld [vmem:[#allocation87_spill] sm:$0xff] }
 0x54d   : > { %3300 = vmatpush1.msra.mxu0 %v9618_v45  ;;  %3258 = vmatprep.subr.mxu1 %v9619_v61  ;;  %v9645_v25 = vld [vmem:[#allocation88_spill] sm:$0xff]  ;;  %v9647_v61 = vld [vmem:[#allocation94_spill] sm:$0xff] }
 0x54e   : > { %3301 = vmatprep.subr.mxu0 %v9620_v51  ;;  %3259 = vmatpush2.msra.mxu1 %v9621_v31  ;;  %v9646_v45 = vld [vmem:[#allocation96_spill] sm:$0xff]  ;;  %v9648_v51 = vld [vmem:[#allocation41_spill] sm:$0xff]  ;;  %v9649_v31 = vld [vmem:[#allocation99_spill] sm:$0xff] }
 0x54f   : > { %3302 = vmatpush1.msra.mxu0 %v9622_v30  ;;  %3260 = vmatprep.subr.mxu1 %v9623_v24  ;;  %v9650_v30 = vld [vmem:[#allocation98_spill] sm:$0xff]  ;;  %v9651_v24 = vld [vmem:[#allocation103_spill] sm:$0xff] }
 0x550   : > { %3303 = vmatprep.subr.mxu0 %v9624_v53  ;;  %3261 = vmatpush2.msra.mxu1 %v9625_v2  ;;  %v9652_v53 = vld [vmem:[#allocation89_spill] sm:$0xff]  ;;  %v9653_v2 = vld [vmem:[#allocation107_spill] sm:$0xff] }
 0x551   : > { %3304 = vmatpush1.msra.mxu0 %v9626_v62  ;;  %3262 = vmatprep.subr.mxu1 %v9627_v8  ;;  %v9654_v62 = vld [vmem:[#allocation100_spill] sm:$0xff]  ;;  %v9655_v8 = vld [vmem:[#allocation111_spill] sm:$0xff] }
 0x552   : > { %3305 = vmatprep.subr.mxu0 %v9628_v16  ;;  %3263 = vmatpush2.msra.mxu1 %v9629_v4  ;;  %v9656_v16 = vld [vmem:[#allocation42_spill] sm:$0xff]  ;;  %v9657_v4 = vld [vmem:[#allocation115_spill] sm:$0xff] }
 0x553   : > { %3306 = vmatpush1.msra.mxu0 %v9630_v44  ;;  %3264 = vmatprep.subr.mxu1 %v9631_v55  ;;  %v9658_v44 = vld [vmem:[#allocation102_spill] sm:$0xff]  ;;  %v9659_v55 = vld [vmem:[#allocation119_spill] sm:$0xff] }
 0x554   : > { %3307 = vmatprep.subr.mxu0 %v9632_v21  ;;  %3265 = vmatpush2.msra.mxu1 %v9633_v0  ;;  %v9660_v21 = vld [vmem:[#allocation43_spill] sm:$0xff] }
 0x555   : > { %3308 = vmatpush1.msra.mxu0 %v9634_v29  ;;  %3266 = vmatprep.subr.mxu1 %v9635_v49  ;;  %v9661_v0 = vld [vmem:[#allocation123_spill] sm:$0xff]  ;;  %v9662_v29 = vld [vmem:[#allocation44_spill] sm:$0xff] }
 0x556   : > { %3309 = vmatprep.subr.mxu0 %v9636_v28  ;;  %3267 = vmatpush2.msra.mxu1 %v9637_v35  ;;  %v9663_v49 = vld [vmem:[#allocation127_spill] sm:$0xff]  ;;  %v9664_v28 = vld [vmem:[#allocation93_spill] sm:$0xff] }
 0x557   : > { %3310 = vmatpush1.msra.mxu0 %v9638_v54  ;;  %3268 = vmatprep.subr.mxu1 %v9639_v47  ;;  %v9665_v35 = vld [vmem:[#allocation131_spill] sm:$0xff]  ;;  %v9666_v54 = vld [vmem:[#allocation45_spill] sm:$0xff] }
 0x558   : > { %3311 = vmatprep.subr.mxu0 %v9640_v6  ;;  %3269 = vmatpush2.msra.mxu1 %v9641_v57  ;;  %v9667_v47 = vld [vmem:[#allocation137_spill] sm:$0xff]  ;;  %v9668_v6 = vld [vmem:[#allocation95_spill] sm:$0xff]  ;;  %v9669_v57 = vld [vmem:[#allocation46_spill] sm:$0xff] }
 0x559   : > { %3312 = vmatpush1.msra.mxu0 %v9642_v11  ;;  %3270 = vmatprep.subr.mxu1 %v9643_v14  ;;  %v9670_v11 = vld [vmem:[#allocation47_spill] sm:$0xff]  ;;  %v9671_v14 = vld [vmem:[#allocation48_spill] sm:$0xff] }
 0x55a   : > { %3313 = vmatprep.subr.mxu0 %v9644_v9  ;;  %3271 = vmatpush2.msra.mxu1 %v9645_v25  ;;  %v9672_v9 = vld [vmem:[#allocation49_spill] sm:$0xff]  ;;  %v9673_v25 = vld [vmem:[#allocation50_spill] sm:$0xff] }
 0x55b   : > { %3314 = vmatpush1.msra.mxu0 %v9646_v45  ;;  %3272 = vmatprep.subr.mxu1 %v9647_v61  ;;  %v9674_v45 = vld [vmem:[#allocation51_spill] sm:$0xff]  ;;  %v9675_v61 = vld [vmem:[#allocation52_spill] sm:$0xff] }
 0x55c   : > { %3315 = vmatprep.subr.mxu0 %v9648_v51  ;;  %3273 = vmatpush2.msra.mxu1 %v9649_v31  ;;  %v9676_v51 = vld [vmem:[#allocation54_spill] sm:$0xff]  ;;  %v9677_v31 = vld [vmem:[#allocation56_spill] sm:$0xff] }
 0x55d   : > { %3316 = vmatpush1.msra.mxu0 %v9650_v30  ;;  %3274 = vmatprep.subr.mxu1 %v9651_v24  ;;  %v9678_v30 = vld [vmem:[#allocation60_spill] sm:$0xff] }
 0x55e   : > { %3317 = vmatprep.subr.mxu0 %v9652_v53  ;;  %3275 = vmatpush2.msra.mxu1 %v9653_v2  ;;  %v9679_v24 = vld [vmem:[#allocation64_spill] sm:$0xff] }
 0x55f   : > { %3318 = vmatpush1.msra.mxu0 %v9654_v62  ;;  %3276 = vmatprep.subr.mxu1 %v9655_v8  ;;  %v9680_v53 = vld [vmem:[#allocation68_spill] sm:$0xff] }
 0x560   : > { %3319 = vmatprep.subr.mxu0 %v9656_v16  ;;  %3277 = vmatpush2.msra.mxu1 %v9657_v4  ;;  %v9681_v2 = vld [vmem:[#allocation72_spill] sm:$0xff]  ;;  %v9684_v16 = vld [vmem:[#allocation91_spill] sm:$0xff]  ;;  %v9685_v4 = vld [vmem:[#allocation97_spill] sm:$0xff] }
 0x561   : > { %3320 = vmatpush1.msra.mxu0 %v9658_v44  ;;  %3278 = vmatprep.subr.mxu1 %v9659_v55  ;;  %v9682_v62 = vld [vmem:[#allocation76_spill] sm:$0xff]  ;;  %v9686_v44 = vld [vmem:[#allocation101_spill] sm:$0xff] }
 0x562   : > { %3321 = vmatprep.subr.mxu0 %v9660_v21  ;;  %3279 = vmatpush2.msra.mxu1 %v9661_v0  ;;  %v9683_v8 = vld [vmem:[#allocation84_spill] sm:$0xff]  ;;  %v9687_v55 = vld [vmem:[#allocation105_spill] sm:$0xff] }
 0x563   : > { %3322 = vmatpush2.msra.mxu0 %v9662_v29  ;;  %3280 = vmatprep.subr.mxu1 %v9663_v49  ;;  %v9688_v21 = vld [vmem:[#allocation109_spill] sm:$0xff] }
 0x564   : > { %3323 = vmatprep.subr.mxu0 %v9664_v28  ;;  %3281 = vmatpush2.msra.mxu1 %v9665_v35  ;;  %v9689_v0 = vld [vmem:[#allocation113_spill] sm:$0xff] }
 0x565   : > { %3324 = vmatpush2.msra.mxu0 %v9666_v54  ;;  %4880 = vmatprep.subr.mxu1 %v9667_v47  ;;  %v9690_v29 = vld [vmem:[#allocation117_spill] sm:$0xff]  ;;  %v9695_v47 = vld [vmem:[#allocation135_spill] sm:$0xff] }
 0x566   : > { %3325 = vmatprep.subr.mxu0 %v9668_v6  ;;  %v9691_v49 = vld [vmem:[#allocation121_spill] sm:$0xff] }
 0x567   : > { %3326 = vmatpush2.msra.mxu0 %v9669_v57  ;;  %v9692_v28 = vld [vmem:[#allocation125_spill] sm:$0xff]  ;;  %v7894_v57 = vld [vmem:[%s9320_s19] ss:$0 sm:$0xff] }
 0x568   : > { %3327 = vmatprep.subr.mxu0 %v9670_v11  ;;  %v9693_v35 = vld [vmem:[#allocation129_spill] sm:$0xff] }
 0x569   : > { %3328 = vmatpush2.msra.mxu0 %v9671_v14  ;;  %v9694_v54 = vld [vmem:[#allocation133_spill] sm:$0xff] }
 0x56a   : > { %3329 = vmatprep.subr.mxu0 %v9672_v9  ;;  %v9696_v9 = vld [vmem:[#allocation77_spill] sm:$0xff] }
 0x56b   : > { %3330 = vmatpush2.msra.mxu0 %v9673_v25  ;;  %v9697_v25 = vld [vmem:[#allocation28_spill] sm:$0xff] }
 0x56c   : > { %3331 = vmatprep.subr.mxu0 %v9674_v45  ;;  %v551_v45 = vadd.f32 %v9697_v25, %v9696_v9 }
 0x56d   : > { %3332 = vmatpush2.msra.mxu0 %v9675_v61 }
 0x56e   : > { %3333 = vmatprep.subr.mxu0 %v9676_v51  ;;  %v9698_v51 = vld [vmem:[#allocation61_spill] sm:$0xff] }
 0x56f   : > { %3334 = vmatpush2.msra.mxu0 %v9677_v31  ;;  %v549_v31 = vadd.f32 %v9698_v51, %v6479_v19 }
 0x570   : > { %3335 = vmatprep.subr.mxu0 %v9678_v30 }
 0x571   : > { %3336 = vmatpush2.msra.mxu0 %v9679_v24 }
 0x572   : > { %3337 = vmatprep.subr.mxu0 %v9680_v53 }
 0x573   : > { %3338 = vmatpush2.msra.mxu0 %v9681_v2 }
 0x574   : > { %3339 = vmatprep.subr.mxu0 %v9682_v62 }
 0x575   : > { %3340 = vmatpush2.msra.mxu0 %v9683_v8  ;;  %v9699_v8 = vld [vmem:[#allocation63_spill] sm:$0xff] }
 0x576   : > { %3341 = vmatprep.subr.mxu0 %v9684_v16  ;;  %v662_v16 = vadd.f32 %v9699_v8, %v6483_v15 }
 0x577   : > { %3342 = vmatpush2.msra.mxu0 %v9685_v4 }
 0x578   : > { %3343 = vmatprep.subr.mxu0 %v9686_v44 }
 0x579   : > { %3344 = vmatpush2.msra.mxu0 %v9687_v55 }
 0x57a   : > { %3345 = vmatprep.subr.mxu0 %v9688_v21 }
 0x57b   : > { %3346 = vmatpush2.msra.mxu0 %v9689_v0 }
 0x57c   : > { %3347 = vmatprep.subr.mxu0 %v9690_v29 }
 0x57d   : > { %3348 = vmatpush2.msra.mxu0 %v9691_v49 }
 0x57e   : > { %3349 = vmatprep.subr.mxu0 %v9692_v28 }
 0x57f   : > { %3350 = vmatpush2.msra.mxu0 %v9693_v35  ;;  %v9700_v35 = vld [vmem:[#allocation29_spill] sm:$0xff] }
 0x580   : > { %3351 = vmatprep.subr.mxu0 %v9694_v54  ;;  %v664_v54 = vadd.f32 %v9700_v35, %v6486_v27  ;;  %v8043_v35 = vld [vmem:[#allocation9 + $0x158] sm:$0xff] }
 0x581   : > { %3352 = vmatpush2.msra.mxu0 %v9695_v47  ;;  %9710 = vst [vmem:[#allocation58_spill] sm:$0xff] %v8043_v35 }
 0x5e1   : > { %v2811_v6 = vpop.f32.mrf.mxu0  ;;  %v2882_v14 = vpop.f32.mrf.mxu1 }
 0x5e2   : > { %v2957_v11 = vadd.f32 %v7894_v57, %v2811_v6  ;;  %v2959_v30 = vadd.f32 %v2882_v14, %v551_v45 }
 0x5e3   : > { %v2813_v61 = vpop.f32.mrf.mxu0  ;;  %v2884_v62 = vpop.f32.mrf.mxu1 }
 0x5e4   : > { %3282 = vmatprep.mubr.f32.mxu1 %v2957_v11  ;;  %3353 = vmatprep.mubr.f32.mxu0 %v2957_v11  ;;  %v2958_v24 = vadd.f32 %v2813_v61, %v549_v31  ;;  %v4670_v53 = vmul.f32 -1.442695, %v2959_v30  ;;  %v2960_v4 = vadd.f32 %v2884_v62, %v662_v16 }
 0x5e6   : > { %v4669_v2 = vmul.f32 -1.442695, %v2958_v24  ;;  %5190 = vpow2.f32 %v4670_v53  ;;  %v4671_v21 = vmul.f32 -1.442695, %v2960_v4 }
 0x5e8   : > { %5192 = vpow2.f32 %v4669_v2 }
 0x5e9   : > { %5194 = vpow2.f32 %v4671_v21 }
 0x5f3   : > { %v5191_v44 = vpop.eup %5190 }
 0x5f4   : > { %v2972_v29 = vadd.f32 1.0, %v5191_v44 }
 0x5f5   : > { %v5193_v55 = vpop.eup %5192 }
 0x5f6   : > { %v2971_v49 = vadd.f32 1.0, %v5193_v55  ;;  %5196 = vrcp.f32 %v2972_v29  ;;  %v5195_v14 = vpop.eup %5194 }
 0x5f7   : > { %v2973_v51 = vadd.f32 1.0, %v5195_v14  ;;  %v8055_v14 = vld [vmem:[#allocation9 + $0x130] sm:$0xff] }
 0x5f8   : > { %5198 = vrcp.f32 %v2971_v49  ;;  %v8037_v49 = vld [vmem:[#allocation9 + $0x178] sm:$0xff]  ;;  %9712 = vst [vmem:[#allocation36_spill] sm:$0xff] %v8055_v14 }
 0x5f9   : > { %9709 = vst [vmem:[#allocation27_spill] sm:$0xff] %v8037_v49 }
 0x602   : > { %v4877_v0 = vpop.f32.mrf.mxu0 }
 0x603   : > { %v5197_v25 = vpop.eup %5196 }
 0x604   : > { %v4878_v28 = vpop.f32.mrf.mxu0  ;;  %v2982_v31 = vmul.f32 %v5197_v25, %v7645_v38  ;;  %v8059_v25 = vld [vmem:[#allocation9 + $0xf8] sm:$0xff] }
 0x605   : > { %v4879_v47 = vadd.f32 %v4878_v28, %v4877_v0  ;;  %v5199_v45 = vpop.eup %5198  ;;  %v8041_v28 = vld [vmem:[#allocation9 + $0x140] sm:$0xff] }
 0x607   : > { %v2961_v6 = vadd.f32 %v4879_v47, %v664_v54  ;;  %v8047_v54 = vld [vmem:[#allocation9 + $0x120] sm:$0xff]  ;;  %v8049_v47 = vld [vmem:[#allocation9 + $0x150] sm:$0xff] }
 0x608   : > { %9711 = vst [vmem:[#allocation104_spill] sm:$0xff] %v8049_v47 }
 0x609   : > { %5200 = vtanh.f32 %v2961_v6  ;;  %v8053_v6 = vld [vmem:[#allocation9 + $0x118] sm:$0xff] }
 0x60a   : > { %5202 = vrcp.f32 %v2973_v51  ;;  %v8067_v51 = vld [vmem:[#allocation9 + $0x108] sm:$0xff] }
 0x60b   : > { %9714 = vst [vmem:[#allocation62_spill] sm:$0xff] %v8067_v51 }
 0x616   : > { %v5201_v61 = vpop.eup %5200 }
 0x617   : > { %v2983_v30 = vmul.f32 %v5201_v61, %v5199_v45  ;;  %v5203_v53 = vpop.eup %5202  ;;  %v8061_v45 = vld [vmem:[#allocation9 + $0x128] sm:$0xff]  ;;  %v8065_v61 = vld [vmem:[#allocation9 + $0xf0] sm:$0xff] }
 0x618   : > { %9713 = vst [vmem:[#allocation106_spill] sm:$0xff] %v8061_v45 }
 0x619   : > { %v7906_v24 = vadd.f32 %v2983_v30, %v2982_v31  ;;  %v8071_v31 = vld [vmem:[#allocation9 + $0xd0] sm:$0xff]  ;;  %v8073_v30 = vld [vmem:[#allocation9 + $0x100] sm:$0xff] }
 0x61a   : > { %9715 = vst [vmem:[#allocation108_spill] sm:$0xff] %v8073_v30 }
 0x61b   : > { %5204 = vtanh.f32 %v7906_v24 }
 0x628   : > { %v5205_v2 = vpop.eup %5204 }
 0x629   : > { %v2986_v62 = vmul.f32 %v5205_v2, %v5203_v53  ;;  %v8077_v53 = vld [vmem:[#allocation9 + $0xc8] sm:$0xff]  ;;  %v8079_v2 = vld [vmem:[#allocation9 + $0xe0] sm:$0xff] }
 0x62a   : > { %9716 = vst [vmem:[#allocation79_spill] sm:$0xff] %v8079_v2 }
 0x62b   : > { %v2991_v8 = vcombine.high %v2986_v62, %v2986_v62  ;;  %v2998_v16 = vrot.slane %v2986_v62, %v6493_v23  ;;  %3283 = vmatmul.mubr.f32.vlgmr.msra.gmra.mxu1 %v2986_v62  ;;  %3354 = vmatmul.mubr.f32.vlgmr.msra.gmra.mxu0 %v2986_v62 }
 0x62c   : > { %4881 = vmatpush3.msra.mxu1 %v7650_v1  ;;  %3424 = vmatprep.mubr.f32.mxu1 %v2957_v11 }
 0x62d   : > { %v3005_v38 = vrot.slane %v2991_v8, %v6493_v23  ;;  %v3006_v4 = vcombine.high %v2998_v16, %v2998_v16  ;;  %v3014_v44 = vrot.slane %v2998_v16, %v6493_v23  ;;  %4672 = vst.sshfl [vmem:[%s5769_s10 + $0x4] sm:$0x1 pattern:$0x73625140] %v2998_v16  ;;  %4882 = vmatprep.subr.mxu1 %v7652_v48  ;;  %v8085_v8 = vld [vmem:[#allocation9 + $0xd8] sm:$0xff]  ;;  %v8089_v16 = vld [vmem:[#allocation9 + $0xa0] sm:$0xff] }
 0x62e   : > { %4883 = vmatpush3.msra.mxu1 %v7660_v60  ;;  %9717 = vst [vmem:[#allocation110_spill] sm:$0xff] %v8085_v8 }
 0x62f   : > { %v3007_v55 = vcombine.high %v3005_v38, %v3005_v38  ;;  %v3021_v21 = vrot.slane %v3005_v38, %v6493_v23  ;;  %v3028_v1 = vrot.slane %v3006_v4, %v6493_v23  ;;  %v3036_v11 = vcombine.high %v3014_v44, %v3014_v44  ;;  %4673 = vst.sshfl [vmem:[%s5769_s10 + $0xc] sm:$0x1 pattern:$0x73625140] %v3006_v4  ;;  %v8095_v4 = vld [vmem:[#allocation9 + $0x80] sm:$0xff]  ;;  %v8097_v44 = vld [vmem:[#allocation9 + $0xb0] sm:$0xff] }
 0x630   : > { %4674 = vst.sshfl [vmem:[%s5769_s10 + $0x24] sm:$0x1 pattern:$0x73625140] %v3005_v38  ;;  %4884 = vmatprep.subr.mxu1 %v7663_v3  ;;  %v7954_v3 = vld [vmem:[#allocation9 + $0x260] sm:$0xff]  ;;  %v8091_v38 = vld [vmem:[#allocation9 + $0xb8] sm:$0xff] }
 0x631   : > { %4885 = vmatpush3.msra.mxu1 %v7669_v46  ;;  %v3035_v0 = vrot.slane %v3007_v55, %v6493_v23  ;;  %v3037_v48 = vcombine.high %v3021_v21, %v3021_v21  ;;  %v3038_v29 = vcombine.high %v3028_v1, %v3028_v1  ;;  %3050 = vst [vmem:[%s5769_s10 + $0x14] sm:$0x1] %v3036_v11  ;;  %4675 = vst.sshfl [vmem:[%s5769_s10 + $0x2c] sm:$0x1 pattern:$0x73625140] %v3007_v55 }
 0x632   : > { %4886 = vmatprep.subr.mxu1 %v7673_v13  ;;  %3691 = vmatprep.subr.mxu0 %v7954_v3  ;;  %v7957_v46 = vld [vmem:[#allocation9 + $0x258] sm:$0xff]  ;;  %v7959_v13 = vld [vmem:[#allocation9 + $0x270] sm:$0xff]  ;;  %9718 = vst [vmem:[#allocation66_spill] sm:$0xff] %v8091_v38  ;;  %9719 = vst [vmem:[#allocation112_spill] sm:$0xff] %v8097_v44 }
 0x633   : > { %4887 = vmatpush3.msra.mxu1 %v7681_v39  ;;  %v3039_v60 = vcombine.high %v3035_v0, %v3035_v0  ;;  %3051 = vst [vmem:[%s5769_s10 + $0x1c] sm:$0x1] %v3038_v29  ;;  %3054 = vst [vmem:[%s5769_s10 + $0x34] sm:$0x1] %v3037_v48  ;;  %3692 = vmatpush1.msra.mxu0 %v7957_v46  ;;  %v7963_v39 = vld [vmem:[#allocation9 + $0x238] sm:$0xff]  ;;  %v8103_v21 = vld [vmem:[#allocation9 + $0x90] sm:$0xff] }
 0x634   : > { %4888 = vmatprep.subr.mxu1 %v7684_v32  ;;  %v7965_v32 = vld [vmem:[#allocation9 + $0x268] sm:$0xff]  ;;  %3693 = vmatprep.subr.mxu0 %v7963_v39  ;;  %v8101_v55 = vld [vmem:[#allocation9 + $0x78] sm:$0xff]  ;;  %9720 = vst [vmem:[#allocation37_spill] sm:$0xff] %v8103_v21  ;;  %v8113_v0 = vld [vmem:[#allocation9 + $0x50] sm:$0xff] }
 0x635   : > { %4889 = vmatpush3.msra.mxu1 %v7691_v40  ;;  %3055 = vst [vmem:[%s5769_s10 + $0x3c] sm:$0x1] %v3039_v60  ;;  %v7969_v40 = vld [vmem:[#allocation9 + $0x230] sm:$0xff]  ;;  %v8107_v1 = vld [vmem:[#allocation9 + $0x58] sm:$0xff]  ;;  %v8109_v11 = vld [vmem:[#allocation9 + $0x88] sm:$0xff] }
 0x636   : > { %4890 = vmatprep.subr.mxu1 %v7695_v22  ;;  %v7971_v22 = vld [vmem:[#allocation9 + $0x248] sm:$0xff]  ;;  %3694 = vmatpush1.msra.mxu0 %v7969_v40  ;;  %9721 = vst [vmem:[#allocation114_spill] sm:$0xff] %v8109_v11  ;;  %v8119_v29 = vld [vmem:[#allocation9 + $0x30] sm:$0xff]  ;;  %v8121_v60 = vld [vmem:[#allocation9 + $0x60] sm:$0xff] }
 0x637   : > { %4891 = vmatpush3.msra.mxu1 %v7701_v12  ;;  %v7975_v12 = vld [vmem:[#allocation9 + $0x210] sm:$0xff]  ;;  %v8115_v48 = vld [vmem:[#allocation9 + $0x68] sm:$0xff]  ;;  %9723 = vst [vmem:[#allocation116_spill] sm:$0xff] %v8121_v60 }
 0x638   : > { %4892 = vmatprep.subr.mxu1 %v7705_v43  ;;  %v7977_v43 = vld [vmem:[#allocation9 + $0x240] sm:$0xff]  ;;  %3695 = vmatprep.subr.mxu0 %v7975_v12  ;;  %9722 = vst [vmem:[#allocation70_spill] sm:$0xff] %v8115_v48 }
 0x639   : > { %4893 = vmatpush3.msra.mxu1 %v7710_v20  ;;  %v7981_v20 = vld [vmem:[#allocation9 + $0x208] sm:$0xff] }
 0x63a   : > { %4894 = vmatprep.subr.mxu1 %v7714_v10  ;;  %v7983_v10 = vld [vmem:[#allocation9 + $0x220] sm:$0xff]  ;;  %3696 = vmatpush1.msra.mxu0 %v7981_v20 }
 0x63b   : > { %4895 = vmatpush3.msra.mxu1 %v7718_v18  ;;  %v7987_v18 = vld [vmem:[#allocation9 + $0x1e8] sm:$0xff] }
 0x63c   : > { %4896 = vmatprep.subr.mxu1 %v7722_v26  ;;  %v7989_v26 = vld [vmem:[#allocation9 + $0x218] sm:$0xff]  ;;  %3697 = vmatprep.subr.mxu0 %v7987_v18 }
 0x63d   : > { %4897 = vmatpush3.msra.mxu1 %v7726_v34  ;;  %9701 = vst [vmem:[#allocation138_spill] sm:$0xff] %v7989_v26  ;;  %v7993_v34 = vld [vmem:[#allocation9 + $0x1e0] sm:$0xff] }
 0x63e   : > { %4898 = vmatprep.subr.mxu1 %v7730_v42  ;;  %v7995_v42 = vld [vmem:[#allocation9 + $0x1f8] sm:$0xff]  ;;  %3698 = vmatpush1.msra.mxu0 %v7993_v34 }
 0x63f   : > { %4899 = vmatpush3.msra.mxu1 %v7734_v50  ;;  %9702 = vst [vmem:[#allocation24_spill] sm:$0xff] %v7995_v42  ;;  %v7999_v50 = vld [vmem:[#allocation9 + $0x1c0] sm:$0xff] }
 0x640   : > { %4900 = vmatprep.subr.mxu1 %v7738_v5  ;;  %v8001_v5 = vld [vmem:[#allocation9 + $0x1f0] sm:$0xff]  ;;  %3699 = vmatprep.subr.mxu0 %v7999_v50 }
 0x641   : > { %4901 = vmatpush3.msra.mxu1 %v7742_v7  ;;  %9703 = vst [vmem:[#allocation53_spill] sm:$0xff] %v8001_v5  ;;  %v8005_v7 = vld [vmem:[#allocation9 + $0x1b8] sm:$0xff] }
 0x642   : > { %4902 = vmatprep.subr.mxu1 %v7746_v58  ;;  %v8007_v58 = vld [vmem:[#allocation9 + $0x1d0] sm:$0xff]  ;;  %3700 = vmatpush1.msra.mxu0 %v8005_v7 }
 0x643   : > { %4903 = vmatpush3.msra.mxu1 %v7750_v17  ;;  %9704 = vst [vmem:[#allocation55_spill] sm:$0xff] %v8007_v58  ;;  %v8011_v17 = vld [vmem:[#allocation9 + $0x198] sm:$0xff] }
 0x644   : > { %4904 = vmatprep.subr.mxu1 %v7754_v63  ;;  %v8013_v63 = vld [vmem:[#allocation9 + $0x1c8] sm:$0xff]  ;;  %3701 = vmatprep.subr.mxu0 %v8011_v17 }
 0x645   : > { %4905 = vmatpush3.msra.mxu1 %v7758_v52  ;;  %9705 = vst [vmem:[#allocation25_spill] sm:$0xff] %v8013_v63  ;;  %v8017_v52 = vld [vmem:[#allocation9 + $0x190] sm:$0xff] }
 0x646   : > { %4906 = vmatprep.subr.mxu1 %v7762_v41  ;;  %v8019_v41 = vld [vmem:[#allocation9 + $0x1a8] sm:$0xff]  ;;  %3702 = vmatpush1.msra.mxu0 %v8017_v52 }
 0x647   : > { %4907 = vmatpush3.msra.mxu1 %v7766_v59  ;;  %9706 = vst [vmem:[#allocation26_spill] sm:$0xff] %v8019_v41  ;;  %v8023_v59 = vld [vmem:[#allocation9 + $0x170] sm:$0xff] }
 0x648   : > { %4908 = vmatprep.subr.mxu1 %v7770_v33  ;;  %v8025_v33 = vld [vmem:[#allocation9 + $0x1a0] sm:$0xff]  ;;  %3703 = vmatprep.subr.mxu0 %v8023_v59 }
 0x649   : > { %4909 = vmatpush3.msra.mxu1 %v7774_v56  ;;  %9707 = vst [vmem:[#allocation57_spill] sm:$0xff] %v8025_v33  ;;  %v8029_v56 = vld [vmem:[#allocation9 + $0x168] sm:$0xff] }
 0x64a   : > { %4910 = vmatprep.subr.mxu1 %v7778_v37  ;;  %v8031_v37 = vld [vmem:[#allocation9 + $0x180] sm:$0xff]  ;;  %3704 = vmatpush1.msra.mxu0 %v8029_v56 }
 0x64b   : > { %4911 = vmatpush3.msra.mxu1 %v7782_v36  ;;  %9708 = vst [vmem:[#allocation59_spill] sm:$0xff] %v8031_v37  ;;  %v8035_v36 = vld [vmem:[#allocation9 + $0x148] sm:$0xff] }
 0x64c   : > { %3425 = vmatmul.mubr.f32.vlgmr.msra.gmra.mxu1 %v2986_v62  ;;  %3762 = vmatprep.subr.mxu1 %v7959_v13  ;;  %v8083_v62 = vld [vmem:[#allocation9 + $0xa8] sm:$0xff] }
 0x64d   : > { %3763 = vmatpush1.msra.mxu1 %v7965_v32  ;;  %3705 = vmatprep.subr.mxu0 %v8035_v36 }
 0x64e   : > { %3764 = vmatprep.subr.mxu1 %v7971_v22  ;;  %3706 = vmatpush1.msra.mxu0 %v8041_v28 }
 0x64f   : > { %3765 = vmatpush1.msra.mxu1 %v7977_v43  ;;  %3707 = vmatprep.subr.mxu0 %v8047_v54 }
 0x650   : > { %3766 = vmatprep.subr.mxu1 %v7983_v10  ;;  %3708 = vmatpush1.msra.mxu0 %v8053_v6 }
 0x651   : > { %3767 = vmatpush1.msra.mxu1 %v7989_v26  ;;  %3709 = vmatprep.subr.mxu0 %v8059_v25 }
 0x652   : > { %3768 = vmatprep.subr.mxu1 %v7995_v42  ;;  %3710 = vmatpush1.msra.mxu0 %v8065_v61 }
 0x653   : > { %3769 = vmatpush1.msra.mxu1 %v8001_v5  ;;  %3711 = vmatprep.subr.mxu0 %v8071_v31 }
 0x654   : > { %3770 = vmatprep.subr.mxu1 %v8007_v58  ;;  %3712 = vmatpush1.msra.mxu0 %v8077_v53 }
 0x655   : > { %3771 = vmatpush1.msra.mxu1 %v8013_v63  ;;  %3713 = vmatprep.subr.mxu0 %v8083_v62 }
 0x656   : > { %3772 = vmatprep.subr.mxu1 %v8019_v41  ;;  %3714 = vmatpush1.msra.mxu0 %v8089_v16 }
 0x657   : > { %3773 = vmatpush1.msra.mxu1 %v8025_v33  ;;  %3715 = vmatprep.subr.mxu0 %v8095_v4  ;;  %v8199_v33 = vld [vmem:[#allocation9 + $0x450] sm:$0xff] }
 0x658   : > { %3774 = vmatprep.subr.mxu1 %v8031_v37  ;;  %3716 = vmatpush1.msra.mxu0 %v8101_v55  ;;  %v8193_v37 = vld [vmem:[#allocation9 + $0x470] sm:$0xff]  ;;  %9744 = vst [vmem:[#allocation40_spill] sm:$0xff] %v8199_v33 }
 0x659   : > { %3775 = vmatpush1.msra.mxu1 %v8037_v49  ;;  %3717 = vmatprep.subr.mxu0 %v8107_v1  ;;  %v8187_v49 = vld [vmem:[#allocation9 + $0x478] sm:$0xff]  ;;  %9742 = vst [vmem:[#allocation90_spill] sm:$0xff] %v8193_v37 }
 0x65a   : > { %3776 = vmatprep.subr.mxu1 %v8043_v35  ;;  %3718 = vmatpush1.msra.mxu0 %v8113_v0  ;;  %v8181_v35 = vld [vmem:[#allocation9 + $0x498] sm:$0xff]  ;;  %9740 = vst [vmem:[#allocation85_spill] sm:$0xff] %v8187_v49 }
 0x65b   : > { %3777 = vmatpush1.msra.mxu1 %v8049_v47  ;;  %3719 = vmatprep.subr.mxu0 %v8119_v29  ;;  %v8175_v47 = vld [vmem:[#allocation9 + $0x4a0] sm:$0xff]  ;;  %9738 = vst [vmem:[#allocation86_spill] sm:$0xff] %v8181_v35 }
 0x65c   : > { %3778 = vmatprep.subr.mxu1 %v8055_v14  ;;  %v8169_v14 = vld [vmem:[#allocation9 + $0x4c0] sm:$0xff]  ;;  %9736 = vst [vmem:[#allocation39_spill] sm:$0xff] %v8175_v47 }
 0x65d   : > { %3779 = vmatpush1.msra.mxu1 %v8061_v45  ;;  %v8163_v45 = vld [vmem:[#allocation9 + $0x4c8] sm:$0xff]  ;;  %9734 = vst [vmem:[#allocation82_spill] sm:$0xff] %v8169_v14 }
 0x65e   : > { %3780 = vmatprep.subr.mxu1 %v8067_v51  ;;  %v8157_v51 = vld [vmem:[#allocation9 + $0x4e8] sm:$0xff]  ;;  %9732 = vst [vmem:[#allocation83_spill] sm:$0xff] %v8163_v45 }
 0x65f   : > { %3781 = vmatpush1.msra.mxu1 %v8073_v30  ;;  %v8151_v30 = vld [vmem:[#allocation9 + $0x4f0] sm:$0xff]  ;;  %9730 = vst [vmem:[#allocation78_spill] sm:$0xff] %v8157_v51 }
 0x660   : > { %3782 = vmatprep.subr.mxu1 %v8079_v2  ;;  %v8145_v2 = vld [vmem:[#allocation9 + $0x10] sm:$0xff]  ;;  %9728 = vst [vmem:[#allocation38_spill] sm:$0xff] %v8151_v30 }
 0x661   : > { %3783 = vmatpush1.msra.mxu1 %v8085_v8  ;;  %v8139_v8 = vld [vmem:[#allocation9 + $0x18] sm:$0xff]  ;;  %9727 = vst [vmem:[#allocation120_spill] sm:$0xff] %v8145_v2 }
 0x662   : > { %3784 = vmatprep.subr.mxu1 %v8091_v38  ;;  %v8133_v38 = vld [vmem:[#allocation9 + $0x38] sm:$0xff]  ;;  %9726 = vst [vmem:[#allocation74_spill] sm:$0xff] %v8139_v8 }
 0x663   : > { %3785 = vmatpush1.msra.mxu1 %v8097_v44  ;;  %v8127_v44 = vld [vmem:[#allocation9 + $0x40] sm:$0xff]  ;;  %9725 = vst [vmem:[#allocation118_spill] sm:$0xff] %v8133_v38 }
 0x664   : > { %3786 = vmatprep.subr.mxu1 %v8103_v21  ;;  %v8125_v21 = vld [vmem:[#allocation9 + $0x28] sm:$0xff]  ;;  %9724 = vst [vmem:[#allocation81_spill] sm:$0xff] %v8127_v44 }
 0x665   : > { %3787 = vmatpush1.msra.mxu1 %v8109_v11  ;;  %3720 = vmatpush1.msra.mxu0 %v8125_v21  ;;  %v8131_v11 = vld [vmem:[#allocation9 + $0x8] sm:$0xff] }
 0x666   : > { %3788 = vmatprep.subr.mxu1 %v8115_v48  ;;  %3721 = vmatprep.subr.mxu0 %v8131_v11  ;;  %v8137_v48 = vld [vmem:[#allocation9] sm:$0xff] }
 0x667   : > { %3789 = vmatpush1.msra.mxu1 %v8121_v60  ;;  %3722 = vmatpush1.msra.mxu0 %v8137_v48  ;;  %v8143_v60 = vld [vmem:[#allocation9 + $0x4e0] sm:$0xff] }
 0x668   : > { %3790 = vmatprep.subr.mxu1 %v8127_v44  ;;  %3723 = vmatprep.subr.mxu0 %v8143_v60  ;;  %v8149_v44 = vld [vmem:[#allocation9 + $0x4d8] sm:$0xff] }
 0x669   : > { %3791 = vmatpush1.msra.mxu1 %v8133_v38  ;;  %3724 = vmatpush2.msra.mxu0 %v8149_v44  ;;  %v8155_v38 = vld [vmem:[#allocation9 + $0x4b8] sm:$0xff] }
 0x66a   : > { %3792 = vmatprep.subr.mxu1 %v8139_v8  ;;  %9729 = vst [vmem:[#allocation122_spill] sm:$0xff] %v8155_v38  ;;  %3725 = vmatprep.subr.mxu0 %v8155_v38  ;;  %v8161_v8 = vld [vmem:[#allocation9 + $0x4b0] sm:$0xff] }
 0x66b   : > { %3793 = vmatpush1.msra.mxu1 %v8145_v2  ;;  %9731 = vst [vmem:[#allocation124_spill] sm:$0xff] %v8161_v8  ;;  %3726 = vmatpush2.msra.mxu0 %v8161_v8  ;;  %v8167_v2 = vld [vmem:[#allocation9 + $0x490] sm:$0xff] }
 0x66c   : > { %3794 = vmatprep.subr.mxu1 %v8151_v30  ;;  %9733 = vst [vmem:[#allocation126_spill] sm:$0xff] %v8167_v2  ;;  %3727 = vmatprep.subr.mxu0 %v8167_v2  ;;  %v8173_v30 = vld [vmem:[#allocation9 + $0x488] sm:$0xff] }
 0x66d   : > { %3795 = vmatpush2.msra.mxu1 %v8157_v51  ;;  %9735 = vst [vmem:[#allocation128_spill] sm:$0xff] %v8173_v30  ;;  %3728 = vmatpush2.msra.mxu0 %v8173_v30  ;;  %v8179_v51 = vld [vmem:[#allocation9 + $0x468] sm:$0xff] }
 0x66e   : > { %3796 = vmatprep.subr.mxu1 %v8163_v45  ;;  %9737 = vst [vmem:[#allocation130_spill] sm:$0xff] %v8179_v51  ;;  %3729 = vmatprep.subr.mxu0 %v8179_v51  ;;  %v8185_v45 = vld [vmem:[#allocation9 + $0x460] sm:$0xff]  ;;  %v9792_v51 = vld [vmem:[#allocation65_spill] sm:$0xff] }
 0x66f   : > { %3797 = vmatpush2.msra.mxu1 %v8169_v14  ;;  %9739 = vst [vmem:[#allocation132_spill] sm:$0xff] %v8185_v45  ;;  %3730 = vmatpush2.msra.mxu0 %v8185_v45  ;;  %v8191_v14 = vld [vmem:[#allocation9 + $0x440] sm:$0xff]  ;;  %v8205_v45 = vld [vmem:[#allocation9 + $0x448] sm:$0xff]  ;;  %v555_v63 = vadd.f32 %v9792_v51, %v6479_v19 }
 0x670   : > { %3798 = vmatprep.subr.mxu1 %v8175_v47  ;;  %9741 = vst [vmem:[#allocation134_spill] sm:$0xff] %v8191_v14  ;;  %3731 = vmatprep.subr.mxu0 %v8191_v14  ;;  %v8197_v47 = vld [vmem:[#allocation9 + $0x438] sm:$0xff]  ;;  %9746 = vst [vmem:[#allocation92_spill] sm:$0xff] %v8205_v45  ;;  %v8211_v14 = vld [vmem:[#allocation9 + $0x428] sm:$0xff] }
 0x671   : > { %3799 = vmatpush2.msra.mxu1 %v8181_v35  ;;  %9743 = vst [vmem:[#allocation136_spill] sm:$0xff] %v8197_v47  ;;  %3732 = vmatpush2.msra.mxu0 %v8197_v47  ;;  %v8203_v35 = vld [vmem:[#allocation9 + $0x418] sm:$0xff]  ;;  %9748 = vst [vmem:[#allocation87_spill] sm:$0xff] %v8211_v14  ;;  %v8217_v47 = vld [vmem:[#allocation9 + $0x420] sm:$0xff] }
 0x672   : > { %3800 = vmatprep.subr.mxu1 %v8187_v49  ;;  %9745 = vst [vmem:[#allocation139_spill] sm:$0xff] %v8203_v35  ;;  %3733 = vmatprep.subr.mxu0 %v8203_v35  ;;  %v8209_v49 = vld [vmem:[#allocation9 + $0x410] sm:$0xff]  ;;  %9750 = vst [vmem:[#allocation96_spill] sm:$0xff] %v8217_v47  ;;  %v8223_v35 = vld [vmem:[#allocation9 + $0x400] sm:$0xff] }
 0x673   : > { %3801 = vmatpush2.msra.mxu1 %v8193_v37  ;;  %9747 = vst [vmem:[#allocation80_spill] sm:$0xff] %v8209_v49  ;;  %3734 = vmatpush2.msra.mxu0 %v8209_v49  ;;  %v8215_v37 = vld [vmem:[#allocation9 + $0x3f0] sm:$0xff]  ;;  %9752 = vst [vmem:[#allocation41_spill] sm:$0xff] %v8223_v35  ;;  %v8229_v49 = vld [vmem:[#allocation9 + $0x3f8] sm:$0xff] }
 0x674   : > { %3802 = vmatprep.subr.mxu1 %v8199_v33  ;;  %9749 = vst [vmem:[#allocation88_spill] sm:$0xff] %v8215_v37  ;;  %3735 = vmatprep.subr.mxu0 %v8215_v37  ;;  %v8221_v33 = vld [vmem:[#allocation9 + $0x3e8] sm:$0xff]  ;;  %9754 = vst [vmem:[#allocation98_spill] sm:$0xff] %v8229_v49  ;;  %v8235_v37 = vld [vmem:[#allocation9 + $0x3d8] sm:$0xff] }
 0x675   : > { %3803 = vmatpush2.msra.mxu1 %v8205_v45  ;;  %9751 = vst [vmem:[#allocation94_spill] sm:$0xff] %v8221_v33  ;;  %3736 = vmatpush2.msra.mxu0 %v8221_v33  ;;  %v8227_v45 = vld [vmem:[#allocation9 + $0x3c8] sm:$0xff]  ;;  %9756 = vst [vmem:[#allocation89_spill] sm:$0xff] %v8235_v37  ;;  %v8241_v33 = vld [vmem:[#allocation9 + $0x3d0] sm:$0xff] }
 0x676   : > { %3804 = vmatprep.subr.mxu1 %v8211_v14  ;;  %9753 = vst [vmem:[#allocation99_spill] sm:$0xff] %v8227_v45  ;;  %3737 = vmatprep.subr.mxu0 %v8227_v45  ;;  %v8233_v14 = vld [vmem:[#allocation9 + $0x3c0] sm:$0xff]  ;;  %9758 = vst [vmem:[#allocation100_spill] sm:$0xff] %v8241_v33  ;;  %v8247_v45 = vld [vmem:[#allocation9 + $0x3b0] sm:$0xff] }
 0x677   : > { %3805 = vmatpush2.msra.mxu1 %v8217_v47  ;;  %9755 = vst [vmem:[#allocation103_spill] sm:$0xff] %v8233_v14  ;;  %3738 = vmatpush2.msra.mxu0 %v8233_v14  ;;  %v8239_v47 = vld [vmem:[#allocation9 + $0x3a0] sm:$0xff]  ;;  %9760 = vst [vmem:[#allocation42_spill] sm:$0xff] %v8247_v45  ;;  %v8253_v14 = vld [vmem:[#allocation9 + $0x3a8] sm:$0xff] }
 0x678   : > { %3806 = vmatprep.subr.mxu1 %v8223_v35  ;;  %9757 = vst [vmem:[#allocation107_spill] sm:$0xff] %v8239_v47  ;;  %3739 = vmatprep.subr.mxu0 %v8239_v47  ;;  %v8245_v35 = vld [vmem:[#allocation9 + $0x398] sm:$0xff]  ;;  %9762 = vst [vmem:[#allocation102_spill] sm:$0xff] %v8253_v14  ;;  %v8259_v47 = vld [vmem:[#allocation9 + $0x388] sm:$0xff] }
 0x679   : > { %3807 = vmatpush2.msra.mxu1 %v8229_v49  ;;  %9759 = vst [vmem:[#allocation111_spill] sm:$0xff] %v8245_v35  ;;  %3740 = vmatpush2.msra.mxu0 %v8245_v35  ;;  %v8251_v49 = vld [vmem:[#allocation9 + $0x378] sm:$0xff]  ;;  %9764 = vst [vmem:[#allocation43_spill] sm:$0xff] %v8259_v47  ;;  %v8265_v35 = vld [vmem:[#allocation9 + $0x380] sm:$0xff] }
 0x67a   : > { %3808 = vmatprep.subr.mxu1 %v8235_v37  ;;  %9761 = vst [vmem:[#allocation115_spill] sm:$0xff] %v8251_v49  ;;  %3741 = vmatprep.subr.mxu0 %v8251_v49  ;;  %v8257_v37 = vld [vmem:[#allocation9 + $0x370] sm:$0xff]  ;;  %9766 = vst [vmem:[#allocation44_spill] sm:$0xff] %v8265_v35  ;;  %v8271_v49 = vld [vmem:[#allocation9 + $0x360] sm:$0xff] }
 0x67b   : > { %3809 = vmatpush2.msra.mxu1 %v8241_v33  ;;  %9763 = vst [vmem:[#allocation119_spill] sm:$0xff] %v8257_v37  ;;  %3742 = vmatpush2.msra.mxu0 %v8257_v37  ;;  %v8263_v33 = vld [vmem:[#allocation9 + $0x350] sm:$0xff]  ;;  %9768 = vst [vmem:[#allocation93_spill] sm:$0xff] %v8271_v49  ;;  %v8277_v37 = vld [vmem:[#allocation9 + $0x358] sm:$0xff] }
 0x67c   : > { %3810 = vmatprep.subr.mxu1 %v8247_v45  ;;  %9765 = vst [vmem:[#allocation123_spill] sm:$0xff] %v8263_v33  ;;  %3743 = vmatprep.subr.mxu0 %v8263_v33  ;;  %v8269_v45 = vld [vmem:[#allocation9 + $0x348] sm:$0xff]  ;;  %9770 = vst [vmem:[#allocation45_spill] sm:$0xff] %v8277_v37  ;;  %v8283_v33 = vld [vmem:[#allocation9 + $0x338] sm:$0xff] }
 0x67d   : > { %3811 = vmatpush2.msra.mxu1 %v8253_v14  ;;  %9767 = vst [vmem:[#allocation127_spill] sm:$0xff] %v8269_v45  ;;  %3744 = vmatpush2.msra.mxu0 %v8269_v45  ;;  %v8275_v14 = vld [vmem:[#allocation9 + $0x328] sm:$0xff]  ;;  %9772 = vst [vmem:[#allocation95_spill] sm:$0xff] %v8283_v33  ;;  %v8289_v45 = vld [vmem:[#allocation9 + $0x330] sm:$0xff] }
 0x67e   : > { %3812 = vmatprep.subr.mxu1 %v8259_v47  ;;  %9769 = vst [vmem:[#allocation131_spill] sm:$0xff] %v8275_v14  ;;  %3745 = vmatprep.subr.mxu0 %v8275_v14  ;;  %v8281_v47 = vld [vmem:[#allocation9 + $0x320] sm:$0xff]  ;;  %9774 = vst [vmem:[#allocation47_spill] sm:$0xff] %v8289_v45  ;;  %v8295_v14 = vld [vmem:[#allocation9 + $0x310] sm:$0xff] }
 0x67f   : > { %3813 = vmatpush2.msra.mxu1 %v8265_v35  ;;  %9771 = vst [vmem:[#allocation137_spill] sm:$0xff] %v8281_v47  ;;  %3746 = vmatpush2.msra.mxu0 %v8281_v47  ;;  %v8287_v35 = vld [vmem:[#allocation9 + $0x300] sm:$0xff]  ;;  %9776 = vst [vmem:[#allocation49_spill] sm:$0xff] %v8295_v14  ;;  %v8301_v47 = vld [vmem:[#allocation9 + $0x308] sm:$0xff] }
 0x680   : > { %3814 = vmatprep.subr.mxu1 %v8271_v49  ;;  %9773 = vst [vmem:[#allocation46_spill] sm:$0xff] %v8287_v35  ;;  %3747 = vmatprep.subr.mxu0 %v8287_v35  ;;  %v8293_v49 = vld [vmem:[#allocation9 + $0x2f8] sm:$0xff]  ;;  %9778 = vst [vmem:[#allocation51_spill] sm:$0xff] %v8301_v47  ;;  %v8307_v35 = vld [vmem:[#allocation9 + $0x2e8] sm:$0xff] }
 0x681   : > { %3815 = vmatpush2.msra.mxu1 %v8277_v37  ;;  %9775 = vst [vmem:[#allocation48_spill] sm:$0xff] %v8293_v49  ;;  %3748 = vmatpush2.msra.mxu0 %v8293_v49  ;;  %v8299_v37 = vld [vmem:[#allocation9 + $0x2d8] sm:$0xff]  ;;  %9780 = vst [vmem:[#allocation54_spill] sm:$0xff] %v8307_v35  ;;  %v8313_v49 = vld [vmem:[#allocation9 + $0x2e0] sm:$0xff] }
 0x682   : > { %3816 = vmatprep.subr.mxu1 %v8283_v33  ;;  %9777 = vst [vmem:[#allocation50_spill] sm:$0xff] %v8299_v37  ;;  %3749 = vmatprep.subr.mxu0 %v8299_v37  ;;  %v8305_v33 = vld [vmem:[#allocation9 + $0x2d0] sm:$0xff]  ;;  %9782 = vst [vmem:[#allocation60_spill] sm:$0xff] %v8313_v49  ;;  %v8319_v37 = vld [vmem:[#allocation9 + $0x2c0] sm:$0xff] }
 0x683   : > { %3817 = vmatpush2.msra.mxu1 %v8289_v45  ;;  %9779 = vst [vmem:[#allocation52_spill] sm:$0xff] %v8305_v33  ;;  %3750 = vmatpush2.msra.mxu0 %v8305_v33  ;;  %v8311_v45 = vld [vmem:[#allocation9 + $0x2b0] sm:$0xff]  ;;  %9784 = vst [vmem:[#allocation68_spill] sm:$0xff] %v8319_v37  ;;  %v8325_v33 = vld [vmem:[#allocation9 + $0x2b8] sm:$0xff] }
 0x684   : > { %3818 = vmatprep.subr.mxu1 %v8295_v14  ;;  %9781 = vst [vmem:[#allocation56_spill] sm:$0xff] %v8311_v45  ;;  %3751 = vmatprep.subr.mxu0 %v8311_v45  ;;  %v8317_v14 = vld [vmem:[#allocation9 + $0x2a8] sm:$0xff]  ;;  %9786 = vst [vmem:[#allocation76_spill] sm:$0xff] %v8325_v33  ;;  %v8331_v45 = vld [vmem:[#allocation9 + $0x298] sm:$0xff] }
 0x685   : > { %3819 = vmatpush2.msra.mxu1 %v8301_v47  ;;  %9783 = vst [vmem:[#allocation64_spill] sm:$0xff] %v8317_v14  ;;  %3752 = vmatpush2.msra.mxu0 %v8317_v14  ;;  %v8323_v47 = vld [vmem:[#allocation9 + $0x288] sm:$0xff]  ;;  %9788 = vst [vmem:[#allocation91_spill] sm:$0xff] %v8331_v45  ;;  %v8337_v14 = vld [vmem:[#allocation9 + $0x4f8] sm:$0xff] }
 0x686   : > { %3820 = vmatprep.subr.mxu1 %v8307_v35  ;;  %9785 = vst [vmem:[#allocation72_spill] sm:$0xff] %v8323_v47  ;;  %3753 = vmatprep.subr.mxu0 %v8323_v47  ;;  %v8329_v35 = vld [vmem:[#allocation9 + $0x280] sm:$0xff]  ;;  %9790 = vst [vmem:[#allocation101_spill] sm:$0xff] %v8337_v14  ;;  %v9794_v51 = vld [vmem:[#allocation69_spill] sm:$0xff] }
 0x687   : > { %3821 = vmatpush2.msra.mxu1 %v8313_v49  ;;  %9787 = vst [vmem:[#allocation84_spill] sm:$0xff] %v8329_v35  ;;  %3754 = vmatpush2.msra.mxu0 %v8329_v35  ;;  %v8335_v49 = vld [vmem:[#allocation9 + $0x290] sm:$0xff] }
 0x688   : > { %3822 = vmatprep.subr.mxu1 %v8319_v37  ;;  %9789 = vst [vmem:[#allocation97_spill] sm:$0xff] %v8335_v49  ;;  %4915 = vmatprep.subr.mxu0 %v8337_v14  ;;  %v9791_v35 = vld [vmem:[#allocation30_spill] sm:$0xff]  ;;  %v9793_v14 = vld [vmem:[#allocation67_spill] sm:$0xff] }
 0x689   : > { %3823 = vmatpush2.msra.mxu1 %v8325_v33  ;;  %v557_v41 = vadd.f32 %v9791_v35, %v9696_v9 }
 0x68a   : > { %3824 = vmatprep.subr.mxu1 %v8331_v45 }
 0x68b   : > { %3825 = vmatpush2.msra.mxu1 %v8335_v49 }
 0x68c   : > { %4164 = vmatprep.subr.mxu1 %v7954_v3 }
 0x6eb   : > { %v3284_v37 = vpop.f32.mrf.mxu1  ;;  %v3355_v47 = vpop.f32.mrf.mxu0 }
 0x6ec   : > { %v3430_v33 = vadd.f32 %v7894_v57, %v3284_v37  ;;  %v3432_v30 = vadd.f32 %v3355_v47, %v557_v41  ;;  %v668_v57 = vadd.f32 %v9793_v14, %v6483_v15  ;;  %v670_v41 = vadd.f32 %v9794_v51, %v6486_v27 }
 0x6ed   : > { %v3286_v45 = vpop.f32.mrf.mxu1  ;;  %v3357_v3 = vpop.f32.mrf.mxu0 }
 0x6ee   : > { %3755 = vmatprep.mubr.f32.mxu0 %v3430_v33  ;;  %3826 = vmatprep.mubr.f32.mxu1 %v3430_v33  ;;  %v3431_v58 = vadd.f32 %v3286_v45, %v555_v63  ;;  %v4677_v49 = vmul.f32 -1.442695, %v3432_v30  ;;  %v3433_v37 = vadd.f32 %v3357_v3, %v668_v57 }
 0x6f0   : > { %v4676_v2 = vmul.f32 -1.442695, %v3431_v58  ;;  %5206 = vpow2.f32 %v4677_v49  ;;  %v4678_v42 = vmul.f32 -1.442695, %v3433_v37  ;;  %v8367_v37 = vld [vmem:[#allocation9 + $0x250] sm:$0xff] }
 0x6f2   : > { %5208 = vpow2.f32 %v4676_v2 }
 0x6f3   : > { %5210 = vpow2.f32 %v4678_v42 }
 0x6fd   : > { %v5207_v5 = vpop.eup %5206 }
 0x6fe   : > { %v3445_v35 = vadd.f32 1.0, %v5207_v5 }
 0x6ff   : > { %v5209_v8 = vpop.eup %5208 }
 0x700   : > { %v3444_v9 = vadd.f32 1.0, %v5209_v8  ;;  %5212 = vrcp.f32 %v3445_v35  ;;  %v5211_v49 = vpop.eup %5210  ;;  %v8370_v35 = vld [vmem:[#allocation9 + $0x4a8] sm:$0xff] }
 0x701   : > { %v3446_v30 = vadd.f32 1.0, %v5211_v49  ;;  %v8380_v49 = vld [vmem:[#allocation9 + $0x480] sm:$0xff] }
 0x702   : > { %5214 = vrcp.f32 %v3444_v9  ;;  %v8357_v9 = vld [vmem:[#allocation9 + $0x278] sm:$0xff] }
 0x70c   : > { %v4912_v38 = vpop.f32.mrf.mxu1 }
 0x70d   : > { %v5213_v47 = vpop.eup %5212 }
 0x70e   : > { %v4913_v26 = vpop.f32.mrf.mxu1  ;;  %v3455_v2 = vmul.f32 %v5213_v47, %v7906_v24 }
 0x70f   : > { %v4914_v63 = vadd.f32 %v4913_v26, %v4912_v38  ;;  %v5215_v14 = vpop.eup %5214  ;;  %v8359_v38 = vld [vmem:[#allocation9 + $0x4d0] sm:$0xff] }
 0x711   : > { %v3434_v58 = vadd.f32 %v4914_v63, %v670_v41 }
 0x713   : > { %5216 = vtanh.f32 %v3434_v58  ;;  %v8376_v58 = vld [vmem:[#allocation9 + $0x228] sm:$0xff] }
 0x714   : > { %5218 = vrcp.f32 %v3446_v30  ;;  %v8388_v30 = vld [vmem:[#allocation9 + $0x200] sm:$0xff] }
 0x720   : > { %v5217_v45 = vpop.eup %5216 }
 0x721   : > { %v3456_v3 = vmul.f32 %v5217_v45, %v5215_v14  ;;  %v5219_v8 = vpop.eup %5218 }
 0x723   : > { %v8352_v5 = vadd.f32 %v3456_v3, %v3455_v2 }
 0x725   : > { %5220 = vtanh.f32 %v8352_v5 }
 0x732   : > { %v5221_v26 = vpop.eup %5220 }
 0x733   : > { %v8355_v42 = vmul.f32 %v5221_v26, %v5219_v8  ;;  %v8398_v8 = vld [vmem:[#allocation9 + $0x1d8] sm:$0xff]  ;;  %v8402_v26 = vld [vmem:[#allocation9 + $0x430] sm:$0xff] }
 0x735   : > { %v3464_v57 = vcombine.high %v8355_v42, %v8355_v42  ;;  %v3471_v24 = vrot.slane %v8355_v42, %v6493_v23  ;;  %3756 = vmatmul.mubr.f32.vlgmr.msra.gmra.mxu0 %v8355_v42  ;;  %3827 = vmatmul.mubr.f32.vlgmr.msra.gmra.mxu1 %v8355_v42 }
 0x736   : > { %4916 = vmatpush3.msra.mxu0 %v8357_v9  ;;  %3897 = vmatprep.mubr.f32.mxu0 %v3430_v33 }
 0x737   : > { %v3478_v51 = vrot.slane %v3464_v57, %v6493_v23  ;;  %v3479_v41 = vcombine.high %v3471_v24, %v3471_v24  ;;  %v3487_v63 = vrot.slane %v3471_v24, %v6493_v23  ;;  %4679 = vst.sshfl [vmem:[%s5769_s10 + $0x5] sm:$0x1 pattern:$0x73625140] %v3471_v24  ;;  %4917 = vmatprep.subr.mxu0 %v8359_v38  ;;  %v8408_v57 = vld [vmem:[#allocation9 + $0x1b0] sm:$0xff]  ;;  %v8412_v24 = vld [vmem:[#allocation9 + $0x408] sm:$0xff] }
 0x738   : > { %4165 = vmatpush1.msra.mxu1 %v7957_v46  ;;  %4918 = vmatpush3.msra.mxu0 %v8367_v37  ;;  %v8391_v46 = vld [vmem:[#allocation9 + $0x458] sm:$0xff] }
 0x739   : > { %4166 = vmatprep.subr.mxu1 %v7963_v39  ;;  %v3480_v33 = vcombine.high %v3478_v51, %v3478_v51  ;;  %v3494_v47 = vrot.slane %v3478_v51, %v6493_v23  ;;  %v3501_v14 = vrot.slane %v3479_v41, %v6493_v23  ;;  %v3509_v45 = vcombine.high %v3487_v63, %v3487_v63  ;;  %v9814_v63 = vld [vmem:[#allocation80_spill] sm:$0xff] }
 0x73a   : > { %4680 = vst.sshfl [vmem:[%s5769_s10 + $0xd] sm:$0x1 pattern:$0x73625140] %v3479_v41  ;;  %4919 = vmatprep.subr.mxu0 %v8370_v35  ;;  %4167 = vmatpush1.msra.mxu1 %v7969_v40  ;;  %v9813_v41 = vld [vmem:[#allocation58_spill] sm:$0xff] }
 0x73b   : > { %4681 = vst.sshfl [vmem:[%s5769_s10 + $0x25] sm:$0x1 pattern:$0x73625140] %v3478_v51  ;;  %4920 = vmatpush3.msra.mxu0 %v8376_v58  ;;  %v3508_v39 = vrot.slane %v3480_v33, %v6493_v23  ;;  %v3510_v2 = vcombine.high %v3494_v47, %v3494_v47  ;;  %v3511_v3 = vcombine.high %v3501_v14, %v3501_v14  ;;  %3523 = vst [vmem:[%s5769_s10 + $0x15] sm:$0x1] %v3509_v45 }
 0x73c   : > { %4682 = vst.sshfl [vmem:[%s5769_s10 + $0x2d] sm:$0x1 pattern:$0x73625140] %v3480_v33  ;;  %4921 = vmatprep.subr.mxu0 %v8380_v49  ;;  %4168 = vmatprep.subr.mxu1 %v7975_v12  ;;  %v8417_v12 = vld [vmem:[#allocation9 + $0x188] sm:$0xff]  ;;  %v9812_v51 = vld [vmem:[#allocation139_spill] sm:$0xff] }
 0x73d   : > { %4922 = vmatpush3.msra.mxu0 %v8388_v30  ;;  %4169 = vmatpush1.msra.mxu1 %v7981_v20  ;;  %v3512_v40 = vcombine.high %v3508_v39, %v3508_v39  ;;  %3524 = vst [vmem:[%s5769_s10 + $0x1d] sm:$0x1] %v3511_v3  ;;  %3527 = vst [vmem:[%s5769_s10 + $0x35] sm:$0x1] %v3510_v2  ;;  %v8421_v20 = vld [vmem:[#allocation9 + $0x3e0] sm:$0xff]  ;;  %v9818_v45 = vld [vmem:[#allocation94_spill] sm:$0xff] }
 0x73e   : > { %4923 = vmatprep.subr.mxu0 %v8391_v46  ;;  %4170 = vmatprep.subr.mxu1 %v7987_v18  ;;  %v8425_v18 = vld [vmem:[#allocation9 + $0x160] sm:$0xff]  ;;  %v9819_v39 = vld [vmem:[#allocation106_spill] sm:$0xff]  ;;  %v9820_v2 = vld [vmem:[#allocation99_spill] sm:$0xff] }
 0x73f   : > { %4924 = vmatpush3.msra.mxu0 %v8398_v8  ;;  %4171 = vmatpush1.msra.mxu1 %v7993_v34  ;;  %3528 = vst [vmem:[%s5769_s10 + $0x3d] sm:$0x1] %v3512_v40  ;;  %v8429_v34 = vld [vmem:[#allocation9 + $0x3b8] sm:$0xff]  ;;  %v9815_v33 = vld [vmem:[#allocation104_spill] sm:$0xff]  ;;  %v9821_v3 = vld [vmem:[#allocation62_spill] sm:$0xff] }
 0x740   : > { %4925 = vmatprep.subr.mxu0 %v8402_v26  ;;  %4172 = vmatprep.subr.mxu1 %v7999_v50  ;;  %v8433_v50 = vld [vmem:[#allocation9 + $0x138] sm:$0xff]  ;;  %v9816_v47 = vld [vmem:[#allocation88_spill] sm:$0xff] }
 0x741   : > { %4926 = vmatpush3.msra.mxu0 %v8408_v57  ;;  %4173 = vmatpush1.msra.mxu1 %v8005_v7  ;;  %v8437_v7 = vld [vmem:[#allocation9 + $0x390] sm:$0xff]  ;;  %v9817_v14 = vld [vmem:[#allocation36_spill] sm:$0xff]  ;;  %v9822_v40 = vld [vmem:[#allocation103_spill] sm:$0xff] }
 0x742   : > { %4927 = vmatprep.subr.mxu0 %v8412_v24  ;;  %4174 = vmatprep.subr.mxu1 %v8011_v17  ;;  %v8441_v17 = vld [vmem:[#allocation9 + $0x110] sm:$0xff] }
 0x743   : > { %4928 = vmatpush3.msra.mxu0 %v8417_v12  ;;  %4175 = vmatpush1.msra.mxu1 %v8017_v52  ;;  %v8445_v52 = vld [vmem:[#allocation9 + $0x368] sm:$0xff] }
 0x744   : > { %4929 = vmatprep.subr.mxu0 %v8421_v20  ;;  %4176 = vmatprep.subr.mxu1 %v8023_v59  ;;  %v8449_v59 = vld [vmem:[#allocation9 + $0xe8] sm:$0xff] }
 0x745   : > { %4930 = vmatpush3.msra.mxu0 %v8425_v18  ;;  %4177 = vmatpush1.msra.mxu1 %v8029_v56  ;;  %v8453_v56 = vld [vmem:[#allocation9 + $0x340] sm:$0xff] }
 0x746   : > { %4931 = vmatprep.subr.mxu0 %v8429_v34  ;;  %4178 = vmatprep.subr.mxu1 %v8035_v36  ;;  %v8457_v36 = vld [vmem:[#allocation9 + $0xc0] sm:$0xff] }
 0x747   : > { %4932 = vmatpush3.msra.mxu0 %v8433_v50  ;;  %4179 = vmatpush1.msra.mxu1 %v8041_v28  ;;  %v8461_v28 = vld [vmem:[#allocation9 + $0x318] sm:$0xff] }
 0x748   : > { %4933 = vmatprep.subr.mxu0 %v8437_v7  ;;  %4180 = vmatprep.subr.mxu1 %v8047_v54  ;;  %v8465_v54 = vld [vmem:[#allocation9 + $0x98] sm:$0xff] }
 0x749   : > { %4934 = vmatpush3.msra.mxu0 %v8441_v17  ;;  %4181 = vmatpush1.msra.mxu1 %v8053_v6  ;;  %v8469_v6 = vld [vmem:[#allocation9 + $0x2f0] sm:$0xff] }
 0x74a   : > { %4935 = vmatprep.subr.mxu0 %v8445_v52  ;;  %4182 = vmatprep.subr.mxu1 %v8059_v25  ;;  %v8473_v25 = vld [vmem:[#allocation9 + $0x70] sm:$0xff] }
 0x74b   : > { %4936 = vmatpush3.msra.mxu0 %v8449_v59  ;;  %4183 = vmatpush1.msra.mxu1 %v8065_v61  ;;  %v8477_v61 = vld [vmem:[#allocation9 + $0x2c8] sm:$0xff] }
 0x74c   : > { %4937 = vmatprep.subr.mxu0 %v8453_v56  ;;  %4184 = vmatprep.subr.mxu1 %v8071_v31  ;;  %v8481_v31 = vld [vmem:[#allocation9 + $0x48] sm:$0xff] }
 0x74d   : > { %4938 = vmatpush3.msra.mxu0 %v8457_v36  ;;  %4185 = vmatpush1.msra.mxu1 %v8077_v53  ;;  %v8485_v53 = vld [vmem:[#allocation9 + $0x2a0] sm:$0xff] }
 0x74e   : > { %4939 = vmatprep.subr.mxu0 %v8461_v28  ;;  %4186 = vmatprep.subr.mxu1 %v8083_v62  ;;  %v8489_v62 = vld [vmem:[#allocation9 + $0x20] sm:$0xff] }
 0x74f   : > { %4940 = vmatpush3.msra.mxu0 %v8465_v54  ;;  %4187 = vmatpush1.msra.mxu1 %v8089_v16  ;;  %v9795_v16 = vld [vmem:[#allocation138_spill] sm:$0xff] }
 0x750   : > { %4941 = vmatprep.subr.mxu0 %v8469_v6  ;;  %4188 = vmatprep.subr.mxu1 %v8095_v4  ;;  %v9796_v4 = vld [vmem:[#allocation122_spill] sm:$0xff] }
 0x751   : > { %4942 = vmatpush3.msra.mxu0 %v8473_v25  ;;  %4189 = vmatpush1.msra.mxu1 %v8101_v55  ;;  %v9799_v55 = vld [vmem:[#allocation53_spill] sm:$0xff] }
 0x752   : > { %4943 = vmatprep.subr.mxu0 %v8477_v61  ;;  %4190 = vmatprep.subr.mxu1 %v8107_v1  ;;  %v9803_v1 = vld [vmem:[#allocation25_spill] sm:$0xff] }
 0x753   : > { %4944 = vmatpush3.msra.mxu0 %v8481_v31  ;;  %4191 = vmatpush1.msra.mxu1 %v8113_v0  ;;  %v9807_v0 = vld [vmem:[#allocation57_spill] sm:$0xff] }
 0x754   : > { %4945 = vmatprep.subr.mxu0 %v8485_v53  ;;  %4192 = vmatprep.subr.mxu1 %v8119_v29  ;;  %v9809_v29 = vld [vmem:[#allocation59_spill] sm:$0xff] }
 0x755   : > { %4946 = vmatpush3.msra.mxu0 %v8489_v62  ;;  %4193 = vmatpush1.msra.mxu1 %v8125_v21  ;;  %v9801_v21 = vld [vmem:[#allocation55_spill] sm:$0xff] }
 0x756   : > { %3898 = vmatmul.mubr.f32.vlgmr.msra.gmra.mxu0 %v8355_v42  ;;  %4235 = vmatprep.subr.mxu0 %v7959_v13  ;;  %v9797_v13 = vld [vmem:[#allocation24_spill] sm:$0xff]  ;;  %v9811_v42 = vld [vmem:[#allocation27_spill] sm:$0xff] }
 0x757   : > { %4236 = vmatpush1.msra.mxu0 %v7965_v32  ;;  %4194 = vmatprep.subr.mxu1 %v8131_v11  ;;  %v9798_v32 = vld [vmem:[#allocation124_spill] sm:$0xff] }
 0x758   : > { %4237 = vmatprep.subr.mxu0 %v7971_v22  ;;  %4195 = vmatpush1.msra.mxu1 %v8137_v48  ;;  %v9800_v22 = vld [vmem:[#allocation126_spill] sm:$0xff]  ;;  %v9806_v11 = vld [vmem:[#allocation132_spill] sm:$0xff] }
 0x759   : > { %4238 = vmatpush1.msra.mxu0 %v7977_v43  ;;  %4196 = vmatprep.subr.mxu1 %v8143_v60  ;;  %v9802_v43 = vld [vmem:[#allocation128_spill] sm:$0xff]  ;;  %v9808_v48 = vld [vmem:[#allocation134_spill] sm:$0xff] }
 0x75a   : > { %4239 = vmatprep.subr.mxu0 %v7983_v10  ;;  %4197 = vmatpush2.msra.mxu1 %v8149_v44  ;;  %v9804_v10 = vld [vmem:[#allocation130_spill] sm:$0xff]  ;;  %v9810_v60 = vld [vmem:[#allocation136_spill] sm:$0xff] }
 0x75b   : > { %4240 = vmatpush1.msra.mxu0 %v9795_v16  ;;  %4198 = vmatprep.subr.mxu1 %v9796_v4  ;;  %v9805_v44 = vld [vmem:[#allocation26_spill] sm:$0xff]  ;;  %v9823_v16 = vld [vmem:[#allocation108_spill] sm:$0xff]  ;;  %v9824_v4 = vld [vmem:[#allocation107_spill] sm:$0xff] }
 0x75c   : > { %4241 = vmatprep.subr.mxu0 %v9797_v13  ;;  %4199 = vmatpush2.msra.mxu1 %v9798_v32  ;;  %v9825_v13 = vld [vmem:[#allocation79_spill] sm:$0xff] }
 0x75d   : > { %4242 = vmatpush1.msra.mxu0 %v9799_v55  ;;  %4200 = vmatprep.subr.mxu1 %v9800_v22  ;;  %v9826_v32 = vld [vmem:[#allocation111_spill] sm:$0xff]  ;;  %v9827_v55 = vld [vmem:[#allocation110_spill] sm:$0xff] }
 0x75e   : > { %4243 = vmatprep.subr.mxu0 %v9801_v21  ;;  %4201 = vmatpush2.msra.mxu1 %v9802_v43  ;;  %v9828_v22 = vld [vmem:[#allocation115_spill] sm:$0xff]  ;;  %v9829_v21 = vld [vmem:[#allocation66_spill] sm:$0xff] }
 0x75f   : > { %4244 = vmatpush1.msra.mxu0 %v9803_v1  ;;  %4202 = vmatprep.subr.mxu1 %v9804_v10  ;;  %v9830_v43 = vld [vmem:[#allocation119_spill] sm:$0xff]  ;;  %v9831_v1 = vld [vmem:[#allocation112_spill] sm:$0xff] }
 0x760   : > { %4245 = vmatprep.subr.mxu0 %v9805_v44  ;;  %4203 = vmatpush2.msra.mxu1 %v9806_v11  ;;  %v9832_v10 = vld [vmem:[#allocation123_spill] sm:$0xff]  ;;  %v9833_v44 = vld [vmem:[#allocation37_spill] sm:$0xff] }
 0x761   : > { %4246 = vmatpush1.msra.mxu0 %v9807_v0  ;;  %4204 = vmatprep.subr.mxu1 %v9808_v48  ;;  %v9834_v11 = vld [vmem:[#allocation127_spill] sm:$0xff]  ;;  %v9835_v0 = vld [vmem:[#allocation114_spill] sm:$0xff] }
 0x762   : > { %4247 = vmatprep.subr.mxu0 %v9809_v29  ;;  %4205 = vmatpush2.msra.mxu1 %v9810_v60  ;;  %v9836_v48 = vld [vmem:[#allocation131_spill] sm:$0xff]  ;;  %v9837_v29 = vld [vmem:[#allocation70_spill] sm:$0xff]  ;;  %v9838_v60 = vld [vmem:[#allocation137_spill] sm:$0xff] }
 0x763   : > { %4248 = vmatpush1.msra.mxu0 %v9811_v42  ;;  %4206 = vmatprep.subr.mxu1 %v9812_v51  ;;  %v9839_v42 = vld [vmem:[#allocation116_spill] sm:$0xff]  ;;  %v9840_v51 = vld [vmem:[#allocation46_spill] sm:$0xff] }
 0x764   : > { %4249 = vmatprep.subr.mxu0 %v9813_v41  ;;  %4207 = vmatpush2.msra.mxu1 %v9814_v63  ;;  %v9841_v41 = vld [vmem:[#allocation81_spill] sm:$0xff]  ;;  %v9842_v63 = vld [vmem:[#allocation48_spill] sm:$0xff] }
 0x765   : > { %4250 = vmatpush1.msra.mxu0 %v9815_v33  ;;  %4208 = vmatprep.subr.mxu1 %v9816_v47  ;;  %v9843_v33 = vld [vmem:[#allocation118_spill] sm:$0xff] }
 0x766   : > { %4251 = vmatprep.subr.mxu0 %v9817_v14  ;;  %4209 = vmatpush2.msra.mxu1 %v9818_v45  ;;  %v9844_v47 = vld [vmem:[#allocation50_spill] sm:$0xff]  ;;  %v9846_v45 = vld [vmem:[#allocation52_spill] sm:$0xff] }
 0x767   : > { %4252 = vmatpush1.msra.mxu0 %v9819_v39  ;;  %4210 = vmatprep.subr.mxu1 %v9820_v2  ;;  %v9845_v14 = vld [vmem:[#allocation74_spill] sm:$0xff]  ;;  %v9847_v39 = vld [vmem:[#allocation120_spill] sm:$0xff] }
 0x768   : > { %4253 = vmatprep.subr.mxu0 %v9821_v3  ;;  %4211 = vmatpush2.msra.mxu1 %v9822_v40  ;;  %v9848_v2 = vld [vmem:[#allocation56_spill] sm:$0xff]  ;;  %v9849_v3 = vld [vmem:[#allocation38_spill] sm:$0xff] }
 0x769   : > { %4254 = vmatpush1.msra.mxu0 %v9823_v16  ;;  %4212 = vmatprep.subr.mxu1 %v9824_v4  ;;  %v9850_v40 = vld [vmem:[#allocation64_spill] sm:$0xff]  ;;  %v9851_v16 = vld [vmem:[#allocation78_spill] sm:$0xff] }
 0x76a   : > { %4255 = vmatprep.subr.mxu0 %v9825_v13  ;;  %4213 = vmatpush2.msra.mxu1 %v9826_v32  ;;  %v9852_v4 = vld [vmem:[#allocation72_spill] sm:$0xff]  ;;  %v9853_v13 = vld [vmem:[#allocation83_spill] sm:$0xff] }
 0x76b   : > { %4256 = vmatpush1.msra.mxu0 %v9827_v55  ;;  %4214 = vmatprep.subr.mxu1 %v9828_v22  ;;  %v9854_v32 = vld [vmem:[#allocation84_spill] sm:$0xff]  ;;  %v9855_v55 = vld [vmem:[#allocation82_spill] sm:$0xff]  ;;  %v9856_v22 = vld [vmem:[#allocation101_spill] sm:$0xff] }
 0x76c   : > { %4257 = vmatprep.subr.mxu0 %v9829_v21  ;;  %4215 = vmatpush2.msra.mxu1 %v9830_v43  ;;  %v9857_v21 = vld [vmem:[#allocation39_spill] sm:$0xff]  ;;  %v9858_v43 = vld [vmem:[#allocation86_spill] sm:$0xff] }
 0x76d   : > { %4258 = vmatpush1.msra.mxu0 %v9831_v1  ;;  %4216 = vmatprep.subr.mxu1 %v9832_v10  ;;  %v9859_v1 = vld [vmem:[#allocation85_spill] sm:$0xff]  ;;  %v9860_v10 = vld [vmem:[#allocation90_spill] sm:$0xff] }
 0x76e   : > { %4259 = vmatprep.subr.mxu0 %v9833_v44  ;;  %4217 = vmatpush2.msra.mxu1 %v9834_v11  ;;  %v9861_v44 = vld [vmem:[#allocation40_spill] sm:$0xff] }
 0x76f   : > { %4260 = vmatpush1.msra.mxu0 %v9835_v0  ;;  %4218 = vmatprep.subr.mxu1 %v9836_v48  ;;  %v9862_v11 = vld [vmem:[#allocation92_spill] sm:$0xff]  ;;  %v9863_v0 = vld [vmem:[#allocation87_spill] sm:$0xff] }
 0x770   : > { %4261 = vmatprep.subr.mxu0 %v9837_v29  ;;  %4219 = vmatpush2.msra.mxu1 %v9838_v60  ;;  %v9864_v48 = vld [vmem:[#allocation96_spill] sm:$0xff]  ;;  %v9865_v29 = vld [vmem:[#allocation41_spill] sm:$0xff]  ;;  %v9866_v60 = vld [vmem:[#allocation98_spill] sm:$0xff] }
 0x771   : > { %4262 = vmatpush1.msra.mxu0 %v9839_v42  ;;  %4220 = vmatprep.subr.mxu1 %v9840_v51  ;;  %v9867_v42 = vld [vmem:[#allocation89_spill] sm:$0xff]  ;;  %v9868_v51 = vld [vmem:[#allocation100_spill] sm:$0xff] }
 0x772   : > { %4263 = vmatprep.subr.mxu0 %v9841_v41  ;;  %4221 = vmatpush2.msra.mxu1 %v9842_v63  ;;  %v9869_v41 = vld [vmem:[#allocation42_spill] sm:$0xff] }
 0x773   : > { %4264 = vmatpush1.msra.mxu0 %v9843_v33  ;;  %4222 = vmatprep.subr.mxu1 %v9844_v47  ;;  %v9870_v63 = vld [vmem:[#allocation102_spill] sm:$0xff]  ;;  %v9871_v33 = vld [vmem:[#allocation43_spill] sm:$0xff]  ;;  %v9872_v47 = vld [vmem:[#allocation44_spill] sm:$0xff] }
 0x774   : > { %4265 = vmatprep.subr.mxu0 %v9845_v14  ;;  %4223 = vmatpush2.msra.mxu1 %v9846_v45  ;;  %v9873_v14 = vld [vmem:[#allocation93_spill] sm:$0xff] }
 0x775   : > { %4266 = vmatpush1.msra.mxu0 %v9847_v39  ;;  %4224 = vmatprep.subr.mxu1 %v9848_v2  ;;  %v9874_v45 = vld [vmem:[#allocation45_spill] sm:$0xff]  ;;  %v9875_v39 = vld [vmem:[#allocation95_spill] sm:$0xff] }
 0x776   : > { %4267 = vmatprep.subr.mxu0 %v9849_v3  ;;  %4225 = vmatpush2.msra.mxu1 %v9850_v40  ;;  %v9876_v2 = vld [vmem:[#allocation47_spill] sm:$0xff]  ;;  %v9877_v3 = vld [vmem:[#allocation49_spill] sm:$0xff] }
 0x777   : > { %4268 = vmatpush2.msra.mxu0 %v9851_v16  ;;  %4226 = vmatprep.subr.mxu1 %v9852_v4  ;;  %v9878_v40 = vld [vmem:[#allocation51_spill] sm:$0xff]  ;;  %v9879_v16 = vld [vmem:[#allocation54_spill] sm:$0xff]  ;;  %v9880_v4 = vld [vmem:[#allocation60_spill] sm:$0xff] }
 0x778   : > { %4269 = vmatprep.subr.mxu0 %v9853_v13  ;;  %4227 = vmatpush2.msra.mxu1 %v9854_v32  ;;  %v9881_v13 = vld [vmem:[#allocation68_spill] sm:$0xff] }
 0x779   : > { %4270 = vmatpush2.msra.mxu0 %v9855_v55  ;;  %4950 = vmatprep.subr.mxu1 %v9856_v22  ;;  %v9882_v32 = vld [vmem:[#allocation76_spill] sm:$0xff]  ;;  %v9883_v55 = vld [vmem:[#allocation91_spill] sm:$0xff]  ;;  %v9884_v22 = vld [vmem:[#allocation97_spill] sm:$0xff] }
 0x77a   : > { %4271 = vmatprep.subr.mxu0 %v9857_v21 }
 0x77b   : > { %4272 = vmatpush2.msra.mxu0 %v9858_v43  ;;  %v8601_v43 = vld [vmem:[%s9320_s19] ss:$0 sm:$0xff] }
 0x77c   : > { %4273 = vmatprep.subr.mxu0 %v9859_v1 }
 0x77d   : > { %4274 = vmatpush2.msra.mxu0 %v9860_v10 }
 0x77e   : > { %4275 = vmatprep.subr.mxu0 %v9861_v44  ;;  %v9885_v44 = vld [vmem:[#allocation77_spill] sm:$0xff] }
 0x77f   : > { %4276 = vmatpush2.msra.mxu0 %v9862_v11  ;;  %v9886_v11 = vld [vmem:[#allocation32_spill] sm:$0xff] }
 0x780   : > { %4277 = vmatprep.subr.mxu0 %v9863_v0  ;;  %v563_v0 = vadd.f32 %v9886_v11, %v9885_v44 }
 0x781   : > { %4278 = vmatpush2.msra.mxu0 %v9864_v48 }
 0x782   : > { %4279 = vmatprep.subr.mxu0 %v9865_v29  ;;  %v9887_v29 = vld [vmem:[#allocation31_spill] sm:$0xff] }
 0x783   : > { %4280 = vmatpush2.msra.mxu0 %v9866_v60  ;;  %v561_v60 = vadd.f32 %v9887_v29, %v6479_v19 }
 0x784   : > { %4281 = vmatprep.subr.mxu0 %v9867_v42 }
 0x785   : > { %4282 = vmatpush2.msra.mxu0 %v9868_v51 }
 0x786   : > { %4283 = vmatprep.subr.mxu0 %v9869_v41 }
 0x787   : > { %4284 = vmatpush2.msra.mxu0 %v9870_v63 }
 0x788   : > { %4285 = vmatprep.subr.mxu0 %v9871_v33 }
 0x789   : > { %4286 = vmatpush2.msra.mxu0 %v9872_v47  ;;  %v9888_v47 = vld [vmem:[#allocation71_spill] sm:$0xff] }
 0x78a   : > { %4287 = vmatprep.subr.mxu0 %v9873_v14  ;;  %v674_v14 = vadd.f32 %v9888_v47, %v6483_v15 }
 0x78b   : > { %4288 = vmatpush2.msra.mxu0 %v9874_v45 }
 0x78c   : > { %4289 = vmatprep.subr.mxu0 %v9875_v39 }
 0x78d   : > { %4290 = vmatpush2.msra.mxu0 %v9876_v2 }
 0x78e   : > { %4291 = vmatprep.subr.mxu0 %v9877_v3 }
 0x78f   : > { %4292 = vmatpush2.msra.mxu0 %v9878_v40 }
 0x790   : > { %4293 = vmatprep.subr.mxu0 %v9879_v16 }
 0x791   : > { %4294 = vmatpush2.msra.mxu0 %v9880_v4 }
 0x792   : > { %4295 = vmatprep.subr.mxu0 %v9881_v13 }
 0x793   : > { %4296 = vmatpush2.msra.mxu0 %v9882_v32  ;;  %v9889_v32 = vld [vmem:[#allocation73_spill] sm:$0xff] }
 0x794   : > { %4297 = vmatprep.subr.mxu0 %v9883_v55  ;;  %v676_v55 = vadd.f32 %v9889_v32, %v6486_v27 }
 0x795   : > { %4298 = vmatpush2.msra.mxu0 %v9884_v22 }
 0x7f5   : > { %v3757_v21 = vpop.f32.mrf.mxu0  ;;  %v3828_v10 = vpop.f32.mrf.mxu1 }
 0x7f6   : > { %v3903_v1 = vadd.f32 %v8601_v43, %v3757_v21  ;;  %v3905_v42 = vadd.f32 %v3828_v10, %v563_v0 }
 0x7f7   : > { %v3759_v48 = vpop.f32.mrf.mxu0  ;;  %v3830_v33 = vpop.f32.mrf.mxu1 }
 0x7f8   : > { %4228 = vmatprep.mubr.f32.mxu1 %v3903_v1  ;;  %4299 = vmatprep.mubr.f32.mxu0 %v3903_v1  ;;  %v3904_v51 = vadd.f32 %v3759_v48, %v561_v60  ;;  %v4684_v41 = vmul.f32 -1.442695, %v3905_v42  ;;  %v3906_v45 = vadd.f32 %v3830_v33, %v674_v14 }
 0x7fa   : > { %v4683_v63 = vmul.f32 -1.442695, %v3904_v51  ;;  %5222 = vpow2.f32 %v4684_v41  ;;  %v4685_v3 = vmul.f32 -1.442695, %v3906_v45 }
 0x7fc   : > { %5224 = vpow2.f32 %v4683_v63 }
 0x7fd   : > { %5226 = vpow2.f32 %v4685_v3 }
 0x807   : > { %v5223_v39 = vpop.eup %5222 }
 0x808   : > { %v3918_v16 = vadd.f32 1.0, %v5223_v39 }
 0x809   : > { %v5225_v2 = vpop.eup %5224 }
 0x80a   : > { %v3917_v4 = vadd.f32 1.0, %v5225_v2  ;;  %5228 = vrcp.f32 %v3918_v16  ;;  %v5227_v10 = vpop.eup %5226 }
 0x80b   : > { %v3919_v29 = vadd.f32 1.0, %v5227_v10 }
 0x80c   : > { %5230 = vrcp.f32 %v3917_v4 }
 0x816   : > { %v4947_v40 = vpop.f32.mrf.mxu0 }
 0x817   : > { %v5229_v11 = vpop.eup %5228 }
 0x818   : > { %v4948_v13 = vpop.f32.mrf.mxu0  ;;  %v3928_v60 = vmul.f32 %v5229_v11, %v8352_v5 }
 0x819   : > { %v4949_v22 = vadd.f32 %v4948_v13, %v4947_v40  ;;  %v5231_v0 = vpop.eup %5230 }
 0x81b   : > { %v3907_v21 = vadd.f32 %v4949_v22, %v676_v55 }
 0x81d   : > { %5232 = vtanh.f32 %v3907_v21 }
 0x81e   : > { %5234 = vrcp.f32 %v3919_v29 }
 0x82a   : > { %v5233_v48 = vpop.eup %5232 }
 0x82b   : > { %v3929_v42 = vmul.f32 %v5233_v48, %v5231_v0  ;;  %v5235_v41 = vpop.eup %5234 }
 0x82d   : > { %v8613_v51 = vadd.f32 %v3929_v42, %v3928_v60 }
 0x82f   : > { %5236 = vtanh.f32 %v8613_v51 }
 0x83c   : > { %v5237_v63 = vpop.eup %5236 }
 0x83d   : > { %v3932_v33 = vmul.f32 %v5237_v63, %v5235_v41 }
 0x83f   : > { %v3937_v47 = vcombine.high %v3932_v33, %v3932_v33  ;;  %v3944_v14 = vrot.slane %v3932_v33, %v6493_v23  ;;  %4229 = vmatmul.mubr.f32.vlgmr.msra.gmra.mxu1 %v3932_v33  ;;  %4300 = vmatmul.mubr.f32.vlgmr.msra.gmra.mxu0 %v3932_v33 }
 0x840   : > { %4951 = vmatpush3.msra.mxu1 %v8357_v9  ;;  %4370 = vmatprep.mubr.f32.mxu1 %v3903_v1 }
 0x841   : > { %v3951_v5 = vrot.slane %v3937_v47, %v6493_v23  ;;  %v3952_v45 = vcombine.high %v3944_v14, %v3944_v14  ;;  %v3960_v39 = vrot.slane %v3944_v14, %v6493_v23  ;;  %4686 = vst.sshfl [vmem:[%s5769_s10 + $0x6] sm:$0x1 pattern:$0x73625140] %v3944_v14  ;;  %4952 = vmatprep.subr.mxu1 %v8359_v38 }
 0x842   : > { %4953 = vmatpush3.msra.mxu1 %v8367_v37 }
 0x843   : > { %v3953_v2 = vcombine.high %v3951_v5, %v3951_v5  ;;  %v3967_v3 = vrot.slane %v3951_v5, %v6493_v23  ;;  %v3974_v9 = vrot.slane %v3952_v45, %v6493_v23  ;;  %v3982_v1 = vcombine.high %v3960_v39, %v3960_v39  ;;  %4687 = vst.sshfl [vmem:[%s5769_s10 + $0xe] sm:$0x1 pattern:$0x73625140] %v3952_v45 }
 0x844   : > { %4688 = vst.sshfl [vmem:[%s5769_s10 + $0x26] sm:$0x1 pattern:$0x73625140] %v3951_v5  ;;  %4954 = vmatprep.subr.mxu1 %v8370_v35 }
 0x845   : > { %4955 = vmatpush3.msra.mxu1 %v8376_v58  ;;  %v3981_v40 = vrot.slane %v3953_v2, %v6493_v23  ;;  %v3983_v38 = vcombine.high %v3967_v3, %v3967_v3  ;;  %v3984_v16 = vcombine.high %v3974_v9, %v3974_v9  ;;  %3996 = vst [vmem:[%s5769_s10 + $0x16] sm:$0x1] %v3982_v1  ;;  %4689 = vst.sshfl [vmem:[%s5769_s10 + $0x2e] sm:$0x1 pattern:$0x73625140] %v3953_v2 }
 0x846   : > { %4956 = vmatprep.subr.mxu1 %v8380_v49 }
 0x847   : > { %4957 = vmatpush3.msra.mxu1 %v8388_v30  ;;  %v3985_v37 = vcombine.high %v3981_v40, %v3981_v40  ;;  %3997 = vst [vmem:[%s5769_s10 + $0x1e] sm:$0x1] %v3984_v16  ;;  %4000 = vst [vmem:[%s5769_s10 + $0x36] sm:$0x1] %v3983_v38  ;;  %v9890_v30 = vld [vmem:[#allocation34_spill] sm:$0xff] }
 0x848   : > { %4958 = vmatprep.subr.mxu1 %v8391_v46  ;;  %v569_v46 = vadd.f32 %v9890_v30, %v9885_v44 }
 0x849   : > { %4959 = vmatpush3.msra.mxu1 %v8398_v8  ;;  %4001 = vst [vmem:[%s5769_s10 + $0x3e] sm:$0x1] %v3985_v37 }
 0x84a   : > { %4960 = vmatprep.subr.mxu1 %v8402_v26  ;;  %v9891_v26 = vld [vmem:[#allocation33_spill] sm:$0xff] }
 0x84b   : > { %4961 = vmatpush3.msra.mxu1 %v8408_v57  ;;  %v567_v57 = vadd.f32 %v9891_v26, %v6479_v19  ;;  %v9893_v19 = vld [vmem:[#allocation35_spill] sm:$0xff] }
 0x84c   : > { %4962 = vmatprep.subr.mxu1 %v8412_v24 }
 0x84d   : > { %4963 = vmatpush3.msra.mxu1 %v8417_v12 }
 0x84e   : > { %4964 = vmatprep.subr.mxu1 %v8421_v20 }
 0x84f   : > { %4965 = vmatpush3.msra.mxu1 %v8425_v18 }
 0x850   : > { %4966 = vmatprep.subr.mxu1 %v8429_v34 }
 0x851   : > { %4967 = vmatpush3.msra.mxu1 %v8433_v50  ;;  %v9892_v50 = vld [vmem:[#allocation75_spill] sm:$0xff] }
 0x852   : > { %4968 = vmatprep.subr.mxu1 %v8437_v7  ;;  %v680_v7 = vadd.f32 %v9892_v50, %v6483_v15 }
 0x853   : > { %4969 = vmatpush3.msra.mxu1 %v8441_v17 }
 0x854   : > { %4970 = vmatprep.subr.mxu1 %v8445_v52 }
 0x855   : > { %4971 = vmatpush3.msra.mxu1 %v8449_v59 }
 0x856   : > { %4972 = vmatprep.subr.mxu1 %v8453_v56 }
 0x857   : > { %4973 = vmatpush3.msra.mxu1 %v8457_v36 }
 0x858   : > { %4974 = vmatprep.subr.mxu1 %v8461_v28 }
 0x859   : > { %4975 = vmatpush3.msra.mxu1 %v8465_v54 }
 0x85a   : > { %4976 = vmatprep.subr.mxu1 %v8469_v6 }
 0x85b   : > { %4977 = vmatpush3.msra.mxu1 %v8473_v25  ;;  %v682_v25 = vadd.f32 %v9893_v19, %v6486_v27 }
 0x85c   : > { %4978 = vmatprep.subr.mxu1 %v8477_v61 }
 0x85d   : > { %4979 = vmatpush3.msra.mxu1 %v8481_v31 }
 0x85e   : > { %4980 = vmatprep.subr.mxu1 %v8485_v53 }
 0x85f   : > { %4981 = vmatpush3.msra.mxu1 %v8489_v62 }
 0x860   : > { %4371 = vmatmul.mubr.f32.vlgmr.msra.gmra.mxu1 %v3932_v33 }
 0x8ff   : > { %v4230_v35 = vpop.f32.mrf.mxu1  ;;  %v4301_v49 = vpop.f32.mrf.mxu0 }
 0x900   : > { %v4376_v58 = vadd.f32 %v8601_v43, %v4230_v35  ;;  %v4378_v24 = vadd.f32 %v4301_v49, %v569_v46 }
 0x901   : > { %v4232_v8 = vpop.f32.mrf.mxu1  ;;  %v4303_v34 = vpop.f32.mrf.mxu0 }
 0x902   : > { %4408 = vst [vmem:[#allocation2 + $0x8] sm:$0xff] %v4376_v58  ;;  %v4377_v12 = vadd.f32 %v4232_v8, %v567_v57  ;;  %v4691_v20 = vmul.f32 -1.442695, %v4378_v24  ;;  %v4379_v17 = vadd.f32 %v4303_v34, %v680_v7 }
 0x904   : > { %v4690_v18 = vmul.f32 -1.442695, %v4377_v12  ;;  %5238 = vpow2.f32 %v4691_v20  ;;  %v4692_v56 = vmul.f32 -1.442695, %v4379_v17 }
 0x906   : > { %5240 = vpow2.f32 %v4690_v18 }
 0x907   : > { %5242 = vpow2.f32 %v4692_v56 }
 0x911   : > { %v5239_v52 = vpop.eup %5238 }
 0x912   : > { %v4391_v28 = vadd.f32 1.0, %v5239_v52 }
 0x913   : > { %v5241_v59 = vpop.eup %5240 }
 0x914   : > { %v4390_v54 = vadd.f32 1.0, %v5241_v59  ;;  %5244 = vrcp.f32 %v4391_v28  ;;  %v5243_v53 = vpop.eup %5242 }
 0x915   : > { %v4392_v44 = vadd.f32 1.0, %v5243_v53 }
 0x916   : > { %5246 = vrcp.f32 %v4390_v54 }
 0x920   : > { %v4982_v36 = vpop.f32.mrf.mxu1 }
 0x921   : > { %v5245_v15 = vpop.eup %5244 }
 0x922   : > { %v4983_v6 = vpop.f32.mrf.mxu1  ;;  %v4401_v4 = vmul.f32 %v5245_v15, %v8613_v51 }
 0x923   : > { %v4984_v61 = vadd.f32 %v4983_v6, %v4982_v36  ;;  %v5247_v62 = vpop.eup %5246 }
 0x925   : > { %v4380_v31 = vadd.f32 %v4984_v61, %v682_v25 }
 0x927   : > { %5248 = vtanh.f32 %v4380_v31 }
 0x928   : > { %5250 = vrcp.f32 %v4392_v44 }
 0x934   : > { %v5249_v43 = vpop.eup %5248 }
 0x935   : > { %v4402_v13 = vmul.f32 %v5249_v43, %v5247_v62  ;;  %v5251_v27 = vpop.eup %5250 }
 0x937   : > { %v4403_v32 = vadd.f32 %v4402_v13, %v4401_v4 }
 0x939   : > { %5252 = vtanh.f32 %v4403_v32  ;;  %4406 = vst [vmem:[#allocation3] sm:$0xff] %v4403_v32 }
 0x946   : > { %v5253_v55 = vpop.eup %5252 }
 0x947   : > { %v4405_v22 = vmul.f32 %v5253_v55, %v5251_v27 }
 0x949   : > { %4407 = vst [vmem:[#allocation2] sm:$0xff] %v4405_v22  ;;  %v4410_v21 = vcombine.high %v4405_v22, %v4405_v22  ;;  %v4417_v10 = vrot.slane %v4405_v22, %v6493_v23 }
 0x94b   : > { %v4424_v11 = vrot.slane %v4410_v21, %v6493_v23  ;;  %v4425_v0 = vcombine.high %v4417_v10, %v4417_v10  ;;  %v4433_v48 = vrot.slane %v4417_v10, %v6493_v23  ;;  %4693 = vst.sshfl [vmem:[%s5769_s10 + $0x7] sm:$0x1 pattern:$0x73625140] %v4417_v10 }
 0x94d   : > { %v4426_v29 = vcombine.high %v4424_v11, %v4424_v11  ;;  %v4440_v60 = vrot.slane %v4424_v11, %v6493_v23  ;;  %v4447_v42 = vrot.slane %v4425_v0, %v6493_v23  ;;  %v4455_v51 = vcombine.high %v4433_v48, %v4433_v48  ;;  %4694 = vst.sshfl [vmem:[%s5769_s10 + $0xf] sm:$0x1 pattern:$0x73625140] %v4425_v0 }
 0x94e   : > { %4695 = vst.sshfl [vmem:[%s5769_s10 + $0x27] sm:$0x1 pattern:$0x73625140] %v4424_v11 }
 0x94f   : > { %v4454_v41 = vrot.slane %v4426_v29, %v6493_v23  ;;  %v4456_v63 = vcombine.high %v4440_v60, %v4440_v60  ;;  %v4457_v33 = vcombine.high %v4447_v42, %v4447_v42  ;;  %4469 = vst [vmem:[%s5769_s10 + $0x17] sm:$0x1] %v4455_v51  ;;  %4696 = vst.sshfl [vmem:[%s5769_s10 + $0x2f] sm:$0x1 pattern:$0x73625140] %v4426_v29 }
 0x951   : > { %v4458_v47 = vcombine.high %v4454_v41, %v4454_v41  ;;  %4470 = vst [vmem:[%s5769_s10 + $0x1f] sm:$0x1] %v4457_v33  ;;  %4473 = vst [vmem:[%s5769_s10 + $0x37] sm:$0x1] %v4456_v63 }
 0x953   : > { %4474 = vst [vmem:[%s5769_s10 + $0x3f] sm:$0x1] %v4458_v47 }
 0x954   : > { %5378 = shalt.err (!%p5375_p2)
}
 0x955   : > { %s5379_s10 = scalar_lea.hbm %s8688_s21, 1024  ;;  %s5383_s12 = scalar_lea.hbm %s9896_s2, 4096 }
 0x956   : > { %p5380_p9 = scmp.ne.s32.totalorder %s8688_s21, %s5379_s10  ;;  %p5384_p4 = scmp.lt.s32.totalorder %s8688_s21, %s9896_s2 }
 0x957   : > { %p5385_p13 = scmp.lt.s32.totalorder %s5383_s12, %s5379_s10 }
 0x958   : > { %p5381_p8 = pnand %p5380_p9, %p5676_p7 }
 0x959   : > { %p5386_p5 = por %p5385_p13, %p5384_p4 }
 0x95a   : > { %p5382_p0 = pneg %p5381_p8 }
 0x95c   : > { %p5387_p10 = pnand %p5386_p5, %p5382_p0 }
 0x95e   : > { %5390 = shalt.err (!%p5387_p10)
}
 0x95f   : > { %s5514_s3 = smov 128   ;;  %s5515_s8 = smov 256  }
 0x960   : > { %s5516_s4 = smov 8  }
 0x961   : > { %4997 = dma.vmem_to_hbm [thread:$0]  (%p5676_p7), %s8690_s6, 1024, %s8688_s21, %s4476_s11, %s5514_s3, %s5515_s8, %s5516_s4  }
 0x962 PF: > { %s9897_s16 = sld [smem:[#allocation18_spill]]  ;;  %p5022_p12 = scmp.ge.s32.totalorder %s5497_s7, 2 }
 0x963   : > { %s9898_s15 = sld [smem:[#allocation20_spill]] }
 0x968   : > { %s4506_s17 = sand.u32 1, %s9897_s16  }
 0x969   : > { %p9899_p6 = scmp.ne.s32.totalorder %s9898_s15, 0  ;;  %s4507_s20 = scalar_lea.sflag [#allocation6], %s4506_s17 }
 0x96b   : > { %p5014_p11 = pnand %p5022_p12, %p9899_p6 }
 0x96d   : > { %p5015_p3 = pneg %p5014_p11 }
 0x96f   : > { %5452 = dma.done.wait (%p5015_p3), %s4507_s20, 1024  }
 0x970   : > { %5454 = vsyncadd (%p5015_p3), %s4507_s20, 4294966272  ;;  %s26_s7 = sadd.s32 1, %s5497_s7   ;;  %s9900_s14 = sld [smem:[#allocation21_spill]] }
 0x971   : > { %p23_p1 = scmp.ge.s32.totalorder %s26_s7, 6   ;;  %s9901_s6 = sld [smem:[#allocation23_spill]] }
 0x972   : > { %s9902_s21 = smov %s5461_s22  ;;  %s9903_s22 = smov %s5465_s23 }
 0x973   : > { %s9904_s23 = smov %s5714_s18  ;;  %s9905_s24 = smov %s5473_s25 }
 0x974   : > { %s9906_s25 = smov %s5477_s26  ;;  %s9907_s26 = smov %s5692_s28 }
 0x975   : > { %s9908_s27 = smov %s5489_s29  ;;  %s9909_s28 = smov %s5493_s30 }
 0x976   : > { %s9910_s29 = smov %s9900_s14  ;;  %25 = sbr.rel (!%p23_p1) target bundleno = 18 (0x12), region = 114 }
 0x977   : > { %s9911_s30 = smov %s9901_s6 }
 0x97b   :  { %4512 = vsyncpa [#allocation5], 1 }
 0x97c   :  { %4514 = vsyncpa [#allocation5 + $0x1], 1 }
 0x97d   :  { %4515 = vsyncpa [#allocation8], 1 }
 0x97e   :  { %4517 = vsyncpa [#allocation8 + $0x1], 1 }
 0x97f   :  { %4518 = vsyncpa [#allocation11], 1 }
 0x980   :  { %4519 = vsyncpa [#allocation6], 1 }
 0x981   :  { %4521 = vsyncpa [#allocation6 + $0x1], 1 }

</bundles_post_ra>
